<compile_context>
chip_gen: v6e
topology: v6e:2x2x1
jax: 0.10.0
libtpu: 0.0.40
codegen_flags: <defaults>
</compile_context>

<pallas_src>
import functools

import numpy as np
import jax
import jax.numpy as jnp
from jax.experimental import pallas as pl
from jax.experimental.pallas import tpu as pltpu

KSIZE = 4
STRIDE = 2
PAD = 1
NTAPS = KSIZE * KSIZE


# ----------------------------------------------------------------------------
# Static geometry: per-layer gather matrices (built once with numpy, host-side)
# ----------------------------------------------------------------------------
def _gather_matrix(kind, hin, win):
    """0/1 matrix G of shape (hin*win, 16 * hout*wout).

    G[p, t*m_out + m] == 1  iff input pixel p feeds output pixel m through
    kernel tap t = kh*4 + kw (zero columns encode zero padding / invalid taps).
    `kind` is "conv" (k=4,s=2,p=1) or "convT" (transposed, same hyper-params).
    """
    if kind == "conv":
        ho, wo = hin // STRIDE, win // STRIDE
    else:
        ho, wo = hin * STRIDE, win * STRIDE
    m_in, m_out = hin * win, ho * wo
    g = np.zeros((m_in, NTAPS * m_out), np.float32)
    for kh in range(KSIZE):
        for kw in range(KSIZE):
            t = kh * KSIZE + kw
            for oh in range(ho):
                for ow in range(wo):
                    if kind == "conv":
                        ih = STRIDE * oh + kh - PAD
                        iw = STRIDE * ow + kw - PAD
                    else:
                        th = oh + PAD - kh
                        tw = ow + PAD - kw
                        if th < 0 or tw < 0 or th % STRIDE or tw % STRIDE:
                            continue
                        ih, iw = th // STRIDE, tw // STRIDE
                    if 0 <= ih < hin and 0 <= iw < win:
                        g[ih * win + iw, t * m_out + oh * wo + ow] = 1.0
    return g


def _layer_plan(h, w, lfnum):
    plan = []
    enc_ch = [3, 12, 24, lfnum]
    hh, ww = h, w
    for i in range(3):
        plan.append(dict(kind="conv", cin=enc_ch[i], cout=enc_ch[i + 1],
                         hin=hh, win=ww, act="relu"))
        hh, ww = hh // 2, ww // 2
    dec_ch = [lfnum, 24, 12, 3]
    for i in range(3):
        plan.append(dict(kind="convT", cin=dec_ch[i], cout=dec_ch[i + 1],
                         hin=hh, win=ww, act="relu" if i < 2 else "sigmoid"))
        hh, ww = hh * 2, ww * 2
    return plan


# ----------------------------------------------------------------------------
# Fused Pallas kernel: whole autoencoder forward for one batch element
# Activations are channel-major: (C, H*W) with spatial on lanes.
# ----------------------------------------------------------------------------
def _autoencoder_kernel(*refs, dims):
    # refs = (x_ref, [w_ref, b_ref, g_ref] * 6, enc_ref, dec_ref)
    x_ref = refs[0]
    enc_ref, dec_ref = refs[-2], refs[-1]

    y = x_ref[...]                                    # (cin, H*W) f32
    enc = None
    for li, (m_out, cout, act) in enumerate(dims):
        w_ref, b_ref, g_ref = refs[1 + 3 * li: 4 + 3 * li]

        # Gather (im2col) as ONE lane-dense GEMM: (cin, m_in) @ (m_in, 16*m_out)
        yg = jnp.dot(y, g_ref[...], preferred_element_type=jnp.float32)

        # Weight application: 16 tiny (cout, cin) @ (cin, m_out) GEMMs,
        # combined with a balanced tree sum (no long serial add chain).
        parts = [
            jnp.dot(w_ref[k], yg[:, k * m_out:(k + 1) * m_out],
                    preferred_element_type=jnp.float32)
            for k in range(NTAPS)
        ]
        while len(parts) > 1:
            nxt = [parts[i] + parts[i + 1] for i in range(0, len(parts) - 1, 2)]
            if len(parts) % 2:
                nxt.append(parts[-1])
            parts = nxt
        acc = parts[0] + b_ref[...]                   # bias (cout, 1) broadcasts
        assert acc.shape == (cout, m_out)             # trace-time sanity check

        if act == "relu":
            y = jnp.maximum(acc, 0.0)
        else:                                         # sigmoid (exp hits the EUP)
            y = 1.0 / (1.0 + jnp.exp(-acc))

        if li == 2:                                   # end of encoder
            enc = y

    enc_ref[...] = enc
    dec_ref[...] = y


# ----------------------------------------------------------------------------
# Wrapper: weight packing + single pallas_call (no boundary transposes)
# ----------------------------------------------------------------------------
def autoencoder_forward(params, x_nchw):
    """Matches Autoencoder.forward: returns (encoded, decoded), both NCHW."""
    n, cin0, h, w = x_nchw.shape
    lfnum = params["e3"][0].shape[0]
    plan = _layer_plan(h, w, lfnum)

    # NCHW is already channel-major: just flatten spatial (free reshape).
    x_flat = x_nchw.reshape(n, cin0, h * w)

    names = ["e1", "e2", "e3", "d1", "d2", "d3"]
    layer_inputs = []
    in_specs = [pl.BlockSpec((None, cin0, h * w), lambda i: (i, 0, 0))]
    dims = []
    for name, cfg in zip(names, plan):
        wgt, bias = params[name]
        cin_l, cout_l = cfg["cin"], cfg["cout"]
        if cfg["kind"] == "conv":
            # Conv2d weight (Cout, Cin, 4, 4) -> (16, Cout, Cin), tap-major
            w_packed = jnp.transpose(wgt, (2, 3, 0, 1)).reshape(NTAPS, cout_l, cin_l)
        else:
            # ConvTranspose2d weight (Cin, Cout, 4, 4) -> (16, Cout, Cin)
            w_packed = jnp.transpose(wgt, (2, 3, 1, 0)).reshape(NTAPS, cout_l, cin_l)
        g_np = _gather_matrix(cfg["kind"], cfg["hin"], cfg["win"])
        m_in = cfg["hin"] * cfg["win"]
        m_out = g_np.shape[1] // NTAPS
        dims.append((m_out, cout_l, cfg["act"]))

        layer_inputs += [w_packed, bias.reshape(cout_l, 1), jnp.asarray(g_np)]
        in_specs += [
            pl.BlockSpec((NTAPS, cout_l, cin_l), lambda i: (0, 0, 0)),
            pl.BlockSpec((cout_l, 1), lambda i: (0, 0)),
            pl.BlockSpec((m_in, NTAPS * m_out), lambda i: (0, 0)),
        ]

    m_enc, c_enc = dims[2][0], dims[2][1]
    m_dec, c_dec = dims[5][0], dims[5][1]

    enc_flat, dec_flat = pl.pallas_call(
        functools.partial(_autoencoder_kernel, dims=tuple(dims)),
        out_shape=(
            jax.ShapeDtypeStruct((n, c_enc, m_enc), jnp.float32),
            jax.ShapeDtypeStruct((n, c_dec, m_dec), jnp.float32),
        ),
        grid=(n,),
        in_specs=in_specs,
        out_specs=(
            pl.BlockSpec((None, c_enc, m_enc), lambda i: (i, 0, 0)),
            pl.BlockSpec((None, c_dec, m_dec), lambda i: (i, 0, 0)),
        ),
        compiler_params=pltpu.CompilerParams(
            dimension_semantics=("parallel",),
            vmem_limit_bytes=32 * 1024 * 1024,
        ),
    )(x_flat, *layer_inputs)

    h_enc, w_enc = h // 8, w // 8
    encoded = enc_flat.reshape(n, c_enc, h_enc, w_enc)
    decoded = dec_flat.reshape(n, c_dec, h, w)
    return encoded, decoded


# ----------------------------------------------------------------------------
# Parameter init (deterministic, PyTorch-like uniform bounds)
# ----------------------------------------------------------------------------
def init_params(key, lfnum):
    def conv_w(key, cout, cin, k):
        bound = 1.0 / float(np.sqrt(cin * k * k))
        kw, kb = jax.random.split(key)
        return (jax.random.uniform(kw, (cout, cin, k, k), jnp.float32, -bound, bound),
                jax.random.uniform(kb, (cout,), jnp.float32, -bound, bound))

    def convt_w(key, cin, cout, k):
        bound = 1.0 / float(np.sqrt(cout * k * k))
        kw, kb = jax.random.split(key)
        return (jax.random.uniform(kw, (cin, cout, k, k), jnp.float32, -bound, bound),
                jax.random.uniform(kb, (cout,), jnp.float32, -bound, bound))

    ks = jax.random.split(key, 6)
    return {
        "e1": conv_w(ks[0], 12, 3, 4),
        "e2": conv_w(ks[1], 24, 12, 4),
        "e3": conv_w(ks[2], lfnum, 24, 4),
        "d1": convt_w(ks[3], lfnum, 24, 4),
        "d2": convt_w(ks[4], 24, 12, 4),
        "d3": convt_w(ks[5], 12, 3, 4),
    }


# ----------------------------------------------------------------------------
# NumPy reference (mirrors PyTorch Conv2d / ConvTranspose2d semantics exactly)
# ----------------------------------------------------------------------------
def _np_forward(params, x_nchw):
    def conv(x, wgt, b):
        nb, hh, ww, ci = x.shape
        co = wgt.shape[0]
        ho, wo = hh // 2, ww // 2
        xp = np.zeros((nb, hh + 2, ww + 2, ci), np.float32)
        xp[:, 1:hh + 1, 1:ww + 1, :] = x
        out = np.zeros((nb, ho, wo, co), np.float32)
        for kh in range(4):
            for kw in range(4):
                patch = xp[:, kh:kh + 2 * ho:2, kw:kw + 2 * wo:2, :]
                out += patch @ wgt[:, :, kh, kw].T
        return out + b

    def convT(x, wgt, b):
        nb, hh, ww, ci = x.shape
        co = wgt.shape[1]
        ho, wo = 2 * hh, 2 * ww
        full = np.zeros((nb, 2 * hh + 3, 2 * ww + 3, co), np.float32)
        for kh in range(4):
            for kw in range(4):
                full[:, kh:kh + 2 * hh:2, kw:kw + 2 * ww:2, :] += x @ wgt[:, :, kh, kw]
        return full[:, 1:1 + ho, 1:1 + wo, :] + b

    relu = lambda a: np.maximum(a, 0.0)
    sig = lambda a: 1.0 / (1.0 + np.exp(-a))

    p = {k: (np.asarray(v[0]), np.asarray(v[1])) for k, v in params.items()}
    x = np.asarray(x_nchw).transpose(0, 2, 3, 1)
    y = relu(conv(x, *p["e1"]))
    y = relu(conv(y, *p["e2"]))
    enc = relu(conv(y, *p["e3"]))
    y = relu(convT(enc, *p["d1"]))
    y = relu(convT(y, *p["d2"]))
    dec = sig(convT(y, *p["d3"]))
    return enc.transpose(0, 3, 1, 2), dec.transpose(0, 3, 1, 2)


if __name__ == "__main__":
    lfnum = 8
    key = jax.random.PRNGKey(0)
    k_params, k_x = jax.random.split(key)
    params = init_params(k_params, lfnum)
    x = jax.random.uniform(k_x, (2, 3, 16, 16), jnp.float32)     # NCHW like PyTorch

    fwd = jax.jit(autoencoder_forward)
    encoded, decoded = fwd(params, x)
    encoded = jax.block_until_ready(encoded)
    decoded = jax.block_until_ready(decoded)

    assert encoded.shape == (2, lfnum, 2, 2), encoded.shape
    assert decoded.shape == (2, 3, 16, 16), decoded.shape

    enc_ref, dec_ref = _np_forward(params, x)
    np.testing.assert_allclose(np.asarray(encoded), enc_ref, atol=1e-3, rtol=1e-3)
    np.testing.assert_allclose(np.asarray(decoded), dec_ref, atol=1e-3, rtol=1e-3)

    print("KERNEL_OK")
</pallas_src>

<mosaic_0001>
module attributes {stable_mosaic.version = 11 : i64} {
  func.func @_autoencoder_kernel(%arg0: i32, %arg1: memref<1x3x256xf32, #tpu.memory_space<vmem>>, %arg2: memref<16x12x3xf32, #tpu.memory_space<vmem>>, %arg3: memref<12x1xf32, #tpu.memory_space<vmem>>, %arg4: memref<256x1024xf32, #tpu.memory_space<vmem>>, %arg5: memref<16x24x12xf32, #tpu.memory_space<vmem>>, %arg6: memref<24x1xf32, #tpu.memory_space<vmem>>, %arg7: memref<64x256xf32, #tpu.memory_space<vmem>>, %arg8: memref<16x8x24xf32, #tpu.memory_space<vmem>>, %arg9: memref<8x1xf32, #tpu.memory_space<vmem>>, %arg10: memref<16x64xf32, #tpu.memory_space<vmem>>, %arg11: memref<16x24x8xf32, #tpu.memory_space<vmem>>, %arg12: memref<24x1xf32, #tpu.memory_space<vmem>>, %arg13: memref<4x256xf32, #tpu.memory_space<vmem>>, %arg14: memref<16x12x24xf32, #tpu.memory_space<vmem>>, %arg15: memref<12x1xf32, #tpu.memory_space<vmem>>, %arg16: memref<16x1024xf32, #tpu.memory_space<vmem>>, %arg17: memref<16x3x12xf32, #tpu.memory_space<vmem>>, %arg18: memref<3x1xf32, #tpu.memory_space<vmem>>, %arg19: memref<64x4096xf32, #tpu.memory_space<vmem>>, %arg20: memref<1x8x4xf32, #tpu.memory_space<vmem>>, %arg21: memref<1x3x256xf32, #tpu.memory_space<vmem>>) attributes {dimension_semantics = [#tpu.dimension_semantics<parallel>], iteration_bounds = array<i64: 2>, scalar_prefetch = 0 : i64, scratch_operands = 0 : i64, tpu.core_type = #tpu.core_type<tc>, window_params = [{transform_indices = @transform_0, window_bounds = array<i64: 1, 3, 256>}, {pipeline_mode = #tpu.pipeline_mode<synchronous>, transform_indices = @transform_1, window_bounds = array<i64: 16, 12, 3>}, {pipeline_mode = #tpu.pipeline_mode<synchronous>, transform_indices = @transform_2, window_bounds = array<i64: 12, 1>}, {pipeline_mode = #tpu.pipeline_mode<synchronous>, transform_indices = @transform_3, window_bounds = array<i64: 256, 1024>}, {pipeline_mode = #tpu.pipeline_mode<synchronous>, transform_indices = @transform_4, window_bounds = array<i64: 16, 24, 12>}, {pipeline_mode = #tpu.pipeline_mode<synchronous>, transform_indices = @transform_5, window_bounds = array<i64: 24, 1>}, {pipeline_mode = #tpu.pipeline_mode<synchronous>, transform_indices = @transform_6, window_bounds = array<i64: 64, 256>}, {pipeline_mode = #tpu.pipeline_mode<synchronous>, transform_indices = @transform_7, window_bounds = array<i64: 16, 8, 24>}, {pipeline_mode = #tpu.pipeline_mode<synchronous>, transform_indices = @transform_8, window_bounds = array<i64: 8, 1>}, {pipeline_mode = #tpu.pipeline_mode<synchronous>, transform_indices = @transform_9, window_bounds = array<i64: 16, 64>}, {pipeline_mode = #tpu.pipeline_mode<synchronous>, transform_indices = @transform_10, window_bounds = array<i64: 16, 24, 8>}, {pipeline_mode = #tpu.pipeline_mode<synchronous>, transform_indices = @transform_11, window_bounds = array<i64: 24, 1>}, {pipeline_mode = #tpu.pipeline_mode<synchronous>, transform_indices = @transform_12, window_bounds = array<i64: 4, 256>}, {pipeline_mode = #tpu.pipeline_mode<synchronous>, transform_indices = @transform_13, window_bounds = array<i64: 16, 12, 24>}, {pipeline_mode = #tpu.pipeline_mode<synchronous>, transform_indices = @transform_14, window_bounds = array<i64: 12, 1>}, {pipeline_mode = #tpu.pipeline_mode<synchronous>, transform_indices = @transform_15, window_bounds = array<i64: 16, 1024>}, {pipeline_mode = #tpu.pipeline_mode<synchronous>, transform_indices = @transform_16, window_bounds = array<i64: 16, 3, 12>}, {pipeline_mode = #tpu.pipeline_mode<synchronous>, transform_indices = @transform_17, window_bounds = array<i64: 3, 1>}, {pipeline_mode = #tpu.pipeline_mode<synchronous>, transform_indices = @transform_18, window_bounds = array<i64: 64, 4096>}, {transform_indices = @transform_19, window_bounds = array<i64: 1, 8, 4>}, {transform_indices = @transform_20, window_bounds = array<i64: 1, 3, 256>}]} {
    %c0 = arith.constant 0 : index
    %c0_0 = arith.constant 0 : index
    %c0_1 = arith.constant 0 : index
    %0 = vector.load %arg1[%c0, %c0_0, %c0_1] : memref<1x3x256xf32, #tpu.memory_space<vmem>>, vector<1x3x256xf32>
    %1 = vector.shape_cast %0 : vector<1x3x256xf32> to vector<3x256xf32>
    %c0_2 = arith.constant 0 : index
    %c0_3 = arith.constant 0 : index
    %2 = vector.load %arg4[%c0_2, %c0_3] : memref<256x1024xf32, #tpu.memory_space<vmem>>, vector<256x1024xf32>
    %cst = arith.constant dense<0.000000e+00> : vector<3x1024xf32>
    %3 = tpu.matmul %1, %2, %cst {dimension_numbers = #tpu.dot_dimension_numbers<[1], [0], [0], [1], [0, 0, 1, 1], [], []>} : vector<3x256xf32>, vector<256x1024xf32>, vector<3x1024xf32> -> vector<3x1024xf32>
    %c0_4 = arith.constant 0 : index
    %c0_5 = arith.constant 0 : index
    %c0_6 = arith.constant 0 : index
    %4 = vector.load %arg2[%c0_4, %c0_5, %c0_6] : memref<16x12x3xf32, #tpu.memory_space<vmem>>, vector<1x12x3xf32>
    %5 = vector.shape_cast %4 : vector<1x12x3xf32> to vector<12x3xf32>
    %6 = vector.extract_strided_slice %3 {offsets = [0, 0], sizes = [3, 64], strides = [1, 1]} : vector<3x1024xf32> to vector<3x64xf32>
    %cst_7 = arith.constant dense<0.000000e+00> : vector<12x64xf32>
    %7 = tpu.matmul %5, %6, %cst_7 {dimension_numbers = #tpu.dot_dimension_numbers<[1], [0], [0], [1], [0, 0, 1, 1], [], []>} : vector<12x3xf32>, vector<3x64xf32>, vector<12x64xf32> -> vector<12x64xf32>
    %c1 = arith.constant 1 : index
    %c0_8 = arith.constant 0 : index
    %c0_9 = arith.constant 0 : index
    %8 = vector.load %arg2[%c1, %c0_8, %c0_9] : memref<16x12x3xf32, #tpu.memory_space<vmem>>, vector<1x12x3xf32>
    %9 = vector.shape_cast %8 : vector<1x12x3xf32> to vector<12x3xf32>
    %10 = vector.extract_strided_slice %3 {offsets = [0, 64], sizes = [3, 64], strides = [1, 1]} : vector<3x1024xf32> to vector<3x64xf32>
    %cst_10 = arith.constant dense<0.000000e+00> : vector<12x64xf32>
    %11 = tpu.matmul %9, %10, %cst_10 {dimension_numbers = #tpu.dot_dimension_numbers<[1], [0], [0], [1], [0, 0, 1, 1], [], []>} : vector<12x3xf32>, vector<3x64xf32>, vector<12x64xf32> -> vector<12x64xf32>
    %c2 = arith.constant 2 : index
    %c0_11 = arith.constant 0 : index
    %c0_12 = arith.constant 0 : index
    %12 = vector.load %arg2[%c2, %c0_11, %c0_12] : memref<16x12x3xf32, #tpu.memory_space<vmem>>, vector<1x12x3xf32>
    %13 = vector.shape_cast %12 : vector<1x12x3xf32> to vector<12x3xf32>
    %14 = vector.extract_strided_slice %3 {offsets = [0, 128], sizes = [3, 64], strides = [1, 1]} : vector<3x1024xf32> to vector<3x64xf32>
    %cst_13 = arith.constant dense<0.000000e+00> : vector<12x64xf32>
    %15 = tpu.matmul %13, %14, %cst_13 {dimension_numbers = #tpu.dot_dimension_numbers<[1], [0], [0], [1], [0, 0, 1, 1], [], []>} : vector<12x3xf32>, vector<3x64xf32>, vector<12x64xf32> -> vector<12x64xf32>
    %c3 = arith.constant 3 : index
    %c0_14 = arith.constant 0 : index
    %c0_15 = arith.constant 0 : index
    %16 = vector.load %arg2[%c3, %c0_14, %c0_15] : memref<16x12x3xf32, #tpu.memory_space<vmem>>, vector<1x12x3xf32>
    %17 = vector.shape_cast %16 : vector<1x12x3xf32> to vector<12x3xf32>
    %18 = vector.extract_strided_slice %3 {offsets = [0, 192], sizes = [3, 64], strides = [1, 1]} : vector<3x1024xf32> to vector<3x64xf32>
    %cst_16 = arith.constant dense<0.000000e+00> : vector<12x64xf32>
    %19 = tpu.matmul %17, %18, %cst_16 {dimension_numbers = #tpu.dot_dimension_numbers<[1], [0], [0], [1], [0, 0, 1, 1], [], []>} : vector<12x3xf32>, vector<3x64xf32>, vector<12x64xf32> -> vector<12x64xf32>
    %c4 = arith.constant 4 : index
    %c0_17 = arith.constant 0 : index
    %c0_18 = arith.constant 0 : index
    %20 = vector.load %arg2[%c4, %c0_17, %c0_18] : memref<16x12x3xf32, #tpu.memory_space<vmem>>, vector<1x12x3xf32>
    %21 = vector.shape_cast %20 : vector<1x12x3xf32> to vector<12x3xf32>
    %22 = vector.extract_strided_slice %3 {offsets = [0, 256], sizes = [3, 64], strides = [1, 1]} : vector<3x1024xf32> to vector<3x64xf32>
    %cst_19 = arith.constant dense<0.000000e+00> : vector<12x64xf32>
    %23 = tpu.matmul %21, %22, %cst_19 {dimension_numbers = #tpu.dot_dimension_numbers<[1], [0], [0], [1], [0, 0, 1, 1], [], []>} : vector<12x3xf32>, vector<3x64xf32>, vector<12x64xf32> -> vector<12x64xf32>
    %c5 = arith.constant 5 : index
    %c0_20 = arith.constant 0 : index
    %c0_21 = arith.constant 0 : index
    %24 = vector.load %arg2[%c5, %c0_20, %c0_21] : memref<16x12x3xf32, #tpu.memory_space<vmem>>, vector<1x12x3xf32>
    %25 = vector.shape_cast %24 : vector<1x12x3xf32> to vector<12x3xf32>
    %26 = vector.extract_strided_slice %3 {offsets = [0, 320], sizes = [3, 64], strides = [1, 1]} : vector<3x1024xf32> to vector<3x64xf32>
    %cst_22 = arith.constant dense<0.000000e+00> : vector<12x64xf32>
    %27 = tpu.matmul %25, %26, %cst_22 {dimension_numbers = #tpu.dot_dimension_numbers<[1], [0], [0], [1], [0, 0, 1, 1], [], []>} : vector<12x3xf32>, vector<3x64xf32>, vector<12x64xf32> -> vector<12x64xf32>
    %c6 = arith.constant 6 : index
    %c0_23 = arith.constant 0 : index
    %c0_24 = arith.constant 0 : index
    %28 = vector.load %arg2[%c6, %c0_23, %c0_24] : memref<16x12x3xf32, #tpu.memory_space<vmem>>, vector<1x12x3xf32>
    %29 = vector.shape_cast %28 : vector<1x12x3xf32> to vector<12x3xf32>
    %30 = vector.extract_strided_slice %3 {offsets = [0, 384], sizes = [3, 64], strides = [1, 1]} : vector<3x1024xf32> to vector<3x64xf32>
    %cst_25 = arith.constant dense<0.000000e+00> : vector<12x64xf32>
    %31 = tpu.matmul %29, %30, %cst_25 {dimension_numbers = #tpu.dot_dimension_numbers<[1], [0], [0], [1], [0, 0, 1, 1], [], []>} : vector<12x3xf32>, vector<3x64xf32>, vector<12x64xf32> -> vector<12x64xf32>
    %c7 = arith.constant 7 : index
    %c0_26 = arith.constant 0 : index
    %c0_27 = arith.constant 0 : index
    %32 = vector.load %arg2[%c7, %c0_26, %c0_27] : memref<16x12x3xf32, #tpu.memory_space<vmem>>, vector<1x12x3xf32>
    %33 = vector.shape_cast %32 : vector<1x12x3xf32> to vector<12x3xf32>
    %34 = vector.extract_strided_slice %3 {offsets = [0, 448], sizes = [3, 64], strides = [1, 1]} : vector<3x1024xf32> to vector<3x64xf32>
    %cst_28 = arith.constant dense<0.000000e+00> : vector<12x64xf32>
    %35 = tpu.matmul %33, %34, %cst_28 {dimension_numbers = #tpu.dot_dimension_numbers<[1], [0], [0], [1], [0, 0, 1, 1], [], []>} : vector<12x3xf32>, vector<3x64xf32>, vector<12x64xf32> -> vector<12x64xf32>
    %c8 = arith.constant 8 : index
    %c0_29 = arith.constant 0 : index
    %c0_30 = arith.constant 0 : index
    %36 = vector.load %arg2[%c8, %c0_29, %c0_30] : memref<16x12x3xf32, #tpu.memory_space<vmem>>, vector<1x12x3xf32>
    %37 = vector.shape_cast %36 : vector<1x12x3xf32> to vector<12x3xf32>
    %38 = vector.extract_strided_slice %3 {offsets = [0, 512], sizes = [3, 64], strides = [1, 1]} : vector<3x1024xf32> to vector<3x64xf32>
    %cst_31 = arith.constant dense<0.000000e+00> : vector<12x64xf32>
    %39 = tpu.matmul %37, %38, %cst_31 {dimension_numbers = #tpu.dot_dimension_numbers<[1], [0], [0], [1], [0, 0, 1, 1], [], []>} : vector<12x3xf32>, vector<3x64xf32>, vector<12x64xf32> -> vector<12x64xf32>
    %c9 = arith.constant 9 : index
    %c0_32 = arith.constant 0 : index
    %c0_33 = arith.constant 0 : index
    %40 = vector.load %arg2[%c9, %c0_32, %c0_33] : memref<16x12x3xf32, #tpu.memory_space<vmem>>, vector<1x12x3xf32>
    %41 = vector.shape_cast %40 : vector<1x12x3xf32> to vector<12x3xf32>
    %42 = vector.extract_strided_slice %3 {offsets = [0, 576], sizes = [3, 64], strides = [1, 1]} : vector<3x1024xf32> to vector<3x64xf32>
    %cst_34 = arith.constant dense<0.000000e+00> : vector<12x64xf32>
    %43 = tpu.matmul %41, %42, %cst_34 {dimension_numbers = #tpu.dot_dimension_numbers<[1], [0], [0], [1], [0, 0, 1, 1], [], []>} : vector<12x3xf32>, vector<3x64xf32>, vector<12x64xf32> -> vector<12x64xf32>
    %c10 = arith.constant 10 : index
    %c0_35 = arith.constant 0 : index
    %c0_36 = arith.constant 0 : index
    %44 = vector.load %arg2[%c10, %c0_35, %c0_36] : memref<16x12x3xf32, #tpu.memory_space<vmem>>, vector<1x12x3xf32>
    %45 = vector.shape_cast %44 : vector<1x12x3xf32> to vector<12x3xf32>
    %46 = vector.extract_strided_slice %3 {offsets = [0, 640], sizes = [3, 64], strides = [1, 1]} : vector<3x1024xf32> to vector<3x64xf32>
    %cst_37 = arith.constant dense<0.000000e+00> : vector<12x64xf32>
    %47 = tpu.matmul %45, %46, %cst_37 {dimension_numbers = #tpu.dot_dimension_numbers<[1], [0], [0], [1], [0, 0, 1, 1], [], []>} : vector<12x3xf32>, vector<3x64xf32>, vector<12x64xf32> -> vector<12x64xf32>
    %c11 = arith.constant 11 : index
    %c0_38 = arith.constant 0 : index
    %c0_39 = arith.constant 0 : index
    %48 = vector.load %arg2[%c11, %c0_38, %c0_39] : memref<16x12x3xf32, #tpu.memory_space<vmem>>, vector<1x12x3xf32>
    %49 = vector.shape_cast %48 : vector<1x12x3xf32> to vector<12x3xf32>
    %50 = vector.extract_strided_slice %3 {offsets = [0, 704], sizes = [3, 64], strides = [1, 1]} : vector<3x1024xf32> to vector<3x64xf32>
    %cst_40 = arith.constant dense<0.000000e+00> : vector<12x64xf32>
    %51 = tpu.matmul %49, %50, %cst_40 {dimension_numbers = #tpu.dot_dimension_numbers<[1], [0], [0], [1], [0, 0, 1, 1], [], []>} : vector<12x3xf32>, vector<3x64xf32>, vector<12x64xf32> -> vector<12x64xf32>
    %c12 = arith.constant 12 : index
    %c0_41 = arith.constant 0 : index
    %c0_42 = arith.constant 0 : index
    %52 = vector.load %arg2[%c12, %c0_41, %c0_42] : memref<16x12x3xf32, #tpu.memory_space<vmem>>, vector<1x12x3xf32>
    %53 = vector.shape_cast %52 : vector<1x12x3xf32> to vector<12x3xf32>
    %54 = vector.extract_strided_slice %3 {offsets = [0, 768], sizes = [3, 64], strides = [1, 1]} : vector<3x1024xf32> to vector<3x64xf32>
    %cst_43 = arith.constant dense<0.000000e+00> : vector<12x64xf32>
    %55 = tpu.matmul %53, %54, %cst_43 {dimension_numbers = #tpu.dot_dimension_numbers<[1], [0], [0], [1], [0, 0, 1, 1], [], []>} : vector<12x3xf32>, vector<3x64xf32>, vector<12x64xf32> -> vector<12x64xf32>
    %c13 = arith.constant 13 : index
    %c0_44 = arith.constant 0 : index
    %c0_45 = arith.constant 0 : index
    %56 = vector.load %arg2[%c13, %c0_44, %c0_45] : memref<16x12x3xf32, #tpu.memory_space<vmem>>, vector<1x12x3xf32>
    %57 = vector.shape_cast %56 : vector<1x12x3xf32> to vector<12x3xf32>
    %58 = vector.extract_strided_slice %3 {offsets = [0, 832], sizes = [3, 64], strides = [1, 1]} : vector<3x1024xf32> to vector<3x64xf32>
    %cst_46 = arith.constant dense<0.000000e+00> : vector<12x64xf32>
    %59 = tpu.matmul %57, %58, %cst_46 {dimension_numbers = #tpu.dot_dimension_numbers<[1], [0], [0], [1], [0, 0, 1, 1], [], []>} : vector<12x3xf32>, vector<3x64xf32>, vector<12x64xf32> -> vector<12x64xf32>
    %c14 = arith.constant 14 : index
    %c0_47 = arith.constant 0 : index
    %c0_48 = arith.constant 0 : index
    %60 = vector.load %arg2[%c14, %c0_47, %c0_48] : memref<16x12x3xf32, #tpu.memory_space<vmem>>, vector<1x12x3xf32>
    %61 = vector.shape_cast %60 : vector<1x12x3xf32> to vector<12x3xf32>
    %62 = vector.extract_strided_slice %3 {offsets = [0, 896], sizes = [3, 64], strides = [1, 1]} : vector<3x1024xf32> to vector<3x64xf32>
    %cst_49 = arith.constant dense<0.000000e+00> : vector<12x64xf32>
    %63 = tpu.matmul %61, %62, %cst_49 {dimension_numbers = #tpu.dot_dimension_numbers<[1], [0], [0], [1], [0, 0, 1, 1], [], []>} : vector<12x3xf32>, vector<3x64xf32>, vector<12x64xf32> -> vector<12x64xf32>
    %c15 = arith.constant 15 : index
    %c0_50 = arith.constant 0 : index
    %c0_51 = arith.constant 0 : index
    %64 = vector.load %arg2[%c15, %c0_50, %c0_51] : memref<16x12x3xf32, #tpu.memory_space<vmem>>, vector<1x12x3xf32>
    %65 = vector.shape_cast %64 : vector<1x12x3xf32> to vector<12x3xf32>
    %66 = vector.extract_strided_slice %3 {offsets = [0, 960], sizes = [3, 64], strides = [1, 1]} : vector<3x1024xf32> to vector<3x64xf32>
    %cst_52 = arith.constant dense<0.000000e+00> : vector<12x64xf32>
    %67 = tpu.matmul %65, %66, %cst_52 {dimension_numbers = #tpu.dot_dimension_numbers<[1], [0], [0], [1], [0, 0, 1, 1], [], []>} : vector<12x3xf32>, vector<3x64xf32>, vector<12x64xf32> -> vector<12x64xf32>
    %68 = arith.addf %7, %11 : vector<12x64xf32>
    %69 = arith.addf %15, %19 : vector<12x64xf32>
    %70 = arith.addf %23, %27 : vector<12x64xf32>
    %71 = arith.addf %31, %35 : vector<12x64xf32>
    %72 = arith.addf %39, %43 : vector<12x64xf32>
    %73 = arith.addf %47, %51 : vector<12x64xf32>
    %74 = arith.addf %55, %59 : vector<12x64xf32>
    %75 = arith.addf %63, %67 : vector<12x64xf32>
    %76 = arith.addf %68, %69 : vector<12x64xf32>
    %77 = arith.addf %70, %71 : vector<12x64xf32>
    %78 = arith.addf %72, %73 : vector<12x64xf32>
    %79 = arith.addf %74, %75 : vector<12x64xf32>
    %80 = arith.addf %76, %77 : vector<12x64xf32>
    %81 = arith.addf %78, %79 : vector<12x64xf32>
    %82 = arith.addf %80, %81 : vector<12x64xf32>
    %c0_53 = arith.constant 0 : index
    %c0_54 = arith.constant 0 : index
    %83 = vector.load %arg3[%c0_53, %c0_54] : memref<12x1xf32, #tpu.memory_space<vmem>>, vector<12x1xf32>
    %84 = vector.broadcast %83 : vector<12x1xf32> to vector<12x64xf32>
    %85 = arith.addf %82, %84 : vector<12x64xf32>
    %cst_55 = arith.constant 0.000000e+00 : f32
    %86 = vector.broadcast %cst_55 : f32 to vector<12x64xf32>
    %87 = arith.maximumf %85, %86 : vector<12x64xf32>
    %c0_56 = arith.constant 0 : index
    %c0_57 = arith.constant 0 : index
    %88 = vector.load %arg7[%c0_56, %c0_57] : memref<64x256xf32, #tpu.memory_space<vmem>>, vector<64x256xf32>
    %cst_58 = arith.constant dense<0.000000e+00> : vector<12x256xf32>
    %89 = tpu.matmul %87, %88, %cst_58 {dimension_numbers = #tpu.dot_dimension_numbers<[1], [0], [0], [1], [0, 0, 1, 1], [], []>} : vector<12x64xf32>, vector<64x256xf32>, vector<12x256xf32> -> vector<12x256xf32>
    %c0_59 = arith.constant 0 : index
    %c0_60 = arith.constant 0 : index
    %c0_61 = arith.constant 0 : index
    %90 = vector.load %arg5[%c0_59, %c0_60, %c0_61] : memref<16x24x12xf32, #tpu.memory_space<vmem>>, vector<1x24x12xf32>
    %91 = vector.shape_cast %90 : vector<1x24x12xf32> to vector<24x12xf32>
    %92 = vector.extract_strided_slice %89 {offsets = [0, 0], sizes = [12, 16], strides = [1, 1]} : vector<12x256xf32> to vector<12x16xf32>
    %cst_62 = arith.constant dense<0.000000e+00> : vector<24x16xf32>
    %93 = tpu.matmul %91, %92, %cst_62 {dimension_numbers = #tpu.dot_dimension_numbers<[1], [0], [0], [1], [0, 0, 1, 1], [], []>} : vector<24x12xf32>, vector<12x16xf32>, vector<24x16xf32> -> vector<24x16xf32>
    %c1_63 = arith.constant 1 : index
    %c0_64 = arith.constant 0 : index
    %c0_65 = arith.constant 0 : index
    %94 = vector.load %arg5[%c1_63, %c0_64, %c0_65] : memref<16x24x12xf32, #tpu.memory_space<vmem>>, vector<1x24x12xf32>
    %95 = vector.shape_cast %94 : vector<1x24x12xf32> to vector<24x12xf32>
    %96 = vector.extract_strided_slice %89 {offsets = [0, 16], sizes = [12, 16], strides = [1, 1]} : vector<12x256xf32> to vector<12x16xf32>
    %cst_66 = arith.constant dense<0.000000e+00> : vector<24x16xf32>
    %97 = tpu.matmul %95, %96, %cst_66 {dimension_numbers = #tpu.dot_dimension_numbers<[1], [0], [0], [1], [0, 0, 1, 1], [], []>} : vector<24x12xf32>, vector<12x16xf32>, vector<24x16xf32> -> vector<24x16xf32>
    %c2_67 = arith.constant 2 : index
    %c0_68 = arith.constant 0 : index
    %c0_69 = arith.constant 0 : index
    %98 = vector.load %arg5[%c2_67, %c0_68, %c0_69] : memref<16x24x12xf32, #tpu.memory_space<vmem>>, vector<1x24x12xf32>
    %99 = vector.shape_cast %98 : vector<1x24x12xf32> to vector<24x12xf32>
    %100 = vector.extract_strided_slice %89 {offsets = [0, 32], sizes = [12, 16], strides = [1, 1]} : vector<12x256xf32> to vector<12x16xf32>
    %cst_70 = arith.constant dense<0.000000e+00> : vector<24x16xf32>
    %101 = tpu.matmul %99, %100, %cst_70 {dimension_numbers = #tpu.dot_dimension_numbers<[1], [0], [0], [1], [0, 0, 1, 1], [], []>} : vector<24x12xf32>, vector<12x16xf32>, vector<24x16xf32> -> vector<24x16xf32>
    %c3_71 = arith.constant 3 : index
    %c0_72 = arith.constant 0 : index
    %c0_73 = arith.constant 0 : index
    %102 = vector.load %arg5[%c3_71, %c0_72, %c0_73] : memref<16x24x12xf32, #tpu.memory_space<vmem>>, vector<1x24x12xf32>
    %103 = vector.shape_cast %102 : vector<1x24x12xf32> to vector<24x12xf32>
    %104 = vector.extract_strided_slice %89 {offsets = [0, 48], sizes = [12, 16], strides = [1, 1]} : vector<12x256xf32> to vector<12x16xf32>
    %cst_74 = arith.constant dense<0.000000e+00> : vector<24x16xf32>
    %105 = tpu.matmul %103, %104, %cst_74 {dimension_numbers = #tpu.dot_dimension_numbers<[1], [0], [0], [1], [0, 0, 1, 1], [], []>} : vector<24x12xf32>, vector<12x16xf32>, vector<24x16xf32> -> vector<24x16xf32>
    %c4_75 = arith.constant 4 : index
    %c0_76 = arith.constant 0 : index
    %c0_77 = arith.constant 0 : index
    %106 = vector.load %arg5[%c4_75, %c0_76, %c0_77] : memref<16x24x12xf32, #tpu.memory_space<vmem>>, vector<1x24x12xf32>
    %107 = vector.shape_cast %106 : vector<1x24x12xf32> to vector<24x12xf32>
    %108 = vector.extract_strided_slice %89 {offsets = [0, 64], sizes = [12, 16], strides = [1, 1]} : vector<12x256xf32> to vector<12x16xf32>
    %cst_78 = arith.constant dense<0.000000e+00> : vector<24x16xf32>
    %109 = tpu.matmul %107, %108, %cst_78 {dimension_numbers = #tpu.dot_dimension_numbers<[1], [0], [0], [1], [0, 0, 1, 1], [], []>} : vector<24x12xf32>, vector<12x16xf32>, vector<24x16xf32> -> vector<24x16xf32>
    %c5_79 = arith.constant 5 : index
    %c0_80 = arith.constant 0 : index
    %c0_81 = arith.constant 0 : index
    %110 = vector.load %arg5[%c5_79, %c0_80, %c0_81] : memref<16x24x12xf32, #tpu.memory_space<vmem>>, vector<1x24x12xf32>
    %111 = vector.shape_cast %110 : vector<1x24x12xf32> to vector<24x12xf32>
    %112 = vector.extract_strided_slice %89 {offsets = [0, 80], sizes = [12, 16], strides = [1, 1]} : vector<12x256xf32> to vector<12x16xf32>
    %cst_82 = arith.constant dense<0.000000e+00> : vector<24x16xf32>
    %113 = tpu.matmul %111, %112, %cst_82 {dimension_numbers = #tpu.dot_dimension_numbers<[1], [0], [0], [1], [0, 0, 1, 1], [], []>} : vector<24x12xf32>, vector<12x16xf32>, vector<24x16xf32> -> vector<24x16xf32>
    %c6_83 = arith.constant 6 : index
    %c0_84 = arith.constant 0 : index
    %c0_85 = arith.constant 0 : index
    %114 = vector.load %arg5[%c6_83, %c0_84, %c0_85] : memref<16x24x12xf32, #tpu.memory_space<vmem>>, vector<1x24x12xf32>
    %115 = vector.shape_cast %114 : vector<1x24x12xf32> to vector<24x12xf32>
    %116 = vector.extract_strided_slice %89 {offsets = [0, 96], sizes = [12, 16], strides = [1, 1]} : vector<12x256xf32> to vector<12x16xf32>
    %cst_86 = arith.constant dense<0.000000e+00> : vector<24x16xf32>
    %117 = tpu.matmul %115, %116, %cst_86 {dimension_numbers = #tpu.dot_dimension_numbers<[1], [0], [0], [1], [0, 0, 1, 1], [], []>} : vector<24x12xf32>, vector<12x16xf32>, vector<24x16xf32> -> vector<24x16xf32>
    %c7_87 = arith.constant 7 : index
    %c0_88 = arith.constant 0 : index
    %c0_89 = arith.constant 0 : index
    %118 = vector.load %arg5[%c7_87, %c0_88, %c0_89] : memref<16x24x12xf32, #tpu.memory_space<vmem>>, vector<1x24x12xf32>
    %119 = vector.shape_cast %118 : vector<1x24x12xf32> to vector<24x12xf32>
    %120 = vector.extract_strided_slice %89 {offsets = [0, 112], sizes = [12, 16], strides = [1, 1]} : vector<12x256xf32> to vector<12x16xf32>
    %cst_90 = arith.constant dense<0.000000e+00> : vector<24x16xf32>
    %121 = tpu.matmul %119, %120, %cst_90 {dimension_numbers = #tpu.dot_dimension_numbers<[1], [0], [0], [1], [0, 0, 1, 1], [], []>} : vector<24x12xf32>, vector<12x16xf32>, vector<24x16xf32> -> vector<24x16xf32>
    %c8_91 = arith.constant 8 : index
    %c0_92 = arith.constant 0 : index
    %c0_93 = arith.constant 0 : index
    %122 = vector.load %arg5[%c8_91, %c0_92, %c0_93] : memref<16x24x12xf32, #tpu.memory_space<vmem>>, vector<1x24x12xf32>
    %123 = vector.shape_cast %122 : vector<1x24x12xf32> to vector<24x12xf32>
    %124 = vector.extract_strided_slice %89 {offsets = [0, 128], sizes = [12, 16], strides = [1, 1]} : vector<12x256xf32> to vector<12x16xf32>
    %cst_94 = arith.constant dense<0.000000e+00> : vector<24x16xf32>
    %125 = tpu.matmul %123, %124, %cst_94 {dimension_numbers = #tpu.dot_dimension_numbers<[1], [0], [0], [1], [0, 0, 1, 1], [], []>} : vector<24x12xf32>, vector<12x16xf32>, vector<24x16xf32> -> vector<24x16xf32>
    %c9_95 = arith.constant 9 : index
    %c0_96 = arith.constant 0 : index
    %c0_97 = arith.constant 0 : index
    %126 = vector.load %arg5[%c9_95, %c0_96, %c0_97] : memref<16x24x12xf32, #tpu.memory_space<vmem>>, vector<1x24x12xf32>
    %127 = vector.shape_cast %126 : vector<1x24x12xf32> to vector<24x12xf32>
    %128 = vector.extract_strided_slice %89 {offsets = [0, 144], sizes = [12, 16], strides = [1, 1]} : vector<12x256xf32> to vector<12x16xf32>
    %cst_98 = arith.constant dense<0.000000e+00> : vector<24x16xf32>
    %129 = tpu.matmul %127, %128, %cst_98 {dimension_numbers = #tpu.dot_dimension_numbers<[1], [0], [0], [1], [0, 0, 1, 1], [], []>} : vector<24x12xf32>, vector<12x16xf32>, vector<24x16xf32> -> vector<24x16xf32>
    %c10_99 = arith.constant 10 : index
    %c0_100 = arith.constant 0 : index
    %c0_101 = arith.constant 0 : index
    %130 = vector.load %arg5[%c10_99, %c0_100, %c0_101] : memref<16x24x12xf32, #tpu.memory_space<vmem>>, vector<1x24x12xf32>
    %131 = vector.shape_cast %130 : vector<1x24x12xf32> to vector<24x12xf32>
    %132 = vector.extract_strided_slice %89 {offsets = [0, 160], sizes = [12, 16], strides = [1, 1]} : vector<12x256xf32> to vector<12x16xf32>
    %cst_102 = arith.constant dense<0.000000e+00> : vector<24x16xf32>
    %133 = tpu.matmul %131, %132, %cst_102 {dimension_numbers = #tpu.dot_dimension_numbers<[1], [0], [0], [1], [0, 0, 1, 1], [], []>} : vector<24x12xf32>, vector<12x16xf32>, vector<24x16xf32> -> vector<24x16xf32>
    %c11_103 = arith.constant 11 : index
    %c0_104 = arith.constant 0 : index
    %c0_105 = arith.constant 0 : index
    %134 = vector.load %arg5[%c11_103, %c0_104, %c0_105] : memref<16x24x12xf32, #tpu.memory_space<vmem>>, vector<1x24x12xf32>
    %135 = vector.shape_cast %134 : vector<1x24x12xf32> to vector<24x12xf32>
    %136 = vector.extract_strided_slice %89 {offsets = [0, 176], sizes = [12, 16], strides = [1, 1]} : vector<12x256xf32> to vector<12x16xf32>
    %cst_106 = arith.constant dense<0.000000e+00> : vector<24x16xf32>
    %137 = tpu.matmul %135, %136, %cst_106 {dimension_numbers = #tpu.dot_dimension_numbers<[1], [0], [0], [1], [0, 0, 1, 1], [], []>} : vector<24x12xf32>, vector<12x16xf32>, vector<24x16xf32> -> vector<24x16xf32>
    %c12_107 = arith.constant 12 : index
    %c0_108 = arith.constant 0 : index
    %c0_109 = arith.constant 0 : index
    %138 = vector.load %arg5[%c12_107, %c0_108, %c0_109] : memref<16x24x12xf32, #tpu.memory_space<vmem>>, vector<1x24x12xf32>
    %139 = vector.shape_cast %138 : vector<1x24x12xf32> to vector<24x12xf32>
    %140 = vector.extract_strided_slice %89 {offsets = [0, 192], sizes = [12, 16], strides = [1, 1]} : vector<12x256xf32> to vector<12x16xf32>
    %cst_110 = arith.constant dense<0.000000e+00> : vector<24x16xf32>
    %141 = tpu.matmul %139, %140, %cst_110 {dimension_numbers = #tpu.dot_dimension_numbers<[1], [0], [0], [1], [0, 0, 1, 1], [], []>} : vector<24x12xf32>, vector<12x16xf32>, vector<24x16xf32> -> vector<24x16xf32>
    %c13_111 = arith.constant 13 : index
    %c0_112 = arith.constant 0 : index
    %c0_113 = arith.constant 0 : index
    %142 = vector.load %arg5[%c13_111, %c0_112, %c0_113] : memref<16x24x12xf32, #tpu.memory_space<vmem>>, vector<1x24x12xf32>
    %143 = vector.shape_cast %142 : vector<1x24x12xf32> to vector<24x12xf32>
    %144 = vector.extract_strided_slice %89 {offsets = [0, 208], sizes = [12, 16], strides = [1, 1]} : vector<12x256xf32> to vector<12x16xf32>
    %cst_114 = arith.constant dense<0.000000e+00> : vector<24x16xf32>
    %145 = tpu.matmul %143, %144, %cst_114 {dimension_numbers = #tpu.dot_dimension_numbers<[1], [0], [0], [1], [0, 0, 1, 1], [], []>} : vector<24x12xf32>, vector<12x16xf32>, vector<24x16xf32> -> vector<24x16xf32>
    %c14_115 = arith.constant 14 : index
    %c0_116 = arith.constant 0 : index
    %c0_117 = arith.constant 0 : index
    %146 = vector.load %arg5[%c14_115, %c0_116, %c0_117] : memref<16x24x12xf32, #tpu.memory_space<vmem>>, vector<1x24x12xf32>
    %147 = vector.shape_cast %146 : vector<1x24x12xf32> to vector<24x12xf32>
    %148 = vector.extract_strided_slice %89 {offsets = [0, 224], sizes = [12, 16], strides = [1, 1]} : vector<12x256xf32> to vector<12x16xf32>
    %cst_118 = arith.constant dense<0.000000e+00> : vector<24x16xf32>
    %149 = tpu.matmul %147, %148, %cst_118 {dimension_numbers = #tpu.dot_dimension_numbers<[1], [0], [0], [1], [0, 0, 1, 1], [], []>} : vector<24x12xf32>, vector<12x16xf32>, vector<24x16xf32> -> vector<24x16xf32>
    %c15_119 = arith.constant 15 : index
    %c0_120 = arith.constant 0 : index
    %c0_121 = arith.constant 0 : index
    %150 = vector.load %arg5[%c15_119, %c0_120, %c0_121] : memref<16x24x12xf32, #tpu.memory_space<vmem>>, vector<1x24x12xf32>
    %151 = vector.shape_cast %150 : vector<1x24x12xf32> to vector<24x12xf32>
    %152 = vector.extract_strided_slice %89 {offsets = [0, 240], sizes = [12, 16], strides = [1, 1]} : vector<12x256xf32> to vector<12x16xf32>
    %cst_122 = arith.constant dense<0.000000e+00> : vector<24x16xf32>
    %153 = tpu.matmul %151, %152, %cst_122 {dimension_numbers = #tpu.dot_dimension_numbers<[1], [0], [0], [1], [0, 0, 1, 1], [], []>} : vector<24x12xf32>, vector<12x16xf32>, vector<24x16xf32> -> vector<24x16xf32>
    %154 = arith.addf %93, %97 : vector<24x16xf32>
    %155 = arith.addf %101, %105 : vector<24x16xf32>
    %156 = arith.addf %109, %113 : vector<24x16xf32>
    %157 = arith.addf %117, %121 : vector<24x16xf32>
    %158 = arith.addf %125, %129 : vector<24x16xf32>
    %159 = arith.addf %133, %137 : vector<24x16xf32>
    %160 = arith.addf %141, %145 : vector<24x16xf32>
    %161 = arith.addf %149, %153 : vector<24x16xf32>
    %162 = arith.addf %154, %155 : vector<24x16xf32>
    %163 = arith.addf %156, %157 : vector<24x16xf32>
    %164 = arith.addf %158, %159 : vector<24x16xf32>
    %165 = arith.addf %160, %161 : vector<24x16xf32>
    %166 = arith.addf %162, %163 : vector<24x16xf32>
    %167 = arith.addf %164, %165 : vector<24x16xf32>
    %168 = arith.addf %166, %167 : vector<24x16xf32>
    %c0_123 = arith.constant 0 : index
    %c0_124 = arith.constant 0 : index
    %169 = vector.load %arg6[%c0_123, %c0_124] : memref<24x1xf32, #tpu.memory_space<vmem>>, vector<24x1xf32>
    %170 = vector.broadcast %169 : vector<24x1xf32> to vector<24x16xf32>
    %171 = arith.addf %168, %170 : vector<24x16xf32>
    %cst_125 = arith.constant 0.000000e+00 : f32
    %172 = vector.broadcast %cst_125 : f32 to vector<24x16xf32>
    %173 = arith.maximumf %171, %172 : vector<24x16xf32>
    %c0_126 = arith.constant 0 : index
    %c0_127 = arith.constant 0 : index
    %174 = vector.load %arg10[%c0_126, %c0_127] : memref<16x64xf32, #tpu.memory_space<vmem>>, vector<16x64xf32>
    %cst_128 = arith.constant dense<0.000000e+00> : vector<24x64xf32>
    %175 = tpu.matmul %173, %174, %cst_128 {dimension_numbers = #tpu.dot_dimension_numbers<[1], [0], [0], [1], [0, 0, 1, 1], [], []>} : vector<24x16xf32>, vector<16x64xf32>, vector<24x64xf32> -> vector<24x64xf32>
    %c0_129 = arith.constant 0 : index
    %c0_130 = arith.constant 0 : index
    %c0_131 = arith.constant 0 : index
    %176 = vector.load %arg8[%c0_129, %c0_130, %c0_131] : memref<16x8x24xf32, #tpu.memory_space<vmem>>, vector<1x8x24xf32>
    %177 = vector.shape_cast %176 : vector<1x8x24xf32> to vector<8x24xf32>
    %178 = vector.extract_strided_slice %175 {offsets = [0, 0], sizes = [24, 4], strides = [1, 1]} : vector<24x64xf32> to vector<24x4xf32>
    %cst_132 = arith.constant dense<0.000000e+00> : vector<8x4xf32>
    %179 = tpu.matmul %177, %178, %cst_132 {dimension_numbers = #tpu.dot_dimension_numbers<[1], [0], [0], [1], [0, 0, 1, 1], [], []>} : vector<8x24xf32>, vector<24x4xf32>, vector<8x4xf32> -> vector<8x4xf32>
    %c1_133 = arith.constant 1 : index
    %c0_134 = arith.constant 0 : index
    %c0_135 = arith.constant 0 : index
    %180 = vector.load %arg8[%c1_133, %c0_134, %c0_135] : memref<16x8x24xf32, #tpu.memory_space<vmem>>, vector<1x8x24xf32>
    %181 = vector.shape_cast %180 : vector<1x8x24xf32> to vector<8x24xf32>
    %182 = vector.extract_strided_slice %175 {offsets = [0, 4], sizes = [24, 4], strides = [1, 1]} : vector<24x64xf32> to vector<24x4xf32>
    %cst_136 = arith.constant dense<0.000000e+00> : vector<8x4xf32>
    %183 = tpu.matmul %181, %182, %cst_136 {dimension_numbers = #tpu.dot_dimension_numbers<[1], [0], [0], [1], [0, 0, 1, 1], [], []>} : vector<8x24xf32>, vector<24x4xf32>, vector<8x4xf32> -> vector<8x4xf32>
    %c2_137 = arith.constant 2 : index
    %c0_138 = arith.constant 0 : index
    %c0_139 = arith.constant 0 : index
    %184 = vector.load %arg8[%c2_137, %c0_138, %c0_139] : memref<16x8x24xf32, #tpu.memory_space<vmem>>, vector<1x8x24xf32>
    %185 = vector.shape_cast %184 : vector<1x8x24xf32> to vector<8x24xf32>
    %186 = vector.extract_strided_slice %175 {offsets = [0, 8], sizes = [24, 4], strides = [1, 1]} : vector<24x64xf32> to vector<24x4xf32>
    %cst_140 = arith.constant dense<0.000000e+00> : vector<8x4xf32>
    %187 = tpu.matmul %185, %186, %cst_140 {dimension_numbers = #tpu.dot_dimension_numbers<[1], [0], [0], [1], [0, 0, 1, 1], [], []>} : vector<8x24xf32>, vector<24x4xf32>, vector<8x4xf32> -> vector<8x4xf32>
    %c3_141 = arith.constant 3 : index
    %c0_142 = arith.constant 0 : index
    %c0_143 = arith.constant 0 : index
    %188 = vector.load %arg8[%c3_141, %c0_142, %c0_143] : memref<16x8x24xf32, #tpu.memory_space<vmem>>, vector<1x8x24xf32>
    %189 = vector.shape_cast %188 : vector<1x8x24xf32> to vector<8x24xf32>
    %190 = vector.extract_strided_slice %175 {offsets = [0, 12], sizes = [24, 4], strides = [1, 1]} : vector<24x64xf32> to vector<24x4xf32>
    %cst_144 = arith.constant dense<0.000000e+00> : vector<8x4xf32>
    %191 = tpu.matmul %189, %190, %cst_144 {dimension_numbers = #tpu.dot_dimension_numbers<[1], [0], [0], [1], [0, 0, 1, 1], [], []>} : vector<8x24xf32>, vector<24x4xf32>, vector<8x4xf32> -> vector<8x4xf32>
    %c4_145 = arith.constant 4 : index
    %c0_146 = arith.constant 0 : index
    %c0_147 = arith.constant 0 : index
    %192 = vector.load %arg8[%c4_145, %c0_146, %c0_147] : memref<16x8x24xf32, #tpu.memory_space<vmem>>, vector<1x8x24xf32>
    %193 = vector.shape_cast %192 : vector<1x8x24xf32> to vector<8x24xf32>
    %194 = vector.extract_strided_slice %175 {offsets = [0, 16], sizes = [24, 4], strides = [1, 1]} : vector<24x64xf32> to vector<24x4xf32>
    %cst_148 = arith.constant dense<0.000000e+00> : vector<8x4xf32>
    %195 = tpu.matmul %193, %194, %cst_148 {dimension_numbers = #tpu.dot_dimension_numbers<[1], [0], [0], [1], [0, 0, 1, 1], [], []>} : vector<8x24xf32>, vector<24x4xf32>, vector<8x4xf32> -> vector<8x4xf32>
    %c5_149 = arith.constant 5 : index
    %c0_150 = arith.constant 0 : index
    %c0_151 = arith.constant 0 : index
    %196 = vector.load %arg8[%c5_149, %c0_150, %c0_151] : memref<16x8x24xf32, #tpu.memory_space<vmem>>, vector<1x8x24xf32>
    %197 = vector.shape_cast %196 : vector<1x8x24xf32> to vector<8x24xf32>
    %198 = vector.extract_strided_slice %175 {offsets = [0, 20], sizes = [24, 4], strides = [1, 1]} : vector<24x64xf32> to vector<24x4xf32>
    %cst_152 = arith.constant dense<0.000000e+00> : vector<8x4xf32>
    %199 = tpu.matmul %197, %198, %cst_152 {dimension_numbers = #tpu.dot_dimension_numbers<[1], [0], [0], [1], [0, 0, 1, 1], [], []>} : vector<8x24xf32>, vector<24x4xf32>, vector<8x4xf32> -> vector<8x4xf32>
    %c6_153 = arith.constant 6 : index
    %c0_154 = arith.constant 0 : index
    %c0_155 = arith.constant 0 : index
    %200 = vector.load %arg8[%c6_153, %c0_154, %c0_155] : memref<16x8x24xf32, #tpu.memory_space<vmem>>, vector<1x8x24xf32>
    %201 = vector.shape_cast %200 : vector<1x8x24xf32> to vector<8x24xf32>
    %202 = vector.extract_strided_slice %175 {offsets = [0, 24], sizes = [24, 4], strides = [1, 1]} : vector<24x64xf32> to vector<24x4xf32>
    %cst_156 = arith.constant dense<0.000000e+00> : vector<8x4xf32>
    %203 = tpu.matmul %201, %202, %cst_156 {dimension_numbers = #tpu.dot_dimension_numbers<[1], [0], [0], [1], [0, 0, 1, 1], [], []>} : vector<8x24xf32>, vector<24x4xf32>, vector<8x4xf32> -> vector<8x4xf32>
    %c7_157 = arith.constant 7 : index
    %c0_158 = arith.constant 0 : index
    %c0_159 = arith.constant 0 : index
    %204 = vector.load %arg8[%c7_157, %c0_158, %c0_159] : memref<16x8x24xf32, #tpu.memory_space<vmem>>, vector<1x8x24xf32>
    %205 = vector.shape_cast %204 : vector<1x8x24xf32> to vector<8x24xf32>
    %206 = vector.extract_strided_slice %175 {offsets = [0, 28], sizes = [24, 4], strides = [1, 1]} : vector<24x64xf32> to vector<24x4xf32>
    %cst_160 = arith.constant dense<0.000000e+00> : vector<8x4xf32>
    %207 = tpu.matmul %205, %206, %cst_160 {dimension_numbers = #tpu.dot_dimension_numbers<[1], [0], [0], [1], [0, 0, 1, 1], [], []>} : vector<8x24xf32>, vector<24x4xf32>, vector<8x4xf32> -> vector<8x4xf32>
    %c8_161 = arith.constant 8 : index
    %c0_162 = arith.constant 0 : index
    %c0_163 = arith.constant 0 : index
    %208 = vector.load %arg8[%c8_161, %c0_162, %c0_163] : memref<16x8x24xf32, #tpu.memory_space<vmem>>, vector<1x8x24xf32>
    %209 = vector.shape_cast %208 : vector<1x8x24xf32> to vector<8x24xf32>
    %210 = vector.extract_strided_slice %175 {offsets = [0, 32], sizes = [24, 4], strides = [1, 1]} : vector<24x64xf32> to vector<24x4xf32>
    %cst_164 = arith.constant dense<0.000000e+00> : vector<8x4xf32>
    %211 = tpu.matmul %209, %210, %cst_164 {dimension_numbers = #tpu.dot_dimension_numbers<[1], [0], [0], [1], [0, 0, 1, 1], [], []>} : vector<8x24xf32>, vector<24x4xf32>, vector<8x4xf32> -> vector<8x4xf32>
    %c9_165 = arith.constant 9 : index
    %c0_166 = arith.constant 0 : index
    %c0_167 = arith.constant 0 : index
    %212 = vector.load %arg8[%c9_165, %c0_166, %c0_167] : memref<16x8x24xf32, #tpu.memory_space<vmem>>, vector<1x8x24xf32>
    %213 = vector.shape_cast %212 : vector<1x8x24xf32> to vector<8x24xf32>
    %214 = vector.extract_strided_slice %175 {offsets = [0, 36], sizes = [24, 4], strides = [1, 1]} : vector<24x64xf32> to vector<24x4xf32>
    %cst_168 = arith.constant dense<0.000000e+00> : vector<8x4xf32>
    %215 = tpu.matmul %213, %214, %cst_168 {dimension_numbers = #tpu.dot_dimension_numbers<[1], [0], [0], [1], [0, 0, 1, 1], [], []>} : vector<8x24xf32>, vector<24x4xf32>, vector<8x4xf32> -> vector<8x4xf32>
    %c10_169 = arith.constant 10 : index
    %c0_170 = arith.constant 0 : index
    %c0_171 = arith.constant 0 : index
    %216 = vector.load %arg8[%c10_169, %c0_170, %c0_171] : memref<16x8x24xf32, #tpu.memory_space<vmem>>, vector<1x8x24xf32>
    %217 = vector.shape_cast %216 : vector<1x8x24xf32> to vector<8x24xf32>
    %218 = vector.extract_strided_slice %175 {offsets = [0, 40], sizes = [24, 4], strides = [1, 1]} : vector<24x64xf32> to vector<24x4xf32>
    %cst_172 = arith.constant dense<0.000000e+00> : vector<8x4xf32>
    %219 = tpu.matmul %217, %218, %cst_172 {dimension_numbers = #tpu.dot_dimension_numbers<[1], [0], [0], [1], [0, 0, 1, 1], [], []>} : vector<8x24xf32>, vector<24x4xf32>, vector<8x4xf32> -> vector<8x4xf32>
    %c11_173 = arith.constant 11 : index
    %c0_174 = arith.constant 0 : index
    %c0_175 = arith.constant 0 : index
    %220 = vector.load %arg8[%c11_173, %c0_174, %c0_175] : memref<16x8x24xf32, #tpu.memory_space<vmem>>, vector<1x8x24xf32>
    %221 = vector.shape_cast %220 : vector<1x8x24xf32> to vector<8x24xf32>
    %222 = vector.extract_strided_slice %175 {offsets = [0, 44], sizes = [24, 4], strides = [1, 1]} : vector<24x64xf32> to vector<24x4xf32>
    %cst_176 = arith.constant dense<0.000000e+00> : vector<8x4xf32>
    %223 = tpu.matmul %221, %222, %cst_176 {dimension_numbers = #tpu.dot_dimension_numbers<[1], [0], [0], [1], [0, 0, 1, 1], [], []>} : vector<8x24xf32>, vector<24x4xf32>, vector<8x4xf32> -> vector<8x4xf32>
    %c12_177 = arith.constant 12 : index
    %c0_178 = arith.constant 0 : index
    %c0_179 = arith.constant 0 : index
    %224 = vector.load %arg8[%c12_177, %c0_178, %c0_179] : memref<16x8x24xf32, #tpu.memory_space<vmem>>, vector<1x8x24xf32>
    %225 = vector.shape_cast %224 : vector<1x8x24xf32> to vector<8x24xf32>
    %226 = vector.extract_strided_slice %175 {offsets = [0, 48], sizes = [24, 4], strides = [1, 1]} : vector<24x64xf32> to vector<24x4xf32>
    %cst_180 = arith.constant dense<0.000000e+00> : vector<8x4xf32>
    %227 = tpu.matmul %225, %226, %cst_180 {dimension_numbers = #tpu.dot_dimension_numbers<[1], [0], [0], [1], [0, 0, 1, 1], [], []>} : vector<8x24xf32>, vector<24x4xf32>, vector<8x4xf32> -> vector<8x4xf32>
    %c13_181 = arith.constant 13 : index
    %c0_182 = arith.constant 0 : index
    %c0_183 = arith.constant 0 : index
    %228 = vector.load %arg8[%c13_181, %c0_182, %c0_183] : memref<16x8x24xf32, #tpu.memory_space<vmem>>, vector<1x8x24xf32>
    %229 = vector.shape_cast %228 : vector<1x8x24xf32> to vector<8x24xf32>
    %230 = vector.extract_strided_slice %175 {offsets = [0, 52], sizes = [24, 4], strides = [1, 1]} : vector<24x64xf32> to vector<24x4xf32>
    %cst_184 = arith.constant dense<0.000000e+00> : vector<8x4xf32>
    %231 = tpu.matmul %229, %230, %cst_184 {dimension_numbers = #tpu.dot_dimension_numbers<[1], [0], [0], [1], [0, 0, 1, 1], [], []>} : vector<8x24xf32>, vector<24x4xf32>, vector<8x4xf32> -> vector<8x4xf32>
    %c14_185 = arith.constant 14 : index
    %c0_186 = arith.constant 0 : index
    %c0_187 = arith.constant 0 : index
    %232 = vector.load %arg8[%c14_185, %c0_186, %c0_187] : memref<16x8x24xf32, #tpu.memory_space<vmem>>, vector<1x8x24xf32>
    %233 = vector.shape_cast %232 : vector<1x8x24xf32> to vector<8x24xf32>
    %234 = vector.extract_strided_slice %175 {offsets = [0, 56], sizes = [24, 4], strides = [1, 1]} : vector<24x64xf32> to vector<24x4xf32>
    %cst_188 = arith.constant dense<0.000000e+00> : vector<8x4xf32>
    %235 = tpu.matmul %233, %234, %cst_188 {dimension_numbers = #tpu.dot_dimension_numbers<[1], [0], [0], [1], [0, 0, 1, 1], [], []>} : vector<8x24xf32>, vector<24x4xf32>, vector<8x4xf32> -> vector<8x4xf32>
    %c15_189 = arith.constant 15 : index
    %c0_190 = arith.constant 0 : index
    %c0_191 = arith.constant 0 : index
    %236 = vector.load %arg8[%c15_189, %c0_190, %c0_191] : memref<16x8x24xf32, #tpu.memory_space<vmem>>, vector<1x8x24xf32>
    %237 = vector.shape_cast %236 : vector<1x8x24xf32> to vector<8x24xf32>
    %238 = vector.extract_strided_slice %175 {offsets = [0, 60], sizes = [24, 4], strides = [1, 1]} : vector<24x64xf32> to vector<24x4xf32>
    %cst_192 = arith.constant dense<0.000000e+00> : vector<8x4xf32>
    %239 = tpu.matmul %237, %238, %cst_192 {dimension_numbers = #tpu.dot_dimension_numbers<[1], [0], [0], [1], [0, 0, 1, 1], [], []>} : vector<8x24xf32>, vector<24x4xf32>, vector<8x4xf32> -> vector<8x4xf32>
    %240 = arith.addf %179, %183 : vector<8x4xf32>
    %241 = arith.addf %187, %191 : vector<8x4xf32>
    %242 = arith.addf %195, %199 : vector<8x4xf32>
    %243 = arith.addf %203, %207 : vector<8x4xf32>
    %244 = arith.addf %211, %215 : vector<8x4xf32>
    %245 = arith.addf %219, %223 : vector<8x4xf32>
    %246 = arith.addf %227, %231 : vector<8x4xf32>
    %247 = arith.addf %235, %239 : vector<8x4xf32>
    %248 = arith.addf %240, %241 : vector<8x4xf32>
    %249 = arith.addf %242, %243 : vector<8x4xf32>
    %250 = arith.addf %244, %245 : vector<8x4xf32>
    %251 = arith.addf %246, %247 : vector<8x4xf32>
    %252 = arith.addf %248, %249 : vector<8x4xf32>
    %253 = arith.addf %250, %251 : vector<8x4xf32>
    %254 = arith.addf %252, %253 : vector<8x4xf32>
    %c0_193 = arith.constant 0 : index
    %c0_194 = arith.constant 0 : index
    %255 = vector.load %arg9[%c0_193, %c0_194] : memref<8x1xf32, #tpu.memory_space<vmem>>, vector<8x1xf32>
    %256 = vector.broadcast %255 : vector<8x1xf32> to vector<8x4xf32>
    %257 = arith.addf %254, %256 : vector<8x4xf32>
    %cst_195 = arith.constant 0.000000e+00 : f32
    %258 = vector.broadcast %cst_195 : f32 to vector<8x4xf32>
    %259 = arith.maximumf %257, %258 : vector<8x4xf32>
    %c0_196 = arith.constant 0 : index
    %c0_197 = arith.constant 0 : index
    %260 = vector.load %arg13[%c0_196, %c0_197] : memref<4x256xf32, #tpu.memory_space<vmem>>, vector<4x256xf32>
    %cst_198 = arith.constant dense<0.000000e+00> : vector<8x256xf32>
    %261 = tpu.matmul %259, %260, %cst_198 {dimension_numbers = #tpu.dot_dimension_numbers<[1], [0], [0], [1], [0, 0, 1, 1], [], []>} : vector<8x4xf32>, vector<4x256xf32>, vector<8x256xf32> -> vector<8x256xf32>
    %c0_199 = arith.constant 0 : index
    %c0_200 = arith.constant 0 : index
    %c0_201 = arith.constant 0 : index
    %262 = vector.load %arg11[%c0_199, %c0_200, %c0_201] : memref<16x24x8xf32, #tpu.memory_space<vmem>>, vector<1x24x8xf32>
    %263 = vector.shape_cast %262 : vector<1x24x8xf32> to vector<24x8xf32>
    %264 = vector.extract_strided_slice %261 {offsets = [0, 0], sizes = [8, 16], strides = [1, 1]} : vector<8x256xf32> to vector<8x16xf32>
    %cst_202 = arith.constant dense<0.000000e+00> : vector<24x16xf32>
    %265 = tpu.matmul %263, %264, %cst_202 {dimension_numbers = #tpu.dot_dimension_numbers<[1], [0], [0], [1], [0, 0, 1, 1], [], []>} : vector<24x8xf32>, vector<8x16xf32>, vector<24x16xf32> -> vector<24x16xf32>
    %c1_203 = arith.constant 1 : index
    %c0_204 = arith.constant 0 : index
    %c0_205 = arith.constant 0 : index
    %266 = vector.load %arg11[%c1_203, %c0_204, %c0_205] : memref<16x24x8xf32, #tpu.memory_space<vmem>>, vector<1x24x8xf32>
    %267 = vector.shape_cast %266 : vector<1x24x8xf32> to vector<24x8xf32>
    %268 = vector.extract_strided_slice %261 {offsets = [0, 16], sizes = [8, 16], strides = [1, 1]} : vector<8x256xf32> to vector<8x16xf32>
    %cst_206 = arith.constant dense<0.000000e+00> : vector<24x16xf32>
    %269 = tpu.matmul %267, %268, %cst_206 {dimension_numbers = #tpu.dot_dimension_numbers<[1], [0], [0], [1], [0, 0, 1, 1], [], []>} : vector<24x8xf32>, vector<8x16xf32>, vector<24x16xf32> -> vector<24x16xf32>
    %c2_207 = arith.constant 2 : index
    %c0_208 = arith.constant 0 : index
    %c0_209 = arith.constant 0 : index
    %270 = vector.load %arg11[%c2_207, %c0_208, %c0_209] : memref<16x24x8xf32, #tpu.memory_space<vmem>>, vector<1x24x8xf32>
    %271 = vector.shape_cast %270 : vector<1x24x8xf32> to vector<24x8xf32>
    %272 = vector.extract_strided_slice %261 {offsets = [0, 32], sizes = [8, 16], strides = [1, 1]} : vector<8x256xf32> to vector<8x16xf32>
    %cst_210 = arith.constant dense<0.000000e+00> : vector<24x16xf32>
    %273 = tpu.matmul %271, %272, %cst_210 {dimension_numbers = #tpu.dot_dimension_numbers<[1], [0], [0], [1], [0, 0, 1, 1], [], []>} : vector<24x8xf32>, vector<8x16xf32>, vector<24x16xf32> -> vector<24x16xf32>
    %c3_211 = arith.constant 3 : index
    %c0_212 = arith.constant 0 : index
    %c0_213 = arith.constant 0 : index
    %274 = vector.load %arg11[%c3_211, %c0_212, %c0_213] : memref<16x24x8xf32, #tpu.memory_space<vmem>>, vector<1x24x8xf32>
    %275 = vector.shape_cast %274 : vector<1x24x8xf32> to vector<24x8xf32>
    %276 = vector.extract_strided_slice %261 {offsets = [0, 48], sizes = [8, 16], strides = [1, 1]} : vector<8x256xf32> to vector<8x16xf32>
    %cst_214 = arith.constant dense<0.000000e+00> : vector<24x16xf32>
    %277 = tpu.matmul %275, %276, %cst_214 {dimension_numbers = #tpu.dot_dimension_numbers<[1], [0], [0], [1], [0, 0, 1, 1], [], []>} : vector<24x8xf32>, vector<8x16xf32>, vector<24x16xf32> -> vector<24x16xf32>
    %c4_215 = arith.constant 4 : index
    %c0_216 = arith.constant 0 : index
    %c0_217 = arith.constant 0 : index
    %278 = vector.load %arg11[%c4_215, %c0_216, %c0_217] : memref<16x24x8xf32, #tpu.memory_space<vmem>>, vector<1x24x8xf32>
    %279 = vector.shape_cast %278 : vector<1x24x8xf32> to vector<24x8xf32>
    %280 = vector.extract_strided_slice %261 {offsets = [0, 64], sizes = [8, 16], strides = [1, 1]} : vector<8x256xf32> to vector<8x16xf32>
    %cst_218 = arith.constant dense<0.000000e+00> : vector<24x16xf32>
    %281 = tpu.matmul %279, %280, %cst_218 {dimension_numbers = #tpu.dot_dimension_numbers<[1], [0], [0], [1], [0, 0, 1, 1], [], []>} : vector<24x8xf32>, vector<8x16xf32>, vector<24x16xf32> -> vector<24x16xf32>
    %c5_219 = arith.constant 5 : index
    %c0_220 = arith.constant 0 : index
    %c0_221 = arith.constant 0 : index
    %282 = vector.load %arg11[%c5_219, %c0_220, %c0_221] : memref<16x24x8xf32, #tpu.memory_space<vmem>>, vector<1x24x8xf32>
    %283 = vector.shape_cast %282 : vector<1x24x8xf32> to vector<24x8xf32>
    %284 = vector.extract_strided_slice %261 {offsets = [0, 80], sizes = [8, 16], strides = [1, 1]} : vector<8x256xf32> to vector<8x16xf32>
    %cst_222 = arith.constant dense<0.000000e+00> : vector<24x16xf32>
    %285 = tpu.matmul %283, %284, %cst_222 {dimension_numbers = #tpu.dot_dimension_numbers<[1], [0], [0], [1], [0, 0, 1, 1], [], []>} : vector<24x8xf32>, vector<8x16xf32>, vector<24x16xf32> -> vector<24x16xf32>
    %c6_223 = arith.constant 6 : index
    %c0_224 = arith.constant 0 : index
    %c0_225 = arith.constant 0 : index
    %286 = vector.load %arg11[%c6_223, %c0_224, %c0_225] : memref<16x24x8xf32, #tpu.memory_space<vmem>>, vector<1x24x8xf32>
    %287 = vector.shape_cast %286 : vector<1x24x8xf32> to vector<24x8xf32>
    %288 = vector.extract_strided_slice %261 {offsets = [0, 96], sizes = [8, 16], strides = [1, 1]} : vector<8x256xf32> to vector<8x16xf32>
    %cst_226 = arith.constant dense<0.000000e+00> : vector<24x16xf32>
    %289 = tpu.matmul %287, %288, %cst_226 {dimension_numbers = #tpu.dot_dimension_numbers<[1], [0], [0], [1], [0, 0, 1, 1], [], []>} : vector<24x8xf32>, vector<8x16xf32>, vector<24x16xf32> -> vector<24x16xf32>
    %c7_227 = arith.constant 7 : index
    %c0_228 = arith.constant 0 : index
    %c0_229 = arith.constant 0 : index
    %290 = vector.load %arg11[%c7_227, %c0_228, %c0_229] : memref<16x24x8xf32, #tpu.memory_space<vmem>>, vector<1x24x8xf32>
    %291 = vector.shape_cast %290 : vector<1x24x8xf32> to vector<24x8xf32>
    %292 = vector.extract_strided_slice %261 {offsets = [0, 112], sizes = [8, 16], strides = [1, 1]} : vector<8x256xf32> to vector<8x16xf32>
    %cst_230 = arith.constant dense<0.000000e+00> : vector<24x16xf32>
    %293 = tpu.matmul %291, %292, %cst_230 {dimension_numbers = #tpu.dot_dimension_numbers<[1], [0], [0], [1], [0, 0, 1, 1], [], []>} : vector<24x8xf32>, vector<8x16xf32>, vector<24x16xf32> -> vector<24x16xf32>
    %c8_231 = arith.constant 8 : index
    %c0_232 = arith.constant 0 : index
    %c0_233 = arith.constant 0 : index
    %294 = vector.load %arg11[%c8_231, %c0_232, %c0_233] : memref<16x24x8xf32, #tpu.memory_space<vmem>>, vector<1x24x8xf32>
    %295 = vector.shape_cast %294 : vector<1x24x8xf32> to vector<24x8xf32>
    %296 = vector.extract_strided_slice %261 {offsets = [0, 128], sizes = [8, 16], strides = [1, 1]} : vector<8x256xf32> to vector<8x16xf32>
    %cst_234 = arith.constant dense<0.000000e+00> : vector<24x16xf32>
    %297 = tpu.matmul %295, %296, %cst_234 {dimension_numbers = #tpu.dot_dimension_numbers<[1], [0], [0], [1], [0, 0, 1, 1], [], []>} : vector<24x8xf32>, vector<8x16xf32>, vector<24x16xf32> -> vector<24x16xf32>
    %c9_235 = arith.constant 9 : index
    %c0_236 = arith.constant 0 : index
    %c0_237 = arith.constant 0 : index
    %298 = vector.load %arg11[%c9_235, %c0_236, %c0_237] : memref<16x24x8xf32, #tpu.memory_space<vmem>>, vector<1x24x8xf32>
    %299 = vector.shape_cast %298 : vector<1x24x8xf32> to vector<24x8xf32>
    %300 = vector.extract_strided_slice %261 {offsets = [0, 144], sizes = [8, 16], strides = [1, 1]} : vector<8x256xf32> to vector<8x16xf32>
    %cst_238 = arith.constant dense<0.000000e+00> : vector<24x16xf32>
    %301 = tpu.matmul %299, %300, %cst_238 {dimension_numbers = #tpu.dot_dimension_numbers<[1], [0], [0], [1], [0, 0, 1, 1], [], []>} : vector<24x8xf32>, vector<8x16xf32>, vector<24x16xf32> -> vector<24x16xf32>
    %c10_239 = arith.constant 10 : index
    %c0_240 = arith.constant 0 : index
    %c0_241 = arith.constant 0 : index
    %302 = vector.load %arg11[%c10_239, %c0_240, %c0_241] : memref<16x24x8xf32, #tpu.memory_space<vmem>>, vector<1x24x8xf32>
    %303 = vector.shape_cast %302 : vector<1x24x8xf32> to vector<24x8xf32>
    %304 = vector.extract_strided_slice %261 {offsets = [0, 160], sizes = [8, 16], strides = [1, 1]} : vector<8x256xf32> to vector<8x16xf32>
    %cst_242 = arith.constant dense<0.000000e+00> : vector<24x16xf32>
    %305 = tpu.matmul %303, %304, %cst_242 {dimension_numbers = #tpu.dot_dimension_numbers<[1], [0], [0], [1], [0, 0, 1, 1], [], []>} : vector<24x8xf32>, vector<8x16xf32>, vector<24x16xf32> -> vector<24x16xf32>
    %c11_243 = arith.constant 11 : index
    %c0_244 = arith.constant 0 : index
    %c0_245 = arith.constant 0 : index
    %306 = vector.load %arg11[%c11_243, %c0_244, %c0_245] : memref<16x24x8xf32, #tpu.memory_space<vmem>>, vector<1x24x8xf32>
    %307 = vector.shape_cast %306 : vector<1x24x8xf32> to vector<24x8xf32>
    %308 = vector.extract_strided_slice %261 {offsets = [0, 176], sizes = [8, 16], strides = [1, 1]} : vector<8x256xf32> to vector<8x16xf32>
    %cst_246 = arith.constant dense<0.000000e+00> : vector<24x16xf32>
    %309 = tpu.matmul %307, %308, %cst_246 {dimension_numbers = #tpu.dot_dimension_numbers<[1], [0], [0], [1], [0, 0, 1, 1], [], []>} : vector<24x8xf32>, vector<8x16xf32>, vector<24x16xf32> -> vector<24x16xf32>
    %c12_247 = arith.constant 12 : index
    %c0_248 = arith.constant 0 : index
    %c0_249 = arith.constant 0 : index
    %310 = vector.load %arg11[%c12_247, %c0_248, %c0_249] : memref<16x24x8xf32, #tpu.memory_space<vmem>>, vector<1x24x8xf32>
    %311 = vector.shape_cast %310 : vector<1x24x8xf32> to vector<24x8xf32>
    %312 = vector.extract_strided_slice %261 {offsets = [0, 192], sizes = [8, 16], strides = [1, 1]} : vector<8x256xf32> to vector<8x16xf32>
    %cst_250 = arith.constant dense<0.000000e+00> : vector<24x16xf32>
    %313 = tpu.matmul %311, %312, %cst_250 {dimension_numbers = #tpu.dot_dimension_numbers<[1], [0], [0], [1], [0, 0, 1, 1], [], []>} : vector<24x8xf32>, vector<8x16xf32>, vector<24x16xf32> -> vector<24x16xf32>
    %c13_251 = arith.constant 13 : index
    %c0_252 = arith.constant 0 : index
    %c0_253 = arith.constant 0 : index
    %314 = vector.load %arg11[%c13_251, %c0_252, %c0_253] : memref<16x24x8xf32, #tpu.memory_space<vmem>>, vector<1x24x8xf32>
    %315 = vector.shape_cast %314 : vector<1x24x8xf32> to vector<24x8xf32>
    %316 = vector.extract_strided_slice %261 {offsets = [0, 208], sizes = [8, 16], strides = [1, 1]} : vector<8x256xf32> to vector<8x16xf32>
    %cst_254 = arith.constant dense<0.000000e+00> : vector<24x16xf32>
    %317 = tpu.matmul %315, %316, %cst_254 {dimension_numbers = #tpu.dot_dimension_numbers<[1], [0], [0], [1], [0, 0, 1, 1], [], []>} : vector<24x8xf32>, vector<8x16xf32>, vector<24x16xf32> -> vector<24x16xf32>
    %c14_255 = arith.constant 14 : index
    %c0_256 = arith.constant 0 : index
    %c0_257 = arith.constant 0 : index
    %318 = vector.load %arg11[%c14_255, %c0_256, %c0_257] : memref<16x24x8xf32, #tpu.memory_space<vmem>>, vector<1x24x8xf32>
    %319 = vector.shape_cast %318 : vector<1x24x8xf32> to vector<24x8xf32>
    %320 = vector.extract_strided_slice %261 {offsets = [0, 224], sizes = [8, 16], strides = [1, 1]} : vector<8x256xf32> to vector<8x16xf32>
    %cst_258 = arith.constant dense<0.000000e+00> : vector<24x16xf32>
    %321 = tpu.matmul %319, %320, %cst_258 {dimension_numbers = #tpu.dot_dimension_numbers<[1], [0], [0], [1], [0, 0, 1, 1], [], []>} : vector<24x8xf32>, vector<8x16xf32>, vector<24x16xf32> -> vector<24x16xf32>
    %c15_259 = arith.constant 15 : index
    %c0_260 = arith.constant 0 : index
    %c0_261 = arith.constant 0 : index
    %322 = vector.load %arg11[%c15_259, %c0_260, %c0_261] : memref<16x24x8xf32, #tpu.memory_space<vmem>>, vector<1x24x8xf32>
    %323 = vector.shape_cast %322 : vector<1x24x8xf32> to vector<24x8xf32>
    %324 = vector.extract_strided_slice %261 {offsets = [0, 240], sizes = [8, 16], strides = [1, 1]} : vector<8x256xf32> to vector<8x16xf32>
    %cst_262 = arith.constant dense<0.000000e+00> : vector<24x16xf32>
    %325 = tpu.matmul %323, %324, %cst_262 {dimension_numbers = #tpu.dot_dimension_numbers<[1], [0], [0], [1], [0, 0, 1, 1], [], []>} : vector<24x8xf32>, vector<8x16xf32>, vector<24x16xf32> -> vector<24x16xf32>
    %326 = arith.addf %265, %269 : vector<24x16xf32>
    %327 = arith.addf %273, %277 : vector<24x16xf32>
    %328 = arith.addf %281, %285 : vector<24x16xf32>
    %329 = arith.addf %289, %293 : vector<24x16xf32>
    %330 = arith.addf %297, %301 : vector<24x16xf32>
    %331 = arith.addf %305, %309 : vector<24x16xf32>
    %332 = arith.addf %313, %317 : vector<24x16xf32>
    %333 = arith.addf %321, %325 : vector<24x16xf32>
    %334 = arith.addf %326, %327 : vector<24x16xf32>
    %335 = arith.addf %328, %329 : vector<24x16xf32>
    %336 = arith.addf %330, %331 : vector<24x16xf32>
    %337 = arith.addf %332, %333 : vector<24x16xf32>
    %338 = arith.addf %334, %335 : vector<24x16xf32>
    %339 = arith.addf %336, %337 : vector<24x16xf32>
    %340 = arith.addf %338, %339 : vector<24x16xf32>
    %c0_263 = arith.constant 0 : index
    %c0_264 = arith.constant 0 : index
    %341 = vector.load %arg12[%c0_263, %c0_264] : memref<24x1xf32, #tpu.memory_space<vmem>>, vector<24x1xf32>
    %342 = vector.broadcast %341 : vector<24x1xf32> to vector<24x16xf32>
    %343 = arith.addf %340, %342 : vector<24x16xf32>
    %cst_265 = arith.constant 0.000000e+00 : f32
    %344 = vector.broadcast %cst_265 : f32 to vector<24x16xf32>
    %345 = arith.maximumf %343, %344 : vector<24x16xf32>
    %c0_266 = arith.constant 0 : index
    %c0_267 = arith.constant 0 : index
    %346 = vector.load %arg16[%c0_266, %c0_267] : memref<16x1024xf32, #tpu.memory_space<vmem>>, vector<16x1024xf32>
    %cst_268 = arith.constant dense<0.000000e+00> : vector<24x1024xf32>
    %347 = tpu.matmul %345, %346, %cst_268 {dimension_numbers = #tpu.dot_dimension_numbers<[1], [0], [0], [1], [0, 0, 1, 1], [], []>} : vector<24x16xf32>, vector<16x1024xf32>, vector<24x1024xf32> -> vector<24x1024xf32>
    %c0_269 = arith.constant 0 : index
    %c0_270 = arith.constant 0 : index
    %c0_271 = arith.constant 0 : index
    %348 = vector.load %arg14[%c0_269, %c0_270, %c0_271] : memref<16x12x24xf32, #tpu.memory_space<vmem>>, vector<1x12x24xf32>
    %349 = vector.shape_cast %348 : vector<1x12x24xf32> to vector<12x24xf32>
    %350 = vector.extract_strided_slice %347 {offsets = [0, 0], sizes = [24, 64], strides = [1, 1]} : vector<24x1024xf32> to vector<24x64xf32>
    %cst_272 = arith.constant dense<0.000000e+00> : vector<12x64xf32>
    %351 = tpu.matmul %349, %350, %cst_272 {dimension_numbers = #tpu.dot_dimension_numbers<[1], [0], [0], [1], [0, 0, 1, 1], [], []>} : vector<12x24xf32>, vector<24x64xf32>, vector<12x64xf32> -> vector<12x64xf32>
    %c1_273 = arith.constant 1 : index
    %c0_274 = arith.constant 0 : index
    %c0_275 = arith.constant 0 : index
    %352 = vector.load %arg14[%c1_273, %c0_274, %c0_275] : memref<16x12x24xf32, #tpu.memory_space<vmem>>, vector<1x12x24xf32>
    %353 = vector.shape_cast %352 : vector<1x12x24xf32> to vector<12x24xf32>
    %354 = vector.extract_strided_slice %347 {offsets = [0, 64], sizes = [24, 64], strides = [1, 1]} : vector<24x1024xf32> to vector<24x64xf32>
    %cst_276 = arith.constant dense<0.000000e+00> : vector<12x64xf32>
    %355 = tpu.matmul %353, %354, %cst_276 {dimension_numbers = #tpu.dot_dimension_numbers<[1], [0], [0], [1], [0, 0, 1, 1], [], []>} : vector<12x24xf32>, vector<24x64xf32>, vector<12x64xf32> -> vector<12x64xf32>
    %c2_277 = arith.constant 2 : index
    %c0_278 = arith.constant 0 : index
    %c0_279 = arith.constant 0 : index
    %356 = vector.load %arg14[%c2_277, %c0_278, %c0_279] : memref<16x12x24xf32, #tpu.memory_space<vmem>>, vector<1x12x24xf32>
    %357 = vector.shape_cast %356 : vector<1x12x24xf32> to vector<12x24xf32>
    %358 = vector.extract_strided_slice %347 {offsets = [0, 128], sizes = [24, 64], strides = [1, 1]} : vector<24x1024xf32> to vector<24x64xf32>
    %cst_280 = arith.constant dense<0.000000e+00> : vector<12x64xf32>
    %359 = tpu.matmul %357, %358, %cst_280 {dimension_numbers = #tpu.dot_dimension_numbers<[1], [0], [0], [1], [0, 0, 1, 1], [], []>} : vector<12x24xf32>, vector<24x64xf32>, vector<12x64xf32> -> vector<12x64xf32>
    %c3_281 = arith.constant 3 : index
    %c0_282 = arith.constant 0 : index
    %c0_283 = arith.constant 0 : index
    %360 = vector.load %arg14[%c3_281, %c0_282, %c0_283] : memref<16x12x24xf32, #tpu.memory_space<vmem>>, vector<1x12x24xf32>
    %361 = vector.shape_cast %360 : vector<1x12x24xf32> to vector<12x24xf32>
    %362 = vector.extract_strided_slice %347 {offsets = [0, 192], sizes = [24, 64], strides = [1, 1]} : vector<24x1024xf32> to vector<24x64xf32>
    %cst_284 = arith.constant dense<0.000000e+00> : vector<12x64xf32>
    %363 = tpu.matmul %361, %362, %cst_284 {dimension_numbers = #tpu.dot_dimension_numbers<[1], [0], [0], [1], [0, 0, 1, 1], [], []>} : vector<12x24xf32>, vector<24x64xf32>, vector<12x64xf32> -> vector<12x64xf32>
    %c4_285 = arith.constant 4 : index
    %c0_286 = arith.constant 0 : index
    %c0_287 = arith.constant 0 : index
    %364 = vector.load %arg14[%c4_285, %c0_286, %c0_287] : memref<16x12x24xf32, #tpu.memory_space<vmem>>, vector<1x12x24xf32>
    %365 = vector.shape_cast %364 : vector<1x12x24xf32> to vector<12x24xf32>
    %366 = vector.extract_strided_slice %347 {offsets = [0, 256], sizes = [24, 64], strides = [1, 1]} : vector<24x1024xf32> to vector<24x64xf32>
    %cst_288 = arith.constant dense<0.000000e+00> : vector<12x64xf32>
    %367 = tpu.matmul %365, %366, %cst_288 {dimension_numbers = #tpu.dot_dimension_numbers<[1], [0], [0], [1], [0, 0, 1, 1], [], []>} : vector<12x24xf32>, vector<24x64xf32>, vector<12x64xf32> -> vector<12x64xf32>
    %c5_289 = arith.constant 5 : index
    %c0_290 = arith.constant 0 : index
    %c0_291 = arith.constant 0 : index
    %368 = vector.load %arg14[%c5_289, %c0_290, %c0_291] : memref<16x12x24xf32, #tpu.memory_space<vmem>>, vector<1x12x24xf32>
    %369 = vector.shape_cast %368 : vector<1x12x24xf32> to vector<12x24xf32>
    %370 = vector.extract_strided_slice %347 {offsets = [0, 320], sizes = [24, 64], strides = [1, 1]} : vector<24x1024xf32> to vector<24x64xf32>
    %cst_292 = arith.constant dense<0.000000e+00> : vector<12x64xf32>
    %371 = tpu.matmul %369, %370, %cst_292 {dimension_numbers = #tpu.dot_dimension_numbers<[1], [0], [0], [1], [0, 0, 1, 1], [], []>} : vector<12x24xf32>, vector<24x64xf32>, vector<12x64xf32> -> vector<12x64xf32>
    %c6_293 = arith.constant 6 : index
    %c0_294 = arith.constant 0 : index
    %c0_295 = arith.constant 0 : index
    %372 = vector.load %arg14[%c6_293, %c0_294, %c0_295] : memref<16x12x24xf32, #tpu.memory_space<vmem>>, vector<1x12x24xf32>
    %373 = vector.shape_cast %372 : vector<1x12x24xf32> to vector<12x24xf32>
    %374 = vector.extract_strided_slice %347 {offsets = [0, 384], sizes = [24, 64], strides = [1, 1]} : vector<24x1024xf32> to vector<24x64xf32>
    %cst_296 = arith.constant dense<0.000000e+00> : vector<12x64xf32>
    %375 = tpu.matmul %373, %374, %cst_296 {dimension_numbers = #tpu.dot_dimension_numbers<[1], [0], [0], [1], [0, 0, 1, 1], [], []>} : vector<12x24xf32>, vector<24x64xf32>, vector<12x64xf32> -> vector<12x64xf32>
    %c7_297 = arith.constant 7 : index
    %c0_298 = arith.constant 0 : index
    %c0_299 = arith.constant 0 : index
    %376 = vector.load %arg14[%c7_297, %c0_298, %c0_299] : memref<16x12x24xf32, #tpu.memory_space<vmem>>, vector<1x12x24xf32>
    %377 = vector.shape_cast %376 : vector<1x12x24xf32> to vector<12x24xf32>
    %378 = vector.extract_strided_slice %347 {offsets = [0, 448], sizes = [24, 64], strides = [1, 1]} : vector<24x1024xf32> to vector<24x64xf32>
    %cst_300 = arith.constant dense<0.000000e+00> : vector<12x64xf32>
    %379 = tpu.matmul %377, %378, %cst_300 {dimension_numbers = #tpu.dot_dimension_numbers<[1], [0], [0], [1], [0, 0, 1, 1], [], []>} : vector<12x24xf32>, vector<24x64xf32>, vector<12x64xf32> -> vector<12x64xf32>
    %c8_301 = arith.constant 8 : index
    %c0_302 = arith.constant 0 : index
    %c0_303 = arith.constant 0 : index
    %380 = vector.load %arg14[%c8_301, %c0_302, %c0_303] : memref<16x12x24xf32, #tpu.memory_space<vmem>>, vector<1x12x24xf32>
    %381 = vector.shape_cast %380 : vector<1x12x24xf32> to vector<12x24xf32>
    %382 = vector.extract_strided_slice %347 {offsets = [0, 512], sizes = [24, 64], strides = [1, 1]} : vector<24x1024xf32> to vector<24x64xf32>
    %cst_304 = arith.constant dense<0.000000e+00> : vector<12x64xf32>
    %383 = tpu.matmul %381, %382, %cst_304 {dimension_numbers = #tpu.dot_dimension_numbers<[1], [0], [0], [1], [0, 0, 1, 1], [], []>} : vector<12x24xf32>, vector<24x64xf32>, vector<12x64xf32> -> vector<12x64xf32>
    %c9_305 = arith.constant 9 : index
    %c0_306 = arith.constant 0 : index
    %c0_307 = arith.constant 0 : index
    %384 = vector.load %arg14[%c9_305, %c0_306, %c0_307] : memref<16x12x24xf32, #tpu.memory_space<vmem>>, vector<1x12x24xf32>
    %385 = vector.shape_cast %384 : vector<1x12x24xf32> to vector<12x24xf32>
    %386 = vector.extract_strided_slice %347 {offsets = [0, 576], sizes = [24, 64], strides = [1, 1]} : vector<24x1024xf32> to vector<24x64xf32>
    %cst_308 = arith.constant dense<0.000000e+00> : vector<12x64xf32>
    %387 = tpu.matmul %385, %386, %cst_308 {dimension_numbers = #tpu.dot_dimension_numbers<[1], [0], [0], [1], [0, 0, 1, 1], [], []>} : vector<12x24xf32>, vector<24x64xf32>, vector<12x64xf32> -> vector<12x64xf32>
    %c10_309 = arith.constant 10 : index
    %c0_310 = arith.constant 0 : index
    %c0_311 = arith.constant 0 : index
    %388 = vector.load %arg14[%c10_309, %c0_310, %c0_311] : memref<16x12x24xf32, #tpu.memory_space<vmem>>, vector<1x12x24xf32>
    %389 = vector.shape_cast %388 : vector<1x12x24xf32> to vector<12x24xf32>
    %390 = vector.extract_strided_slice %347 {offsets = [0, 640], sizes = [24, 64], strides = [1, 1]} : vector<24x1024xf32> to vector<24x64xf32>
    %cst_312 = arith.constant dense<0.000000e+00> : vector<12x64xf32>
    %391 = tpu.matmul %389, %390, %cst_312 {dimension_numbers = #tpu.dot_dimension_numbers<[1], [0], [0], [1], [0, 0, 1, 1], [], []>} : vector<12x24xf32>, vector<24x64xf32>, vector<12x64xf32> -> vector<12x64xf32>
    %c11_313 = arith.constant 11 : index
    %c0_314 = arith.constant 0 : index
    %c0_315 = arith.constant 0 : index
    %392 = vector.load %arg14[%c11_313, %c0_314, %c0_315] : memref<16x12x24xf32, #tpu.memory_space<vmem>>, vector<1x12x24xf32>
    %393 = vector.shape_cast %392 : vector<1x12x24xf32> to vector<12x24xf32>
    %394 = vector.extract_strided_slice %347 {offsets = [0, 704], sizes = [24, 64], strides = [1, 1]} : vector<24x1024xf32> to vector<24x64xf32>
    %cst_316 = arith.constant dense<0.000000e+00> : vector<12x64xf32>
    %395 = tpu.matmul %393, %394, %cst_316 {dimension_numbers = #tpu.dot_dimension_numbers<[1], [0], [0], [1], [0, 0, 1, 1], [], []>} : vector<12x24xf32>, vector<24x64xf32>, vector<12x64xf32> -> vector<12x64xf32>
    %c12_317 = arith.constant 12 : index
    %c0_318 = arith.constant 0 : index
    %c0_319 = arith.constant 0 : index
    %396 = vector.load %arg14[%c12_317, %c0_318, %c0_319] : memref<16x12x24xf32, #tpu.memory_space<vmem>>, vector<1x12x24xf32>
    %397 = vector.shape_cast %396 : vector<1x12x24xf32> to vector<12x24xf32>
    %398 = vector.extract_strided_slice %347 {offsets = [0, 768], sizes = [24, 64], strides = [1, 1]} : vector<24x1024xf32> to vector<24x64xf32>
    %cst_320 = arith.constant dense<0.000000e+00> : vector<12x64xf32>
    %399 = tpu.matmul %397, %398, %cst_320 {dimension_numbers = #tpu.dot_dimension_numbers<[1], [0], [0], [1], [0, 0, 1, 1], [], []>} : vector<12x24xf32>, vector<24x64xf32>, vector<12x64xf32> -> vector<12x64xf32>
    %c13_321 = arith.constant 13 : index
    %c0_322 = arith.constant 0 : index
    %c0_323 = arith.constant 0 : index
    %400 = vector.load %arg14[%c13_321, %c0_322, %c0_323] : memref<16x12x24xf32, #tpu.memory_space<vmem>>, vector<1x12x24xf32>
    %401 = vector.shape_cast %400 : vector<1x12x24xf32> to vector<12x24xf32>
    %402 = vector.extract_strided_slice %347 {offsets = [0, 832], sizes = [24, 64], strides = [1, 1]} : vector<24x1024xf32> to vector<24x64xf32>
    %cst_324 = arith.constant dense<0.000000e+00> : vector<12x64xf32>
    %403 = tpu.matmul %401, %402, %cst_324 {dimension_numbers = #tpu.dot_dimension_numbers<[1], [0], [0], [1], [0, 0, 1, 1], [], []>} : vector<12x24xf32>, vector<24x64xf32>, vector<12x64xf32> -> vector<12x64xf32>
    %c14_325 = arith.constant 14 : index
    %c0_326 = arith.constant 0 : index
    %c0_327 = arith.constant 0 : index
    %404 = vector.load %arg14[%c14_325, %c0_326, %c0_327] : memref<16x12x24xf32, #tpu.memory_space<vmem>>, vector<1x12x24xf32>
    %405 = vector.shape_cast %404 : vector<1x12x24xf32> to vector<12x24xf32>
    %406 = vector.extract_strided_slice %347 {offsets = [0, 896], sizes = [24, 64], strides = [1, 1]} : vector<24x1024xf32> to vector<24x64xf32>
    %cst_328 = arith.constant dense<0.000000e+00> : vector<12x64xf32>
    %407 = tpu.matmul %405, %406, %cst_328 {dimension_numbers = #tpu.dot_dimension_numbers<[1], [0], [0], [1], [0, 0, 1, 1], [], []>} : vector<12x24xf32>, vector<24x64xf32>, vector<12x64xf32> -> vector<12x64xf32>
    %c15_329 = arith.constant 15 : index
    %c0_330 = arith.constant 0 : index
    %c0_331 = arith.constant 0 : index
    %408 = vector.load %arg14[%c15_329, %c0_330, %c0_331] : memref<16x12x24xf32, #tpu.memory_space<vmem>>, vector<1x12x24xf32>
    %409 = vector.shape_cast %408 : vector<1x12x24xf32> to vector<12x24xf32>
    %410 = vector.extract_strided_slice %347 {offsets = [0, 960], sizes = [24, 64], strides = [1, 1]} : vector<24x1024xf32> to vector<24x64xf32>
    %cst_332 = arith.constant dense<0.000000e+00> : vector<12x64xf32>
    %411 = tpu.matmul %409, %410, %cst_332 {dimension_numbers = #tpu.dot_dimension_numbers<[1], [0], [0], [1], [0, 0, 1, 1], [], []>} : vector<12x24xf32>, vector<24x64xf32>, vector<12x64xf32> -> vector<12x64xf32>
    %412 = arith.addf %351, %355 : vector<12x64xf32>
    %413 = arith.addf %359, %363 : vector<12x64xf32>
    %414 = arith.addf %367, %371 : vector<12x64xf32>
    %415 = arith.addf %375, %379 : vector<12x64xf32>
    %416 = arith.addf %383, %387 : vector<12x64xf32>
    %417 = arith.addf %391, %395 : vector<12x64xf32>
    %418 = arith.addf %399, %403 : vector<12x64xf32>
    %419 = arith.addf %407, %411 : vector<12x64xf32>
    %420 = arith.addf %412, %413 : vector<12x64xf32>
    %421 = arith.addf %414, %415 : vector<12x64xf32>
    %422 = arith.addf %416, %417 : vector<12x64xf32>
    %423 = arith.addf %418, %419 : vector<12x64xf32>
    %424 = arith.addf %420, %421 : vector<12x64xf32>
    %425 = arith.addf %422, %423 : vector<12x64xf32>
    %426 = arith.addf %424, %425 : vector<12x64xf32>
    %c0_333 = arith.constant 0 : index
    %c0_334 = arith.constant 0 : index
    %427 = vector.load %arg15[%c0_333, %c0_334] : memref<12x1xf32, #tpu.memory_space<vmem>>, vector<12x1xf32>
    %428 = vector.broadcast %427 : vector<12x1xf32> to vector<12x64xf32>
    %429 = arith.addf %426, %428 : vector<12x64xf32>
    %cst_335 = arith.constant 0.000000e+00 : f32
    %430 = vector.broadcast %cst_335 : f32 to vector<12x64xf32>
    %431 = arith.maximumf %429, %430 : vector<12x64xf32>
    %c0_336 = arith.constant 0 : index
    %c0_337 = arith.constant 0 : index
    %432 = vector.load %arg19[%c0_336, %c0_337] : memref<64x4096xf32, #tpu.memory_space<vmem>>, vector<64x4096xf32>
    %cst_338 = arith.constant dense<0.000000e+00> : vector<12x4096xf32>
    %433 = tpu.matmul %431, %432, %cst_338 {dimension_numbers = #tpu.dot_dimension_numbers<[1], [0], [0], [1], [0, 0, 1, 1], [], []>} : vector<12x64xf32>, vector<64x4096xf32>, vector<12x4096xf32> -> vector<12x4096xf32>
    %c0_339 = arith.constant 0 : index
    %c0_340 = arith.constant 0 : index
    %c0_341 = arith.constant 0 : index
    %434 = vector.load %arg17[%c0_339, %c0_340, %c0_341] : memref<16x3x12xf32, #tpu.memory_space<vmem>>, vector<1x3x12xf32>
    %435 = vector.shape_cast %434 : vector<1x3x12xf32> to vector<3x12xf32>
    %436 = vector.extract_strided_slice %433 {offsets = [0, 0], sizes = [12, 256], strides = [1, 1]} : vector<12x4096xf32> to vector<12x256xf32>
    %cst_342 = arith.constant dense<0.000000e+00> : vector<3x256xf32>
    %437 = tpu.matmul %435, %436, %cst_342 {dimension_numbers = #tpu.dot_dimension_numbers<[1], [0], [0], [1], [0, 0, 1, 1], [], []>} : vector<3x12xf32>, vector<12x256xf32>, vector<3x256xf32> -> vector<3x256xf32>
    %c1_343 = arith.constant 1 : index
    %c0_344 = arith.constant 0 : index
    %c0_345 = arith.constant 0 : index
    %438 = vector.load %arg17[%c1_343, %c0_344, %c0_345] : memref<16x3x12xf32, #tpu.memory_space<vmem>>, vector<1x3x12xf32>
    %439 = vector.shape_cast %438 : vector<1x3x12xf32> to vector<3x12xf32>
    %440 = vector.extract_strided_slice %433 {offsets = [0, 256], sizes = [12, 256], strides = [1, 1]} : vector<12x4096xf32> to vector<12x256xf32>
    %cst_346 = arith.constant dense<0.000000e+00> : vector<3x256xf32>
    %441 = tpu.matmul %439, %440, %cst_346 {dimension_numbers = #tpu.dot_dimension_numbers<[1], [0], [0], [1], [0, 0, 1, 1], [], []>} : vector<3x12xf32>, vector<12x256xf32>, vector<3x256xf32> -> vector<3x256xf32>
    %c2_347 = arith.constant 2 : index
    %c0_348 = arith.constant 0 : index
    %c0_349 = arith.constant 0 : index
    %442 = vector.load %arg17[%c2_347, %c0_348, %c0_349] : memref<16x3x12xf32, #tpu.memory_space<vmem>>, vector<1x3x12xf32>
    %443 = vector.shape_cast %442 : vector<1x3x12xf32> to vector<3x12xf32>
    %444 = vector.extract_strided_slice %433 {offsets = [0, 512], sizes = [12, 256], strides = [1, 1]} : vector<12x4096xf32> to vector<12x256xf32>
    %cst_350 = arith.constant dense<0.000000e+00> : vector<3x256xf32>
    %445 = tpu.matmul %443, %444, %cst_350 {dimension_numbers = #tpu.dot_dimension_numbers<[1], [0], [0], [1], [0, 0, 1, 1], [], []>} : vector<3x12xf32>, vector<12x256xf32>, vector<3x256xf32> -> vector<3x256xf32>
    %c3_351 = arith.constant 3 : index
    %c0_352 = arith.constant 0 : index
    %c0_353 = arith.constant 0 : index
    %446 = vector.load %arg17[%c3_351, %c0_352, %c0_353] : memref<16x3x12xf32, #tpu.memory_space<vmem>>, vector<1x3x12xf32>
    %447 = vector.shape_cast %446 : vector<1x3x12xf32> to vector<3x12xf32>
    %448 = vector.extract_strided_slice %433 {offsets = [0, 768], sizes = [12, 256], strides = [1, 1]} : vector<12x4096xf32> to vector<12x256xf32>
    %cst_354 = arith.constant dense<0.000000e+00> : vector<3x256xf32>
    %449 = tpu.matmul %447, %448, %cst_354 {dimension_numbers = #tpu.dot_dimension_numbers<[1], [0], [0], [1], [0, 0, 1, 1], [], []>} : vector<3x12xf32>, vector<12x256xf32>, vector<3x256xf32> -> vector<3x256xf32>
    %c4_355 = arith.constant 4 : index
    %c0_356 = arith.constant 0 : index
    %c0_357 = arith.constant 0 : index
    %450 = vector.load %arg17[%c4_355, %c0_356, %c0_357] : memref<16x3x12xf32, #tpu.memory_space<vmem>>, vector<1x3x12xf32>
    %451 = vector.shape_cast %450 : vector<1x3x12xf32> to vector<3x12xf32>
    %452 = vector.extract_strided_slice %433 {offsets = [0, 1024], sizes = [12, 256], strides = [1, 1]} : vector<12x4096xf32> to vector<12x256xf32>
    %cst_358 = arith.constant dense<0.000000e+00> : vector<3x256xf32>
    %453 = tpu.matmul %451, %452, %cst_358 {dimension_numbers = #tpu.dot_dimension_numbers<[1], [0], [0], [1], [0, 0, 1, 1], [], []>} : vector<3x12xf32>, vector<12x256xf32>, vector<3x256xf32> -> vector<3x256xf32>
    %c5_359 = arith.constant 5 : index
    %c0_360 = arith.constant 0 : index
    %c0_361 = arith.constant 0 : index
    %454 = vector.load %arg17[%c5_359, %c0_360, %c0_361] : memref<16x3x12xf32, #tpu.memory_space<vmem>>, vector<1x3x12xf32>
    %455 = vector.shape_cast %454 : vector<1x3x12xf32> to vector<3x12xf32>
    %456 = vector.extract_strided_slice %433 {offsets = [0, 1280], sizes = [12, 256], strides = [1, 1]} : vector<12x4096xf32> to vector<12x256xf32>
    %cst_362 = arith.constant dense<0.000000e+00> : vector<3x256xf32>
    %457 = tpu.matmul %455, %456, %cst_362 {dimension_numbers = #tpu.dot_dimension_numbers<[1], [0], [0], [1], [0, 0, 1, 1], [], []>} : vector<3x12xf32>, vector<12x256xf32>, vector<3x256xf32> -> vector<3x256xf32>
    %c6_363 = arith.constant 6 : index
    %c0_364 = arith.constant 0 : index
    %c0_365 = arith.constant 0 : index
    %458 = vector.load %arg17[%c6_363, %c0_364, %c0_365] : memref<16x3x12xf32, #tpu.memory_space<vmem>>, vector<1x3x12xf32>
    %459 = vector.shape_cast %458 : vector<1x3x12xf32> to vector<3x12xf32>
    %460 = vector.extract_strided_slice %433 {offsets = [0, 1536], sizes = [12, 256], strides = [1, 1]} : vector<12x4096xf32> to vector<12x256xf32>
    %cst_366 = arith.constant dense<0.000000e+00> : vector<3x256xf32>
    %461 = tpu.matmul %459, %460, %cst_366 {dimension_numbers = #tpu.dot_dimension_numbers<[1], [0], [0], [1], [0, 0, 1, 1], [], []>} : vector<3x12xf32>, vector<12x256xf32>, vector<3x256xf32> -> vector<3x256xf32>
    %c7_367 = arith.constant 7 : index
    %c0_368 = arith.constant 0 : index
    %c0_369 = arith.constant 0 : index
    %462 = vector.load %arg17[%c7_367, %c0_368, %c0_369] : memref<16x3x12xf32, #tpu.memory_space<vmem>>, vector<1x3x12xf32>
    %463 = vector.shape_cast %462 : vector<1x3x12xf32> to vector<3x12xf32>
    %464 = vector.extract_strided_slice %433 {offsets = [0, 1792], sizes = [12, 256], strides = [1, 1]} : vector<12x4096xf32> to vector<12x256xf32>
    %cst_370 = arith.constant dense<0.000000e+00> : vector<3x256xf32>
    %465 = tpu.matmul %463, %464, %cst_370 {dimension_numbers = #tpu.dot_dimension_numbers<[1], [0], [0], [1], [0, 0, 1, 1], [], []>} : vector<3x12xf32>, vector<12x256xf32>, vector<3x256xf32> -> vector<3x256xf32>
    %c8_371 = arith.constant 8 : index
    %c0_372 = arith.constant 0 : index
    %c0_373 = arith.constant 0 : index
    %466 = vector.load %arg17[%c8_371, %c0_372, %c0_373] : memref<16x3x12xf32, #tpu.memory_space<vmem>>, vector<1x3x12xf32>
    %467 = vector.shape_cast %466 : vector<1x3x12xf32> to vector<3x12xf32>
    %468 = vector.extract_strided_slice %433 {offsets = [0, 2048], sizes = [12, 256], strides = [1, 1]} : vector<12x4096xf32> to vector<12x256xf32>
    %cst_374 = arith.constant dense<0.000000e+00> : vector<3x256xf32>
    %469 = tpu.matmul %467, %468, %cst_374 {dimension_numbers = #tpu.dot_dimension_numbers<[1], [0], [0], [1], [0, 0, 1, 1], [], []>} : vector<3x12xf32>, vector<12x256xf32>, vector<3x256xf32> -> vector<3x256xf32>
    %c9_375 = arith.constant 9 : index
    %c0_376 = arith.constant 0 : index
    %c0_377 = arith.constant 0 : index
    %470 = vector.load %arg17[%c9_375, %c0_376, %c0_377] : memref<16x3x12xf32, #tpu.memory_space<vmem>>, vector<1x3x12xf32>
    %471 = vector.shape_cast %470 : vector<1x3x12xf32> to vector<3x12xf32>
    %472 = vector.extract_strided_slice %433 {offsets = [0, 2304], sizes = [12, 256], strides = [1, 1]} : vector<12x4096xf32> to vector<12x256xf32>
    %cst_378 = arith.constant dense<0.000000e+00> : vector<3x256xf32>
    %473 = tpu.matmul %471, %472, %cst_378 {dimension_numbers = #tpu.dot_dimension_numbers<[1], [0], [0], [1], [0, 0, 1, 1], [], []>} : vector<3x12xf32>, vector<12x256xf32>, vector<3x256xf32> -> vector<3x256xf32>
    %c10_379 = arith.constant 10 : index
    %c0_380 = arith.constant 0 : index
    %c0_381 = arith.constant 0 : index
    %474 = vector.load %arg17[%c10_379, %c0_380, %c0_381] : memref<16x3x12xf32, #tpu.memory_space<vmem>>, vector<1x3x12xf32>
    %475 = vector.shape_cast %474 : vector<1x3x12xf32> to vector<3x12xf32>
    %476 = vector.extract_strided_slice %433 {offsets = [0, 2560], sizes = [12, 256], strides = [1, 1]} : vector<12x4096xf32> to vector<12x256xf32>
    %cst_382 = arith.constant dense<0.000000e+00> : vector<3x256xf32>
    %477 = tpu.matmul %475, %476, %cst_382 {dimension_numbers = #tpu.dot_dimension_numbers<[1], [0], [0], [1], [0, 0, 1, 1], [], []>} : vector<3x12xf32>, vector<12x256xf32>, vector<3x256xf32> -> vector<3x256xf32>
    %c11_383 = arith.constant 11 : index
    %c0_384 = arith.constant 0 : index
    %c0_385 = arith.constant 0 : index
    %478 = vector.load %arg17[%c11_383, %c0_384, %c0_385] : memref<16x3x12xf32, #tpu.memory_space<vmem>>, vector<1x3x12xf32>
    %479 = vector.shape_cast %478 : vector<1x3x12xf32> to vector<3x12xf32>
    %480 = vector.extract_strided_slice %433 {offsets = [0, 2816], sizes = [12, 256], strides = [1, 1]} : vector<12x4096xf32> to vector<12x256xf32>
    %cst_386 = arith.constant dense<0.000000e+00> : vector<3x256xf32>
    %481 = tpu.matmul %479, %480, %cst_386 {dimension_numbers = #tpu.dot_dimension_numbers<[1], [0], [0], [1], [0, 0, 1, 1], [], []>} : vector<3x12xf32>, vector<12x256xf32>, vector<3x256xf32> -> vector<3x256xf32>
    %c12_387 = arith.constant 12 : index
    %c0_388 = arith.constant 0 : index
    %c0_389 = arith.constant 0 : index
    %482 = vector.load %arg17[%c12_387, %c0_388, %c0_389] : memref<16x3x12xf32, #tpu.memory_space<vmem>>, vector<1x3x12xf32>
    %483 = vector.shape_cast %482 : vector<1x3x12xf32> to vector<3x12xf32>
    %484 = vector.extract_strided_slice %433 {offsets = [0, 3072], sizes = [12, 256], strides = [1, 1]} : vector<12x4096xf32> to vector<12x256xf32>
    %cst_390 = arith.constant dense<0.000000e+00> : vector<3x256xf32>
    %485 = tpu.matmul %483, %484, %cst_390 {dimension_numbers = #tpu.dot_dimension_numbers<[1], [0], [0], [1], [0, 0, 1, 1], [], []>} : vector<3x12xf32>, vector<12x256xf32>, vector<3x256xf32> -> vector<3x256xf32>
    %c13_391 = arith.constant 13 : index
    %c0_392 = arith.constant 0 : index
    %c0_393 = arith.constant 0 : index
    %486 = vector.load %arg17[%c13_391, %c0_392, %c0_393] : memref<16x3x12xf32, #tpu.memory_space<vmem>>, vector<1x3x12xf32>
    %487 = vector.shape_cast %486 : vector<1x3x12xf32> to vector<3x12xf32>
    %488 = vector.extract_strided_slice %433 {offsets = [0, 3328], sizes = [12, 256], strides = [1, 1]} : vector<12x4096xf32> to vector<12x256xf32>
    %cst_394 = arith.constant dense<0.000000e+00> : vector<3x256xf32>
    %489 = tpu.matmul %487, %488, %cst_394 {dimension_numbers = #tpu.dot_dimension_numbers<[1], [0], [0], [1], [0, 0, 1, 1], [], []>} : vector<3x12xf32>, vector<12x256xf32>, vector<3x256xf32> -> vector<3x256xf32>
    %c14_395 = arith.constant 14 : index
    %c0_396 = arith.constant 0 : index
    %c0_397 = arith.constant 0 : index
    %490 = vector.load %arg17[%c14_395, %c0_396, %c0_397] : memref<16x3x12xf32, #tpu.memory_space<vmem>>, vector<1x3x12xf32>
    %491 = vector.shape_cast %490 : vector<1x3x12xf32> to vector<3x12xf32>
    %492 = vector.extract_strided_slice %433 {offsets = [0, 3584], sizes = [12, 256], strides = [1, 1]} : vector<12x4096xf32> to vector<12x256xf32>
    %cst_398 = arith.constant dense<0.000000e+00> : vector<3x256xf32>
    %493 = tpu.matmul %491, %492, %cst_398 {dimension_numbers = #tpu.dot_dimension_numbers<[1], [0], [0], [1], [0, 0, 1, 1], [], []>} : vector<3x12xf32>, vector<12x256xf32>, vector<3x256xf32> -> vector<3x256xf32>
    %c15_399 = arith.constant 15 : index
    %c0_400 = arith.constant 0 : index
    %c0_401 = arith.constant 0 : index
    %494 = vector.load %arg17[%c15_399, %c0_400, %c0_401] : memref<16x3x12xf32, #tpu.memory_space<vmem>>, vector<1x3x12xf32>
    %495 = vector.shape_cast %494 : vector<1x3x12xf32> to vector<3x12xf32>
    %496 = vector.extract_strided_slice %433 {offsets = [0, 3840], sizes = [12, 256], strides = [1, 1]} : vector<12x4096xf32> to vector<12x256xf32>
    %cst_402 = arith.constant dense<0.000000e+00> : vector<3x256xf32>
    %497 = tpu.matmul %495, %496, %cst_402 {dimension_numbers = #tpu.dot_dimension_numbers<[1], [0], [0], [1], [0, 0, 1, 1], [], []>} : vector<3x12xf32>, vector<12x256xf32>, vector<3x256xf32> -> vector<3x256xf32>
    %498 = arith.addf %437, %441 : vector<3x256xf32>
    %499 = arith.addf %445, %449 : vector<3x256xf32>
    %500 = arith.addf %453, %457 : vector<3x256xf32>
    %501 = arith.addf %461, %465 : vector<3x256xf32>
    %502 = arith.addf %469, %473 : vector<3x256xf32>
    %503 = arith.addf %477, %481 : vector<3x256xf32>
    %504 = arith.addf %485, %489 : vector<3x256xf32>
    %505 = arith.addf %493, %497 : vector<3x256xf32>
    %506 = arith.addf %498, %499 : vector<3x256xf32>
    %507 = arith.addf %500, %501 : vector<3x256xf32>
    %508 = arith.addf %502, %503 : vector<3x256xf32>
    %509 = arith.addf %504, %505 : vector<3x256xf32>
    %510 = arith.addf %506, %507 : vector<3x256xf32>
    %511 = arith.addf %508, %509 : vector<3x256xf32>
    %512 = arith.addf %510, %511 : vector<3x256xf32>
    %c0_403 = arith.constant 0 : index
    %c0_404 = arith.constant 0 : index
    %513 = vector.load %arg18[%c0_403, %c0_404] : memref<3x1xf32, #tpu.memory_space<vmem>>, vector<3x1xf32>
    %514 = vector.broadcast %513 : vector<3x1xf32> to vector<3x256xf32>
    %515 = arith.addf %512, %514 : vector<3x256xf32>
    %cst_405 = arith.constant 0.000000e+00 : f32
    %516 = vector.broadcast %cst_405 : f32 to vector<3x256xf32>
    %517 = arith.subf %516, %515 : vector<3x256xf32>
    %518 = math.exp %517 : vector<3x256xf32>
    %cst_406 = arith.constant 1.000000e+00 : f32
    %519 = vector.broadcast %cst_406 : f32 to vector<3x256xf32>
    %520 = arith.addf %519, %518 : vector<3x256xf32>
    %cst_407 = arith.constant 1.000000e+00 : f32
    %521 = vector.broadcast %cst_407 : f32 to vector<3x256xf32>
    %522 = arith.divf %521, %520 : vector<3x256xf32>
    %c0_408 = arith.constant 0 : index
    %c0_409 = arith.constant 0 : index
    %c0_410 = arith.constant 0 : index
    %523 = vector.load %arg20[%c0_408, %c0_409, %c0_410] : memref<1x8x4xf32, #tpu.memory_space<vmem>>, vector<1x8x4xf32>
    %524 = vector.shape_cast %523 : vector<1x8x4xf32> to vector<8x4xf32>
    %525 = vector.shape_cast %259 : vector<8x4xf32> to vector<1x8x4xf32>
    tpu.vector_store %arg20[%c0_408, %c0_409, %c0_410], %525 {strides = array<i32>} : memref<1x8x4xf32, #tpu.memory_space<vmem>>, vector<1x8x4xf32>,
    %c0_411 = arith.constant 0 : index
    %c0_412 = arith.constant 0 : index
    %c0_413 = arith.constant 0 : index
    %526 = vector.load %arg21[%c0_411, %c0_412, %c0_413] : memref<1x3x256xf32, #tpu.memory_space<vmem>>, vector<1x3x256xf32>
    %527 = vector.shape_cast %526 : vector<1x3x256xf32> to vector<3x256xf32>
    %528 = vector.shape_cast %522 : vector<3x256xf32> to vector<1x3x256xf32>
    tpu.vector_store %arg21[%c0_411, %c0_412, %c0_413], %528 {strides = array<i32>} : memref<1x3x256xf32, #tpu.memory_space<vmem>>, vector<1x3x256xf32>,
    return
  }
  func.func @transform_0(%arg0: i32) -> (i32, i32, i32) {
    %c0_i32 = arith.constant 0 : i32
    %c0_i32_0 = arith.constant 0 : i32
    %c0_i32_1 = arith.constant 0 : i32
    return %arg0, %c0_i32, %c0_i32_0 : i32, i32, i32
  }
  func.func @transform_1(%arg0: i32) -> (i32, i32, i32) {
    %c0_i32 = arith.constant 0 : i32
    %c0_i32_0 = arith.constant 0 : i32
    %c0_i32_1 = arith.constant 0 : i32
    %c0_i32_2 = arith.constant 0 : i32
    return %c0_i32, %c0_i32_0, %c0_i32_1 : i32, i32, i32
  }
  func.func @transform_2(%arg0: i32) -> (i32, i32) {
    %c0_i32 = arith.constant 0 : i32
    %c0_i32_0 = arith.constant 0 : i32
    %c0_i32_1 = arith.constant 0 : i32
    return %c0_i32, %c0_i32_0 : i32, i32
  }
  func.func @transform_3(%arg0: i32) -> (i32, i32) {
    %c0_i32 = arith.constant 0 : i32
    %c0_i32_0 = arith.constant 0 : i32
    %c0_i32_1 = arith.constant 0 : i32
    return %c0_i32, %c0_i32_0 : i32, i32
  }
  func.func @transform_4(%arg0: i32) -> (i32, i32, i32) {
    %c0_i32 = arith.constant 0 : i32
    %c0_i32_0 = arith.constant 0 : i32
    %c0_i32_1 = arith.constant 0 : i32
    %c0_i32_2 = arith.constant 0 : i32
    return %c0_i32, %c0_i32_0, %c0_i32_1 : i32, i32, i32
  }
  func.func @transform_5(%arg0: i32) -> (i32, i32) {
    %c0_i32 = arith.constant 0 : i32
    %c0_i32_0 = arith.constant 0 : i32
    %c0_i32_1 = arith.constant 0 : i32
    return %c0_i32, %c0_i32_0 : i32, i32
  }
  func.func @transform_6(%arg0: i32) -> (i32, i32) {
    %c0_i32 = arith.constant 0 : i32
    %c0_i32_0 = arith.constant 0 : i32
    %c0_i32_1 = arith.constant 0 : i32
    return %c0_i32, %c0_i32_0 : i32, i32
  }
  func.func @transform_7(%arg0: i32) -> (i32, i32, i32) {
    %c0_i32 = arith.constant 0 : i32
    %c0_i32_0 = arith.constant 0 : i32
    %c0_i32_1 = arith.constant 0 : i32
    %c0_i32_2 = arith.constant 0 : i32
    return %c0_i32, %c0_i32_0, %c0_i32_1 : i32, i32, i32
  }
  func.func @transform_8(%arg0: i32) -> (i32, i32) {
    %c0_i32 = arith.constant 0 : i32
    %c0_i32_0 = arith.constant 0 : i32
    %c0_i32_1 = arith.constant 0 : i32
    return %c0_i32, %c0_i32_0 : i32, i32
  }
  func.func @transform_9(%arg0: i32) -> (i32, i32) {
    %c0_i32 = arith.constant 0 : i32
    %c0_i32_0 = arith.constant 0 : i32
    %c0_i32_1 = arith.constant 0 : i32
    return %c0_i32, %c0_i32_0 : i32, i32
  }
  func.func @transform_10(%arg0: i32) -> (i32, i32, i32) {
    %c0_i32 = arith.constant 0 : i32
    %c0_i32_0 = arith.constant 0 : i32
    %c0_i32_1 = arith.constant 0 : i32
    %c0_i32_2 = arith.constant 0 : i32
    return %c0_i32, %c0_i32_0, %c0_i32_1 : i32, i32, i32
  }
  func.func @transform_11(%arg0: i32) -> (i32, i32) {
    %c0_i32 = arith.constant 0 : i32
    %c0_i32_0 = arith.constant 0 : i32
    %c0_i32_1 = arith.constant 0 : i32
    return %c0_i32, %c0_i32_0 : i32, i32
  }
  func.func @transform_12(%arg0: i32) -> (i32, i32) {
    %c0_i32 = arith.constant 0 : i32
    %c0_i32_0 = arith.constant 0 : i32
    %c0_i32_1 = arith.constant 0 : i32
    return %c0_i32, %c0_i32_0 : i32, i32
  }
  func.func @transform_13(%arg0: i32) -> (i32, i32, i32) {
    %c0_i32 = arith.constant 0 : i32
    %c0_i32_0 = arith.constant 0 : i32
    %c0_i32_1 = arith.constant 0 : i32
    %c0_i32_2 = arith.constant 0 : i32
    return %c0_i32, %c0_i32_0, %c0_i32_1 : i32, i32, i32
  }
  func.func @transform_14(%arg0: i32) -> (i32, i32) {
    %c0_i32 = arith.constant 0 : i32
    %c0_i32_0 = arith.constant 0 : i32
    %c0_i32_1 = arith.constant 0 : i32
    return %c0_i32, %c0_i32_0 : i32, i32
  }
  func.func @transform_15(%arg0: i32) -> (i32, i32) {
    %c0_i32 = arith.constant 0 : i32
    %c0_i32_0 = arith.constant 0 : i32
    %c0_i32_1 = arith.constant 0 : i32
    return %c0_i32, %c0_i32_0 : i32, i32
  }
  func.func @transform_16(%arg0: i32) -> (i32, i32, i32) {
    %c0_i32 = arith.constant 0 : i32
    %c0_i32_0 = arith.constant 0 : i32
    %c0_i32_1 = arith.constant 0 : i32
    %c0_i32_2 = arith.constant 0 : i32
    return %c0_i32, %c0_i32_0, %c0_i32_1 : i32, i32, i32
  }
  func.func @transform_17(%arg0: i32) -> (i32, i32) {
    %c0_i32 = arith.constant 0 : i32
    %c0_i32_0 = arith.constant 0 : i32
    %c0_i32_1 = arith.constant 0 : i32
    return %c0_i32, %c0_i32_0 : i32, i32
  }
  func.func @transform_18(%arg0: i32) -> (i32, i32) {
    %c0_i32 = arith.constant 0 : i32
    %c0_i32_0 = arith.constant 0 : i32
    %c0_i32_1 = arith.constant 0 : i32
    return %c0_i32, %c0_i32_0 : i32, i32
  }
  func.func @transform_19(%arg0: i32) -> (i32, i32, i32) {
    %c0_i32 = arith.constant 0 : i32
    %c0_i32_0 = arith.constant 0 : i32
    %c0_i32_1 = arith.constant 0 : i32
    return %arg0, %c0_i32, %c0_i32_0 : i32, i32, i32
  }
  func.func @transform_20(%arg0: i32) -> (i32, i32, i32) {
    %c0_i32 = arith.constant 0 : i32
    %c0_i32_0 = arith.constant 0 : i32
    %c0_i32_1 = arith.constant 0 : i32
    return %arg0, %c0_i32, %c0_i32_0 : i32, i32, i32
  }
}

</mosaic_0001>

<bundles_post_ra>
// kernel: autoencoder_forward.1
= control target key start
LH: loop header
LB: loop body
LE: loop exit
PB: predicated region body
PF: predicated region fallthrough
CT: control target
= control target key end

     0   :  { %s16945_s0 = inlined_call_operand.vmem [shape: f32[2,3,256], index: 0, kind: input, shape index: {}]   ;;  %s16946_s1 = inlined_call_operand.vmem [shape: f32[16,12,3], index: 1, kind: input, shape index: {}]   ;;  %s16947_s2 = inlined_call_operand.vmem [shape: f32[12,1], index: 2, kind: input, shape index: {}]   ;;  %s16948_s3 = inlined_call_operand.hbm [shape: f32[256,1024], index: 3, kind: input, shape index: {}]   ;;  %s16949_s4 = inlined_call_operand.vmem [shape: f32[16,24,12], index: 4, kind: input, shape index: {}]   ;;  %s16950_s5 = inlined_call_operand.vmem [shape: f32[24,1], index: 5, kind: input, shape index: {}]   ;;  %s16951_s6 = inlined_call_operand.vmem [shape: f32[64,256], index: 6, kind: input, shape index: {}]   ;;  %s16952_s7 = inlined_call_operand.vmem [shape: f32[16,8,24], index: 7, kind: input, shape index: {}]   ;;  %s16953_s8 = inlined_call_operand.vmem [shape: f32[8,1], index: 8, kind: input, shape index: {}]   ;;  %s16954_s9 = inlined_call_operand.vmem [shape: f32[16,64], index: 9, kind: input, shape index: {}]   ;;  %s16955_s10 = inlined_call_operand.vmem [shape: f32[16,24,8], index: 10, kind: input, shape index: {}]   ;;  %s16956_s11 = inlined_call_operand.vmem [shape: f32[24,1], index: 11, kind: input, shape index: {}]   ;;  %s16957_s12 = inlined_call_operand.vmem [shape: f32[4,256], index: 12, kind: input, shape index: {}]   ;;  %s16958_s13 = inlined_call_operand.vmem [shape: f32[16,12,24], index: 13, kind: input, shape index: {}]   ;;  %s16959_s14 = inlined_call_operand.vmem [shape: f32[12,1], index: 14, kind: input, shape index: {}]   ;;  %s16960_s15 = inlined_call_operand.vmem [shape: f32[16,1024], index: 15, kind: input, shape index: {}]   ;;  %s16961_s16 = inlined_call_operand.vmem [shape: f32[16,3,12], index: 16, kind: input, shape index: {}]   ;;  %s16962_s17 = inlined_call_operand.vmem [shape: f32[3,1], index: 17, kind: input, shape index: {}]   ;;  %s16963_s18 = inlined_call_operand.vmem [shape: f32[64,4096], index: 18, kind: input, shape index: {}]   ;;  %s16964_s19 = inlined_call_operand.vmem [shape: f32[2,8,4], index: 19, kind: output, shape index: {0}]   ;;  %s16965_s20 = inlined_call_operand.vmem [shape: f32[2,3,256], index: 20, kind: output, shape index: {1}]  }
   0x1   :  { %16983 = sst [smem:[#allocation5_spill]] %s16945_s0 }
   0x2   :  { %16984 = sst [smem:[#allocation6_spill]] %s16946_s1 }
   0x3   :  { %16985 = sst [smem:[#allocation7_spill]] %s16947_s2 }
   0x4   :  { %16986 = sst [smem:[#allocation8_spill]] %s16948_s3 }
   0x5   :  { %16987 = sst [smem:[#allocation9_spill]] %s16949_s4 }
   0x6   :  { %26 = vsyncpa [#allocation3], 0  ;;  %s14077_s1 = smov 0  }
   0x7 LB: > { %s14083_s22 = sadd.s32 4294967295, %s13945_s1   ;;  %p12246_p0 = scmp.ge.s32.totalorder %s13945_s1, 1  ;;  %s13945_s1 = sphi %s14077_s1, %s32_s1  }
   0x8   : > { %p493_p1 = scmp.lt.s32.totalorder %s13945_s1, 3  ;;  %s13947_s23 = smov [#allocation2]  }
   0x9   : > { %s511_s24 = sshll.u32 %s13947_s23, 4  ;;  %p13862_p3 = scmp.eq.s32.totalorder %s14083_s22, 0  ;;  %s512_s24 = int_to_ptr.vmem [resolvable:$true] %s511_s24 }
   0xa   : > { %p14087_p2 = pnand %p12246_p0, %p493_p1  ;;  %s13920_s25 = scalar_lea.vmem %s512_s24, 32768 }
   0xb   : > { %p13921_p7 = scmp.ne.s32.totalorder %s512_s24, %s13920_s25  ;;  %p13928_p10 = scmp.lt.s32.totalorder %s512_s24, %s512_s24 }
   0xc   : > { %p13858_p4 = pneg %p14087_p2  ;;  %p13929_p11 = scmp.lt.s32.totalorder %s13920_s25, %s13920_s25 }
   0xe   : > { %p13859_p5 = pnand %p13862_p3, %p13858_p4  ;;  %p13930_p12 = por %p13929_p11, %p13928_p10 }
  0x10   : > { %p13911_p6 = pneg %p13859_p5 }
  0x12   : > { %p13923_p8 = pnand %p13921_p7, %p13911_p6 }
  0x14   : > { %p13924_p9 = pneg %p13923_p8 }
  0x16   : > { %p13931_p13 = pnand %p13930_p12, %p13924_p9 }
  0x18   : > { %13934 = shalt.err (!%p13931_p13)
}
  0x19   : > { %s13948_s3 = smov 1024   ;;  %s13949_s26 = smov 64  }
  0x1a   : > { %s16989_s4 = sld [smem:[#allocation8_spill]] }
  0x1c   : > { %580 = sbr.rel (%p14087_p2) target bundleno = 3729 (0xe91), region = 96 }
  0x20   : > { %13861 = dma.hbm_to_vmem [thread:$0]  (!%p13859_p5), %s16989_s4, 32768, %s512_s24, [#allocation3], %s13948_s3, %s13948_s3, %s13949_s26  }
  0x21   : > { %13940 = dma.done.wait (%p13862_p3), [#allocation3], 32768  }
  0x22   : > { %13942 = vsyncadd (%p13862_p3), [#allocation3], 4294934528  ;;  %v778_v0 = vld [vmem:[#allocation2 + $0x3c8] sm:$0xff]  ;;  %v777_v1 = vld [vmem:[#allocation2 + $0x3c0] sm:$0xff]  ;;  %p642_p0 = scmp.lt.s32.totalorder %s14083_s22, 1  ;;  %s16990_s21 = sld [smem:[#allocation5_spill]] }
  0x23   : > { %v780_v2 = vld [vmem:[#allocation2 + $0x3d8] sm:$0xff]  ;;  %916 = vmatprep.subr.mxu0 %v778_v0  ;;  %v770_v3 = vld [vmem:[#allocation2 + $0x388] sm:$0xff]  ;;  %v779_v4 = vld [vmem:[#allocation2 + $0x3d0] sm:$0xff]  ;;  %s16991_s2 = sld [smem:[#allocation6_spill]]  ;;  %vm1208_vm0 = vcmask 23552   ;;  %s16975_s26 = smov 64  }
  0x24   : > { %987 = vmatprep.subr.mxu1 %v780_v2  ;;  %v769_v5 = vld [vmem:[#allocation2 + $0x380] sm:$0xff]  ;;  %917 = vmatpush1.msra.mxu0 %v777_v1  ;;  %v772_v6 = vld [vmem:[#allocation2 + $0x398] sm:$0xff]  ;;  %v762_v7 = vld [vmem:[#allocation2 + $0x348] sm:$0xff]  ;;  %s17002_s22 = smov (!%p642_p0, %s14083_s22), 1  ;;  %s16992_s4 = sld [smem:[#allocation7_spill]]  ;;  %vm1215_vm1 = vcmask 1042432  }
  0x25   : > { %988 = vmatpush1.msra.mxu1 %v779_v4  ;;  %v771_v8 = vld [vmem:[#allocation2 + $0x390] sm:$0xff]  ;;  %918 = vmatprep.subr.mxu0 %v770_v3  ;;  %v761_v9 = vld [vmem:[#allocation2 + $0x340] sm:$0xff]  ;;  %v764_v10 = vld [vmem:[#allocation2 + $0x358] sm:$0xff]  ;;  %s14109_s29 = sshll.u32 %s17002_s22, 3  ;;  %vm2647_vm2 = vcmask 523264   ;;  %vm13953_vm3 = vmmov 0  }
  0x26   : > { %989 = vmatprep.subr.mxu1 %v772_v6  ;;  %919 = vmatpush1.msra.mxu0 %v769_v5  ;;  %v754_v11 = vld [vmem:[#allocation2 + $0x308] sm:$0xff]  ;;  %v763_v12 = vld [vmem:[#allocation2 + $0x350] sm:$0xff]  ;;  %v756_v13 = vld [vmem:[#allocation2 + $0x318] sm:$0xff]  ;;  %s13954_s22 = smov 112   ;;  %s16977_s24 = smov 80   ;;  %vm2755_vm4 = vcmask 1043456  }
  0x27   : > { %990 = vmatpush1.msra.mxu1 %v771_v8  ;;  %920 = vmatprep.subr.mxu0 %v762_v7  ;;  %v753_v14 = vld [vmem:[#allocation2 + $0x300] sm:$0xff]  ;;  %v755_v15 = vld [vmem:[#allocation2 + $0x310] sm:$0xff]  ;;  %v746_v16 = vld [vmem:[#allocation2 + $0x2c8] sm:$0xff]  ;;  %s16971_s25 = smov 16   ;;  %s16969_s3 = smov 48   ;;  %vm2745_vm5 = vcmask 97280  }
  0x28   : > { %991 = vmatprep.subr.mxu1 %v764_v10  ;;  %921 = vmatpush1.msra.mxu0 %v761_v9  ;;  %v748_v17 = vld [vmem:[#allocation2 + $0x2d8] sm:$0xff]  ;;  %v745_v18 = vld [vmem:[#allocation2 + $0x2c0] sm:$0xff]  ;;  %v747_v19 = vld [vmem:[#allocation2 + $0x2d0] sm:$0xff]  ;;  %s646_s23 = scalar_lea.vmem %s16990_s21, %s14109_s29  ;;  %s16979_s27 = smov 96   ;;  %vm4373_vm6 = vcmask 130048   ;;  %vm4478_vm7 = vcmask 195584  }
  0x29   : > { %992 = vmatpush1.msra.mxu1 %v763_v12  ;;  %922 = vmatprep.subr.mxu0 %v754_v11  ;;  %v738_v20 = vld [vmem:[#allocation2 + $0x288] sm:$0xff]  ;;  %v740_v21 = vld [vmem:[#allocation2 + $0x298] sm:$0xff]  ;;  %v737_v22 = vld [vmem:[#allocation2 + $0x280] sm:$0xff]  ;;  %s16973_s28 = smov 32   ;;  %s13960_s21 = smov 116   ;;  %vm5819_vm8 = vcmask 31744  }
  0x2a   : > { %993 = vmatprep.subr.mxu1 %v756_v13  ;;  %923 = vmatpush1.msra.mxu0 %v753_v14  ;;  %v739_v23 = vld [vmem:[#allocation2 + $0x290] sm:$0xff]  ;;  %v730_v24 = vld [vmem:[#allocation2 + $0x248] sm:$0xff]  ;;  %v732_v25 = vld [vmem:[#allocation2 + $0x258] sm:$0xff]  ;;  %s13962_s30 = smov 100   ;;  %s16981_s0 = smov 108   ;;  %vm5909_vm9 = vcmask 64512  }
  0x2b   : > { %994 = vmatpush1.msra.mxu1 %v755_v15  ;;  %924 = vmatprep.subr.mxu0 %v746_v16  ;;  %v729_v26 = vld [vmem:[#allocation2 + $0x240] sm:$0xff]  ;;  %v731_v27 = vld [vmem:[#allocation2 + $0x250] sm:$0xff]  ;;  %v722_v28 = vld [vmem:[#allocation2 + $0x208] sm:$0xff] }
  0x2c   : > { %995 = vmatprep.subr.mxu1 %v748_v17  ;;  %925 = vmatpush1.msra.mxu0 %v745_v18  ;;  %v724_v29 = vld [vmem:[#allocation2 + $0x218] sm:$0xff]  ;;  %v721_v30 = vld [vmem:[#allocation2 + $0x200] sm:$0xff]  ;;  %v723_v31 = vld [vmem:[#allocation2 + $0x210] sm:$0xff] }
  0x2d   : > { %996 = vmatpush1.msra.mxu1 %v747_v19  ;;  %926 = vmatprep.subr.mxu0 %v738_v20  ;;  %v714_v32 = vld [vmem:[#allocation2 + $0x1c8] sm:$0xff]  ;;  %v716_v33 = vld [vmem:[#allocation2 + $0x1d8] sm:$0xff]  ;;  %v713_v34 = vld [vmem:[#allocation2 + $0x1c0] sm:$0xff] }
  0x2e   : > { %997 = vmatprep.subr.mxu1 %v740_v21  ;;  %927 = vmatpush1.msra.mxu0 %v737_v22  ;;  %v715_v35 = vld [vmem:[#allocation2 + $0x1d0] sm:$0xff]  ;;  %v706_v36 = vld [vmem:[#allocation2 + $0x188] sm:$0xff]  ;;  %v708_v37 = vld [vmem:[#allocation2 + $0x198] sm:$0xff] }
  0x2f   : > { %998 = vmatpush1.msra.mxu1 %v739_v23  ;;  %928 = vmatprep.subr.mxu0 %v730_v24  ;;  %v705_v38 = vld [vmem:[#allocation2 + $0x180] sm:$0xff]  ;;  %v707_v39 = vld [vmem:[#allocation2 + $0x190] sm:$0xff]  ;;  %v698_v40 = vld [vmem:[#allocation2 + $0x148] sm:$0xff] }
  0x30   : > { %999 = vmatprep.subr.mxu1 %v732_v25  ;;  %929 = vmatpush1.msra.mxu0 %v729_v26  ;;  %v700_v41 = vld [vmem:[#allocation2 + $0x158] sm:$0xff]  ;;  %v697_v42 = vld [vmem:[#allocation2 + $0x140] sm:$0xff]  ;;  %v699_v43 = vld [vmem:[#allocation2 + $0x150] sm:$0xff] }
  0x31   : > { %1000 = vmatpush1.msra.mxu1 %v731_v27  ;;  %930 = vmatprep.subr.mxu0 %v722_v28  ;;  %v690_v44 = vld [vmem:[#allocation2 + $0x108] sm:$0xff]  ;;  %v692_v45 = vld [vmem:[#allocation2 + $0x118] sm:$0xff]  ;;  %v689_v46 = vld [vmem:[#allocation2 + $0x100] sm:$0xff] }
  0x32   : > { %1001 = vmatprep.subr.mxu1 %v724_v29  ;;  %931 = vmatpush1.msra.mxu0 %v721_v30  ;;  %v691_v47 = vld [vmem:[#allocation2 + $0x110] sm:$0xff]  ;;  %v682_v48 = vld [vmem:[#allocation2 + $0xc8] sm:$0xff]  ;;  %v684_v49 = vld [vmem:[#allocation2 + $0xd8] sm:$0xff] }
  0x33   : > { %1002 = vmatpush1.msra.mxu1 %v723_v31  ;;  %932 = vmatprep.subr.mxu0 %v714_v32  ;;  %v681_v50 = vld [vmem:[#allocation2 + $0xc0] sm:$0xff]  ;;  %v683_v51 = vld [vmem:[#allocation2 + $0xd0] sm:$0xff]  ;;  %v674_v52 = vld [vmem:[#allocation2 + $0x88] sm:$0xff] }
  0x34   : > { %1003 = vmatprep.subr.mxu1 %v716_v33  ;;  %933 = vmatpush1.msra.mxu0 %v713_v34  ;;  %v676_v53 = vld [vmem:[#allocation2 + $0x98] sm:$0xff]  ;;  %v673_v54 = vld [vmem:[#allocation2 + $0x80] sm:$0xff]  ;;  %v675_v55 = vld [vmem:[#allocation2 + $0x90] sm:$0xff] }
  0x35   : > { %1004 = vmatpush1.msra.mxu1 %v715_v35  ;;  %934 = vmatprep.subr.mxu0 %v706_v36  ;;  %v666_v56 = vld [vmem:[#allocation2 + $0x48] sm:$0xff]  ;;  %v668_v57 = vld [vmem:[#allocation2 + $0x58] sm:$0xff]  ;;  %v665_v58 = vld [vmem:[#allocation2 + $0x40] sm:$0xff] }
  0x36   : > { %1005 = vmatprep.subr.mxu1 %v708_v37  ;;  %935 = vmatpush1.msra.mxu0 %v705_v38  ;;  %v667_v59 = vld [vmem:[#allocation2 + $0x50] sm:$0xff]  ;;  %v658_v60 = vld [vmem:[#allocation2 + $0x8] sm:$0xff]  ;;  %v660_v61 = vld [vmem:[#allocation2 + $0x18] sm:$0xff] }
  0x37   : > { %1006 = vmatpush1.msra.mxu1 %v707_v39  ;;  %936 = vmatprep.subr.mxu0 %v698_v40  ;;  %v657_v62 = vld [vmem:[#allocation2] sm:$0xff]  ;;  %v659_v63 = vld [vmem:[#allocation2 + $0x10] sm:$0xff]  ;;  %v906_v0 = vld [vmem:[#allocation2 + $0x7c8] sm:$0xff] }
  0x38   : > { %1007 = vmatprep.subr.mxu1 %v700_v41  ;;  %937 = vmatpush1.msra.mxu0 %v697_v42  ;;  %v908_v1 = vld [vmem:[#allocation2 + $0x7d8] sm:$0xff]  ;;  %v905_v2 = vld [vmem:[#allocation2 + $0x7c0] sm:$0xff]  ;;  %v907_v3 = vld [vmem:[#allocation2 + $0x7d0] sm:$0xff] }
  0x39   : > { %1008 = vmatpush1.msra.mxu1 %v699_v43  ;;  %938 = vmatprep.subr.mxu0 %v690_v44  ;;  %v898_v4 = vld [vmem:[#allocation2 + $0x788] sm:$0xff]  ;;  %v900_v5 = vld [vmem:[#allocation2 + $0x798] sm:$0xff]  ;;  %v897_v6 = vld [vmem:[#allocation2 + $0x780] sm:$0xff] }
  0x3a   : > { %1009 = vmatprep.subr.mxu1 %v692_v45  ;;  %939 = vmatpush1.msra.mxu0 %v689_v46  ;;  %v899_v7 = vld [vmem:[#allocation2 + $0x790] sm:$0xff]  ;;  %v890_v8 = vld [vmem:[#allocation2 + $0x748] sm:$0xff]  ;;  %v892_v9 = vld [vmem:[#allocation2 + $0x758] sm:$0xff] }
  0x3b   : > { %1010 = vmatpush1.msra.mxu1 %v691_v47  ;;  %940 = vmatprep.subr.mxu0 %v682_v48  ;;  %v889_v10 = vld [vmem:[#allocation2 + $0x740] sm:$0xff]  ;;  %v891_v11 = vld [vmem:[#allocation2 + $0x750] sm:$0xff]  ;;  %v882_v12 = vld [vmem:[#allocation2 + $0x708] sm:$0xff] }
  0x3c   : > { %1011 = vmatprep.subr.mxu1 %v684_v49  ;;  %941 = vmatpush1.msra.mxu0 %v681_v50  ;;  %v884_v13 = vld [vmem:[#allocation2 + $0x718] sm:$0xff]  ;;  %v881_v14 = vld [vmem:[#allocation2 + $0x700] sm:$0xff]  ;;  %v883_v15 = vld [vmem:[#allocation2 + $0x710] sm:$0xff] }
  0x3d   : > { %1012 = vmatpush1.msra.mxu1 %v683_v51  ;;  %942 = vmatprep.subr.mxu0 %v674_v52  ;;  %v874_v16 = vld [vmem:[#allocation2 + $0x6c8] sm:$0xff]  ;;  %v876_v17 = vld [vmem:[#allocation2 + $0x6d8] sm:$0xff]  ;;  %v873_v18 = vld [vmem:[#allocation2 + $0x6c0] sm:$0xff] }
  0x3e   : > { %1013 = vmatprep.subr.mxu1 %v676_v53  ;;  %943 = vmatpush1.msra.mxu0 %v673_v54  ;;  %v875_v19 = vld [vmem:[#allocation2 + $0x6d0] sm:$0xff]  ;;  %v866_v20 = vld [vmem:[#allocation2 + $0x688] sm:$0xff]  ;;  %v868_v21 = vld [vmem:[#allocation2 + $0x698] sm:$0xff] }
  0x3f   : > { %1014 = vmatpush1.msra.mxu1 %v675_v55  ;;  %944 = vmatprep.subr.mxu0 %v666_v56  ;;  %v865_v22 = vld [vmem:[#allocation2 + $0x680] sm:$0xff]  ;;  %v867_v23 = vld [vmem:[#allocation2 + $0x690] sm:$0xff]  ;;  %v858_v24 = vld [vmem:[#allocation2 + $0x648] sm:$0xff] }
  0x40   : > { %1015 = vmatprep.subr.mxu1 %v668_v57  ;;  %945 = vmatpush1.msra.mxu0 %v665_v58  ;;  %v860_v25 = vld [vmem:[#allocation2 + $0x658] sm:$0xff]  ;;  %v857_v26 = vld [vmem:[#allocation2 + $0x640] sm:$0xff]  ;;  %v859_v27 = vld [vmem:[#allocation2 + $0x650] sm:$0xff] }
  0x41   : > { %1016 = vmatpush1.msra.mxu1 %v667_v59  ;;  %946 = vmatprep.subr.mxu0 %v658_v60  ;;  %v850_v28 = vld [vmem:[#allocation2 + $0x608] sm:$0xff]  ;;  %v852_v29 = vld [vmem:[#allocation2 + $0x618] sm:$0xff]  ;;  %v849_v30 = vld [vmem:[#allocation2 + $0x600] sm:$0xff] }
  0x42   : > { %1017 = vmatprep.subr.mxu1 %v660_v61  ;;  %947 = vmatpush1.msra.mxu0 %v657_v62  ;;  %v851_v31 = vld [vmem:[#allocation2 + $0x610] sm:$0xff]  ;;  %v842_v32 = vld [vmem:[#allocation2 + $0x5c8] sm:$0xff]  ;;  %v844_v33 = vld [vmem:[#allocation2 + $0x5d8] sm:$0xff] }
  0x43   : > { %1018 = vmatpush1.msra.mxu1 %v659_v63  ;;  %948 = vmatprep.subr.mxu0 %v906_v0  ;;  %v841_v34 = vld [vmem:[#allocation2 + $0x5c0] sm:$0xff]  ;;  %v843_v35 = vld [vmem:[#allocation2 + $0x5d0] sm:$0xff]  ;;  %v834_v36 = vld [vmem:[#allocation2 + $0x588] sm:$0xff] }
  0x44   : > { %1019 = vmatprep.subr.mxu1 %v908_v1  ;;  %949 = vmatpush2.msra.mxu0 %v905_v2  ;;  %v836_v37 = vld [vmem:[#allocation2 + $0x598] sm:$0xff]  ;;  %v833_v38 = vld [vmem:[#allocation2 + $0x580] sm:$0xff]  ;;  %v835_v39 = vld [vmem:[#allocation2 + $0x590] sm:$0xff] }
  0x45   : > { %1020 = vmatpush2.msra.mxu1 %v907_v3  ;;  %950 = vmatprep.subr.mxu0 %v898_v4  ;;  %v826_v40 = vld [vmem:[#allocation2 + $0x548] sm:$0xff]  ;;  %v828_v41 = vld [vmem:[#allocation2 + $0x558] sm:$0xff]  ;;  %v825_v42 = vld [vmem:[#allocation2 + $0x540] sm:$0xff] }
  0x46   : > { %1021 = vmatprep.subr.mxu1 %v900_v5  ;;  %951 = vmatpush2.msra.mxu0 %v897_v6  ;;  %v827_v43 = vld [vmem:[#allocation2 + $0x550] sm:$0xff]  ;;  %v818_v44 = vld [vmem:[#allocation2 + $0x508] sm:$0xff]  ;;  %v820_v45 = vld [vmem:[#allocation2 + $0x518] sm:$0xff] }
  0x47   : > { %1022 = vmatpush2.msra.mxu1 %v899_v7  ;;  %952 = vmatprep.subr.mxu0 %v890_v8  ;;  %v817_v46 = vld [vmem:[#allocation2 + $0x500] sm:$0xff]  ;;  %v819_v47 = vld [vmem:[#allocation2 + $0x510] sm:$0xff]  ;;  %v810_v48 = vld [vmem:[#allocation2 + $0x4c8] sm:$0xff] }
  0x48   : > { %1023 = vmatprep.subr.mxu1 %v892_v9  ;;  %953 = vmatpush2.msra.mxu0 %v889_v10  ;;  %v812_v49 = vld [vmem:[#allocation2 + $0x4d8] sm:$0xff]  ;;  %v809_v50 = vld [vmem:[#allocation2 + $0x4c0] sm:$0xff]  ;;  %v811_v51 = vld [vmem:[#allocation2 + $0x4d0] sm:$0xff] }
  0x49   : > { %1024 = vmatpush2.msra.mxu1 %v891_v11  ;;  %954 = vmatprep.subr.mxu0 %v882_v12  ;;  %v802_v52 = vld [vmem:[#allocation2 + $0x488] sm:$0xff]  ;;  %v804_v53 = vld [vmem:[#allocation2 + $0x498] sm:$0xff]  ;;  %v14115_v54 = vld [vmem:[%s646_s23] sm:$0x77]  ;;  %s13961_s23 = smov 124  }
  0x4a   : > { %1025 = vmatprep.subr.mxu1 %v884_v13  ;;  %955 = vmatpush2.msra.mxu0 %v881_v14  ;;  %v801_v55 = vld [vmem:[#allocation2 + $0x480] sm:$0xff]  ;;  %v803_v56 = vld [vmem:[#allocation2 + $0x490] sm:$0xff]  ;;  %v794_v57 = vld [vmem:[#allocation2 + $0x448] sm:$0xff]  ;;  %v14119_v61 = vcombine.high %v14115_v54, %v14115_v54 }
  0x4b   : > { %1026 = vmatpush2.msra.mxu1 %v883_v15  ;;  %956 = vmatprep.subr.mxu0 %v874_v16  ;;  %v796_v58 = vld [vmem:[#allocation2 + $0x458] sm:$0xff]  ;;  %v793_v59 = vld [vmem:[#allocation2 + $0x440] sm:$0xff]  ;;  %v795_v60 = vld [vmem:[#allocation2 + $0x450] sm:$0xff] }
  0x4c   : > { %1027 = vmatprep.subr.mxu1 %v876_v17  ;;  %957 = vmatpush2.msra.mxu0 %v873_v18  ;;  %v786_v62 = vld [vmem:[#allocation2 + $0x408] sm:$0xff]  ;;  %v785_v63 = vld [vmem:[#allocation2 + $0x400] sm:$0xff]  ;;  %v788_v0 = vld [vmem:[#allocation2 + $0x418] sm:$0xff] }
  0x4d   : > { %1028 = vmatpush2.msra.mxu1 %v875_v19  ;;  %958 = vmatprep.subr.mxu0 %v866_v20  ;;  %v787_v1 = vld [vmem:[#allocation2 + $0x410] sm:$0xff]  ;;  %v782_v2 = vld [vmem:[#allocation2 + $0x3e8] sm:$0xff]  ;;  %v781_v3 = vld [vmem:[#allocation2 + $0x3e0] sm:$0xff] }
  0x4e   : > { %1029 = vmatprep.subr.mxu1 %v868_v21  ;;  %959 = vmatpush2.msra.mxu0 %v865_v22  ;;  %v774_v4 = vld [vmem:[#allocation2 + $0x3a8] sm:$0xff]  ;;  %v784_v5 = vld [vmem:[#allocation2 + $0x3f8] sm:$0xff]  ;;  %v773_v6 = vld [vmem:[#allocation2 + $0x3a0] sm:$0xff] }
  0x4f   : > { %1030 = vmatpush2.msra.mxu1 %v867_v23  ;;  %960 = vmatprep.subr.mxu0 %v858_v24  ;;  %v783_v7 = vld [vmem:[#allocation2 + $0x3f0] sm:$0xff]  ;;  %v766_v8 = vld [vmem:[#allocation2 + $0x368] sm:$0xff]  ;;  %v776_v9 = vld [vmem:[#allocation2 + $0x3b8] sm:$0xff] }
  0x50   : > { %1031 = vmatprep.subr.mxu1 %v860_v25  ;;  %961 = vmatpush2.msra.mxu0 %v857_v26  ;;  %v765_v10 = vld [vmem:[#allocation2 + $0x360] sm:$0xff]  ;;  %v775_v11 = vld [vmem:[#allocation2 + $0x3b0] sm:$0xff]  ;;  %v758_v12 = vld [vmem:[#allocation2 + $0x328] sm:$0xff] }
  0x51   : > { %1032 = vmatpush2.msra.mxu1 %v859_v27  ;;  %962 = vmatprep.subr.mxu0 %v850_v28  ;;  %v768_v13 = vld [vmem:[#allocation2 + $0x378] sm:$0xff]  ;;  %v757_v14 = vld [vmem:[#allocation2 + $0x320] sm:$0xff]  ;;  %v767_v15 = vld [vmem:[#allocation2 + $0x370] sm:$0xff] }
  0x52   : > { %1033 = vmatprep.subr.mxu1 %v852_v29  ;;  %963 = vmatpush2.msra.mxu0 %v849_v30  ;;  %v750_v16 = vld [vmem:[#allocation2 + $0x2e8] sm:$0xff]  ;;  %v760_v17 = vld [vmem:[#allocation2 + $0x338] sm:$0xff]  ;;  %v749_v18 = vld [vmem:[#allocation2 + $0x2e0] sm:$0xff] }
  0x53   : > { %1034 = vmatpush2.msra.mxu1 %v851_v31  ;;  %964 = vmatprep.subr.mxu0 %v842_v32  ;;  %v759_v19 = vld [vmem:[#allocation2 + $0x330] sm:$0xff]  ;;  %v742_v20 = vld [vmem:[#allocation2 + $0x2a8] sm:$0xff]  ;;  %v752_v21 = vld [vmem:[#allocation2 + $0x2f8] sm:$0xff] }
  0x54   : > { %1035 = vmatprep.subr.mxu1 %v844_v33  ;;  %965 = vmatpush2.msra.mxu0 %v841_v34  ;;  %v741_v22 = vld [vmem:[#allocation2 + $0x2a0] sm:$0xff]  ;;  %v751_v23 = vld [vmem:[#allocation2 + $0x2f0] sm:$0xff]  ;;  %v734_v24 = vld [vmem:[#allocation2 + $0x268] sm:$0xff] }
  0x55   : > { %1036 = vmatpush2.msra.mxu1 %v843_v35  ;;  %966 = vmatprep.subr.mxu0 %v834_v36  ;;  %v744_v25 = vld [vmem:[#allocation2 + $0x2b8] sm:$0xff]  ;;  %v733_v26 = vld [vmem:[#allocation2 + $0x260] sm:$0xff]  ;;  %v743_v27 = vld [vmem:[#allocation2 + $0x2b0] sm:$0xff] }
  0x56   : > { %1037 = vmatprep.subr.mxu1 %v836_v37  ;;  %967 = vmatpush2.msra.mxu0 %v833_v38  ;;  %v726_v28 = vld [vmem:[#allocation2 + $0x228] sm:$0xff]  ;;  %v736_v29 = vld [vmem:[#allocation2 + $0x278] sm:$0xff]  ;;  %v725_v30 = vld [vmem:[#allocation2 + $0x220] sm:$0xff] }
  0x57   : > { %1038 = vmatpush2.msra.mxu1 %v835_v39  ;;  %968 = vmatprep.subr.mxu0 %v826_v40  ;;  %v735_v31 = vld [vmem:[#allocation2 + $0x270] sm:$0xff]  ;;  %v718_v32 = vld [vmem:[#allocation2 + $0x1e8] sm:$0xff]  ;;  %v728_v33 = vld [vmem:[#allocation2 + $0x238] sm:$0xff] }
  0x58   : > { %1039 = vmatprep.subr.mxu1 %v828_v41  ;;  %969 = vmatpush2.msra.mxu0 %v825_v42  ;;  %v717_v34 = vld [vmem:[#allocation2 + $0x1e0] sm:$0xff]  ;;  %v727_v35 = vld [vmem:[#allocation2 + $0x230] sm:$0xff]  ;;  %v710_v36 = vld [vmem:[#allocation2 + $0x1a8] sm:$0xff] }
  0x59   : > { %1040 = vmatpush2.msra.mxu1 %v827_v43  ;;  %970 = vmatprep.subr.mxu0 %v818_v44  ;;  %v720_v37 = vld [vmem:[#allocation2 + $0x1f8] sm:$0xff]  ;;  %v709_v38 = vld [vmem:[#allocation2 + $0x1a0] sm:$0xff]  ;;  %v719_v39 = vld [vmem:[#allocation2 + $0x1f0] sm:$0xff] }
  0x5a   : > { %1041 = vmatprep.subr.mxu1 %v820_v45  ;;  %971 = vmatpush2.msra.mxu0 %v817_v46  ;;  %v702_v40 = vld [vmem:[#allocation2 + $0x168] sm:$0xff]  ;;  %v712_v41 = vld [vmem:[#allocation2 + $0x1b8] sm:$0xff]  ;;  %v701_v42 = vld [vmem:[#allocation2 + $0x160] sm:$0xff] }
  0x5b   : > { %1042 = vmatpush2.msra.mxu1 %v819_v47  ;;  %972 = vmatprep.subr.mxu0 %v810_v48  ;;  %v711_v43 = vld [vmem:[#allocation2 + $0x1b0] sm:$0xff]  ;;  %v694_v44 = vld [vmem:[#allocation2 + $0x128] sm:$0xff]  ;;  %v704_v45 = vld [vmem:[#allocation2 + $0x178] sm:$0xff] }
  0x5c   : > { %1043 = vmatprep.subr.mxu1 %v812_v49  ;;  %973 = vmatpush2.msra.mxu0 %v809_v50  ;;  %v693_v46 = vld [vmem:[#allocation2 + $0x120] sm:$0xff]  ;;  %v703_v47 = vld [vmem:[#allocation2 + $0x170] sm:$0xff]  ;;  %v686_v48 = vld [vmem:[#allocation2 + $0xe8] sm:$0xff] }
  0x5d   : > { %1044 = vmatpush2.msra.mxu1 %v811_v51  ;;  %974 = vmatprep.subr.mxu0 %v802_v52  ;;  %v696_v49 = vld [vmem:[#allocation2 + $0x138] sm:$0xff]  ;;  %v685_v50 = vld [vmem:[#allocation2 + $0xe0] sm:$0xff]  ;;  %v695_v51 = vld [vmem:[#allocation2 + $0x130] sm:$0xff] }
  0x5e   : > { %1045 = vmatprep.subr.mxu1 %v804_v53  ;;  %975 = vmatpush2.msra.mxu0 %v801_v55  ;;  %v678_v52 = vld [vmem:[#allocation2 + $0xa8] sm:$0xff]  ;;  %v688_v53 = vld [vmem:[#allocation2 + $0xf8] sm:$0xff]  ;;  %v677_v55 = vld [vmem:[#allocation2 + $0xa0] sm:$0xff] }
  0x5f   : > { %1046 = vmatpush2.msra.mxu1 %v803_v56  ;;  %976 = vmatprep.subr.mxu0 %v794_v57  ;;  %v687_v56 = vld [vmem:[#allocation2 + $0xf0] sm:$0xff]  ;;  %v670_v57 = vld [vmem:[#allocation2 + $0x68] sm:$0xff] }
  0x60   : > { %1047 = vmatprep.subr.mxu1 %v796_v58  ;;  %977 = vmatpush2.msra.mxu0 %v793_v59  ;;  %v680_v58 = vld [vmem:[#allocation2 + $0xb8] sm:$0xff]  ;;  %v669_v59 = vld [vmem:[#allocation2 + $0x60] sm:$0xff] }
  0x61   : > { %1048 = vmatpush2.msra.mxu1 %v795_v60  ;;  %978 = vmatprep.subr.mxu0 %v786_v62  ;;  %v679_v60 = vld [vmem:[#allocation2 + $0xb0] sm:$0xff]  ;;  %v662_v62 = vld [vmem:[#allocation2 + $0x28] sm:$0xff] }
  0x62   : > { %980 = vmatprep.mubr.f32.mxu0 %v14119_v61  ;;  %979 = vmatpush2.msra.mxu0 %v785_v63  ;;  %v672_v63 = vld [vmem:[#allocation2 + $0x78] sm:$0xff] }
  0x63   : > { %1049 = vmatprep.subr.mxu1 %v788_v0  ;;  %981 = vmatmul.mubr.f32.vlgmr.msra.gmra.mxu0 %v14115_v54  ;;  %v661_v0 = vld [vmem:[#allocation2 + $0x20] sm:$0xff] }
  0x64   : > { %1050 = vmatpush2.msra.mxu1 %v787_v1  ;;  %1051 = vmatprep.mubr.f32.mxu1 %v14119_v61  ;;  %v671_v1 = vld [vmem:[#allocation2 + $0x70] sm:$0xff] }
  0x65   : > { %1058 = vmatprep.subr.mxu0 %v782_v2  ;;  %1052 = vmatmul.mubr.f32.vlgmr.msra.gmra.mxu1 %v14115_v54  ;;  %v910_v2 = vld [vmem:[#allocation2 + $0x7e8] sm:$0xff] }
  0x66   : > { %1059 = vmatpush1.msra.mxu0 %v781_v3  ;;  %1129 = vmatprep.subr.mxu1 %v784_v5  ;;  %v664_v3 = vld [vmem:[#allocation2 + $0x38] sm:$0xff]  ;;  %v663_v5 = vld [vmem:[#allocation2 + $0x30] sm:$0xff] }
  0x67   : > { %1060 = vmatprep.subr.mxu0 %v774_v4  ;;  %1130 = vmatpush1.msra.mxu1 %v783_v7  ;;  %v909_v4 = vld [vmem:[#allocation2 + $0x7e0] sm:$0xff]  ;;  %v912_v7 = vld [vmem:[#allocation2 + $0x7f8] sm:$0xff] }
  0x68   : > { %1061 = vmatpush1.msra.mxu0 %v773_v6  ;;  %1131 = vmatprep.subr.mxu1 %v776_v9  ;;  %v902_v6 = vld [vmem:[#allocation2 + $0x7a8] sm:$0xff]  ;;  %v911_v9 = vld [vmem:[#allocation2 + $0x7f0] sm:$0xff] }
  0x69   : > { %1062 = vmatprep.subr.mxu0 %v766_v8  ;;  %1132 = vmatpush1.msra.mxu1 %v775_v11  ;;  %v901_v8 = vld [vmem:[#allocation2 + $0x7a0] sm:$0xff]  ;;  %v904_v11 = vld [vmem:[#allocation2 + $0x7b8] sm:$0xff] }
  0x6a   : > { %1063 = vmatpush1.msra.mxu0 %v765_v10  ;;  %1133 = vmatprep.subr.mxu1 %v768_v13  ;;  %v894_v10 = vld [vmem:[#allocation2 + $0x768] sm:$0xff]  ;;  %v903_v13 = vld [vmem:[#allocation2 + $0x7b0] sm:$0xff] }
  0x6b   : > { %1064 = vmatprep.subr.mxu0 %v758_v12  ;;  %1134 = vmatpush1.msra.mxu1 %v767_v15  ;;  %v893_v12 = vld [vmem:[#allocation2 + $0x760] sm:$0xff]  ;;  %v896_v15 = vld [vmem:[#allocation2 + $0x778] sm:$0xff] }
  0x6c   : > { %1065 = vmatpush1.msra.mxu0 %v757_v14  ;;  %1135 = vmatprep.subr.mxu1 %v760_v17  ;;  %v886_v14 = vld [vmem:[#allocation2 + $0x728] sm:$0xff]  ;;  %v895_v17 = vld [vmem:[#allocation2 + $0x770] sm:$0xff] }
  0x6d   : > { %1066 = vmatprep.subr.mxu0 %v750_v16  ;;  %1136 = vmatpush1.msra.mxu1 %v759_v19  ;;  %v885_v16 = vld [vmem:[#allocation2 + $0x720] sm:$0xff]  ;;  %v888_v19 = vld [vmem:[#allocation2 + $0x738] sm:$0xff] }
  0x6e   : > { %1067 = vmatpush1.msra.mxu0 %v749_v18  ;;  %1137 = vmatprep.subr.mxu1 %v752_v21  ;;  %v878_v18 = vld [vmem:[#allocation2 + $0x6e8] sm:$0xff]  ;;  %v887_v21 = vld [vmem:[#allocation2 + $0x730] sm:$0xff] }
  0x6f   : > { %1068 = vmatprep.subr.mxu0 %v742_v20  ;;  %1138 = vmatpush1.msra.mxu1 %v751_v23  ;;  %v877_v20 = vld [vmem:[#allocation2 + $0x6e0] sm:$0xff]  ;;  %v880_v23 = vld [vmem:[#allocation2 + $0x6f8] sm:$0xff] }
  0x70   : > { %1069 = vmatpush1.msra.mxu0 %v741_v22  ;;  %1139 = vmatprep.subr.mxu1 %v744_v25  ;;  %v870_v22 = vld [vmem:[#allocation2 + $0x6a8] sm:$0xff]  ;;  %v879_v25 = vld [vmem:[#allocation2 + $0x6f0] sm:$0xff] }
  0x71   : > { %1070 = vmatprep.subr.mxu0 %v734_v24  ;;  %1140 = vmatpush1.msra.mxu1 %v743_v27  ;;  %v869_v24 = vld [vmem:[#allocation2 + $0x6a0] sm:$0xff]  ;;  %v872_v27 = vld [vmem:[#allocation2 + $0x6b8] sm:$0xff] }
  0x72   : > { %1071 = vmatpush1.msra.mxu0 %v733_v26  ;;  %1141 = vmatprep.subr.mxu1 %v736_v29  ;;  %v862_v26 = vld [vmem:[#allocation2 + $0x668] sm:$0xff]  ;;  %v871_v29 = vld [vmem:[#allocation2 + $0x6b0] sm:$0xff] }
  0x73   : > { %1072 = vmatprep.subr.mxu0 %v726_v28  ;;  %1142 = vmatpush1.msra.mxu1 %v735_v31  ;;  %v861_v28 = vld [vmem:[#allocation2 + $0x660] sm:$0xff]  ;;  %v864_v31 = vld [vmem:[#allocation2 + $0x678] sm:$0xff] }
  0x74   : > { %1073 = vmatpush1.msra.mxu0 %v725_v30  ;;  %1143 = vmatprep.subr.mxu1 %v728_v33  ;;  %v854_v30 = vld [vmem:[#allocation2 + $0x628] sm:$0xff]  ;;  %v863_v33 = vld [vmem:[#allocation2 + $0x670] sm:$0xff] }
  0x75   : > { %1074 = vmatprep.subr.mxu0 %v718_v32  ;;  %1144 = vmatpush1.msra.mxu1 %v727_v35  ;;  %v853_v32 = vld [vmem:[#allocation2 + $0x620] sm:$0xff]  ;;  %v856_v35 = vld [vmem:[#allocation2 + $0x638] sm:$0xff] }
  0x76   : > { %1075 = vmatpush1.msra.mxu0 %v717_v34  ;;  %1145 = vmatprep.subr.mxu1 %v720_v37  ;;  %v846_v34 = vld [vmem:[#allocation2 + $0x5e8] sm:$0xff]  ;;  %v855_v37 = vld [vmem:[#allocation2 + $0x630] sm:$0xff] }
  0x77   : > { %1076 = vmatprep.subr.mxu0 %v710_v36  ;;  %1146 = vmatpush1.msra.mxu1 %v719_v39  ;;  %v845_v36 = vld [vmem:[#allocation2 + $0x5e0] sm:$0xff]  ;;  %v848_v39 = vld [vmem:[#allocation2 + $0x5f8] sm:$0xff] }
  0x78   : > { %1077 = vmatpush1.msra.mxu0 %v709_v38  ;;  %1147 = vmatprep.subr.mxu1 %v712_v41  ;;  %v838_v38 = vld [vmem:[#allocation2 + $0x5a8] sm:$0xff]  ;;  %v847_v41 = vld [vmem:[#allocation2 + $0x5f0] sm:$0xff] }
  0x79   : > { %1078 = vmatprep.subr.mxu0 %v702_v40  ;;  %1148 = vmatpush1.msra.mxu1 %v711_v43  ;;  %v837_v40 = vld [vmem:[#allocation2 + $0x5a0] sm:$0xff]  ;;  %v840_v43 = vld [vmem:[#allocation2 + $0x5b8] sm:$0xff] }
  0x7a   : > { %1079 = vmatpush1.msra.mxu0 %v701_v42  ;;  %1149 = vmatprep.subr.mxu1 %v704_v45  ;;  %v830_v42 = vld [vmem:[#allocation2 + $0x568] sm:$0xff]  ;;  %v839_v45 = vld [vmem:[#allocation2 + $0x5b0] sm:$0xff] }
  0x7b   : > { %1080 = vmatprep.subr.mxu0 %v694_v44  ;;  %1150 = vmatpush1.msra.mxu1 %v703_v47  ;;  %v829_v44 = vld [vmem:[#allocation2 + $0x560] sm:$0xff]  ;;  %v832_v47 = vld [vmem:[#allocation2 + $0x578] sm:$0xff] }
  0x7c   : > { %1081 = vmatpush1.msra.mxu0 %v693_v46  ;;  %1151 = vmatprep.subr.mxu1 %v696_v49  ;;  %v822_v46 = vld [vmem:[#allocation2 + $0x528] sm:$0xff]  ;;  %v831_v49 = vld [vmem:[#allocation2 + $0x570] sm:$0xff] }
  0x7d   : > { %1082 = vmatprep.subr.mxu0 %v686_v48  ;;  %1152 = vmatpush1.msra.mxu1 %v695_v51  ;;  %v821_v48 = vld [vmem:[#allocation2 + $0x520] sm:$0xff]  ;;  %v824_v51 = vld [vmem:[#allocation2 + $0x538] sm:$0xff] }
  0x7e   : > { %1083 = vmatpush1.msra.mxu0 %v685_v50  ;;  %1153 = vmatprep.subr.mxu1 %v688_v53  ;;  %v814_v50 = vld [vmem:[#allocation2 + $0x4e8] sm:$0xff]  ;;  %v823_v53 = vld [vmem:[#allocation2 + $0x530] sm:$0xff] }
  0x7f   : > { %1084 = vmatprep.subr.mxu0 %v678_v52  ;;  %1154 = vmatpush1.msra.mxu1 %v687_v56  ;;  %v813_v52 = vld [vmem:[#allocation2 + $0x4e0] sm:$0xff]  ;;  %v816_v56 = vld [vmem:[#allocation2 + $0x4f8] sm:$0xff] }
  0x80   : > { %1085 = vmatpush1.msra.mxu0 %v677_v55  ;;  %1155 = vmatprep.subr.mxu1 %v680_v58  ;;  %v806_v55 = vld [vmem:[#allocation2 + $0x4a8] sm:$0xff]  ;;  %v815_v58 = vld [vmem:[#allocation2 + $0x4f0] sm:$0xff] }
  0x81   : > { %1086 = vmatprep.subr.mxu0 %v670_v57  ;;  %1156 = vmatpush1.msra.mxu1 %v679_v60  ;;  %v805_v57 = vld [vmem:[#allocation2 + $0x4a0] sm:$0xff]  ;;  %v808_v60 = vld [vmem:[#allocation2 + $0x4b8] sm:$0xff] }
  0x82   : > { %1087 = vmatpush1.msra.mxu0 %v669_v59  ;;  %1157 = vmatprep.subr.mxu1 %v672_v63  ;;  %v798_v59 = vld [vmem:[#allocation2 + $0x468] sm:$0xff]  ;;  %v807_v63 = vld [vmem:[#allocation2 + $0x4b0] sm:$0xff] }
  0x83   : > { %1088 = vmatprep.subr.mxu0 %v662_v62  ;;  %1158 = vmatpush1.msra.mxu1 %v671_v1  ;;  %v797_v62 = vld [vmem:[#allocation2 + $0x460] sm:$0xff]  ;;  %v800_v1 = vld [vmem:[#allocation2 + $0x478] sm:$0xff] }
  0x84   : > { %1089 = vmatpush1.msra.mxu0 %v661_v0  ;;  %1159 = vmatprep.subr.mxu1 %v664_v3  ;;  %v790_v0 = vld [vmem:[#allocation2 + $0x428] sm:$0xff]  ;;  %v799_v3 = vld [vmem:[#allocation2 + $0x470] sm:$0xff] }
  0x85   : > { %1090 = vmatprep.subr.mxu0 %v910_v2  ;;  %1160 = vmatpush1.msra.mxu1 %v663_v5  ;;  %v789_v2 = vld [vmem:[#allocation2 + $0x420] sm:$0xff]  ;;  %v791_v5 = vld [vmem:[#allocation2 + $0x430] sm:$0xff] }
  0x86   : > { %1091 = vmatpush2.msra.mxu0 %v909_v4  ;;  %1161 = vmatprep.subr.mxu1 %v912_v7  ;;  %v792_v4 = vld [vmem:[#allocation2 + $0x438] sm:$0xff]  ;;  %v12263_v7 = vld [vmem:[%s16991_s2 + $0x30] sm:$0xff] }
  0x87   : > { %1092 = vmatprep.subr.mxu0 %v902_v6  ;;  %1162 = vmatpush2.msra.mxu1 %v911_v9  ;;  %v12256_v6 = vld [vmem:[%s16991_s2 + $0x10] sm:$0xff] }
  0x88   : > { %1093 = vmatpush2.msra.mxu0 %v901_v8  ;;  %1163 = vmatprep.subr.mxu1 %v904_v11 }
  0x89   : > { %1094 = vmatprep.subr.mxu0 %v894_v10  ;;  %1164 = vmatpush2.msra.mxu1 %v903_v13 }
  0x8a   : > { %1095 = vmatpush2.msra.mxu0 %v893_v12  ;;  %1165 = vmatprep.subr.mxu1 %v896_v15  ;;  %v2615_v15 = vld [vmem:[%s16992_s4] sm:$0xff] }
  0x8b   : > { %1096 = vmatprep.subr.mxu0 %v886_v14  ;;  %1166 = vmatpush2.msra.mxu1 %v895_v17  ;;  %v2616_v14 = vld [vmem:[%s16992_s4 + $0x8] sm:$0xf] }
  0x8c   : > { %1097 = vmatpush2.msra.mxu0 %v885_v16  ;;  %1167 = vmatprep.subr.mxu1 %v888_v19  ;;  %v13951_v16 = vmov 0   ;;  %v12270_v19 = vld [vmem:[%s16991_s2 + $0x50] sm:$0xff] }
  0x8d   : > { %1098 = vmatprep.subr.mxu0 %v878_v18  ;;  %1168 = vmatpush2.msra.mxu1 %v887_v21  ;;  %v12257_v18 = vld [vmem:[%s16991_s2 + $0x18] sm:$0xf] }
  0x8e   : > { %1099 = vmatpush2.msra.mxu0 %v877_v20  ;;  %1169 = vmatprep.subr.mxu1 %v880_v23  ;;  %v12277_v23 = vld [vmem:[%s16991_s2 + $0x70] sm:$0xff] }
  0x8f   : > { %1100 = vmatprep.subr.mxu0 %v870_v22  ;;  %1170 = vmatpush2.msra.mxu1 %v879_v25  ;;  %v12264_v22 = vld [vmem:[%s16991_s2 + $0x38] sm:$0xf] }
  0x90   : > { %1101 = vmatpush2.msra.mxu0 %v869_v24  ;;  %1171 = vmatprep.subr.mxu1 %v872_v27  ;;  %v12271_v25 = vld [vmem:[%s16991_s2 + $0x58] sm:$0xf] }
  0x91   : > { %1102 = vmatprep.subr.mxu0 %v862_v26  ;;  %1172 = vmatpush2.msra.mxu1 %v871_v29  ;;  %v12284_v26 = vld [vmem:[%s16991_s2 + $0x90] sm:$0xff]  ;;  %v12278_v27 = vld [vmem:[%s16991_s2 + $0x78] sm:$0xf] }
  0x92   : > { %1103 = vmatpush2.msra.mxu0 %v861_v28  ;;  %1173 = vmatprep.subr.mxu1 %v864_v31  ;;  %v12291_v28 = vld [vmem:[%s16991_s2 + $0xb0] sm:$0xff] }
  0x93   : > { %1104 = vmatprep.subr.mxu0 %v854_v30  ;;  %1174 = vmatpush2.msra.mxu1 %v863_v33  ;;  %v12285_v30 = vld [vmem:[%s16991_s2 + $0x98] sm:$0xf]  ;;  %v12298_v31 = vld [vmem:[%s16991_s2 + $0xd0] sm:$0xff] }
  0x94   : > { %1105 = vmatpush2.msra.mxu0 %v853_v32  ;;  %1175 = vmatprep.subr.mxu1 %v856_v35  ;;  %v12292_v33 = vld [vmem:[%s16991_s2 + $0xb8] sm:$0xf] }
  0x95   : > { %1106 = vmatprep.subr.mxu0 %v846_v34  ;;  %1176 = vmatpush2.msra.mxu1 %v855_v37  ;;  %v12305_v34 = vld [vmem:[%s16991_s2 + $0xf0] sm:$0xff] }
  0x96   : > { %1107 = vmatpush2.msra.mxu0 %v845_v36  ;;  %1177 = vmatprep.subr.mxu1 %v848_v39  ;;  %v12299_v36 = vld [vmem:[%s16991_s2 + $0xd8] sm:$0xf]  ;;  %v1200_v39 = vld [vmem:[%s16991_s2] sm:$0xff] }
  0x97   : > { %1108 = vmatprep.subr.mxu0 %v838_v38  ;;  %1178 = vmatpush2.msra.mxu1 %v847_v41  ;;  %v12306_v38 = vld [vmem:[%s16991_s2 + $0xf8] sm:$0xf]  ;;  %v12261_v41 = vld [vmem:[%s16991_s2 + $0x20] sm:$0xff] }
  0x98   : > { %1109 = vmatpush2.msra.mxu0 %v837_v40  ;;  %1179 = vmatprep.subr.mxu1 %v840_v43  ;;  %v1201_v40 = vld [vmem:[%s16991_s2 + $0x8] sm:$0xf]  ;;  %v12268_v43 = vld [vmem:[%s16991_s2 + $0x40] sm:$0xff] }
  0x99   : > { %1110 = vmatprep.subr.mxu0 %v830_v42  ;;  %1180 = vmatpush2.msra.mxu1 %v839_v45  ;;  %v12262_v42 = vld [vmem:[%s16991_s2 + $0x28] sm:$0xf]  ;;  %v12275_v45 = vld [vmem:[%s16991_s2 + $0x60] sm:$0xff] }
  0x9a   : > { %1111 = vmatpush2.msra.mxu0 %v829_v44  ;;  %1181 = vmatprep.subr.mxu1 %v832_v47  ;;  %v12269_v44 = vld [vmem:[%s16991_s2 + $0x48] sm:$0xf]  ;;  %v12282_v47 = vld [vmem:[%s16991_s2 + $0x80] sm:$0xff] }
  0x9b   : > { %1112 = vmatprep.subr.mxu0 %v822_v46  ;;  %1182 = vmatpush2.msra.mxu1 %v831_v49  ;;  %v12276_v46 = vld [vmem:[%s16991_s2 + $0x68] sm:$0xf]  ;;  %v12289_v49 = vld [vmem:[%s16991_s2 + $0xa0] sm:$0xff] }
  0x9c   : > { %1113 = vmatpush2.msra.mxu0 %v821_v48  ;;  %1183 = vmatprep.subr.mxu1 %v824_v51  ;;  %v12283_v48 = vld [vmem:[%s16991_s2 + $0x88] sm:$0xf]  ;;  %v12296_v51 = vld [vmem:[%s16991_s2 + $0xc0] sm:$0xff] }
  0x9d   : > { %1114 = vmatprep.subr.mxu0 %v814_v50  ;;  %1184 = vmatpush2.msra.mxu1 %v823_v53  ;;  %v12290_v50 = vld [vmem:[%s16991_s2 + $0xa8] sm:$0xf] }
  0x9e   : > { %1115 = vmatpush2.msra.mxu0 %v813_v52  ;;  %1185 = vmatprep.subr.mxu1 %v816_v56  ;;  %v12303_v52 = vld [vmem:[%s16991_s2 + $0xe0] sm:$0xff]  ;;  %v12297_v53 = vld [vmem:[%s16991_s2 + $0xc8] sm:$0xf]  ;;  %v2646_v56 = vld [vmem:[%s16951_s6 + $0x78] sm:$0xff] }
  0x9f   : > { %1116 = vmatprep.subr.mxu0 %v806_v55  ;;  %1186 = vmatpush2.msra.mxu1 %v815_v58  ;;  %v12304_v55 = vld [vmem:[%s16991_s2 + $0xe8] sm:$0xf]  ;;  %s16994_s2 = smov 108  }
  0xa0   : > { %1117 = vmatpush2.msra.mxu0 %v805_v57  ;;  %1187 = vmatprep.subr.mxu1 %v808_v60  ;;  %v2645_v57 = vld [vmem:[%s16951_s6 + $0x70] sm:$0xff]  ;;  %v2644_v58 = vld [vmem:[%s16951_s6 + $0x68] sm:$0xff]  ;;  %v2642_v60 = vld [vmem:[%s16951_s6 + $0x58] sm:$0xff] }
  0xa1   : > { %1118 = vmatprep.subr.mxu0 %v798_v59  ;;  %1188 = vmatpush2.msra.mxu1 %v807_v63  ;;  %v2643_v59 = vld [vmem:[%s16951_s6 + $0x60] sm:$0xff]  ;;  %v2640_v63 = vld [vmem:[%s16951_s6 + $0x48] sm:$0xff] }
  0xa2   : > { %1119 = vmatpush2.msra.mxu0 %v797_v62  ;;  %1189 = vmatprep.subr.mxu1 %v800_v1  ;;  %v2641_v62 = vld [vmem:[%s16951_s6 + $0x50] sm:$0xff]  ;;  %v2638_v1 = vld [vmem:[%s16951_s6 + $0x38] sm:$0xff] }
  0xa3   : > { %1120 = vmatprep.subr.mxu0 %v790_v0  ;;  %1122 = vmatprep.mubr.f32.mxu0 %v14119_v61  ;;  %v2639_v0 = vld [vmem:[%s16951_s6 + $0x40] sm:$0xff] }
  0xa4   : > { %1121 = vmatpush2.msra.mxu0 %v789_v2  ;;  %1190 = vmatpush2.msra.mxu1 %v799_v3  ;;  %v2637_v2 = vld [vmem:[%s16951_s6 + $0x30] sm:$0xff]  ;;  %v2636_v3 = vld [vmem:[%s16951_s6 + $0x28] sm:$0xff] }
  0xa5   : > { %1123 = vmatmul.mubr.f32.vlgmr.msra.gmra.mxu0 %v14115_v54  ;;  %1191 = vmatprep.subr.mxu1 %v792_v4  ;;  %v2635_v4 = vld [vmem:[%s16951_s6 + $0x20] sm:$0xff] }
  0xa6   : > { %1193 = vmatprep.mubr.f32.mxu1 %v14119_v61  ;;  %1192 = vmatpush2.msra.mxu1 %v791_v5  ;;  %v2634_v5 = vld [vmem:[%s16951_s6 + $0x18] sm:$0xff] }
  0xa7   : > { %1194 = vmatmul.mubr.f32.vlgmr.msra.gmra.mxu1 %v14115_v54  ;;  %13091 = vmatprep.mubr.msk.f32.mxu0 %vm1208_vm0, %v12256_v6  ;;  %v2633_v6 = vld [vmem:[%s16951_s6 + $0x10] sm:$0xff] }
  0xa8   : > { %13096 = vmatprep.mubr.msk.f32.mxu1 %vm1208_vm0, %v12263_v7  ;;  %13898 = vset.pattern.permute.xlu1 %v13951_v16  ;;  %v2632_v7 = vld [vmem:[%s16951_s6 + $0x8] sm:$0xff] }
  0xa9   : > { %13897 = vset.pattern.permute.xlu0 %v13951_v16 }
 0x123   : > { %v14137_v8 = vpop.f32.mrf.mxu0 }
 0x124   : > { %1206 = vrot.lane.b32.xlu0 %v14137_v8, %s16975_s26 }
 0x125   : > { %v14141_v54 = vpop.f32.mrf.mxu1  ;;  %v14145_v61 = vpop.f32.mrf.mxu0 }
 0x126   : > { %1392 = vrot.lane.b32.xlu1 %v14141_v54, %s16975_s26 }
 0x127   : > { %v14147_v9 = vpop.f32.mrf.mxu1 }
 0x128   : > { %1300 = vrot.lane.b32.xlu0 %v14145_v61, %s16975_s26 }
 0x12a   : > { %1484 = vrot.lane.b32.xlu1 %v14147_v9, %s16975_s26 }
 0x165   : > { %v14153_v10 = vpop.f32.mrf.mxu0 }
 0x166   : > { %1576 = vrot.lane.b32.xlu0 %v14153_v10, %s16975_s26 }
 0x167   : > { %v14157_v11 = vpop.f32.mrf.mxu0  ;;  %v14159_v12 = vpop.f32.mrf.mxu1 }
 0x168   : > { %1668 = vrot.lane.b32.xlu1 %v14157_v11, %s16975_s26 }
 0x169   : > { %v14165_v13 = vpop.f32.mrf.mxu1 }
 0x16a   : > { %1760 = vrot.lane.b32.xlu0 %v14159_v12, %s16975_s26 }
 0x16c   : > { %1852 = vrot.lane.b32.xlu1 %v14165_v13, %s16975_s26 }
 0x16e   : > { %2619 = vperm.xlu0 %13897, %v2615_v15  }
 0x170   : > { %2624 = vperm.xlu1 %13898, %v2616_v14  }
 0x196   : > { %v1207_v17 = vpop.permute.xlu0 %1206 }
 0x197   : > { %13089 = vmatprep.subr.msk.mxu0 %vm1215_vm1, %v1207_v17 }
 0x198   : > { %v1393_v20 = vpop.permute.xlu1 %1392  ;;  %13090 = vmatpush3.msk.msra.mxu0 %vm1215_vm1, %v1207_v17 }
 0x199   : > { %13099 = vmatprep.subr.msk.mxu0 %vm1215_vm1, %v1393_v20  ;;  %13092 = vmatmul.mubr.msk.f32.vlgmr.msra.gmra.mxu0 %vm1208_vm0, %v12257_v18 }
 0x19a   : > { %v1301_v21 = vpop.permute.xlu0 %1300  ;;  %13100 = vmatpush3.msk.msra.mxu0 %vm1215_vm1, %v1393_v20  ;;  %13101 = vmatprep.mubr.msk.f32.mxu0 %vm1208_vm0, %v12270_v19 }
 0x19b   : > { %13094 = vmatprep.subr.msk.mxu1 %vm1215_vm1, %v1301_v21 }
 0x19c   : > { %v1485_v24 = vpop.permute.xlu1 %1484  ;;  %13095 = vmatpush3.msk.msra.mxu1 %vm1215_vm1, %v1301_v21 }
 0x19d   : > { %13104 = vmatprep.subr.msk.mxu1 %vm1215_vm1, %v1485_v24  ;;  %13097 = vmatmul.mubr.msk.f32.vlgmr.msra.gmra.mxu1 %vm1208_vm0, %v12264_v22 }
 0x19e   : > { %13105 = vmatpush3.msk.msra.mxu1 %vm1215_vm1, %v1485_v24  ;;  %13106 = vmatprep.mubr.msk.f32.mxu1 %vm1208_vm0, %v12277_v23 }
 0x19f   : > { %13102 = vmatmul.mubr.msk.f32.vlgmr.msra.gmra.mxu0 %vm1208_vm0, %v12271_v25 }
 0x1a0   : > { %13111 = vmatprep.mubr.msk.f32.mxu0 %vm1208_vm0, %v12284_v26 }
 0x1a1   : > { %13107 = vmatmul.mubr.msk.f32.vlgmr.msra.gmra.mxu1 %vm1208_vm0, %v12278_v27 }
 0x1a2   : > { %13116 = vmatprep.mubr.msk.f32.mxu1 %vm1208_vm0, %v12291_v28 }
 0x1d8   : > { %v1577_v29 = vpop.permute.xlu0 %1576 }
 0x1d9   : > { %13109 = vmatprep.subr.msk.mxu0 %vm1215_vm1, %v1577_v29 }
 0x1da   : > { %13110 = vmatpush3.msk.msra.mxu0 %vm1215_vm1, %v1577_v29  ;;  %v1669_v32 = vpop.permute.xlu1 %1668 }
 0x1db   : > { %13112 = vmatmul.mubr.msk.f32.vlgmr.msra.gmra.mxu0 %vm1208_vm0, %v12285_v30  ;;  %13114 = vmatprep.subr.msk.mxu1 %vm1215_vm1, %v1669_v32 }
 0x1dc   : > { %v1761_v35 = vpop.permute.xlu0 %1760  ;;  %13115 = vmatpush3.msk.msra.mxu1 %vm1215_vm1, %v1669_v32  ;;  %13121 = vmatprep.mubr.msk.f32.mxu0 %vm1208_vm0, %v12298_v31 }
 0x1dd   : > { %13117 = vmatmul.mubr.msk.f32.vlgmr.msra.gmra.mxu1 %vm1208_vm0, %v12292_v33  ;;  %13119 = vmatprep.subr.msk.mxu0 %vm1215_vm1, %v1761_v35 }
 0x1de   : > { %13120 = vmatpush3.msk.msra.mxu0 %vm1215_vm1, %v1761_v35  ;;  %v1853_v37 = vpop.permute.xlu1 %1852  ;;  %13126 = vmatprep.mubr.msk.f32.mxu1 %vm1208_vm0, %v12305_v34 }
 0x1df   : > { %13122 = vmatmul.mubr.msk.f32.vlgmr.msra.gmra.mxu0 %vm1208_vm0, %v12299_v36  ;;  %13124 = vmatprep.subr.msk.mxu1 %vm1215_vm1, %v1853_v37 }
 0x1e0   : > { %13129 = vmatprep.subr.msk.mxu0 %vm1215_vm1, %v14137_v8  ;;  %13125 = vmatpush3.msk.msra.mxu1 %vm1215_vm1, %v1853_v37 }
 0x1e1   : > { %13130 = vmatpush3.msk.msra.mxu0 %vm1215_vm1, %v14137_v8  ;;  %13127 = vmatmul.mubr.msk.f32.vlgmr.msra.gmra.mxu1 %vm1208_vm0, %v12306_v38  ;;  %v2631_v8 = vld [vmem:[%s16951_s6] sm:$0xff] }
 0x1e2   : > { %13134 = vmatprep.subr.msk.mxu1 %vm1215_vm1, %v14145_v61  ;;  %13139 = vmatprep.subr.msk.mxu0 %vm1215_vm1, %v14141_v54 }
 0x1e3   : > { %13131 = vmatprep.mubr.msk.f32.mxu0 %vm1208_vm0, %v1200_v39  ;;  %13135 = vmatpush3.msk.msra.mxu1 %vm1215_vm1, %v14145_v61 }
 0x1e4   : > { %13132 = vmatmul.mubr.msk.f32.vlgmr.msra.gmra.mxu0 %vm1208_vm0, %v1201_v40  ;;  %13144 = vmatprep.subr.msk.mxu1 %vm1215_vm1, %v14147_v9 }
 0x1e5   : > { %13140 = vmatpush3.msk.msra.mxu0 %vm1215_vm1, %v14141_v54  ;;  %13136 = vmatprep.mubr.msk.f32.mxu1 %vm1208_vm0, %v12261_v41  ;;  %v13952_v54 = vmov 0.0  }
 0x1e6   : > { %13149 = vmatprep.subr.msk.mxu0 %vm1215_vm1, %v14153_v10  ;;  %13137 = vmatmul.mubr.msk.f32.vlgmr.msra.gmra.mxu1 %vm1208_vm0, %v12262_v42 }
 0x1e7   : > { %13145 = vmatpush3.msk.msra.mxu1 %vm1215_vm1, %v14147_v9  ;;  %13141 = vmatprep.mubr.msk.f32.mxu0 %vm1208_vm0, %v12268_v43 }
 0x1e8   : > { %13154 = vmatprep.subr.msk.mxu1 %vm1215_vm1, %v14157_v11  ;;  %13142 = vmatmul.mubr.msk.f32.vlgmr.msra.gmra.mxu0 %vm1208_vm0, %v12269_v44 }
 0x1e9   : > { %13150 = vmatpush3.msk.msra.mxu0 %vm1215_vm1, %v14153_v10  ;;  %13146 = vmatprep.mubr.msk.f32.mxu1 %vm1208_vm0, %v12275_v45 }
 0x1ea   : > { %13159 = vmatprep.subr.msk.mxu0 %vm1215_vm1, %v14159_v12  ;;  %13147 = vmatmul.mubr.msk.f32.vlgmr.msra.gmra.mxu1 %vm1208_vm0, %v12276_v46 }
 0x1eb   : > { %13155 = vmatpush3.msk.msra.mxu1 %vm1215_vm1, %v14157_v11  ;;  %13151 = vmatprep.mubr.msk.f32.mxu0 %vm1208_vm0, %v12282_v47 }
 0x1ec   : > { %13164 = vmatprep.subr.msk.mxu1 %vm1215_vm1, %v14165_v13  ;;  %13152 = vmatmul.mubr.msk.f32.vlgmr.msra.gmra.mxu0 %vm1208_vm0, %v12283_v48 }
 0x1ed   : > { %13160 = vmatpush3.msk.msra.mxu0 %vm1215_vm1, %v14159_v12  ;;  %13156 = vmatprep.mubr.msk.f32.mxu1 %vm1208_vm0, %v12289_v49 }
 0x1ee   : > { %13157 = vmatmul.mubr.msk.f32.vlgmr.msra.gmra.mxu1 %vm1208_vm0, %v12290_v50  ;;  %13161 = vmatprep.mubr.msk.f32.mxu0 %vm1208_vm0, %v12296_v51 }
 0x1ef   : > { %13165 = vmatpush3.msk.msra.mxu1 %vm1215_vm1, %v14165_v13  ;;  %13166 = vmatprep.mubr.msk.f32.mxu1 %vm1208_vm0, %v12303_v52 }
 0x1f0   : > { %13162 = vmatmul.mubr.msk.f32.vlgmr.msra.gmra.mxu0 %vm1208_vm0, %v12297_v53  ;;  %2670 = vmatprep.subr.mxu0 %v2646_v56 }
 0x1f1   : > { %2671 = vmatpush1.msra.mxu0 %v2645_v57  ;;  %2718 = vmatprep.mubr.f32.mxu0 %v13952_v54 }
 0x1f2   : > { %13167 = vmatmul.mubr.msk.f32.vlgmr.msra.gmra.mxu1 %vm1208_vm0, %v12304_v55  ;;  %2672 = vmatprep.subr.mxu0 %v2644_v58 }
 0x1f3   : > { %2673 = vmatpush1.msra.mxu0 %v2643_v59  ;;  %13169 = vmatprep.subr.mxu1 %v13952_v54 }
 0x1f4   : > { %2674 = vmatprep.subr.mxu0 %v2642_v60  ;;  %13173 = vmatprep.mubr.msk.f32.mxu1 %vm13953_vm3, %v13952_v54 }
 0x1f5   : > { %2675 = vmatpush1.msra.mxu0 %v2641_v62 }
 0x1f6   : > { %2676 = vmatprep.subr.mxu0 %v2640_v63 }
 0x1f7   : > { %2677 = vmatpush1.msra.mxu0 %v2639_v0 }
 0x1f8   : > { %2678 = vmatprep.subr.mxu0 %v2638_v1 }
 0x1f9   : > { %2679 = vmatpush1.msra.mxu0 %v2637_v2 }
 0x1fa   : > { %2680 = vmatprep.subr.mxu0 %v2636_v3 }
 0x1fb   : > { %2681 = vmatpush1.msra.mxu0 %v2635_v4 }
 0x1fc   : > { %2682 = vmatprep.subr.mxu0 %v2634_v5 }
 0x1fd   : > { %2683 = vmatpush1.msra.mxu0 %v2633_v6  ;;  %v2620_v6 = vpop.permute.xlu0 %2619 }
 0x1fe   : > { %2684 = vmatprep.subr.mxu0 %v2632_v7 }
 0x1ff   : > { %2685 = vmatpush1.msra.mxu0 %v2631_v8 }
 0x200   : > { %13195 = vmatprep.subr.mxu0 %v13952_v54 }
 0x259   : > { %v13093_v61 = vpop.f32.mrf.mxu0 }
 0x25b   : > { %v1284_v10 = vpop.f32.mrf.mxu0 }
 0x25d   : > { %v13098_v9 = vpop.f32.mrf.mxu1 }
 0x25f   : > { %v1376_v11 = vpop.f32.mrf.mxu1  ;;  %v13103_v12 = vpop.f32.mrf.mxu0 }
 0x261   : > { %v13108_v13 = vpop.f32.mrf.mxu1  ;;  %v1468_v14 = vpop.f32.mrf.mxu0 }
 0x263   : > { %v1560_v15 = vpop.f32.mrf.mxu1 }
 0x29b   : > { %v13113_v16 = vpop.f32.mrf.mxu0 }
 0x29d   : > { %v1652_v17 = vpop.f32.mrf.mxu0  ;;  %v13118_v18 = vpop.f32.mrf.mxu1 }
 0x29f   : > { %v1744_v19 = vpop.f32.mrf.mxu1  ;;  %v13123_v20 = vpop.f32.mrf.mxu0 }
 0x2a1   : > { %v1836_v21 = vpop.f32.mrf.mxu0  ;;  %v13128_v22 = vpop.f32.mrf.mxu1 }
 0x2a3   : > { %v1928_v23 = vpop.f32.mrf.mxu1 }
 0x2a4   : > { %v13133_v24 = vpop.f32.mrf.mxu0 }
 0x2a5   : > { %v2017_v39 = vadd.f32 %v13133_v24, %v13093_v61  ;;  %v2625_v61 = vpop.permute.xlu1 %2624 }
 0x2a6   : > { %v2011_v25 = vpop.f32.mrf.mxu0  ;;  %v13138_v26 = vpop.f32.mrf.mxu1 }
 0x2a7   : > { %v2100_v41 = vadd.f32 %v13138_v26, %v13098_v9  ;;  %v2012_v51 = vadd.f32 %v2011_v25, %v1284_v10 }
 0x2a8   : > { %v2094_v27 = vpop.f32.mrf.mxu1  ;;  %v13143_v28 = vpop.f32.mrf.mxu0 }
 0x2a9   : > { %v2095_v42 = vadd.f32 %v2094_v27, %v1376_v11  ;;  %v2183_v43 = vadd.f32 %v13143_v28, %v13103_v12  ;;  %v2602_v62 = vadd.f32 %v2100_v41, %v2017_v39 }
 0x2aa   : > { %v2177_v29 = vpop.f32.mrf.mxu0  ;;  %v13148_v30 = vpop.f32.mrf.mxu1 }
 0x2ab   : > { %v2266_v35 = vadd.f32 %v13148_v30, %v13108_v13  ;;  %v2178_v44 = vadd.f32 %v2177_v29, %v1468_v14  ;;  %v2601_v63 = vadd.f32 %v2095_v42, %v2012_v51 }
 0x2ac   : > { %v2260_v31 = vpop.f32.mrf.mxu1  ;;  %v13153_v32 = vpop.f32.mrf.mxu0 }
 0x2ad   : > { %v2261_v36 = vadd.f32 %v2260_v31, %v1560_v15  ;;  %v2349_v47 = vadd.f32 %v13153_v32, %v13113_v16  ;;  %v2604_v52 = vadd.f32 %v2266_v35, %v2183_v43 }
 0x2ae   : > { %v2343_v33 = vpop.f32.mrf.mxu0  ;;  %v13158_v34 = vpop.f32.mrf.mxu1 }
 0x2af   : > { %v2432_v40 = vadd.f32 %v13158_v34, %v13118_v18  ;;  %v2603_v53 = vadd.f32 %v2261_v36, %v2178_v44  ;;  %v2344_v55 = vadd.f32 %v2343_v33, %v1652_v17  ;;  %v2610_v3 = vadd.f32 %v2604_v52, %v2602_v62  ;;  %v4348_v17 = vld [vmem:[%s16950_s5 + $0x8] sm:$0xff]  ;;  %v4347_v18 = vld [vmem:[%s16950_s5] sm:$0xff] }
 0x2b0   : > { %v2426_v37 = vpop.f32.mrf.mxu1  ;;  %v13163_v38 = vpop.f32.mrf.mxu0 }
 0x2b1   : > { %v2427_v48 = vadd.f32 %v2426_v37, %v1744_v19  ;;  %v2515_v49 = vadd.f32 %v13163_v38, %v13123_v20  ;;  %v2606_v57 = vadd.f32 %v2432_v40, %v2349_v47  ;;  %v2609_v4 = vadd.f32 %v2603_v53, %v2601_v63  ;;  %v4349_v19 = vld [vmem:[%s16950_s5 + $0x10] sm:$0xff] }
 0x2b2   : > { %v2509_v45 = vpop.f32.mrf.mxu0  ;;  %v13168_v46 = vpop.f32.mrf.mxu1 }
 0x2b3   : > { %v2598_v50 = vadd.f32 %v13168_v46, %v13128_v22  ;;  %v2510_v58 = vadd.f32 %v2509_v45, %v1836_v21  ;;  %v2605_v0 = vadd.f32 %v2427_v48, %v2344_v55 }
 0x2b4   : > { %v2592_v56 = vpop.f32.mrf.mxu1 }
 0x2b5   : > { %v2608_v59 = vadd.f32 %v2598_v50, %v2515_v49  ;;  %v2593_v60 = vadd.f32 %v2592_v56, %v1928_v23 }
 0x2b7   : > { %v2612_v1 = vadd.f32 %v2608_v59, %v2606_v57  ;;  %v2607_v2 = vadd.f32 %v2593_v60, %v2510_v58 }
 0x2b9   : > { %v2611_v5 = vadd.f32 %v2607_v2, %v2605_v0  ;;  %v2614_v7 = vadd.f32 %v2612_v1, %v2610_v3 }
 0x2bb   : > { %v2613_v8 = vadd.f32 %v2611_v5, %v2609_v4  ;;  %v2628_v10 = vadd.f32 %v2625_v61, %v2614_v7 }
 0x2bd   : > { %v2627_v9 = vadd.f32 %v2620_v6, %v2613_v8  ;;  %v2630_v12 = vmax.f32 %v2628_v10, 0.0 }
 0x2bf   : > { %v2629_v11 = vmax.f32 %v2627_v9, 0.0 }
 0x2c1   : > { %12334 = vmatmul.mubr.msk.f32.vlgmr.msra.gmra.mxu0 %vm2647_vm2, %v2629_v11 }
 0x2c2   : > { %2724 = vmatprep.mubr.f32.mxu0 %v13952_v54 }
 0x2c5   : > { %12335 = vmatmul.mubr.msk.f32.gmra.mxu0 %vm2647_vm2, %v2630_v12 }
 0x2c6   : > { %13199 = vmatprep.mubr.msk.f32.mxu0 %vm13953_vm3, %v13952_v54 }
 0x381   : > { %v14401_v13 = vpop.f32.mrf.mxu0 }
 0x382   : > { %2740 = vrot.lane.b32.xlu0 %v14401_v13, %s13954_s22 }
 0x383   : > { %v14405_v14 = vpop.f32.mrf.mxu0 }
 0x385   : > { %v14407_v15 = vpop.f32.mrf.mxu0 }
 0x386   : > { %2846 = vrot.lane.b32.xlu0 %v14401_v13, %s16977_s24  ;;  %2742 = vrot.lane.b32.xlu1 %v14407_v15, %s13954_s22 }
 0x387   : > { %v14421_v16 = vpop.f32.mrf.mxu0 }
 0x38a   : > { %3056 = vrot.lane.b32.xlu0 %v14407_v15, %s16971_s25  ;;  %2848 = vrot.lane.b32.xlu1 %v14407_v15, %s16977_s24 }
 0x38e   : > { %3054 = vrot.lane.b32.xlu0 %v14401_v13, %s16971_s25  ;;  %2952 = vrot.lane.b32.xlu1 %v14407_v15, %s16969_s3 }
 0x392   : > { %2950 = vrot.lane.b32.xlu1 %v14401_v13, %s16969_s3  ;;  %3266 = vrot.lane.b32.xlu0 %v14421_v16, %s16977_s24 }
 0x396   : > { %3264 = vrot.lane.b32.xlu0 %v14405_v14, %s16977_s24  ;;  %3162 = vrot.lane.b32.xlu1 %v14421_v16, %s13954_s22  ;;  %s13967_s24 = smov 76  }
 0x39a   : > { %3474 = vrot.lane.b32.xlu0 %v14421_v16, %s16971_s25  ;;  %3160 = vrot.lane.b32.xlu1 %v14405_v14, %s13954_s22 }
 0x39e   : > { %3472 = vrot.lane.b32.xlu0 %v14405_v14, %s16971_s25  ;;  %3370 = vrot.lane.b32.xlu1 %v14421_v16, %s16969_s3  ;;  %s13964_s25 = smov 84  }
 0x3a2   : > { %3659 = vrot.lane.b32.xlu0 %v14401_v13, %s16979_s27  ;;  %3368 = vrot.lane.b32.xlu1 %v14405_v14, %s16969_s3  ;;  %s13965_s3 = smov 92  }
 0x3a6   : > { %3853 = vrot.lane.b32.xlu0 %v14407_v15, %s16973_s28  ;;  %3661 = vrot.lane.b32.xlu1 %v14407_v15, %s16979_s27 }
 0x3aa   : > { %3851 = vrot.lane.b32.xlu0 %v14401_v13, %s16973_s28  ;;  %3757 = vrot.lane.b32.xlu1 %v14407_v15, %s16975_s26 }
 0x3ae   : > { %4038 = vrot.lane.b32.xlu0 %v14405_v14, %s16979_s27  ;;  %3755 = vrot.lane.b32.xlu1 %v14401_v13, %s16975_s26 }
 0x3b2   : > { %4232 = vrot.lane.b32.xlu0 %v14421_v16, %s16973_s28  ;;  %4040 = vrot.lane.b32.xlu1 %v14421_v16, %s16979_s27  ;;  %s13968_s27 = smov 120  }
 0x3b6   : > { %4230 = vrot.lane.b32.xlu0 %v14405_v14, %s16973_s28  ;;  %4136 = vrot.lane.b32.xlu1 %v14421_v16, %s16975_s26  ;;  %s16993_s28 = sld [smem:[#allocation9_spill]] }
 0x3ba   : > { %4357 = vperm.xlu0 %13897, %v4348_v17   ;;  %4134 = vrot.lane.b32.xlu1 %v14405_v14, %s16975_s26  ;;  %s13966_s26 = smov 68  }
 0x3bc   : > { %v12336_v22 = vld [vmem:[%s16993_s28 + $0x18] sm:$0xff]  ;;  %v12337_v24 = vld [vmem:[%s16993_s28 + $0x20] sm:$0xff]  ;;  %v12338_v27 = vld [vmem:[%s16993_s28 + $0x28] sm:$0xff] }
 0x3bd   : > { %v12356_v28 = vld [vmem:[%s16993_s28 + $0x78] sm:$0xff]  ;;  %v12346_v31 = vld [vmem:[%s16993_s28 + $0x48] sm:$0xff]  ;;  %v12357_v32 = vld [vmem:[%s16993_s28 + $0x80] sm:$0xff] }
 0x3be   : > { %4352 = vperm.xlu1 %13898, %v4347_v18   ;;  %v12347_v34 = vld [vmem:[%s16993_s28 + $0x50] sm:$0xff]  ;;  %v12358_v36 = vld [vmem:[%s16993_s28 + $0x88] sm:$0xff]  ;;  %v12348_v38 = vld [vmem:[%s16993_s28 + $0x58] sm:$0xff] }
 0x3bf   : > { %v12376_v39 = vld [vmem:[%s16993_s28 + $0xd8] sm:$0xff]  ;;  %v12366_v42 = vld [vmem:[%s16993_s28 + $0xa8] sm:$0xff]  ;;  %v12377_v43 = vld [vmem:[%s16993_s28 + $0xe0] sm:$0xff] }
 0x3c0   : > { %v12367_v45 = vld [vmem:[%s16993_s28 + $0xb0] sm:$0xff]  ;;  %v12378_v47 = vld [vmem:[%s16993_s28 + $0xe8] sm:$0xff]  ;;  %v12368_v48 = vld [vmem:[%s16993_s28 + $0xb8] sm:$0xff] }
 0x3c1   : > { %v12396_v49 = vld [vmem:[%s16993_s28 + $0x138] sm:$0xff]  ;;  %v12386_v51 = vld [vmem:[%s16993_s28 + $0x108] sm:$0xff]  ;;  %v12397_v52 = vld [vmem:[%s16993_s28 + $0x140] sm:$0xff] }
 0x3c2   : > { %4362 = vperm.xlu1 %13898, %v4349_v19   ;;  %v12387_v55 = vld [vmem:[%s16993_s28 + $0x110] sm:$0xff]  ;;  %v12398_v57 = vld [vmem:[%s16993_s28 + $0x148] sm:$0xff]  ;;  %v12388_v58 = vld [vmem:[%s16993_s28 + $0x118] sm:$0xff] }
 0x3c3   : > { %v2731_v60 = vld [vmem:[%s16993_s28] sm:$0xff]  ;;  %v12406_v62 = vld [vmem:[%s16993_s28 + $0x168] sm:$0xff]  ;;  %v12407_v1 = vld [vmem:[%s16993_s28 + $0x170] sm:$0xff] }
 0x3c4   : > { %v2732_v63 = vld [vmem:[%s16993_s28 + $0x8] sm:$0xff]  ;;  %v2733_v3 = vld [vmem:[%s16993_s28 + $0x10] sm:$0xff]  ;;  %v12408_v4 = vld [vmem:[%s16993_s28 + $0x178] sm:$0xff] }
 0x3c5   : > { %v12353_v5 = vld [vmem:[%s16993_s28 + $0x60] sm:$0xff]  ;;  %v12343_v7 = vld [vmem:[%s16993_s28 + $0x30] sm:$0xff]  ;;  %v12354_v8 = vld [vmem:[%s16993_s28 + $0x68] sm:$0xff] }
 0x3c6   : > { %v12344_v9 = vld [vmem:[%s16993_s28 + $0x38] sm:$0xff]  ;;  %v12355_v11 = vld [vmem:[%s16993_s28 + $0x70] sm:$0xff]  ;;  %v12345_v12 = vld [vmem:[%s16993_s28 + $0x40] sm:$0xff] }
 0x3c7   : > { %v12364_v18 = vld [vmem:[%s16993_s28 + $0x98] sm:$0xff] }
 0x3f4   : > { %v2741_v20 = vpop.permute.xlu0 %2740 }
 0x3f8   : > { %v2743_v21 = vpop.permute.xlu1 %2742  ;;  %v2847_v25 = vpop.permute.xlu0 %2846 }
 0x3f9   : > { %13170 = vmatpush3.msk.msra.mxu1 %vm2755_vm4, %v2743_v21  ;;  %v12365_v21 = vld [vmem:[%s16993_s28 + $0xa0] sm:$0xff] }
 0x3fa   : > { %13171 = vmatprep.subr.mxu1 %v13952_v54 }
 0x3fb   : > { %13172 = vmatpush3.msra.mxu1 %v2741_v20  ;;  %v12375_v20 = vld [vmem:[%s16993_s28 + $0xd0] sm:$0xff] }
 0x3fc   : > { %13174 = vmatmul.mubr.msk.f32.vlgmr.msra.gmra.mxu1 %vm2745_vm5, %v12336_v22  ;;  %13182 = vmatprep.subr.mxu1 %v13952_v54  ;;  %v2849_v23 = vpop.permute.xlu1 %2848  ;;  %v3057_v29 = vpop.permute.xlu0 %3056  ;;  %v12393_v22 = vld [vmem:[%s16993_s28 + $0x120] sm:$0xff] }
 0x3fd   : > { %13183 = vmatpush3.msk.msra.mxu1 %vm2755_vm4, %v2849_v23  ;;  %13176 = vmatprep.mubr.msk.f32.mxu1 %vm13953_vm3, %v13952_v54 }
 0x3fe   : > { %13184 = vmatprep.subr.mxu1 %v13952_v54 }
 0x3ff   : > { %13185 = vmatpush3.msra.mxu1 %v2847_v25  ;;  %v12394_v25 = vld [vmem:[%s16993_s28 + $0x128] sm:$0xff] }
 0x400   : > { %13177 = vmatmul.mubr.msk.f32.gmra.mxu1 %vm2745_vm5, %v12337_v24  ;;  %v2953_v26 = vpop.permute.xlu1 %2952  ;;  %13208 = vmatprep.subr.mxu1 %v13952_v54  ;;  %v3055_v35 = vpop.permute.xlu0 %3054  ;;  %v12383_v24 = vld [vmem:[%s16993_s28 + $0xf0] sm:$0xff] }
 0x401   : > { %13196 = vmatpush3.msk.msra.mxu0 %vm2755_vm4, %v2953_v26  ;;  %13179 = vmatprep.mubr.msk.f32.mxu1 %vm13953_vm3, %v13952_v54  ;;  %v12384_v26 = vld [vmem:[%s16993_s28 + $0xf8] sm:$0xff] }
 0x402   : > { %13197 = vmatprep.subr.mxu0 %v13952_v54 }
 0x404   : > { %13180 = vmatmul.mubr.msk.f32.gmra.mxu1 %vm2745_vm5, %v12338_v27  ;;  %v2951_v30 = vpop.permute.xlu1 %2950  ;;  %v3267_v40 = vpop.permute.xlu0 %3266 }
 0x405   : > { %13198 = vmatpush3.msra.mxu0 %v2951_v30  ;;  %13186 = vmatprep.mubr.msk.f32.mxu1 %vm13953_vm3, %v13952_v54  ;;  %v12403_v30 = vld [vmem:[%s16993_s28 + $0x150] sm:$0xff] }
 0x406   : > { %13200 = vmatmul.mubr.msk.f32.vlgmr.msra.gmra.mxu0 %vm2745_vm5, %v12356_v28  ;;  %13221 = vmatprep.subr.mxu0 %v13952_v54  ;;  %v12395_v28 = vld [vmem:[%s16993_s28 + $0x130] sm:$0xff] }
 0x407   : > { %13202 = vmatprep.mubr.msk.f32.mxu0 %vm13953_vm3, %v13952_v54 }
 0x408   : > { %13187 = vmatmul.mubr.msk.f32.vlgmr.msra.gmra.mxu1 %vm2745_vm5, %v12346_v31  ;;  %v3163_v33 = vpop.permute.xlu1 %3162  ;;  %v3265_v46 = vpop.permute.xlu0 %3264  ;;  %v12404_v31 = vld [vmem:[%s16993_s28 + $0x158] sm:$0xff] }
 0x409   : > { %13209 = vmatpush3.msk.msra.mxu1 %vm2755_vm4, %v3057_v29  ;;  %13222 = vmatpush3.msk.msra.mxu0 %vm2755_vm4, %v3163_v33  ;;  %v12385_v29 = vld [vmem:[%s16993_s28 + $0x100] sm:$0xff]  ;;  %v4372_v33 = vld [vmem:[%s16954_s9 + $0x8] sm:$0xff] }
 0x40a   : > { %13210 = vmatprep.subr.mxu1 %v13952_v54  ;;  %13203 = vmatmul.mubr.msk.f32.gmra.mxu0 %vm2745_vm5, %v12357_v32  ;;  %v12405_v32 = vld [vmem:[%s16993_s28 + $0x160] sm:$0xff] }
 0x40b   : > { %13211 = vmatpush3.msra.mxu1 %v3055_v35  ;;  %13189 = vmatprep.mubr.msk.f32.mxu1 %vm13953_vm3, %v13952_v54 }
 0x40c   : > { %13190 = vmatmul.mubr.msk.f32.gmra.mxu1 %vm2745_vm5, %v12347_v34  ;;  %13223 = vmatprep.subr.mxu0 %v13952_v54  ;;  %v3161_v37 = vpop.permute.xlu1 %3160  ;;  %v3475_v50 = vpop.permute.xlu0 %3474  ;;  %v4371_v34 = vld [vmem:[%s16954_s9] sm:$0xff] }
 0x40d   : > { %13205 = vmatprep.mubr.msk.f32.mxu0 %vm13953_vm3, %v13952_v54  ;;  %13224 = vmatpush3.msra.mxu0 %v3161_v37 }
 0x40e   : > { %13206 = vmatmul.mubr.msk.f32.gmra.mxu0 %vm2745_vm5, %v12358_v36  ;;  %13192 = vmatprep.mubr.msk.f32.mxu1 %vm13953_vm3, %v13952_v54 }
 0x40f   : > { %13225 = vmatprep.mubr.msk.f32.mxu0 %vm13953_vm3, %v13952_v54  ;;  %13247 = vmatprep.subr.mxu0 %v13952_v54 }
 0x410   : > { %13193 = vmatmul.mubr.msk.f32.gmra.mxu1 %vm2745_vm5, %v12348_v38  ;;  %v3371_v41 = vpop.permute.xlu1 %3370  ;;  %13234 = vmatprep.subr.mxu1 %v13952_v54  ;;  %v3473_v56 = vpop.permute.xlu0 %3472 }
 0x411   : > { %13212 = vmatprep.mubr.msk.f32.mxu1 %vm13953_vm3, %v13952_v54 }
 0x412   : > { %13226 = vmatmul.mubr.msk.f32.vlgmr.msra.gmra.mxu0 %vm2745_vm5, %v12376_v39 }
 0x413   : > { %13248 = vmatpush3.msk.msra.mxu0 %vm2755_vm4, %v3371_v41  ;;  %13228 = vmatprep.mubr.msk.f32.mxu0 %vm13953_vm3, %v13952_v54 }
 0x414   : > { %13213 = vmatmul.mubr.msk.f32.vlgmr.msra.gmra.mxu1 %vm2745_vm5, %v12366_v42  ;;  %13249 = vmatprep.subr.mxu0 %v13952_v54  ;;  %v3369_v44 = vpop.permute.xlu1 %3368  ;;  %v3660_v2 = vpop.permute.xlu0 %3659 }
 0x415   : > { %13235 = vmatpush3.msk.msra.mxu1 %vm2755_vm4, %v3267_v40  ;;  %13250 = vmatpush3.msra.mxu0 %v3369_v44 }
 0x416   : > { %13236 = vmatprep.subr.mxu1 %v13952_v54  ;;  %13229 = vmatmul.mubr.msk.f32.gmra.mxu0 %vm2745_vm5, %v12377_v43 }
 0x417   : > { %13237 = vmatpush3.msra.mxu1 %v3265_v46  ;;  %13215 = vmatprep.mubr.msk.f32.mxu1 %vm13953_vm3, %v13952_v54 }
 0x418   : > { %13216 = vmatmul.mubr.msk.f32.gmra.mxu1 %vm2745_vm5, %v12367_v45  ;;  %13231 = vmatprep.mubr.msk.f32.mxu0 %vm13953_vm3, %v13952_v54  ;;  %v3662_v53 = vpop.permute.xlu1 %3661  ;;  %v3854_v6 = vpop.permute.xlu0 %3853 }
 0x419   : > { %13218 = vmatprep.mubr.msk.f32.mxu1 %vm13953_vm3, %v13952_v54  ;;  %13273 = vmatprep.subr.mxu0 %v13952_v54 }
 0x41a   : > { %13232 = vmatmul.mubr.msk.f32.gmra.mxu0 %vm2745_vm5, %v12378_v47  ;;  %13260 = vmatprep.subr.mxu1 %v13952_v54 }
 0x41b   : > { %13251 = vmatprep.mubr.msk.f32.mxu0 %vm13953_vm3, %v13952_v54 }
 0x41c   : > { %13219 = vmatmul.mubr.msk.f32.gmra.mxu1 %vm2745_vm5, %v12368_v48  ;;  %v3758_v59 = vpop.permute.xlu1 %3757  ;;  %v3852_v10 = vpop.permute.xlu0 %3851 }
 0x41d   : > { %13238 = vmatprep.mubr.msk.f32.mxu1 %vm13953_vm3, %v13952_v54 }
 0x41e   : > { %13252 = vmatmul.mubr.msk.f32.vlgmr.msra.gmra.mxu0 %vm2745_vm5, %v12396_v49 }
 0x41f   : > { %13274 = vmatpush3.msk.msra.mxu0 %vm2755_vm4, %v14407_v15  ;;  %13254 = vmatprep.mubr.msk.f32.mxu0 %vm13953_vm3, %v13952_v54  ;;  %v12363_v15 = vld [vmem:[%s16993_s28 + $0x90] sm:$0xff] }
 0x420   : > { %13275 = vmatprep.subr.mxu0 %v13952_v54  ;;  %13239 = vmatmul.mubr.msk.f32.vlgmr.msra.gmra.mxu1 %vm2745_vm5, %v12386_v51  ;;  %v3756_v0 = vpop.permute.xlu1 %3755  ;;  %v4039_v19 = vpop.permute.xlu0 %4038 }
 0x421   : > { %13261 = vmatpush3.msk.msra.mxu1 %vm2755_vm4, %v3475_v50  ;;  %13276 = vmatpush3.msra.mxu0 %v14401_v13 }
 0x422   : > { %13262 = vmatprep.subr.mxu1 %v13952_v54  ;;  %13255 = vmatmul.mubr.msk.f32.gmra.mxu0 %vm2745_vm5, %v12397_v52 }
 0x423   : > { %13263 = vmatpush3.msra.mxu1 %v3473_v56  ;;  %13241 = vmatprep.mubr.msk.f32.mxu1 %vm13953_vm3, %v13952_v54 }
 0x424   : > { %13242 = vmatmul.mubr.msk.f32.gmra.mxu1 %vm2745_vm5, %v12387_v55  ;;  %13257 = vmatprep.mubr.msk.f32.mxu0 %vm13953_vm3, %v13952_v54  ;;  %v4041_v61 = vpop.permute.xlu1 %4040  ;;  %v4233_v23 = vpop.permute.xlu0 %4232 }
 0x425   : > { %13244 = vmatprep.mubr.msk.f32.mxu1 %vm13953_vm3, %v13952_v54  ;;  %13299 = vmatprep.subr.mxu0 %v13952_v54 }
 0x426   : > { %13258 = vmatmul.mubr.msk.f32.gmra.mxu0 %vm2745_vm5, %v12398_v57  ;;  %13286 = vmatprep.subr.mxu1 %v13952_v54 }
 0x427   : > { %13277 = vmatprep.mubr.msk.f32.mxu0 %vm13953_vm3, %v13952_v54 }
 0x428   : > { %13245 = vmatmul.mubr.msk.f32.gmra.mxu1 %vm2745_vm5, %v12388_v58  ;;  %v4137_v13 = vpop.permute.xlu1 %4136  ;;  %v4231_v27 = vpop.permute.xlu0 %4230 }
 0x429   : > { %13264 = vmatprep.mubr.msk.f32.mxu1 %vm13953_vm3, %v13952_v54 }
 0x42a   : > { %13278 = vmatmul.mubr.msk.f32.vlgmr.msra.gmra.mxu0 %vm2745_vm5, %v2731_v60 }
 0x42b   : > { %13300 = vmatpush3.msk.msra.mxu0 %vm2755_vm4, %v3758_v59  ;;  %13280 = vmatprep.mubr.msk.f32.mxu0 %vm13953_vm3, %v13952_v54 }
 0x42c   : > { %13301 = vmatprep.subr.mxu0 %v13952_v54  ;;  %13265 = vmatmul.mubr.msk.f32.vlgmr.msra.gmra.mxu1 %vm2745_vm5, %v12406_v62  ;;  %v4135_v17 = vpop.permute.xlu1 %4134 }
 0x42d   : > { %13287 = vmatpush3.msk.msra.mxu1 %vm2755_vm4, %v3662_v53  ;;  %13302 = vmatpush3.msra.mxu0 %v3756_v0 }
 0x42e   : > { %13288 = vmatprep.subr.mxu1 %v13952_v54  ;;  %13281 = vmatmul.mubr.msk.f32.gmra.mxu0 %vm2745_vm5, %v2732_v63 }
 0x42f   : > { %13289 = vmatpush3.msra.mxu1 %v3660_v2  ;;  %13267 = vmatprep.mubr.msk.f32.mxu1 %vm13953_vm3, %v13952_v54 }
 0x430   : > { %13268 = vmatmul.mubr.msk.f32.gmra.mxu1 %vm2745_vm5, %v12407_v1  ;;  %13283 = vmatprep.mubr.msk.f32.mxu0 %vm13953_vm3, %v13952_v54 }
 0x431   : > { %13270 = vmatprep.mubr.msk.f32.mxu1 %vm13953_vm3, %v13952_v54  ;;  %13325 = vmatprep.subr.mxu0 %v13952_v54 }
 0x432   : > { %13284 = vmatmul.mubr.msk.f32.gmra.mxu0 %vm2745_vm5, %v2733_v3  ;;  %13312 = vmatprep.subr.mxu1 %v13952_v54 }
 0x433   : > { %13303 = vmatprep.mubr.msk.f32.mxu0 %vm13953_vm3, %v13952_v54 }
 0x434   : > { %13271 = vmatmul.mubr.msk.f32.gmra.mxu1 %vm2745_vm5, %v12408_v4 }
 0x435   : > { %13290 = vmatprep.mubr.msk.f32.mxu1 %vm13953_vm3, %v13952_v54 }
 0x436   : > { %13304 = vmatmul.mubr.msk.f32.vlgmr.msra.gmra.mxu0 %vm2745_vm5, %v12353_v5 }
 0x437   : > { %13326 = vmatpush3.msk.msra.mxu0 %vm2755_vm4, %v14421_v16  ;;  %13306 = vmatprep.mubr.msk.f32.mxu0 %vm13953_vm3, %v13952_v54  ;;  %v12374_v16 = vld [vmem:[%s16993_s28 + $0xc8] sm:$0xff] }
 0x438   : > { %13327 = vmatprep.subr.mxu0 %v13952_v54  ;;  %13291 = vmatmul.mubr.msk.f32.vlgmr.msra.gmra.mxu1 %vm2745_vm5, %v12343_v7 }
 0x439   : > { %13313 = vmatpush3.msk.msra.mxu1 %vm2755_vm4, %v3854_v6  ;;  %13328 = vmatpush3.msra.mxu0 %v14405_v14  ;;  %v12373_v14 = vld [vmem:[%s16993_s28 + $0xc0] sm:$0xff] }
 0x43a   : > { %13314 = vmatprep.subr.mxu1 %v13952_v54  ;;  %13307 = vmatmul.mubr.msk.f32.gmra.mxu0 %vm2745_vm5, %v12354_v8 }
 0x43b   : > { %13315 = vmatpush3.msra.mxu1 %v3852_v10  ;;  %13293 = vmatprep.mubr.msk.f32.mxu1 %vm13953_vm3, %v13952_v54 }
 0x43c   : > { %13294 = vmatmul.mubr.msk.f32.gmra.mxu1 %vm2745_vm5, %v12344_v9  ;;  %13309 = vmatprep.mubr.msk.f32.mxu0 %vm13953_vm3, %v13952_v54 }
 0x43d   : > { %13296 = vmatprep.mubr.msk.f32.mxu1 %vm13953_vm3, %v13952_v54  ;;  %13351 = vmatprep.subr.mxu0 %v13952_v54 }
 0x43e   : > { %13310 = vmatmul.mubr.msk.f32.gmra.mxu0 %vm2745_vm5, %v12355_v11  ;;  %13338 = vmatprep.subr.mxu1 %v13952_v54 }
 0x43f   : > { %13329 = vmatprep.mubr.msk.f32.mxu0 %vm13953_vm3, %v13952_v54 }
 0x440   : > { %13297 = vmatmul.mubr.msk.f32.gmra.mxu1 %vm2745_vm5, %v12345_v12 }
 0x441   : > { %13316 = vmatprep.mubr.msk.f32.mxu1 %vm13953_vm3, %v13952_v54 }
 0x442   : > { %13330 = vmatmul.mubr.msk.f32.vlgmr.msra.gmra.mxu0 %vm2745_vm5, %v12373_v14 }
 0x443   : > { %13352 = vmatpush3.msk.msra.mxu0 %vm2755_vm4, %v4137_v13  ;;  %13332 = vmatprep.mubr.msk.f32.mxu0 %vm13953_vm3, %v13952_v54 }
 0x444   : > { %13353 = vmatprep.subr.mxu0 %v13952_v54  ;;  %13317 = vmatmul.mubr.msk.f32.vlgmr.msra.gmra.mxu1 %vm2745_vm5, %v12363_v15 }
 0x445   : > { %13339 = vmatpush3.msk.msra.mxu1 %vm2755_vm4, %v4041_v61  ;;  %13354 = vmatpush3.msra.mxu0 %v4135_v17 }
 0x446   : > { %13340 = vmatprep.subr.mxu1 %v13952_v54  ;;  %13333 = vmatmul.mubr.msk.f32.gmra.mxu0 %vm2745_vm5, %v12374_v16 }
 0x447   : > { %13341 = vmatpush3.msra.mxu1 %v4039_v19  ;;  %13319 = vmatprep.mubr.msk.f32.mxu1 %vm13953_vm3, %v13952_v54 }
 0x448   : > { %13320 = vmatmul.mubr.msk.f32.gmra.mxu1 %vm2745_vm5, %v12364_v18  ;;  %13335 = vmatprep.mubr.msk.f32.mxu0 %vm13953_vm3, %v13952_v54 }
 0x449   : > { %13322 = vmatprep.mubr.msk.f32.mxu1 %vm13953_vm3, %v13952_v54  ;;  %13364 = vmatprep.subr.mxu1 %v13952_v54 }
 0x44a   : > { %13336 = vmatmul.mubr.msk.f32.gmra.mxu0 %vm2745_vm5, %v12375_v20  ;;  %13377 = vmatprep.subr.mxu0 %v13952_v54 }
 0x44b   : > { %13355 = vmatprep.mubr.msk.f32.mxu0 %vm13953_vm3, %v13952_v54 }
 0x44c   : > { %13323 = vmatmul.mubr.msk.f32.gmra.mxu1 %vm2745_vm5, %v12365_v21 }
 0x44d   : > { %13342 = vmatprep.mubr.msk.f32.mxu1 %vm13953_vm3, %v13952_v54 }
 0x44e   : > { %13356 = vmatmul.mubr.msk.f32.vlgmr.msra.gmra.mxu0 %vm2745_vm5, %v12393_v22 }
 0x44f   : > { %13358 = vmatprep.mubr.msk.f32.mxu0 %vm13953_vm3, %v13952_v54  ;;  %13378 = vmatpush3.msra.mxu0 %v4372_v33 }
 0x450   : > { %13343 = vmatmul.mubr.msk.f32.vlgmr.msra.gmra.mxu1 %vm2745_vm5, %v12383_v24  ;;  %13379 = vmatprep.subr.mxu0 %v13952_v54 }
 0x451   : > { %13365 = vmatpush3.msk.msra.mxu1 %vm2755_vm4, %v4233_v23  ;;  %13345 = vmatprep.mubr.msk.f32.mxu1 %vm13953_vm3, %v13952_v54 }
 0x452   : > { %13366 = vmatprep.subr.mxu1 %v13952_v54  ;;  %13359 = vmatmul.mubr.msk.f32.gmra.mxu0 %vm2745_vm5, %v12394_v25 }
 0x453   : > { %13367 = vmatpush3.msra.mxu1 %v4231_v27  ;;  %13361 = vmatprep.mubr.msk.f32.mxu0 %vm13953_vm3, %v13952_v54 }
 0x454   : > { %13346 = vmatmul.mubr.msk.f32.gmra.mxu1 %vm2745_vm5, %v12384_v26  ;;  %13390 = vmatprep.subr.mxu1 %v13952_v54 }
 0x455   : > { %13348 = vmatprep.mubr.msk.f32.mxu1 %vm13953_vm3, %v13952_v54  ;;  %13380 = vmatpush3.msra.mxu0 %v4371_v34 }
 0x456   : > { %13362 = vmatmul.mubr.msk.f32.gmra.mxu0 %vm2745_vm5, %v12395_v28  ;;  %13408 = vmatprep.subr.mxu0 %v13952_v54 }
 0x457   : > { %13381 = vmatprep.mubr.msk.f32.mxu0 %vm13953_vm3, %v13952_v54 }
 0x458   : > { %13349 = vmatmul.mubr.msk.f32.gmra.mxu1 %vm2745_vm5, %v12385_v29 }
 0x459   : > { %13368 = vmatprep.mubr.msk.f32.mxu1 %vm13953_vm3, %v13952_v54 }
 0x45c   : > { %13369 = vmatmul.mubr.msk.f32.vlgmr.msra.gmra.mxu1 %vm2745_vm5, %v12403_v30 }
 0x45d   : > { %13371 = vmatprep.mubr.msk.f32.mxu1 %vm13953_vm3, %v13952_v54 }
 0x460   : > { %13372 = vmatmul.mubr.msk.f32.gmra.mxu1 %vm2745_vm5, %v12404_v31 }
 0x461   : > { %13374 = vmatprep.mubr.msk.f32.mxu1 %vm13953_vm3, %v13952_v54 }
 0x464   : > { %13375 = vmatmul.mubr.msk.f32.gmra.mxu1 %vm2745_vm5, %v12405_v32 }
 0x465   : > { %13396 = vmatprep.mubr.msk.f32.mxu1 %vm13953_vm3, %v13952_v54 }
 0x4bc   : > { %v2824_v35 = vpop.f32.mrf.mxu1 }
 0x4be   : > { %v13175_v36 = vpop.f32.mrf.mxu1 }
 0x4c0   : > { %v2829_v37 = vpop.f32.mrf.mxu1 }
 0x4c2   : > { %v13178_v38 = vpop.f32.mrf.mxu1 }
 0x4c4   : > { %v14822_v39 = vpop.f32.mrf.mxu1 }
 0x4c6   : > { %v13181_v40 = vpop.f32.mrf.mxu1  ;;  %v14824_v41 = vpop.f32.mrf.mxu0 }
 0x4c8   : > { %v2928_v42 = vpop.f32.mrf.mxu1  ;;  %v13201_v43 = vpop.f32.mrf.mxu0 }
 0x4ca   : > { %v13188_v44 = vpop.f32.mrf.mxu1  ;;  %v14826_v45 = vpop.f32.mrf.mxu0 }
 0x4cc   : > { %v2933_v46 = vpop.f32.mrf.mxu1  ;;  %v13204_v47 = vpop.f32.mrf.mxu0 }
 0x4ce   : > { %v13191_v48 = vpop.f32.mrf.mxu1  ;;  %v14828_v49 = vpop.f32.mrf.mxu0 }
 0x4d0   : > { %v2938_v50 = vpop.f32.mrf.mxu1  ;;  %v13207_v51 = vpop.f32.mrf.mxu0 }
 0x4d2   : > { %v13194_v52 = vpop.f32.mrf.mxu1  ;;  %v14830_v53 = vpop.f32.mrf.mxu0 }
 0x4d4   : > { %v3136_v55 = vpop.f32.mrf.mxu1  ;;  %v13227_v56 = vpop.f32.mrf.mxu0 }
 0x4d6   : > { %v13214_v57 = vpop.f32.mrf.mxu1  ;;  %v14832_v58 = vpop.f32.mrf.mxu0 }
 0x4d8   : > { %v14834_v59 = vpop.f32.mrf.mxu1  ;;  %v13230_v60 = vpop.f32.mrf.mxu0 }
 0x4da   : > { %v13217_v62 = vpop.f32.mrf.mxu1  ;;  %v14836_v63 = vpop.f32.mrf.mxu0 }
 0x4dc   : > { %v14838_v0 = vpop.f32.mrf.mxu1  ;;  %v13233_v1 = vpop.f32.mrf.mxu0 }
 0x4de   : > { %v13220_v2 = vpop.f32.mrf.mxu1  ;;  %v14840_v3 = vpop.f32.mrf.mxu0 }
 0x4e0   : > { %v14842_v4 = vpop.f32.mrf.mxu1  ;;  %v13253_v5 = vpop.f32.mrf.mxu0 }
 0x4e2   : > { %v13240_v6 = vpop.f32.mrf.mxu1  ;;  %v14844_v7 = vpop.f32.mrf.mxu0 }
 0x4e4   : > { %v14846_v8 = vpop.f32.mrf.mxu1  ;;  %v13256_v61 = vpop.f32.mrf.mxu0 }
 0x4e6   : > { %v13243_v9 = vpop.f32.mrf.mxu1  ;;  %v14848_v10 = vpop.f32.mrf.mxu0 }
 0x4e8   : > { %v14850_v11 = vpop.f32.mrf.mxu1  ;;  %v13259_v12 = vpop.f32.mrf.mxu0 }
 0x4ea   : > { %v13246_v13 = vpop.f32.mrf.mxu1  ;;  %v3645_v14 = vpop.f32.mrf.mxu0 }
 0x4eb   : > { %v3646_v29 = vadd.f32 %v3645_v14, %v2824_v35 }
 0x4ec   : > { %v14852_v15 = vpop.f32.mrf.mxu1  ;;  %v13279_v16 = vpop.f32.mrf.mxu0 }
 0x4ee   : > { %v13266_v17 = vpop.f32.mrf.mxu1  ;;  %v3650_v18 = vpop.f32.mrf.mxu0 }
 0x4ef   : > { %v3651_v38 = vadd.f32 %v3650_v18, %v2829_v37 }
 0x4f0   : > { %v14854_v19 = vpop.f32.mrf.mxu1  ;;  %v13282_v20 = vpop.f32.mrf.mxu0 }
 0x4f2   : > { %v13269_v21 = vpop.f32.mrf.mxu1  ;;  %v3655_v22 = vpop.f32.mrf.mxu0 }
 0x4f3   : > { %v3656_v52 = vadd.f32 %v3655_v22, %v14822_v39 }
 0x4f4   : > { %v14856_v23 = vpop.f32.mrf.mxu1  ;;  %v13285_v24 = vpop.f32.mrf.mxu0 }
 0x4f6   : > { %v13272_v25 = vpop.f32.mrf.mxu1  ;;  %v3837_v26 = vpop.f32.mrf.mxu0 }
 0x4f7   : > { %v3838_v1 = vadd.f32 %v3837_v26, %v14824_v41 }
 0x4f8   : > { %v3741_v27 = vpop.f32.mrf.mxu1  ;;  %v13305_v28 = vpop.f32.mrf.mxu0 }
 0x4f9   : > { %v3742_v30 = vadd.f32 %v3741_v27, %v2928_v42 }
 0x4fa   : > { %v13292_v31 = vpop.f32.mrf.mxu1  ;;  %v3842_v32 = vpop.f32.mrf.mxu0 }
 0x4fb   : > { %v4326_v33 = vadd.f32 %v3742_v30, %v3646_v29  ;;  %v3843_v9 = vadd.f32 %v3842_v32, %v14826_v45 }
 0x4fc   : > { %v3746_v34 = vpop.f32.mrf.mxu1  ;;  %v13308_v36 = vpop.f32.mrf.mxu0 }
 0x4fd   : > { %v3747_v40 = vadd.f32 %v3746_v34, %v2933_v46 }
 0x4fe   : > { %v13295_v43 = vpop.f32.mrf.mxu1  ;;  %v3847_v44 = vpop.f32.mrf.mxu0 }
 0x4ff   : > { %v4327_v47 = vadd.f32 %v3747_v40, %v3651_v38  ;;  %v3848_v18 = vadd.f32 %v3847_v44, %v14828_v49 }
 0x500   : > { %v3751_v48 = vpop.f32.mrf.mxu1  ;;  %v13311_v51 = vpop.f32.mrf.mxu0 }
 0x501   : > { %v3752_v56 = vadd.f32 %v3751_v48, %v2938_v50 }
 0x502   : > { %v13298_v57 = vpop.f32.mrf.mxu1  ;;  %v4024_v60 = vpop.f32.mrf.mxu0 }
 0x503   : > { %v4328_v62 = vadd.f32 %v3752_v56, %v3656_v52 }
 0x504   : > { %v3933_v35 = vpop.f32.mrf.mxu1  ;;  %v13331_v42 = vpop.f32.mrf.mxu0 }
 0x505   : > { %v3934_v2 = vadd.f32 %v3933_v35, %v3136_v55 }
 0x506   : > { %v13318_v5 = vpop.f32.mrf.mxu1  ;;  %v4029_v6 = vpop.f32.mrf.mxu0 }
 0x507   : > { %v4329_v37 = vadd.f32 %v3934_v2, %v3838_v1  ;;  %v4030_v51 = vadd.f32 %v4029_v6, %v14832_v58 }
 0x508   : > { %v3938_v46 = vpop.f32.mrf.mxu1  ;;  %v13334_v61 = vpop.f32.mrf.mxu0 }
 0x509   : > { %v4338_v12 = vadd.f32 %v4329_v37, %v4326_v33  ;;  %v3939_v13 = vadd.f32 %v3938_v46, %v14834_v59  ;;  %v4358_v46 = vpop.permute.xlu0 %4357 }
 0x50a   : > { %v13321_v39 = vpop.f32.mrf.mxu1  ;;  %v4034_v50 = vpop.f32.mrf.mxu0 }
 0x50b   : > { %v4330_v14 = vadd.f32 %v3939_v13, %v3843_v9  ;;  %v4035_v35 = vadd.f32 %v4034_v50, %v14836_v63 }
 0x50c   : > { %v3943_v16 = vpop.f32.mrf.mxu1  ;;  %v13337_v17 = vpop.f32.mrf.mxu0 }
 0x50d   : > { %v4339_v20 = vadd.f32 %v4330_v14, %v4327_v47  ;;  %v3944_v41 = vadd.f32 %v3943_v16, %v14838_v0  ;;  %v4025_v0 = vadd.f32 %v4024_v60, %v14830_v53 }
 0x50e   : > { %v13324_v55 = vpop.f32.mrf.mxu1  ;;  %v4216_v21 = vpop.f32.mrf.mxu0 }
 0x50f   : > { %v4331_v22 = vadd.f32 %v3944_v41, %v3848_v18  ;;  %v4217_v36 = vadd.f32 %v4216_v21, %v14840_v3  ;;  %v5808_v18 = vld [vmem:[%s16953_s8] sm:$0xff] }
 0x510   : > { %v4120_v24 = vpop.f32.mrf.mxu1  ;;  %v13357_v25 = vpop.f32.mrf.mxu0 }
 0x511   : > { %v4340_v26 = vadd.f32 %v4331_v22, %v4328_v62  ;;  %v4121_v49 = vadd.f32 %v4120_v24, %v14842_v4 }
 0x512   : > { %v13344_v45 = vpop.f32.mrf.mxu1  ;;  %v4221_v27 = vpop.f32.mrf.mxu0 }
 0x513   : > { %v4332_v43 = vadd.f32 %v4121_v49, %v4025_v0  ;;  %v4222_v52 = vadd.f32 %v4221_v27, %v14844_v7 }
 0x514   : > { %v4125_v28 = vpop.f32.mrf.mxu1  ;;  %v13360_v59 = vpop.f32.mrf.mxu0 }
 0x515   : > { %v4126_v44 = vadd.f32 %v4125_v28, %v14846_v8 }
 0x516   : > { %v13347_v29 = vpop.f32.mrf.mxu1  ;;  %v4226_v30 = vpop.f32.mrf.mxu0 }
 0x517   : > { %v4333_v62 = vadd.f32 %v4126_v44, %v4030_v51  ;;  %v4227_v8 = vadd.f32 %v4226_v30, %v14848_v10 }
 0x518   : > { %v4130_v31 = vpop.f32.mrf.mxu1  ;;  %v13363_v32 = vpop.f32.mrf.mxu0 }
 0x519   : > { %v4131_v53 = vadd.f32 %v4130_v31, %v14850_v11 }
 0x51a   : > { %v13350_v33 = vpop.f32.mrf.mxu1 }
 0x51b   : > { %v4334_v5 = vadd.f32 %v4131_v53, %v4035_v35  ;;  %v12463_v35 = vld [vmem:[%s16952_s7 + $0x58] sm:$0xff] }
 0x51c   : > { %v4312_v34 = vpop.f32.mrf.mxu1 }
 0x51d   : > { %v4313_v38 = vadd.f32 %v4312_v34, %v14852_v15  ;;  %v4353_v15 = vpop.permute.xlu1 %4352 }
 0x51e   : > { %v13370_v40 = vpop.f32.mrf.mxu1 }
 0x51f   : > { %v4335_v47 = vadd.f32 %v4313_v38, %v4217_v36  ;;  %v12448_v36 = vld [vmem:[%s16952_s7 + $0x8] sm:$0xff] }
 0x520   : > { %v4317_v48 = vpop.f32.mrf.mxu1 }
 0x521   : > { %v4341_v56 = vadd.f32 %v4335_v47, %v4332_v43  ;;  %v4318_v4 = vadd.f32 %v4317_v48, %v14854_v19  ;;  %v4363_v9 = vpop.permute.xlu1 %4362  ;;  %v12451_v47 = vld [vmem:[%s16952_s7 + $0x18] sm:$0xff] }
 0x522   : > { %v13373_v57 = vpop.f32.mrf.mxu1 }
 0x523   : > { %v4344_v3 = vadd.f32 %v4341_v56, %v4338_v12  ;;  %v4336_v60 = vadd.f32 %v4318_v4, %v4222_v52  ;;  %v12454_v52 = vld [vmem:[%s16952_s7 + $0x28] sm:$0xff]  ;;  %v12457_v57 = vld [vmem:[%s16952_s7 + $0x38] sm:$0xff] }
 0x524   : > { %v4322_v42 = vpop.f32.mrf.mxu1 }
 0x525   : > { %v4365_v1 = vadd.f32 %v4353_v15, %v4344_v3  ;;  %v4342_v2 = vadd.f32 %v4336_v60, %v4333_v62  ;;  %v4323_v58 = vadd.f32 %v4322_v42, %v14856_v23  ;;  %v12460_v3 = vld [vmem:[%s16952_s7 + $0x48] sm:$0xff] }
 0x526   : > { %v13376_v7 = vpop.f32.mrf.mxu1  ;;  %v12466_v42 = vld [vmem:[%s16952_s7 + $0x68] sm:$0xff] }
 0x527   : > { %v4368_v19 = vmax.f32 %v4365_v1, 0.0  ;;  %v4345_v6 = vadd.f32 %v4342_v2, %v4339_v20  ;;  %v4337_v37 = vadd.f32 %v4323_v58, %v4227_v8  ;;  %v12469_v2 = vld [vmem:[%s16952_s7 + $0x78] sm:$0xff] }
 0x529   : > { %v4343_v11 = vadd.f32 %v4337_v37, %v4334_v5  ;;  %13382 = vmatmul.mubr.msk.f32.vlgmr.msra.gmra.mxu0 %vm4373_vm6, %v4368_v19  ;;  %v4366_v61 = vadd.f32 %v4358_v46, %v4345_v6  ;;  %v4463_v5 = vld [vmem:[%s16952_s7] sm:$0xff]  ;;  %v12450_v37 = vld [vmem:[%s16952_s7 + $0x10] sm:$0xff] }
 0x52a   : > { %13384 = vmatprep.mubr.msk.f32.mxu0 %vm13953_vm3, %v13952_v54  ;;  %v12453_v46 = vld [vmem:[%s16952_s7 + $0x20] sm:$0xff] }
 0x52b   : > { %v4346_v63 = vadd.f32 %v4343_v11, %v4340_v26  ;;  %v4369_v10 = vmax.f32 %v4366_v61, 0.0 }
 0x52d   : > { %13385 = vmatmul.mubr.msk.f32.gmra.mxu0 %vm4373_vm6, %v4369_v10  ;;  %v4367_v23 = vadd.f32 %v4363_v9, %v4346_v63  ;;  %v12456_v63 = vld [vmem:[%s16952_s7 + $0x30] sm:$0xff]  ;;  %v12459_v10 = vld [vmem:[%s16952_s7 + $0x40] sm:$0xff] }
 0x52e   : > { %13387 = vmatprep.mubr.msk.f32.mxu0 %vm13953_vm3, %v13952_v54 }
 0x52f   : > { %v4370_v12 = vmax.f32 %v4367_v23, 0.0 }
 0x531   : > { %13388 = vmatmul.mubr.msk.f32.gmra.mxu0 %vm4373_vm6, %v4370_v12  ;;  %v12462_v12 = vld [vmem:[%s16952_s7 + $0x50] sm:$0xff] }
 0x532   : > { %13414 = vmatprep.mubr.msk.f32.mxu0 %vm13953_vm3, %v13952_v54 }
 0x5e9   : > { %v14885_v13 = vpop.f32.mrf.mxu0 }
 0x5ea   : > { %4556 = vrot.lane.b32.xlu1 %v14885_v13, %s13960_s21  ;;  %4469 = vrot.lane.b32.xlu0 %v14885_v13, %s13961_s23 }
 0x5eb   : > { %v13383_v39 = vpop.f32.mrf.mxu0 }
 0x5ed   : > { %v14891_v50 = vpop.f32.mrf.mxu0 }
 0x5ee   : > { %4728 = vrot.lane.b32.xlu1 %v14885_v13, %s13962_s30  ;;  %4642 = vrot.lane.b32.xlu0 %v14885_v13, %s16981_s0 }
 0x5ef   : > { %v13386_v14 = vpop.f32.mrf.mxu0 }
 0x5f1   : > { %v14897_v16 = vpop.f32.mrf.mxu0 }
 0x5f2   : > { %4900 = vrot.lane.b32.xlu1 %v14885_v13, %s13964_s25  ;;  %4814 = vrot.lane.b32.xlu0 %v14885_v13, %s13965_s3 }
 0x5f3   : > { %v13389_v17 = vpop.f32.mrf.mxu0 }
 0x5f4   : > { %v5816_v17 = vld [vmem:[%s16957_s12] sm:$0xff] }
 0x5f6   : > { %5072 = vrot.lane.b32.xlu1 %v14885_v13, %s13966_s26  ;;  %4986 = vrot.lane.b32.xlu0 %v14885_v13, %s13967_s24 }
 0x5fa   : > { %5227 = vrot.lane.b32.xlu0 %v14885_v13, %s13968_s27  ;;  %4471 = vrot.lane.b32.xlu1 %v14891_v50, %s13961_s23 }
 0x5fe   : > { %4558 = vrot.lane.b32.xlu0 %v14891_v50, %s13960_s21  ;;  %4730 = vrot.lane.b32.xlu1 %v14891_v50, %s13962_s30 }
 0x602   : > { %4644 = vrot.lane.b32.xlu0 %v14891_v50, %s16981_s0  ;;  %4902 = vrot.lane.b32.xlu1 %v14891_v50, %s13964_s25  ;;  %s13969_s0 = smov 104  }
 0x606   : > { %4816 = vrot.lane.b32.xlu0 %v14891_v50, %s13965_s3  ;;  %5074 = vrot.lane.b32.xlu1 %v14891_v50, %s13966_s26 }
 0x60a   : > { %4988 = vrot.lane.b32.xlu0 %v14891_v50, %s13967_s24  ;;  %5229 = vrot.lane.b32.xlu1 %v14891_v50, %s13968_s27 }
 0x60e   : > { %4560 = vrot.lane.b32.xlu1 %v14897_v16, %s13960_s21  ;;  %4473 = vrot.lane.b32.xlu0 %v14897_v16, %s13961_s23  ;;  %s16995_s21 = smov 96   ;;  %s13970_s23 = smov 88  }
 0x612   : > { %5311 = vrot.lane.b32.xlu1 %v14891_v50, %s13954_s22  ;;  %5393 = vrot.lane.b32.xlu0 %v14891_v50, %s13969_s0 }
 0x616   : > { %4732 = vrot.lane.b32.xlu1 %v14897_v16, %s13962_s30  ;;  %4646 = vrot.lane.b32.xlu0 %v14897_v16, %s16994_s2  ;;  %s16996_s2 = smov 80   ;;  %s17000_s30 = smov 32  }
 0x61a   : > { %4904 = vrot.lane.b32.xlu1 %v14897_v16, %s13964_s25  ;;  %4818 = vrot.lane.b32.xlu0 %v14897_v16, %s13965_s3 }
 0x61e   : > { %5309 = vrot.lane.b32.xlu1 %v14885_v13, %s13954_s22  ;;  %5391 = vrot.lane.b32.xlu0 %v14885_v13, %s13969_s0 }
 0x622   : > { %5076 = vrot.lane.b32.xlu1 %v14897_v16, %s13966_s26  ;;  %4990 = vrot.lane.b32.xlu0 %v14897_v16, %s13967_s24  ;;  %s13971_s26 = smov 72   ;;  %s16998_s24 = smov 48  }
 0x626   : > { %5475 = vrot.lane.b32.xlu1 %v14891_v50, %s16995_s21  ;;  %5557 = vrot.lane.b32.xlu0 %v14891_v50, %s13970_s23 }
 0x62a   : > { %5473 = vrot.lane.b32.xlu1 %v14885_v13, %s16995_s21  ;;  %5231 = vrot.lane.b32.xlu0 %v14897_v16, %s13968_s27  ;;  %s16999_s27 = smov 64  }
 0x62e   : > { %5313 = vrot.lane.b32.xlu1 %v14897_v16, %s13954_s22  ;;  %5555 = vrot.lane.b32.xlu0 %v14885_v13, %s13970_s23 }
 0x632   : > { %5477 = vrot.lane.b32.xlu1 %v14897_v16, %s16995_s21  ;;  %5395 = vrot.lane.b32.xlu0 %v14897_v16, %s13969_s0 }
 0x636   : > { %5639 = vrot.lane.b32.xlu1 %v14891_v50, %s16996_s2  ;;  %5559 = vrot.lane.b32.xlu0 %v14897_v16, %s13970_s23  ;;  %s650_s23 = scalar_lea.vmem %s16964_s19, %s14109_s29 }
 0x63a   : > { %5641 = vrot.lane.b32.xlu1 %v14897_v16, %s16996_s2  ;;  %5721 = vrot.lane.b32.xlu0 %v14891_v50, %s13971_s26 }
 0x63e   : > { %5637 = vrot.lane.b32.xlu1 %v14885_v13, %s16996_s2  ;;  %5723 = vrot.lane.b32.xlu0 %v14897_v16, %s13971_s26 }
 0x642   : > { %5811 = vperm.xlu1 %13898, %v5808_v18   ;;  %5719 = vrot.lane.b32.xlu0 %v14885_v13, %s13971_s26  ;;  %v5818_v18 = vcombine.high %v5816_v17, %v5816_v17  ;;  %s16997_s26 = smov 16  }
 0x65c   : > { %v4557_v20 = vpop.permute.xlu1 %4556  ;;  %v4470_v41 = vpop.permute.xlu0 %4469 }
 0x660   : > { %v4729_v55 = vpop.permute.xlu1 %4728  ;;  %v4643_v21 = vpop.permute.xlu0 %4642 }
 0x664   : > { %v14960_v22 = vpop.permute.xlu1 %4900  ;;  %v14962_v24 = vpop.permute.xlu0 %4814 }
 0x668   : > { %v14964_v25 = vpop.permute.xlu1 %5072  ;;  %v14966_v26 = vpop.permute.xlu0 %4986 }
 0x66c   : > { %v14968_v45 = vpop.permute.xlu0 %5227  ;;  %v4472_v27 = vpop.permute.xlu1 %4471 }
 0x670   : > { %v4559_v28 = vpop.permute.xlu0 %4558  ;;  %v4731_v59 = vpop.permute.xlu1 %4730 }
 0x674   : > { %v4645_v29 = vpop.permute.xlu0 %4644  ;;  %v14970_v30 = vpop.permute.xlu1 %4902 }
 0x678   : > { %v4817_v31 = vpop.permute.xlu0 %4816  ;;  %v14972_v32 = vpop.permute.xlu1 %5074 }
 0x67c   : > { %v14974_v33 = vpop.permute.xlu0 %4988  ;;  %v14976_v49 = vpop.permute.xlu1 %5229 }
 0x680   : > { %v4561_v34 = vpop.permute.xlu1 %4560  ;;  %v4474_v0 = vpop.permute.xlu0 %4473 }
 0x681   : > { %13391 = vmatpush3.msra.mxu1 %v4474_v0 }
 0x682   : > { %13392 = vmatprep.subr.mxu1 %v13952_v54 }
 0x683   : > { %13393 = vmatpush3.msra.mxu1 %v4472_v27 }
 0x684   : > { %v14982_v38 = vpop.permute.xlu1 %5311  ;;  %13394 = vmatprep.subr.mxu1 %v13952_v54  ;;  %v14985_v40 = vpop.permute.xlu0 %5393 }
 0x685   : > { %13395 = vmatpush3.msra.mxu1 %v4470_v41 }
 0x686   : > { %13399 = vmatprep.subr.mxu1 %v13952_v54  ;;  %13397 = vmatmul.mubr.msk.f32.vlgmr.msra.gmra.mxu1 %vm4478_vm7, %v12448_v36 }
 0x687   : > { %13400 = vmatpush3.msra.mxu1 %v4561_v34  ;;  %13405 = vmatprep.mubr.msk.f32.mxu1 %vm13953_vm3, %v13952_v54 }
 0x688   : > { %v4733_v43 = vpop.permute.xlu1 %4732  ;;  %13401 = vmatprep.subr.mxu1 %v13952_v54  ;;  %v4647_v44 = vpop.permute.xlu0 %4646 }
 0x689   : > { %13402 = vmatpush3.msra.mxu1 %v4559_v28  ;;  %13409 = vmatpush3.msra.mxu0 %v4647_v44 }
 0x68a   : > { %13403 = vmatprep.subr.mxu1 %v13952_v54  ;;  %13410 = vmatprep.subr.mxu0 %v13952_v54 }
 0x68b   : > { %13404 = vmatpush3.msra.mxu1 %v4557_v20  ;;  %13411 = vmatpush3.msra.mxu0 %v4645_v29 }
 0x68c   : > { %v4905_v48 = vpop.permute.xlu1 %4904  ;;  %13412 = vmatprep.subr.mxu0 %v13952_v54  ;;  %13417 = vmatprep.subr.mxu1 %v13952_v54  ;;  %v4819_v51 = vpop.permute.xlu0 %4818 }
 0x68d   : > { %13406 = vmatmul.mubr.msk.f32.vlgmr.msra.gmra.mxu1 %vm4478_vm7, %v12451_v47  ;;  %13413 = vmatpush3.msra.mxu0 %v4643_v21 }
 0x68e   : > { %13418 = vmatpush3.msra.mxu1 %v4733_v43  ;;  %13426 = vmatprep.subr.mxu0 %v13952_v54 }
 0x68f   : > { %13419 = vmatprep.subr.mxu1 %v13952_v54  ;;  %13415 = vmatmul.mubr.msk.f32.vlgmr.msra.gmra.mxu0 %vm4478_vm7, %v12454_v52 }
 0x690   : > { %13420 = vmatpush3.msra.mxu1 %v4731_v59  ;;  %13427 = vmatpush3.msra.mxu0 %v4819_v51  ;;  %v15006_v56 = vpop.permute.xlu1 %5309  ;;  %v15008_v4 = vpop.permute.xlu0 %5391 }
 0x691   : > { %13421 = vmatprep.subr.mxu1 %v13952_v54  ;;  %13428 = vmatprep.subr.mxu0 %v13952_v54 }
 0x692   : > { %13422 = vmatpush3.msra.mxu1 %v4729_v55  ;;  %13429 = vmatpush3.msra.mxu0 %v4817_v31 }
 0x693   : > { %13423 = vmatprep.mubr.msk.f32.mxu1 %vm13953_vm3, %v13952_v54  ;;  %13430 = vmatprep.subr.mxu0 %v13952_v54 }
 0x694   : > { %13435 = vmatprep.subr.mxu1 %v13952_v54  ;;  %13424 = vmatmul.mubr.msk.f32.vlgmr.msra.gmra.mxu1 %vm4478_vm7, %v12457_v57  ;;  %v5077_v62 = vpop.permute.xlu1 %5076  ;;  %v4991_v53 = vpop.permute.xlu0 %4990 }
 0x695   : > { %13431 = vmatpush3.msra.mxu0 %v14962_v24  ;;  %13436 = vmatpush3.msra.mxu1 %v4905_v48 }
 0x696   : > { %13432 = vmatprep.mubr.msk.f32.mxu0 %vm13953_vm3, %v13952_v54  ;;  %13437 = vmatprep.subr.mxu1 %v13952_v54 }
 0x697   : > { %13444 = vmatprep.subr.mxu0 %v13952_v54  ;;  %13433 = vmatmul.mubr.msk.f32.vlgmr.msra.gmra.mxu0 %vm4478_vm7, %v12460_v3 }
 0x698   : > { %13438 = vmatpush3.msra.mxu1 %v14970_v30  ;;  %13445 = vmatpush3.msra.mxu0 %v4991_v53  ;;  %v15030_v60 = vpop.permute.xlu1 %5475  ;;  %v15032_v15 = vpop.permute.xlu0 %5557 }
 0x699   : > { %13439 = vmatprep.subr.mxu1 %v13952_v54  ;;  %13446 = vmatprep.subr.mxu0 %v13952_v54 }
 0x69a   : > { %13440 = vmatpush3.msra.mxu1 %v14960_v22  ;;  %13447 = vmatpush3.msra.mxu0 %v14974_v33 }
 0x69b   : > { %13441 = vmatprep.mubr.msk.f32.mxu1 %vm13953_vm3, %v13952_v54  ;;  %13448 = vmatprep.subr.mxu0 %v13952_v54 }
 0x69c   : > { %13453 = vmatprep.subr.mxu1 %v13952_v54  ;;  %13442 = vmatmul.mubr.msk.f32.vlgmr.msra.gmra.mxu1 %vm4478_vm7, %v12463_v35  ;;  %v15049_v8 = vpop.permute.xlu1 %5473  ;;  %v5232_v1 = vpop.permute.xlu0 %5231 }
 0x69d   : > { %13449 = vmatpush3.msra.mxu0 %v14966_v26  ;;  %13454 = vmatpush3.msra.mxu1 %v5077_v62 }
 0x69e   : > { %13450 = vmatprep.mubr.msk.f32.mxu0 %vm13953_vm3, %v13952_v54  ;;  %13455 = vmatprep.subr.mxu1 %v13952_v54 }
 0x69f   : > { %13462 = vmatprep.subr.mxu0 %v13952_v54  ;;  %13451 = vmatmul.mubr.msk.f32.vlgmr.msra.gmra.mxu0 %vm4478_vm7, %v12466_v42 }
 0x6a0   : > { %13456 = vmatpush3.msra.mxu1 %v14972_v32  ;;  %13463 = vmatpush3.msra.mxu0 %v14897_v16  ;;  %v5556_v58 = vpop.permute.xlu0 %5555  ;;  %v5314_v7 = vpop.permute.xlu1 %5313  ;;  %v12468_v16 = vld [vmem:[%s16952_s7 + $0x70] sm:$0xff] }
 0x6a1   : > { %13457 = vmatprep.subr.mxu1 %v13952_v54  ;;  %13464 = vmatprep.subr.mxu0 %v13952_v54 }
 0x6a2   : > { %13458 = vmatpush3.msra.mxu1 %v14964_v25  ;;  %13465 = vmatpush3.msra.mxu0 %v14891_v50  ;;  %v12465_v50 = vld [vmem:[%s16952_s7 + $0x60] sm:$0xff] }
 0x6a3   : > { %13459 = vmatprep.mubr.msk.f32.mxu1 %vm13953_vm3, %v13952_v54  ;;  %13466 = vmatprep.subr.mxu0 %v13952_v54 }
 0x6a4   : > { %13471 = vmatprep.subr.mxu1 %v13952_v54  ;;  %13460 = vmatmul.mubr.msk.f32.vlgmr.msra.gmra.mxu1 %vm4478_vm7, %v12469_v2  ;;  %v5396_v19 = vpop.permute.xlu0 %5395  ;;  %v5478_v6 = vpop.permute.xlu1 %5477 }
 0x6a5   : > { %13467 = vmatpush3.msra.mxu0 %v14885_v13  ;;  %13468 = vmatprep.mubr.msk.f32.mxu0 %vm13953_vm3, %v13952_v54 }
 0x6a6   : > { %13472 = vmatpush3.msra.mxu1 %v5232_v1  ;;  %13469 = vmatmul.mubr.msk.f32.vlgmr.msra.gmra.mxu0 %vm4478_vm7, %v4463_v5 }
 0x6a7   : > { %13473 = vmatprep.subr.mxu1 %v13952_v54  ;;  %13480 = vmatprep.subr.mxu0 %v13952_v54 }
 0x6a8   : > { %13474 = vmatpush3.msra.mxu1 %v14976_v49  ;;  %13481 = vmatpush3.msra.mxu0 %v5314_v7  ;;  %v5560_v11 = vpop.permute.xlu0 %5559  ;;  %v5640_v61 = vpop.permute.xlu1 %5639 }
 0x6a9   : > { %13475 = vmatprep.subr.mxu1 %v13952_v54  ;;  %13482 = vmatprep.subr.mxu0 %v13952_v54 }
 0x6aa   : > { %13476 = vmatpush3.msra.mxu1 %v14968_v45  ;;  %13477 = vmatprep.mubr.msk.f32.mxu1 %vm13953_vm3, %v13952_v54 }
 0x6ab   : > { %13483 = vmatpush3.msra.mxu0 %v14982_v38  ;;  %13478 = vmatmul.mubr.msk.f32.vlgmr.msra.gmra.mxu1 %vm4478_vm7, %v12450_v37 }
 0x6ac   : > { %13484 = vmatprep.subr.mxu0 %v13952_v54  ;;  %13489 = vmatprep.subr.mxu1 %v13952_v54  ;;  %v5722_v9 = vpop.permute.xlu0 %5721  ;;  %v5642_v23 = vpop.permute.xlu1 %5641 }
 0x6ad   : > { %13485 = vmatpush3.msra.mxu0 %v15006_v56  ;;  %13486 = vmatprep.mubr.msk.f32.mxu0 %vm13953_vm3, %v13952_v54 }
 0x6ae   : > { %13490 = vmatpush3.msra.mxu1 %v5396_v19  ;;  %13487 = vmatmul.mubr.msk.f32.vlgmr.msra.gmra.mxu0 %vm4478_vm7, %v12453_v46 }
 0x6af   : > { %13491 = vmatprep.subr.mxu1 %v13952_v54  ;;  %13498 = vmatprep.subr.mxu0 %v13952_v54 }
 0x6b0   : > { %13492 = vmatpush3.msra.mxu1 %v14985_v40  ;;  %13499 = vmatpush3.msra.mxu0 %v5478_v6  ;;  %v5724_v13 = vpop.permute.xlu0 %5723  ;;  %v5638_v39 = vpop.permute.xlu1 %5637 }
 0x6b1   : > { %13493 = vmatprep.subr.mxu1 %v13952_v54  ;;  %13500 = vmatprep.subr.mxu0 %v13952_v54 }
 0x6b2   : > { %13494 = vmatpush3.msra.mxu1 %v15008_v4  ;;  %13495 = vmatprep.mubr.msk.f32.mxu1 %vm13953_vm3, %v13952_v54 }
 0x6b3   : > { %13501 = vmatpush3.msra.mxu0 %v15030_v60  ;;  %13496 = vmatmul.mubr.msk.f32.vlgmr.msra.gmra.mxu1 %vm4478_vm7, %v12456_v63 }
 0x6b4   : > { %13502 = vmatprep.subr.mxu0 %v13952_v54  ;;  %13507 = vmatprep.subr.mxu1 %v13952_v54  ;;  %v5720_v14 = vpop.permute.xlu0 %5719 }
 0x6b5   : > { %13503 = vmatpush3.msra.mxu0 %v15049_v8  ;;  %13504 = vmatprep.mubr.msk.f32.mxu0 %vm13953_vm3, %v13952_v54 }
 0x6b6   : > { %13508 = vmatpush3.msra.mxu1 %v5560_v11  ;;  %13505 = vmatmul.mubr.msk.f32.vlgmr.msra.gmra.mxu0 %vm4478_vm7, %v12459_v10  ;;  %v7452_v10 = vld [vmem:[%s16956_s11 + $0x8] sm:$0xff] }
 0x6b7   : > { %13509 = vmatprep.subr.mxu1 %v13952_v54  ;;  %13516 = vmatprep.subr.mxu0 %v13952_v54 }
 0x6b8   : > { %13510 = vmatpush3.msra.mxu1 %v15032_v15  ;;  %13517 = vmatpush3.msra.mxu0 %v5642_v23  ;;  %v7453_v23 = vld [vmem:[%s16956_s11 + $0x10] sm:$0xff] }
 0x6b9   : > { %13511 = vmatprep.subr.mxu1 %v13952_v54  ;;  %13518 = vmatprep.subr.mxu0 %v13952_v54 }
 0x6ba   : > { %13512 = vmatpush3.msra.mxu1 %v5556_v58  ;;  %13513 = vmatprep.mubr.msk.f32.mxu1 %vm13953_vm3, %v13952_v54 }
 0x6bb   : > { %13519 = vmatpush3.msra.mxu0 %v5640_v61  ;;  %13514 = vmatmul.mubr.msk.f32.vlgmr.msra.gmra.mxu1 %vm4478_vm7, %v12462_v12  ;;  %v12482_v12 = vld [vmem:[%s16955_s10 + $0x18] sm:$0xff] }
 0x6bc   : > { %13520 = vmatprep.subr.mxu0 %v13952_v54  ;;  %13525 = vmatprep.subr.mxu1 %v13952_v54 }
 0x6bd   : > { %13521 = vmatpush3.msra.mxu0 %v5638_v39  ;;  %13522 = vmatprep.mubr.msk.f32.mxu0 %vm13953_vm3, %v13952_v54  ;;  %v5812_v37 = vpop.permute.xlu1 %5811 }
 0x6be   : > { %13526 = vmatpush3.msra.mxu1 %v5724_v13  ;;  %13523 = vmatmul.mubr.msk.f32.vlgmr.msra.gmra.mxu0 %vm4478_vm7, %v12465_v50  ;;  %v12491_v13 = vld [vmem:[%s16955_s10 + $0x48] sm:$0xff] }
 0x6bf   : > { %13527 = vmatprep.subr.mxu1 %v13952_v54  ;;  %13531 = vmatprep.mubr.msk.f32.mxu1 %vm13953_vm3, %v13952_v54 }
 0x6c0   : > { %13528 = vmatpush3.msra.mxu1 %v5722_v9  ;;  %5891 = vmatprep.mubr.f32.mxu0 %v13952_v54  ;;  %v7451_v9 = vld [vmem:[%s16956_s11] sm:$0xff] }
 0x6c1   : > { %13529 = vmatprep.subr.mxu1 %v13952_v54  ;;  %12479 = vmatprep.subr.msk.mxu0 %vm2755_vm4, %v5818_v18 }
 0x6c2   : > { %13530 = vmatpush3.msra.mxu1 %v5720_v14  ;;  %12480 = vmatpush1.msk.msra.mxu0 %vm2755_vm4, %v5816_v17  ;;  %v12483_v14 = vld [vmem:[%s16955_s10 + $0x20] sm:$0xff] }
 0x6c3   : > { %13532 = vmatmul.mubr.msk.f32.vlgmr.msra.gmra.mxu1 %vm4478_vm7, %v12468_v16  ;;  %13545 = vmatprep.subr.mxu1 %v13952_v54  ;;  %v12492_v16 = vld [vmem:[%s16955_s10 + $0x50] sm:$0xff] }
 0x6c4   : > { %13547 = vmatprep.mubr.msk.f32.mxu1 %vm13953_vm3, %v13952_v54  ;;  %13534 = vmatprep.subr.mxu0 %v13952_v54 }
 0x746   : > { %v4548_v20 = vpop.f32.mrf.mxu1 }
 0x748   : > { %v13398_v41 = vpop.f32.mrf.mxu1 }
 0x749   : > { %v12493_v41 = vld [vmem:[%s16955_s10 + $0x58] sm:$0xff] }
 0x74d   : > { %v4634_v55 = vpop.f32.mrf.mxu1 }
 0x74f   : > { %v13407_v21 = vpop.f32.mrf.mxu1  ;;  %v4720_v22 = vpop.f32.mrf.mxu0 }
 0x750   : > { %v12509_v21 = vld [vmem:[%s16955_s10 + $0xa8] sm:$0xff] }
 0x751   : > { %v13416_v24 = vpop.f32.mrf.mxu0 }
 0x754   : > { %v4806_v25 = vpop.f32.mrf.mxu1 }
 0x756   : > { %v13425_v26 = vpop.f32.mrf.mxu1 }
 0x757   : > { %v4892_v45 = vpop.f32.mrf.mxu0  ;;  %v12510_v26 = vld [vmem:[%s16955_s10 + $0xb0] sm:$0xff] }
 0x759   : > { %v13434_v27 = vpop.f32.mrf.mxu0 }
 0x75a   : > { %v12511_v27 = vld [vmem:[%s16955_s10 + $0xb8] sm:$0xff] }
 0x75c   : > { %v4978_v28 = vpop.f32.mrf.mxu1 }
 0x75e   : > { %v13443_v59 = vpop.f32.mrf.mxu1 }
 0x75f   : > { %v5064_v29 = vpop.f32.mrf.mxu0  ;;  %v12527_v59 = vld [vmem:[%s16955_s10 + $0x108] sm:$0xff] }
 0x761   : > { %v13452_v30 = vpop.f32.mrf.mxu0 }
 0x764   : > { %v5150_v31 = vpop.f32.mrf.mxu1 }
 0x766   : > { %v5223_v32 = vpop.f32.mrf.mxu0  ;;  %v13461_v33 = vpop.f32.mrf.mxu1 }
 0x767   : > { %v5224_v3 = vadd.f32 %v5223_v32, %v4548_v20  ;;  %v12484_v20 = vld [vmem:[%s16955_s10 + $0x28] sm:$0xff]  ;;  %v12528_v32 = vld [vmem:[%s16955_s10 + $0x110] sm:$0xff] }
 0x768   : > { %v13470_v49 = vpop.f32.mrf.mxu0  ;;  %v12520_v33 = vld [vmem:[%s16955_s10 + $0xe8] sm:$0xff] }
 0x769   : > { %v12529_v49 = vld [vmem:[%s16955_s10 + $0x118] sm:$0xff] }
 0x76b   : > { %v5305_v34 = vpop.f32.mrf.mxu1 }
 0x76c   : > { %v5306_v57 = vadd.f32 %v5305_v34, %v4634_v55  ;;  %v12500_v55 = vld [vmem:[%s16955_s10 + $0x78] sm:$0xff] }
 0x76d   : > { %v13479_v0 = vpop.f32.mrf.mxu1  ;;  %v12536_v34 = vld [vmem:[%s16955_s10 + $0x138] sm:$0xff] }
 0x76e   : > { %v5387_v36 = vpop.f32.mrf.mxu0  ;;  %v5801_v2 = vadd.f32 %v5306_v57, %v5224_v3  ;;  %v12545_v0 = vld [vmem:[%s16955_s10 + $0x168] sm:$0xff]  ;;  %v5900_v57 = vld [vmem:[%s16955_s10 + $0x10] sm:$0xff] }
 0x76f   : > { %v5388_v62 = vadd.f32 %v5387_v36, %v4720_v22  ;;  %v12506_v3 = vld [vmem:[%s16955_s10 + $0x90] sm:$0xff] }
 0x770   : > { %v13488_v38 = vpop.f32.mrf.mxu0 }
 0x771   : > { %v12537_v38 = vld [vmem:[%s16955_s10 + $0x140] sm:$0xff] }
 0x773   : > { %v5469_v40 = vpop.f32.mrf.mxu1 }
 0x774   : > { %v5470_v56 = vadd.f32 %v5469_v40, %v4806_v25  ;;  %v12501_v25 = vld [vmem:[%s16955_s10 + $0x80] sm:$0xff]  ;;  %v12546_v40 = vld [vmem:[%s16955_s10 + $0x170] sm:$0xff] }
 0x775   : > { %v13497_v43 = vpop.f32.mrf.mxu1 }
 0x776   : > { %v5551_v44 = vpop.f32.mrf.mxu0  ;;  %v5802_v15 = vadd.f32 %v5470_v56, %v5388_v62  ;;  %v12538_v43 = vld [vmem:[%s16955_s10 + $0x148] sm:$0xff]  ;;  %v12490_v62 = vld [vmem:[%s16955_s10 + $0x40] sm:$0xff] }
 0x777   : > { %v5552_v35 = vadd.f32 %v5551_v44, %v4892_v45  ;;  %v12502_v45 = vld [vmem:[%s16955_s10 + $0x88] sm:$0xff]  ;;  %v12547_v44 = vld [vmem:[%s16955_s10 + $0x178] sm:$0xff] }
 0x778   : > { %v13506_v47 = vpop.f32.mrf.mxu0  ;;  %v5805_v5 = vadd.f32 %v5802_v15, %v5801_v2  ;;  %v5899_v56 = vld [vmem:[%s16955_s10 + $0x8] sm:$0xff]  ;;  %v12524_v2 = vld [vmem:[%s16955_s10 + $0xf0] sm:$0xff] }
 0x779   : > { %v5898_v47 = vld [vmem:[%s16955_s10] sm:$0xff]  ;;  %v12498_v15 = vld [vmem:[%s16955_s10 + $0x68] sm:$0xff] }
 0x77b   : > { %v5633_v48 = vpop.f32.mrf.mxu1 }
 0x77c   : > { %v5634_v53 = vadd.f32 %v5633_v48, %v4978_v28  ;;  %v12518_v28 = vld [vmem:[%s16955_s10 + $0xd8] sm:$0xff]  ;;  %v12488_v48 = vld [vmem:[%s16955_s10 + $0x30] sm:$0xff] }
 0x77d   : > { %v13515_v51 = vpop.f32.mrf.mxu1 }
 0x77e   : > { %v5715_v52 = vpop.f32.mrf.mxu0  ;;  %v5803_v58 = vadd.f32 %v5634_v53, %v5552_v35  ;;  %v12497_v53 = vld [vmem:[%s16955_s10 + $0x60] sm:$0xff]  ;;  %v12507_v35 = vld [vmem:[%s16955_s10 + $0x98] sm:$0xff] }
 0x77f   : > { %v5716_v42 = vadd.f32 %v5715_v52, %v5064_v29 }
 0x780   : > { %v13524_v4 = vpop.f32.mrf.mxu0 }
 0x781   : > { %v12489_v4 = vld [vmem:[%s16955_s10 + $0x38] sm:$0xff] }
 0x783   : > { %v5797_v60 = vpop.f32.mrf.mxu1 }
 0x784   : > { %v5798_v8 = vadd.f32 %v5797_v60, %v5150_v31  ;;  %v12519_v31 = vld [vmem:[%s16955_s10 + $0xe0] sm:$0xff] }
 0x785   : > { %v13533_v1 = vpop.f32.mrf.mxu1 }
 0x786   : > { %v5804_v7 = vadd.f32 %v5798_v8, %v5716_v42  ;;  %v12499_v42 = vld [vmem:[%s16955_s10 + $0x70] sm:$0xff]  ;;  %v12508_v8 = vld [vmem:[%s16955_s10 + $0xa0] sm:$0xff] }
 0x787   : > { %v12515_v1 = vld [vmem:[%s16955_s10 + $0xc0] sm:$0xff] }
 0x788   : > { %v5806_v19 = vadd.f32 %v5804_v7, %v5803_v58 }
 0x78a   : > { %v5807_v6 = vadd.f32 %v5806_v19, %v5805_v5  ;;  %v12516_v5 = vld [vmem:[%s16955_s10 + $0xc8] sm:$0xff]  ;;  %v12525_v19 = vld [vmem:[%s16955_s10 + $0xf8] sm:$0xff] }
 0x78c   : > { %v5814_v46 = vadd.f32 %v5812_v37, %v5807_v6  ;;  %v12517_v6 = vld [vmem:[%s16955_s10 + $0xd0] sm:$0xff]  ;;  %v12526_v37 = vld [vmem:[%s16955_s10 + $0x100] sm:$0xff] }
 0x78e   : > { %v5815_v11 = vmax.f32 %v5814_v46, 0.0  ;;  %v12533_v46 = vld [vmem:[%s16955_s10 + $0x120] sm:$0xff] }
 0x790   : > { %12481 = vmatmul.mubr.msk.f32.vlgmr.msra.gmra.mxu0 %vm5819_vm8, %v5815_v11  ;;  %12140 = vst.msk [vmem:[%s650_s23] sm:$0xff] %vm5819_vm8, %v5815_v11  ;;  %v12542_v11 = vld [vmem:[%s16955_s10 + $0x150] sm:$0xff] }
 0x791   : > { %13536 = vmatprep.mubr.msk.f32.mxu0 %vm13953_vm3, %v13952_v54 }
 0x850   : > { %v15165_v61 = vpop.f32.mrf.mxu0 }
 0x851   : > { %6007 = vrot.lane.b32.xlu1 %v15165_v61, %s16996_s2  ;;  %5906 = vrot.lane.b32.xlu0 %v15165_v61, %s13954_s22 }
 0x852   : > { %v15175_v63 = vpop.f32.mrf.mxu0 }
 0x855   : > { %6207 = vrot.lane.b32.xlu1 %v15165_v61, %s16997_s26  ;;  %6107 = vrot.lane.b32.xlu0 %v15165_v61, %s16998_s24 }
 0x859   : > { %6408 = vrot.lane.b32.xlu1 %v15175_v63, %s16996_s2  ;;  %6308 = vrot.lane.b32.xlu0 %v15175_v63, %s13954_s22 }
 0x85d   : > { %6608 = vrot.lane.b32.xlu1 %v15175_v63, %s16997_s26  ;;  %6508 = vrot.lane.b32.xlu0 %v15175_v63, %s16998_s24 }
 0x861   : > { %6881 = vrot.lane.b32.xlu1 %v15165_v61, %s16999_s27  ;;  %6789 = vrot.lane.b32.xlu0 %v15165_v61, %s16995_s21 }
 0x865   : > { %7154 = vrot.lane.b32.xlu1 %v15175_v63, %s16995_s21  ;;  %6973 = vrot.lane.b32.xlu0 %v15165_v61, %s17000_s30  ;;  %s655_s21 = scalar_lea.vmem %s16965_s20, %s14109_s29 }
 0x869   : > { %7338 = vrot.lane.b32.xlu1 %v15175_v63, %s17000_s30  ;;  %7246 = vrot.lane.b32.xlu0 %v15175_v63, %s16999_s27 }
 0x86d   : > { %7461 = vperm.xlu1 %13898, %v7452_v10   ;;  %7456 = vperm.xlu0 %13897, %v7451_v9   ;;  %v12535_v10 = vld [vmem:[%s16955_s10 + $0x130] sm:$0xff]  ;;  %v12544_v9 = vld [vmem:[%s16955_s10 + $0x160] sm:$0xff] }
 0x871   : > { %7466 = vperm.xlu0 %13897, %v7453_v23   ;;  %v7484_v23 = vld [vmem:[%s16960_s15 + $0x48] sm:$0xff] }
 0x8c3   : > { %v6008_v39 = vpop.permute.xlu1 %6007  ;;  %v5907_v50 = vpop.permute.xlu0 %5906 }
 0x8c4   : > { %13535 = vmatpush3.msra.mxu0 %v5907_v50  ;;  %13546 = vmatpush3.msra.mxu1 %v6008_v39  ;;  %v7485_v39 = vld [vmem:[%s16960_s15 + $0x50] sm:$0xff]  ;;  %v7476_v50 = vld [vmem:[%s16960_s15 + $0x8] sm:$0xff] }
 0x8c5   : > { %13537 = vmatmul.mubr.msk.f32.vlgmr.msra.gmra.mxu0 %vm5909_vm9, %v12482_v12  ;;  %13548 = vmatmul.mubr.msk.f32.vlgmr.msra.gmra.mxu1 %vm5909_vm9, %v12491_v13  ;;  %v7486_v12 = vld [vmem:[%s16960_s15 + $0x58] sm:$0xff]  ;;  %v7483_v13 = vld [vmem:[%s16960_s15 + $0x40] sm:$0xff] }
 0x8c6   : > { %13567 = vmatprep.subr.mxu1 %v13952_v54  ;;  %13556 = vmatprep.subr.mxu0 %v13952_v54 }
 0x8c7   : > { %v6208_v17 = vpop.permute.xlu1 %6207  ;;  %v6108_v18 = vpop.permute.xlu0 %6107  ;;  %13539 = vmatprep.mubr.msk.f32.mxu0 %vm13953_vm3, %v13952_v54  ;;  %13550 = vmatprep.mubr.msk.f32.mxu1 %vm13953_vm3, %v13952_v54 }
 0x8c8   : > { %13557 = vmatpush3.msra.mxu0 %v6108_v18  ;;  %13568 = vmatpush3.msra.mxu1 %v6208_v17  ;;  %v7477_v17 = vld [vmem:[%s16960_s15 + $0x10] sm:$0xff]  ;;  %v7488_v18 = vld [vmem:[%s16960_s15 + $0x68] sm:$0xff] }
 0x8c9   : > { %13540 = vmatmul.mubr.msk.f32.gmra.mxu0 %vm5909_vm9, %v12483_v14  ;;  %13551 = vmatmul.mubr.msk.f32.gmra.mxu1 %vm5909_vm9, %v12492_v16  ;;  %v7478_v14 = vld [vmem:[%s16960_s15 + $0x18] sm:$0xff]  ;;  %v7475_v16 = vld [vmem:[%s16960_s15] sm:$0xff] }
 0x8ca   : > { %13542 = vmatprep.mubr.msk.f32.mxu0 %vm13953_vm3, %v13952_v54  ;;  %13553 = vmatprep.mubr.msk.f32.mxu1 %vm13953_vm3, %v13952_v54 }
 0x8cb   : > { %13578 = vmatprep.subr.mxu0 %v13952_v54  ;;  %13589 = vmatprep.subr.mxu1 %v13952_v54  ;;  %v6409_v22 = vpop.permute.xlu1 %6408  ;;  %v6309_v24 = vpop.permute.xlu0 %6308 }
 0x8cd   : > { %13543 = vmatmul.mubr.msk.f32.gmra.mxu0 %vm5909_vm9, %v12484_v20  ;;  %13554 = vmatmul.mubr.msk.f32.gmra.mxu1 %vm5909_vm9, %v12493_v41  ;;  %v7490_v20 = vld [vmem:[%s16960_s15 + $0x78] sm:$0xff] }
 0x8ce   : > { %13558 = vmatprep.mubr.msk.f32.mxu0 %vm13953_vm3, %v13952_v54  ;;  %13569 = vmatprep.mubr.msk.f32.mxu1 %vm13953_vm3, %v13952_v54 }
 0x8cf   : > { %v6609_v29 = vpop.permute.xlu1 %6608  ;;  %v6509_v30 = vpop.permute.xlu0 %6508 }
 0x8d1   : > { %13559 = vmatmul.mubr.msk.f32.vlgmr.msra.gmra.mxu0 %vm5909_vm9, %v12500_v55  ;;  %13570 = vmatmul.mubr.msk.f32.vlgmr.msra.gmra.mxu1 %vm5909_vm9, %v12509_v21 }
 0x8d2   : > { %13579 = vmatpush3.msra.mxu0 %v6309_v24  ;;  %13590 = vmatpush3.msra.mxu1 %v6409_v22 }
 0x8d3   : > { %13561 = vmatprep.mubr.msk.f32.mxu0 %vm13953_vm3, %v13952_v54  ;;  %13572 = vmatprep.mubr.msk.f32.mxu1 %vm13953_vm3, %v13952_v54  ;;  %v6790_v36 = vpop.permute.xlu0 %6789  ;;  %v6882_v51 = vpop.permute.xlu1 %6881 }
 0x8d4   : > { %13600 = vmatprep.subr.mxu0 %v13952_v54  ;;  %13611 = vmatprep.subr.mxu1 %v13952_v54 }
 0x8d5   : > { %13562 = vmatmul.mubr.msk.f32.gmra.mxu0 %vm5909_vm9, %v12501_v25  ;;  %13573 = vmatmul.mubr.msk.f32.gmra.mxu1 %vm5909_vm9, %v12510_v26 }
 0x8d6   : > { %13564 = vmatprep.mubr.msk.f32.mxu0 %vm13953_vm3, %v13952_v54  ;;  %13575 = vmatprep.mubr.msk.f32.mxu1 %vm13953_vm3, %v13952_v54 }
 0x8d7   : > { %v6974_v52 = vpop.permute.xlu0 %6973  ;;  %v7155_v60 = vpop.permute.xlu1 %7154 }
 0x8d9   : > { %13565 = vmatmul.mubr.msk.f32.gmra.mxu0 %vm5909_vm9, %v12502_v45  ;;  %13576 = vmatmul.mubr.msk.f32.gmra.mxu1 %vm5909_vm9, %v12511_v27 }
 0x8da   : > { %13580 = vmatprep.mubr.msk.f32.mxu0 %vm13953_vm3, %v13952_v54  ;;  %13591 = vmatprep.mubr.msk.f32.mxu1 %vm13953_vm3, %v13952_v54 }
 0x8db   : > { %v7339_v58 = vpop.permute.xlu1 %7338  ;;  %v7247_v7 = vpop.permute.xlu0 %7246 }
 0x8dd   : > { %13581 = vmatmul.mubr.msk.f32.vlgmr.msra.gmra.mxu0 %vm5909_vm9, %v12518_v28  ;;  %13592 = vmatmul.mubr.msk.f32.vlgmr.msra.gmra.mxu1 %vm5909_vm9, %v12527_v59 }
 0x8de   : > { %13601 = vmatpush3.msra.mxu0 %v6509_v30  ;;  %13612 = vmatpush3.msra.mxu1 %v6609_v29 }
 0x8df   : > { %13583 = vmatprep.mubr.msk.f32.mxu0 %vm13953_vm3, %v13952_v54  ;;  %13594 = vmatprep.mubr.msk.f32.mxu1 %vm13953_vm3, %v13952_v54 }
 0x8e0   : > { %13633 = vmatprep.subr.mxu1 %v13952_v54  ;;  %13622 = vmatprep.subr.mxu0 %v13952_v54 }
 0x8e1   : > { %13584 = vmatmul.mubr.msk.f32.gmra.mxu0 %vm5909_vm9, %v12519_v31  ;;  %13595 = vmatmul.mubr.msk.f32.gmra.mxu1 %vm5909_vm9, %v12528_v32 }
 0x8e2   : > { %13586 = vmatprep.mubr.msk.f32.mxu0 %vm13953_vm3, %v13952_v54  ;;  %13597 = vmatprep.mubr.msk.f32.mxu1 %vm13953_vm3, %v13952_v54 }
 0x8e5   : > { %13587 = vmatmul.mubr.msk.f32.gmra.mxu0 %vm5909_vm9, %v12520_v33  ;;  %13598 = vmatmul.mubr.msk.f32.gmra.mxu1 %vm5909_vm9, %v12529_v49 }
 0x8e6   : > { %13613 = vmatprep.mubr.msk.f32.mxu1 %vm13953_vm3, %v13952_v54  ;;  %13602 = vmatprep.mubr.msk.f32.mxu0 %vm13953_vm3, %v13952_v54 }
 0x8e9   : > { %13603 = vmatmul.mubr.msk.f32.vlgmr.msra.gmra.mxu0 %vm5909_vm9, %v12536_v34  ;;  %13614 = vmatmul.mubr.msk.f32.vlgmr.msra.gmra.mxu1 %vm5909_vm9, %v12545_v0 }
 0x8ea   : > { %13623 = vmatpush3.msra.mxu0 %v15165_v61  ;;  %13634 = vmatpush3.msra.mxu1 %v6790_v36  ;;  %v12534_v61 = vld [vmem:[%s16955_s10 + $0x128] sm:$0xff] }
 0x8eb   : > { %13605 = vmatprep.mubr.msk.f32.mxu0 %vm13953_vm3, %v13952_v54  ;;  %13616 = vmatprep.mubr.msk.f32.mxu1 %vm13953_vm3, %v13952_v54 }
 0x8ec   : > { %13644 = vmatprep.subr.mxu0 %v13952_v54  ;;  %13655 = vmatprep.subr.mxu1 %v13952_v54 }
 0x8ed   : > { %13606 = vmatmul.mubr.msk.f32.gmra.mxu0 %vm5909_vm9, %v12537_v38  ;;  %13617 = vmatmul.mubr.msk.f32.gmra.mxu1 %vm5909_vm9, %v12546_v40 }
 0x8ee   : > { %13608 = vmatprep.mubr.msk.f32.mxu0 %vm13953_vm3, %v13952_v54  ;;  %13619 = vmatprep.mubr.msk.f32.mxu1 %vm13953_vm3, %v13952_v54 }
 0x8f1   : > { %13609 = vmatmul.mubr.msk.f32.gmra.mxu0 %vm5909_vm9, %v12538_v43  ;;  %13620 = vmatmul.mubr.msk.f32.gmra.mxu1 %vm5909_vm9, %v12547_v44 }
 0x8f2   : > { %13624 = vmatprep.mubr.msk.f32.mxu0 %vm13953_vm3, %v13952_v54  ;;  %13635 = vmatprep.mubr.msk.f32.mxu1 %vm13953_vm3, %v13952_v54 }
 0x8f5   : > { %13625 = vmatmul.mubr.msk.f32.vlgmr.msra.gmra.mxu0 %vm5909_vm9, %v5898_v47  ;;  %13636 = vmatmul.mubr.msk.f32.vlgmr.msra.gmra.mxu1 %vm5909_vm9, %v12488_v48 }
 0x8f6   : > { %13645 = vmatpush3.msra.mxu0 %v6882_v51  ;;  %13656 = vmatpush3.msra.mxu1 %v6974_v52 }
 0x8f7   : > { %13627 = vmatprep.mubr.msk.f32.mxu0 %vm13953_vm3, %v13952_v54  ;;  %13638 = vmatprep.mubr.msk.f32.mxu1 %vm13953_vm3, %v13952_v54 }
 0x8f8   : > { %13666 = vmatprep.subr.mxu0 %v13952_v54  ;;  %13677 = vmatprep.subr.mxu1 %v13952_v54 }
 0x8f9   : > { %13628 = vmatmul.mubr.msk.f32.gmra.mxu0 %vm5909_vm9, %v5899_v56  ;;  %13639 = vmatmul.mubr.msk.f32.gmra.mxu1 %vm5909_vm9, %v12489_v4 }
 0x8fa   : > { %13630 = vmatprep.mubr.msk.f32.mxu0 %vm13953_vm3, %v13952_v54  ;;  %13641 = vmatprep.mubr.msk.f32.mxu1 %vm13953_vm3, %v13952_v54 }
 0x8fd   : > { %13631 = vmatmul.mubr.msk.f32.gmra.mxu0 %vm5909_vm9, %v5900_v57  ;;  %13642 = vmatmul.mubr.msk.f32.gmra.mxu1 %vm5909_vm9, %v12490_v62 }
 0x8fe   : > { %13646 = vmatprep.mubr.msk.f32.mxu0 %vm13953_vm3, %v13952_v54  ;;  %13657 = vmatprep.mubr.msk.f32.mxu1 %vm13953_vm3, %v13952_v54 }
 0x901   : > { %13647 = vmatmul.mubr.msk.f32.vlgmr.msra.gmra.mxu0 %vm5909_vm9, %v12497_v53  ;;  %13658 = vmatmul.mubr.msk.f32.vlgmr.msra.gmra.mxu1 %vm5909_vm9, %v12506_v3 }
 0x902   : > { %13667 = vmatpush3.msra.mxu0 %v15175_v63  ;;  %13678 = vmatpush3.msra.mxu1 %v7155_v60  ;;  %v12543_v63 = vld [vmem:[%s16955_s10 + $0x158] sm:$0xff] }
 0x903   : > { %13649 = vmatprep.mubr.msk.f32.mxu0 %vm13953_vm3, %v13952_v54  ;;  %13660 = vmatprep.mubr.msk.f32.mxu1 %vm13953_vm3, %v13952_v54 }
 0x904   : > { %13688 = vmatprep.subr.mxu0 %v13952_v54  ;;  %13699 = vmatprep.subr.mxu1 %v13952_v54 }
 0x905   : > { %13650 = vmatmul.mubr.msk.f32.gmra.mxu0 %vm5909_vm9, %v12498_v15  ;;  %13661 = vmatmul.mubr.msk.f32.gmra.mxu1 %vm5909_vm9, %v12507_v35 }
 0x906   : > { %13652 = vmatprep.mubr.msk.f32.mxu0 %vm13953_vm3, %v13952_v54  ;;  %13663 = vmatprep.mubr.msk.f32.mxu1 %vm13953_vm3, %v13952_v54 }
 0x909   : > { %13653 = vmatmul.mubr.msk.f32.gmra.mxu0 %vm5909_vm9, %v12499_v42  ;;  %13664 = vmatmul.mubr.msk.f32.gmra.mxu1 %vm5909_vm9, %v12508_v8 }
 0x90a   : > { %13668 = vmatprep.mubr.msk.f32.mxu0 %vm13953_vm3, %v13952_v54  ;;  %13679 = vmatprep.mubr.msk.f32.mxu1 %vm13953_vm3, %v13952_v54 }
 0x90d   : > { %13669 = vmatmul.mubr.msk.f32.vlgmr.msra.gmra.mxu0 %vm5909_vm9, %v12515_v1  ;;  %13680 = vmatmul.mubr.msk.f32.vlgmr.msra.gmra.mxu1 %vm5909_vm9, %v12524_v2 }
 0x90e   : > { %13689 = vmatpush3.msra.mxu0 %v7247_v7  ;;  %13700 = vmatpush3.msra.mxu1 %v7339_v58 }
 0x90f   : > { %13671 = vmatprep.mubr.msk.f32.mxu0 %vm13953_vm3, %v13952_v54  ;;  %13682 = vmatprep.mubr.msk.f32.mxu1 %vm13953_vm3, %v13952_v54 }
 0x910   : > { %7528 = vmatprep.subr.mxu0 %v7484_v23  ;;  %7611 = vmatprep.subr.mxu1 %v7486_v12 }
 0x911   : > { %13672 = vmatmul.mubr.msk.f32.gmra.mxu0 %vm5909_vm9, %v12516_v5  ;;  %13683 = vmatmul.mubr.msk.f32.gmra.mxu1 %vm5909_vm9, %v12525_v19 }
 0x912   : > { %13674 = vmatprep.mubr.msk.f32.mxu0 %vm13953_vm3, %v13952_v54  ;;  %13685 = vmatprep.mubr.msk.f32.mxu1 %vm13953_vm3, %v13952_v54 }
 0x915   : > { %13675 = vmatmul.mubr.msk.f32.gmra.mxu0 %vm5909_vm9, %v12517_v6  ;;  %13686 = vmatmul.mubr.msk.f32.gmra.mxu1 %vm5909_vm9, %v12526_v37 }
 0x916   : > { %13690 = vmatprep.mubr.msk.f32.mxu0 %vm13953_vm3, %v13952_v54  ;;  %13701 = vmatprep.mubr.msk.f32.mxu1 %vm13953_vm3, %v13952_v54 }
 0x919   : > { %13691 = vmatmul.mubr.msk.f32.vlgmr.msra.gmra.mxu0 %vm5909_vm9, %v12533_v46  ;;  %13702 = vmatmul.mubr.msk.f32.vlgmr.msra.gmra.mxu1 %vm5909_vm9, %v12542_v11 }
 0x91a   : > { %13693 = vmatprep.mubr.msk.f32.mxu0 %vm13953_vm3, %v13952_v54  ;;  %13704 = vmatprep.mubr.msk.f32.mxu1 %vm13953_vm3, %v13952_v54 }
 0x91b   : > { %7529 = vmatpush1.msra.mxu0 %v7483_v13  ;;  %7612 = vmatpush1.msra.mxu1 %v7485_v39 }
 0x91c   : > { %7530 = vmatprep.subr.mxu0 %v7476_v50  ;;  %7613 = vmatprep.subr.mxu1 %v7478_v14 }
 0x91d   : > { %13694 = vmatmul.mubr.msk.f32.gmra.mxu0 %vm5909_vm9, %v12534_v61  ;;  %13705 = vmatmul.mubr.msk.f32.gmra.mxu1 %vm5909_vm9, %v12543_v63 }
 0x91e   : > { %13696 = vmatprep.mubr.msk.f32.mxu0 %vm13953_vm3, %v13952_v54  ;;  %13707 = vmatprep.mubr.msk.f32.mxu1 %vm13953_vm3, %v13952_v54 }
 0x91f   : > { %7531 = vmatpush1.msra.mxu0 %v7475_v16  ;;  %7614 = vmatpush1.msra.mxu1 %v7477_v17 }
 0x920   : > { %7694 = vmatprep.subr.mxu0 %v7488_v18  ;;  %7777 = vmatprep.subr.mxu1 %v7490_v20 }
 0x921   : > { %13697 = vmatmul.mubr.msk.f32.gmra.mxu0 %vm5909_vm9, %v12535_v10  ;;  %13708 = vmatmul.mubr.msk.f32.gmra.mxu1 %vm5909_vm9, %v12544_v9 }
 0x922   : > { %7564 = vmatprep.mubr.f32.mxu0 %v13952_v54  ;;  %7647 = vmatprep.mubr.f32.mxu1 %v13952_v54 }
 0x985   : > { %v5985_v41 = vpop.f32.mrf.mxu0  ;;  %v6085_v55 = vpop.f32.mrf.mxu1 }
 0x987   : > { %v13538_v21 = vpop.f32.mrf.mxu0  ;;  %v13549_v22 = vpop.f32.mrf.mxu1 }
 0x989   : > { %v5990_v24 = vpop.f32.mrf.mxu0  ;;  %v6090_v25 = vpop.f32.mrf.mxu1 }
 0x98b   : > { %v13541_v26 = vpop.f32.mrf.mxu0  ;;  %v13552_v45 = vpop.f32.mrf.mxu1 }
 0x98d   : > { %v5995_v27 = vpop.f32.mrf.mxu0  ;;  %v6095_v28 = vpop.f32.mrf.mxu1 }
 0x98f   : > { %v13544_v59 = vpop.f32.mrf.mxu0  ;;  %v13555_v29 = vpop.f32.mrf.mxu1 }
 0x991   : > { %v6185_v30 = vpop.f32.mrf.mxu0  ;;  %v6285_v31 = vpop.f32.mrf.mxu1 }
 0x993   : > { %v13560_v32 = vpop.f32.mrf.mxu0  ;;  %v13571_v33 = vpop.f32.mrf.mxu1 }
 0x995   : > { %v15538_v49 = vpop.f32.mrf.mxu0  ;;  %v15540_v34 = vpop.f32.mrf.mxu1 }
 0x997   : > { %v13563_v0 = vpop.f32.mrf.mxu0  ;;  %v13574_v36 = vpop.f32.mrf.mxu1 }
 0x999   : > { %v15542_v38 = vpop.f32.mrf.mxu0  ;;  %v15544_v40 = vpop.f32.mrf.mxu1 }
 0x99b   : > { %v13566_v43 = vpop.f32.mrf.mxu0  ;;  %v13577_v44 = vpop.f32.mrf.mxu1 }
 0x99d   : > { %v15546_v47 = vpop.f32.mrf.mxu0  ;;  %v15548_v48 = vpop.f32.mrf.mxu1 }
 0x99f   : > { %v13582_v51 = vpop.f32.mrf.mxu0  ;;  %v13593_v52 = vpop.f32.mrf.mxu1 }
 0x9a1   : > { %v15550_v56 = vpop.f32.mrf.mxu0  ;;  %v15552_v4 = vpop.f32.mrf.mxu1 }
 0x9a3   : > { %v13585_v57 = vpop.f32.mrf.mxu0  ;;  %v13596_v62 = vpop.f32.mrf.mxu1 }
 0x9a5   : > { %v15554_v53 = vpop.f32.mrf.mxu0  ;;  %v15556_v3 = vpop.f32.mrf.mxu1 }
 0x9a7   : > { %v13588_v60 = vpop.f32.mrf.mxu0  ;;  %v13599_v15 = vpop.f32.mrf.mxu1 }
 0x9a9   : > { %v15558_v35 = vpop.f32.mrf.mxu0  ;;  %v15560_v42 = vpop.f32.mrf.mxu1 }
 0x9ab   : > { %v13604_v8 = vpop.f32.mrf.mxu0  ;;  %v13615_v1 = vpop.f32.mrf.mxu1 }
 0x9ad   : > { %v15562_v2 = vpop.f32.mrf.mxu0  ;;  %v15564_v58 = vpop.f32.mrf.mxu1 }
 0x9af   : > { %v13607_v7 = vpop.f32.mrf.mxu0  ;;  %v13618_v5 = vpop.f32.mrf.mxu1 }
 0x9b1   : > { %v15566_v19 = vpop.f32.mrf.mxu0  ;;  %v15568_v6 = vpop.f32.mrf.mxu1 }
 0x9b3   : > { %v13610_v37 = vpop.f32.mrf.mxu0  ;;  %v13621_v46 = vpop.f32.mrf.mxu1 }
 0x9b5   : > { %v6775_v11 = vpop.f32.mrf.mxu0  ;;  %v6867_v61 = vpop.f32.mrf.mxu1 }
 0x9b6   : > { %v6776_v63 = vadd.f32 %v6775_v11, %v5985_v41  ;;  %v6868_v10 = vadd.f32 %v6867_v61, %v6085_v55 }
 0x9b7   : > { %v13626_v9 = vpop.f32.mrf.mxu0  ;;  %v13637_v23 = vpop.f32.mrf.mxu1 }
 0x9b8   : > { %v7430_v12 = vadd.f32 %v6868_v10, %v6776_v63 }
 0x9b9   : > { %v6780_v13 = vpop.f32.mrf.mxu0  ;;  %v6872_v39 = vpop.f32.mrf.mxu1 }
 0x9ba   : > { %v6781_v50 = vadd.f32 %v6780_v13, %v5990_v24  ;;  %v6873_v14 = vadd.f32 %v6872_v39, %v6090_v25 }
 0x9bb   : > { %v13629_v16 = vpop.f32.mrf.mxu0  ;;  %v13640_v17 = vpop.f32.mrf.mxu1 }
 0x9bc   : > { %v7431_v18 = vadd.f32 %v6873_v14, %v6781_v50 }
 0x9bd   : > { %v6785_v20 = vpop.f32.mrf.mxu0  ;;  %v6877_v21 = vpop.f32.mrf.mxu1 }
 0x9be   : > { %v6786_v22 = vadd.f32 %v6785_v20, %v5995_v27  ;;  %v6878_v26 = vadd.f32 %v6877_v21, %v6095_v28 }
 0x9bf   : > { %v13632_v45 = vpop.f32.mrf.mxu0  ;;  %v13643_v59 = vpop.f32.mrf.mxu1 }
 0x9c0   : > { %v7432_v29 = vadd.f32 %v6878_v26, %v6786_v22 }
 0x9c1   : > { %v6959_v32 = vpop.f32.mrf.mxu0  ;;  %v7051_v41 = vpop.f32.mrf.mxu1 }
 0x9c2   : > { %v6960_v55 = vadd.f32 %v6959_v32, %v6185_v30  ;;  %v7052_v33 = vadd.f32 %v7051_v41, %v6285_v31 }
 0x9c3   : > { %v13648_v0 = vpop.f32.mrf.mxu0  ;;  %v13659_v36 = vpop.f32.mrf.mxu1 }
 0x9c4   : > { %v7433_v43 = vadd.f32 %v7052_v33, %v6960_v55  ;;  %v7457_v55 = vpop.permute.xlu0 %7456 }
 0x9c5   : > { %v6964_v44 = vpop.f32.mrf.mxu0  ;;  %v7056_v24 = vpop.f32.mrf.mxu1 }
 0x9c6   : > { %v7442_v25 = vadd.f32 %v7433_v43, %v7430_v12  ;;  %v6965_v51 = vadd.f32 %v6964_v44, %v15538_v49  ;;  %v7057_v52 = vadd.f32 %v7056_v24, %v15540_v34 }
 0x9c7   : > { %v13651_v57 = vpop.f32.mrf.mxu0  ;;  %v13662_v27 = vpop.f32.mrf.mxu1 }
 0x9c8   : > { %v7434_v28 = vadd.f32 %v7057_v52, %v6965_v51 }
 0x9c9   : > { %v6969_v62 = vpop.f32.mrf.mxu0  ;;  %v7061_v60 = vpop.f32.mrf.mxu1 }
 0x9ca   : > { %v7443_v15 = vadd.f32 %v7434_v28, %v7431_v18  ;;  %v6970_v8 = vadd.f32 %v6969_v62, %v15542_v38  ;;  %v7062_v30 = vadd.f32 %v7061_v60, %v15544_v40  ;;  %v7462_v62 = vpop.permute.xlu1 %7461 }
 0x9cb   : > { %v13654_v31 = vpop.f32.mrf.mxu0  ;;  %v13665_v1 = vpop.f32.mrf.mxu1 }
 0x9cc   : > { %v7435_v7 = vadd.f32 %v7062_v30, %v6970_v8  ;;  %v7467_v30 = vpop.permute.xlu0 %7466  ;;  %v7479_v31 = vld [vmem:[%s16960_s15 + $0x20] sm:$0xff]  ;;  %v7481_v1 = vld [vmem:[%s16960_s15 + $0x30] sm:$0xff] }
 0x9cd   : > { %v7140_v5 = vpop.f32.mrf.mxu0  ;;  %v7232_v37 = vpop.f32.mrf.mxu1 }
 0x9ce   : > { %v7444_v46 = vadd.f32 %v7435_v7, %v7432_v29  ;;  %v7141_v38 = vadd.f32 %v7140_v5, %v15546_v47  ;;  %v7233_v40 = vadd.f32 %v7232_v37, %v15548_v48 }
 0x9cf   : > { %v13670_v11 = vpop.f32.mrf.mxu0  ;;  %v13681_v49 = vpop.f32.mrf.mxu1 }
 0x9d0   : > { %v7436_v22 = vadd.f32 %v7233_v40, %v7141_v38 }
 0x9d1   : > { %v7145_v61 = vpop.f32.mrf.mxu0  ;;  %v7237_v34 = vpop.f32.mrf.mxu1 }
 0x9d2   : > { %v7146_v17 = vadd.f32 %v7145_v61, %v15550_v56  ;;  %v7238_v18 = vadd.f32 %v7237_v34, %v15552_v4 }
 0x9d3   : > { %v13673_v63 = vpop.f32.mrf.mxu0  ;;  %v13684_v10 = vpop.f32.mrf.mxu1 }
 0x9d4   : > { %v7437_v32 = vadd.f32 %v7238_v18, %v7146_v17 }
 0x9d5   : > { %v7150_v9 = vpop.f32.mrf.mxu0  ;;  %v7242_v23 = vpop.f32.mrf.mxu1 }
 0x9d6   : > { %v7243_v56 = vadd.f32 %v7242_v23, %v15556_v3  ;;  %v7489_v3 = vld [vmem:[%s16960_s15 + $0x70] sm:$0xff] }
 0x9d7   : > { %v13676_v12 = vpop.f32.mrf.mxu0  ;;  %v13687_v13 = vpop.f32.mrf.mxu1 }
 0x9d8   : > { %v12593_v13 = vld [vmem:[%s16958_s13 + $0x30] sm:$0xff] }
 0x9d9   : > { %v7324_v39 = vpop.f32.mrf.mxu0  ;;  %v7416_v50 = vpop.f32.mrf.mxu1 }
 0x9da   : > { %v7325_v14 = vadd.f32 %v7324_v39, %v15558_v35  ;;  %v7417_v16 = vadd.f32 %v7416_v50, %v15560_v42  ;;  %v7151_v42 = vadd.f32 %v7150_v9, %v15554_v53  ;;  %v7487_v53 = vld [vmem:[%s16960_s15 + $0x60] sm:$0xff]  ;;  %v12587_v9 = vld [vmem:[%s16958_s13 + $0x10] sm:$0xff] }
 0x9db   : > { %v13692_v20 = vpop.f32.mrf.mxu0  ;;  %v13703_v21 = vpop.f32.mrf.mxu1 }
 0x9dc   : > { %v7439_v26 = vadd.f32 %v7417_v16, %v7325_v14  ;;  %v7438_v52 = vadd.f32 %v7243_v56, %v7151_v42 }
 0x9dd   : > { %v7329_v45 = vpop.f32.mrf.mxu0  ;;  %v7421_v59 = vpop.f32.mrf.mxu1 }
 0x9de   : > { %v7445_v29 = vadd.f32 %v7439_v26, %v7436_v22  ;;  %v7330_v47 = vadd.f32 %v7329_v45, %v15562_v2  ;;  %v7422_v48 = vadd.f32 %v7421_v59, %v15564_v58 }
 0x9df   : > { %v13695_v41 = vpop.f32.mrf.mxu0  ;;  %v13706_v35 = vpop.f32.mrf.mxu1 }
 0x9e0   : > { %v7448_v4 = vadd.f32 %v7445_v29, %v7442_v25  ;;  %v7440_v33 = vadd.f32 %v7422_v48, %v7330_v47  ;;  %v9285_v29 = vld [vmem:[%s16959_s14] sm:$0xff]  ;;  %v9286_v47 = vld [vmem:[%s16959_s14 + $0x8] sm:$0xf] }
 0x9e1   : > { %v7334_v0 = vpop.f32.mrf.mxu0  ;;  %v7426_v36 = vpop.f32.mrf.mxu1  ;;  %v12120_v48 = vld [vmem:[%s16962_s17] sm:$0x7] }
 0x9e2   : > { %v7469_v43 = vadd.f32 %v7457_v55, %v7448_v4  ;;  %v7446_v44 = vadd.f32 %v7440_v33, %v7437_v32  ;;  %v7335_v24 = vadd.f32 %v7334_v0, %v15566_v19  ;;  %v7427_v2 = vadd.f32 %v7426_v36, %v15568_v6  ;;  %v7480_v19 = vld [vmem:[%s16960_s15 + $0x28] sm:$0xff]  ;;  %v7482_v6 = vld [vmem:[%s16960_s15 + $0x38] sm:$0xff] }
 0x9e3   : > { %v13698_v51 = vpop.f32.mrf.mxu0  ;;  %v13709_v58 = vpop.f32.mrf.mxu1 }
 0x9e4   : > { %v7472_v57 = vmax.f32 %v7469_v43, 0.0  ;;  %v7449_v27 = vadd.f32 %v7446_v44, %v7443_v15  ;;  %v7441_v28 = vadd.f32 %v7427_v2, %v7335_v24  ;;  %v12588_v44 = vld [vmem:[%s16958_s13 + $0x18] sm:$0xf] }
 0x9e5   : > { %v12594_v2 = vld [vmem:[%s16958_s13 + $0x38] sm:$0xf] }
 0x9e6   : > { %v7470_v25 = vadd.f32 %v7462_v62, %v7449_v27  ;;  %v7447_v60 = vadd.f32 %v7441_v28, %v7438_v52  ;;  %12575 = vmatmul.mubr.msk.f32.vlgmr.msra.gmra.mxu0 %vm4373_vm6, %v7472_v57  ;;  %12578 = vmatmul.mubr.msk.f32.vlgmr.msra.gmra.mxu1 %vm4373_vm6, %v7472_v57  ;;  %v12599_v52 = vld [vmem:[%s16958_s13 + $0x50] sm:$0xff]  ;;  %v12600_v27 = vld [vmem:[%s16958_s13 + $0x58] sm:$0xf] }
 0x9e7   : > { %7570 = vmatprep.mubr.f32.mxu0 %v13952_v54  ;;  %7653 = vmatprep.mubr.f32.mxu1 %v13952_v54  ;;  %v12605_v28 = vld [vmem:[%s16958_s13 + $0x70] sm:$0xff] }
 0x9e8   : > { %v7473_v15 = vmax.f32 %v7470_v25, 0.0  ;;  %v7450_v8 = vadd.f32 %v7447_v60, %v7444_v46  ;;  %7695 = vmatpush1.msra.mxu0 %v7487_v53  ;;  %7778 = vmatpush1.msra.mxu1 %v7489_v3  ;;  %v12611_v62 = vld [vmem:[%s16958_s13 + $0x90] sm:$0xff]  ;;  %v12606_v3 = vld [vmem:[%s16958_s13 + $0x78] sm:$0xf] }
 0x9e9   : > { %7696 = vmatprep.subr.mxu0 %v7480_v19  ;;  %7779 = vmatprep.subr.mxu1 %v7482_v6  ;;  %v12617_v25 = vld [vmem:[%s16958_s13 + $0xb0] sm:$0xff] }
 0x9ea   : > { %v7471_v7 = vadd.f32 %v7467_v30, %v7450_v8  ;;  %12576 = vmatmul.mubr.msk.f32.gmra.mxu0 %vm4373_vm6, %v7473_v15  ;;  %12579 = vmatmul.mubr.msk.f32.gmra.mxu1 %vm4373_vm6, %v7473_v15  ;;  %v12623_v8 = vld [vmem:[%s16958_s13 + $0xd0] sm:$0xff] }
 0x9eb   : > { %7576 = vmatprep.mubr.f32.mxu0 %v13952_v54  ;;  %7659 = vmatprep.mubr.f32.mxu1 %v13952_v54 }
 0x9ec   : > { %v7474_v5 = vmax.f32 %v7471_v7, 0.0  ;;  %7697 = vmatpush1.msra.mxu0 %v7479_v31  ;;  %7780 = vmatpush1.msra.mxu1 %v7481_v1  ;;  %v12618_v31 = vld [vmem:[%s16958_s13 + $0xb8] sm:$0xf]  ;;  %v12629_v1 = vld [vmem:[%s16958_s13 + $0xf0] sm:$0xff] }
 0x9ee   : > { %12577 = vmatmul.mubr.msk.f32.gmra.mxu0 %vm4373_vm6, %v7474_v5  ;;  %12580 = vmatmul.mubr.msk.f32.gmra.mxu1 %vm4373_vm6, %v7474_v5 }
 0x9ef   : > { %7730 = vmatprep.mubr.f32.mxu0 %v13952_v54  ;;  %7813 = vmatprep.mubr.f32.mxu1 %v13952_v54 }
 0x9f2   : > { %12581 = vmatmul.mubr.msk.f32.vlgmr.msra.gmra.mxu0 %vm4373_vm6, %v7472_v57  ;;  %12584 = vmatmul.mubr.msk.f32.vlgmr.msra.gmra.mxu1 %vm4373_vm6, %v7472_v57 }
 0x9f3   : > { %7736 = vmatprep.mubr.f32.mxu0 %v13952_v54  ;;  %7819 = vmatprep.mubr.f32.mxu1 %v13952_v54 }
 0x9f6   : > { %12582 = vmatmul.mubr.msk.f32.gmra.mxu0 %vm4373_vm6, %v7473_v15  ;;  %12585 = vmatmul.mubr.msk.f32.gmra.mxu1 %vm4373_vm6, %v7473_v15  ;;  %v12612_v15 = vld [vmem:[%s16958_s13 + $0x98] sm:$0xf] }
 0x9f7   : > { %7742 = vmatprep.mubr.f32.mxu0 %v13952_v54  ;;  %7825 = vmatprep.mubr.f32.mxu1 %v13952_v54 }
 0x9fa   : > { %12583 = vmatmul.mubr.msk.f32.gmra.mxu0 %vm4373_vm6, %v7474_v5  ;;  %12586 = vmatmul.mubr.msk.f32.gmra.mxu1 %vm4373_vm6, %v7474_v5 }
 0x9fb   : > { %13716 = vmatprep.mubr.msk.f32.mxu0 %vm4478_vm7, %v12587_v9  ;;  %13725 = vmatprep.mubr.msk.f32.mxu1 %vm4478_vm7, %v12593_v13  ;;  %v12624_v13 = vld [vmem:[%s16958_s13 + $0xd8] sm:$0xf] }
 0xaa6   : > { %v15626_v37 = vpop.f32.mrf.mxu0  ;;  %v15628_v46 = vpop.f32.mrf.mxu1 }
 0xaa7   : > { %7840 = vrot.lane.b32.xlu1 %v15626_v37, %s16999_s27 }
 0xaa8   : > { %v15632_v11 = vpop.f32.mrf.mxu0  ;;  %v15634_v49 = vpop.f32.mrf.mxu1 }
 0xaa9   : > { %7939 = vrot.lane.b32.xlu0 %v15632_v11, %s16999_s27 }
 0xaaa   : > { %v15638_v61 = vpop.f32.mrf.mxu0  ;;  %v15642_v34 = vpop.f32.mrf.mxu1 }
 0xaab   : > { %8038 = vrot.lane.b32.xlu1 %v15628_v46, %s16999_s27 }
 0xaac   : > { %v15644_v63 = vpop.f32.mrf.mxu0  ;;  %v15655_v23 = vpop.f32.mrf.mxu1 }
 0xaad   : > { %8137 = vrot.lane.b32.xlu0 %v15634_v49, %s16999_s27 }
 0xaae   : > { %v15648_v10 = vpop.f32.mrf.mxu0  ;;  %v15668_v38 = vpop.f32.mrf.mxu1 }
 0xaaf   : > { %7842 = vrot.lane.b32.xlu1 %v15638_v61, %s16999_s27 }
 0xab0   : > { %v15657_v12 = vpop.f32.mrf.mxu0  ;;  %v15676_v39 = vpop.f32.mrf.mxu1 }
 0xab1   : > { %7941 = vrot.lane.b32.xlu0 %v15644_v63, %s16999_s27 }
 0xab2   : > { %v15670_v40 = vpop.f32.mrf.mxu0  ;;  %v15684_v14 = vpop.f32.mrf.mxu1 }
 0xab3   : > { %8040 = vrot.lane.b32.xlu1 %v15642_v34, %s16999_s27 }
 0xab4   : > { %v15678_v50 = vpop.f32.mrf.mxu0  ;;  %v15692_v17 = vpop.f32.mrf.mxu1 }
 0xab5   : > { %8139 = vrot.lane.b32.xlu0 %v15655_v23, %s16999_s27 }
 0xab6   : > { %v15686_v16 = vpop.f32.mrf.mxu0  ;;  %v15700_v20 = vpop.f32.mrf.mxu1 }
 0xab7   : > { %7844 = vrot.lane.b32.xlu1 %v15648_v10, %s16999_s27 }
 0xab8   : > { %v15694_v18 = vpop.f32.mrf.mxu0  ;;  %v15708_v22 = vpop.f32.mrf.mxu1 }
 0xab9   : > { %7943 = vrot.lane.b32.xlu0 %v15657_v12, %s16999_s27 }
 0xaba   : > { %v15702_v21 = vpop.f32.mrf.mxu0  ;;  %v15716_v45 = vpop.f32.mrf.mxu1 }
 0xabb   : > { %8042 = vrot.lane.b32.xlu1 %v15668_v38, %s16999_s27 }
 0xabc   : > { %v15710_v26 = vpop.f32.mrf.mxu0  ;;  %v15722_v59 = vpop.f32.mrf.mxu1 }
 0xabd   : > { %8141 = vrot.lane.b32.xlu0 %v15676_v39, %s16999_s27 }
 0xabf   : > { %8236 = vrot.lane.b32.xlu1 %v15670_v40, %s16999_s27 }
 0xac1   : > { %8335 = vrot.lane.b32.xlu0 %v15678_v50, %s16999_s27 }
 0xac3   : > { %8238 = vrot.lane.b32.xlu1 %v15686_v16, %s16999_s27 }
 0xac5   : > { %8337 = vrot.lane.b32.xlu0 %v15694_v18, %s16999_s27 }
 0xac7   : > { %8240 = vrot.lane.b32.xlu1 %v15702_v21, %s16999_s27 }
 0xac9   : > { %8339 = vrot.lane.b32.xlu0 %v15710_v26, %s16999_s27 }
 0xacb   : > { %8436 = vrot.lane.b32.xlu1 %v15700_v20, %s16999_s27 }
 0xacd   : > { %8535 = vrot.lane.b32.xlu0 %v15708_v22, %s16999_s27 }
 0xacf   : > { %8438 = vrot.lane.b32.xlu1 %v15716_v45, %s16999_s27 }
 0xad1   : > { %8537 = vrot.lane.b32.xlu0 %v15722_v59, %s16999_s27 }
 0xad3   : > { %8434 = vrot.lane.b32.xlu1 %v15684_v14, %s16999_s27 }
 0xad5   : > { %8533 = vrot.lane.b32.xlu0 %v15692_v17, %s16999_s27 }
 0xad7   : > { %9289 = vperm.xlu1 %13898, %v9285_v29  }
 0xad9   : > { %9294 = vperm.xlu0 %13897, %v9286_v47   ;;  %v12630_v47 = vld [vmem:[%s16958_s13 + $0xf8] sm:$0xf] }
 0xadb   : > { %12123 = vperm.xlu1 %13898, %v12120_v48   ;;  %v7832_v48 = vld [vmem:[%s16958_s13] sm:$0xff] }
 0xb19   : > { %v7841_v32 = vpop.permute.xlu1 %7840 }
 0xb1b   : > { %v7940_v41 = vpop.permute.xlu0 %7939 }
 0xb1d   : > { %v8039_v35 = vpop.permute.xlu1 %8038 }
 0xb1f   : > { %v8138_v55 = vpop.permute.xlu0 %8137 }
 0xb21   : > { %v7843_v42 = vpop.permute.xlu1 %7842 }
 0xb23   : > { %v7942_v56 = vpop.permute.xlu0 %7941 }
 0xb25   : > { %v8041_v4 = vpop.permute.xlu1 %8040 }
 0xb27   : > { %v8140_v33 = vpop.permute.xlu0 %8139 }
 0xb29   : > { %v7845_v0 = vpop.permute.xlu1 %7844 }
 0xb2a   : > { %13710 = vmatprep.subr.mxu0 %v7845_v0 }
 0xb2b   : > { %13711 = vmatpush3.msra.mxu0 %v7845_v0  ;;  %v7944_v36 = vpop.permute.xlu0 %7943  ;;  %v9400_v0 = vld [vmem:[%s16963_s18 + $0x318] sm:$0xff] }
 0xb2c   : > { %13712 = vmatprep.subr.mxu0 %v7843_v42  ;;  %13719 = vmatprep.subr.mxu1 %v7944_v36 }
 0xb2d   : > { %13713 = vmatpush3.msra.mxu0 %v7843_v42  ;;  %v8043_v43 = vpop.permute.xlu1 %8042  ;;  %13720 = vmatpush3.msra.mxu1 %v7944_v36  ;;  %v9432_v42 = vld [vmem:[%s16963_s18 + $0x418] sm:$0xff]  ;;  %v9397_v36 = vld [vmem:[%s16963_s18 + $0x300] sm:$0xff] }
 0xb2e   : > { %13714 = vmatprep.subr.mxu0 %v7841_v32  ;;  %13721 = vmatprep.subr.mxu1 %v7942_v56 }
 0xb2f   : > { %13715 = vmatpush3.msra.mxu0 %v7841_v32  ;;  %13722 = vmatpush3.msra.mxu1 %v7942_v56  ;;  %v8142_v24 = vpop.permute.xlu0 %8141  ;;  %v7833_v32 = vld [vmem:[%s16958_s13 + $0x8] sm:$0xf]  ;;  %v9429_v56 = vld [vmem:[%s16963_s18 + $0x400] sm:$0xff] }
 0xb30   : > { %13723 = vmatprep.subr.mxu1 %v7940_v41  ;;  %13728 = vmatprep.subr.mxu0 %v8043_v43 }
 0xb31   : > { %13717 = vmatmul.mubr.msk.f32.vlgmr.msra.gmra.mxu0 %vm4478_vm7, %v12588_v44  ;;  %13724 = vmatpush3.msra.mxu1 %v7940_v41  ;;  %v8237_v51 = vpop.permute.xlu1 %8236  ;;  %v9461_v41 = vld [vmem:[%s16963_s18 + $0x500] sm:$0xff]  ;;  %v9366_v44 = vld [vmem:[%s16963_s18 + $0x208] sm:$0xff] }
 0xb32   : > { %13729 = vmatpush3.msra.mxu0 %v8043_v43  ;;  %13737 = vmatprep.subr.mxu1 %v8142_v24  ;;  %v9399_v43 = vld [vmem:[%s16963_s18 + $0x310] sm:$0xff] }
 0xb33   : > { %13730 = vmatprep.subr.mxu0 %v8041_v4  ;;  %13726 = vmatmul.mubr.msk.f32.vlgmr.msra.gmra.mxu1 %vm4478_vm7, %v12594_v2  ;;  %v8336_v58 = vpop.permute.xlu0 %8335  ;;  %v9365_v2 = vld [vmem:[%s16963_s18 + $0x200] sm:$0xff] }
 0xb34   : > { %13731 = vmatpush3.msra.mxu0 %v8041_v4  ;;  %13738 = vmatpush3.msra.mxu1 %v8142_v24  ;;  %v9431_v4 = vld [vmem:[%s16963_s18 + $0x410] sm:$0xff]  ;;  %v9368_v24 = vld [vmem:[%s16963_s18 + $0x218] sm:$0xff] }
 0xb35   : > { %13732 = vmatprep.subr.mxu0 %v8039_v35  ;;  %13739 = vmatprep.subr.mxu1 %v8140_v33  ;;  %v8239_v57 = vpop.permute.xlu1 %8238 }
 0xb36   : > { %13733 = vmatpush3.msra.mxu0 %v8039_v35  ;;  %13740 = vmatpush3.msra.mxu1 %v8140_v33  ;;  %v9463_v35 = vld [vmem:[%s16963_s18 + $0x510] sm:$0xff]  ;;  %v9398_v33 = vld [vmem:[%s16963_s18 + $0x308] sm:$0xff] }
 0xb37   : > { %13741 = vmatprep.subr.mxu1 %v8138_v55  ;;  %v8338_v53 = vpop.permute.xlu0 %8337  ;;  %13734 = vmatprep.mubr.msk.f32.mxu0 %vm4478_vm7, %v12599_v52  ;;  %v9336_v52 = vld [vmem:[%s16963_s18 + $0x118] sm:$0xff] }
 0xb38   : > { %13742 = vmatpush3.msra.mxu1 %v8138_v55  ;;  %13735 = vmatmul.mubr.msk.f32.vlgmr.msra.gmra.mxu0 %vm4478_vm7, %v12600_v27  ;;  %v9430_v55 = vld [vmem:[%s16963_s18 + $0x408] sm:$0xff]  ;;  %v9335_v27 = vld [vmem:[%s16963_s18 + $0x110] sm:$0xff] }
 0xb39   : > { %v8241_v60 = vpop.permute.xlu1 %8240  ;;  %13743 = vmatprep.mubr.msk.f32.mxu1 %vm4478_vm7, %v12605_v28  ;;  %13752 = vmatprep.mubr.msk.f32.mxu0 %vm4478_vm7, %v12611_v62  ;;  %v9302_v28 = vld [vmem:[%s16963_s18 + $0x8] sm:$0xff]  ;;  %v9304_v62 = vld [vmem:[%s16963_s18 + $0x18] sm:$0xff] }
 0xb3a   : > { %13746 = vmatprep.subr.mxu0 %v8241_v60  ;;  %13744 = vmatmul.mubr.msk.f32.vlgmr.msra.gmra.mxu1 %vm4478_vm7, %v12606_v3  ;;  %v9303_v3 = vld [vmem:[%s16963_s18 + $0x10] sm:$0xff] }
 0xb3b   : > { %13747 = vmatpush3.msra.mxu0 %v8241_v60  ;;  %v8340_v19 = vpop.permute.xlu0 %8339  ;;  %13761 = vmatprep.mubr.msk.f32.mxu1 %vm4478_vm7, %v12617_v25  ;;  %v9530_v25 = vld [vmem:[%s16963_s18 + $0x728] sm:$0xff]  ;;  %v9532_v60 = vld [vmem:[%s16963_s18 + $0x738] sm:$0xff] }
 0xb3c   : > { %13748 = vmatprep.subr.mxu0 %v8239_v57  ;;  %13755 = vmatprep.subr.mxu1 %v8340_v19 }
 0xb3d   : > { %13749 = vmatpush3.msra.mxu0 %v8239_v57  ;;  %v8437_v6 = vpop.permute.xlu1 %8436  ;;  %13756 = vmatpush3.msra.mxu1 %v8340_v19  ;;  %v9333_v57 = vld [vmem:[%s16963_s18 + $0x100] sm:$0xff] }
 0xb3e   : > { %13750 = vmatprep.subr.mxu0 %v8237_v51  ;;  %13757 = vmatprep.subr.mxu1 %v8338_v53 }
 0xb3f   : > { %13751 = vmatpush3.msra.mxu0 %v8237_v51  ;;  %13758 = vmatpush3.msra.mxu1 %v8338_v53  ;;  %v8536_v30 = vpop.permute.xlu0 %8535  ;;  %v9367_v51 = vld [vmem:[%s16963_s18 + $0x210] sm:$0xff]  ;;  %v9301_v53 = vld [vmem:[%s16963_s18] sm:$0xff] }
 0xb40   : > { %13759 = vmatprep.subr.mxu1 %v8336_v58  ;;  %13753 = vmatmul.mubr.msk.f32.vlgmr.msra.gmra.mxu0 %vm4478_vm7, %v12612_v15 }
 0xb41   : > { %v8439_v7 = vpop.permute.xlu1 %8438  ;;  %13760 = vmatpush3.msra.mxu1 %v8336_v58  ;;  %13770 = vmatprep.mubr.msk.f32.mxu0 %vm4478_vm7, %v12623_v8  ;;  %v9334_v58 = vld [vmem:[%s16963_s18 + $0x108] sm:$0xff] }
 0xb42   : > { %13764 = vmatprep.subr.mxu0 %v8439_v7  ;;  %13762 = vmatmul.mubr.msk.f32.vlgmr.msra.gmra.mxu1 %vm4478_vm7, %v12618_v31 }
 0xb43   : > { %13765 = vmatpush3.msra.mxu0 %v8439_v7  ;;  %v8538_v5 = vpop.permute.xlu0 %8537  ;;  %13779 = vmatprep.mubr.msk.f32.mxu1 %vm4478_vm7, %v12629_v1 }
 0xb44   : > { %13766 = vmatprep.subr.mxu0 %v8437_v6  ;;  %13773 = vmatprep.subr.mxu1 %v8538_v5 }
 0xb45   : > { %13767 = vmatpush3.msra.mxu0 %v8437_v6  ;;  %v8435_v9 = vpop.permute.xlu1 %8434  ;;  %13774 = vmatpush3.msra.mxu1 %v8538_v5 }
 0xb46   : > { %13768 = vmatprep.subr.mxu0 %v8435_v9  ;;  %13775 = vmatprep.subr.mxu1 %v8536_v30 }
 0xb47   : > { %13769 = vmatpush3.msra.mxu0 %v8435_v9  ;;  %13776 = vmatpush3.msra.mxu1 %v8536_v30  ;;  %v8534_v29 = vpop.permute.xlu0 %8533 }
 0xb48   : > { %13777 = vmatprep.subr.mxu1 %v8534_v29  ;;  %13782 = vmatprep.subr.mxu0 %v15648_v10 }
 0xb49   : > { %13771 = vmatmul.mubr.msk.f32.vlgmr.msra.gmra.mxu0 %vm4478_vm7, %v12624_v13  ;;  %13778 = vmatpush3.msra.mxu1 %v8534_v29 }
 0xb4a   : > { %13783 = vmatpush3.msra.mxu0 %v15648_v10  ;;  %13791 = vmatprep.subr.mxu1 %v15657_v12  ;;  %v12591_v10 = vld [vmem:[%s16958_s13 + $0x20] sm:$0xff] }
 0xb4b   : > { %13784 = vmatprep.subr.mxu0 %v15638_v61  ;;  %13780 = vmatmul.mubr.msk.f32.vlgmr.msra.gmra.mxu1 %vm4478_vm7, %v12630_v47 }
 0xb4c   : > { %13785 = vmatpush3.msra.mxu0 %v15638_v61  ;;  %13792 = vmatpush3.msra.mxu1 %v15657_v12  ;;  %v12592_v61 = vld [vmem:[%s16958_s13 + $0x28] sm:$0xf] }
 0xb4d   : > { %13786 = vmatprep.subr.mxu0 %v15626_v37  ;;  %13793 = vmatprep.subr.mxu1 %v15644_v63  ;;  %v12616_v12 = vld [vmem:[%s16958_s13 + $0xa8] sm:$0xf] }
 0xb4e   : > { %13787 = vmatpush3.msra.mxu0 %v15626_v37  ;;  %13788 = vmatprep.mubr.msk.f32.mxu0 %vm4478_vm7, %v7832_v48  ;;  %v12597_v37 = vld [vmem:[%s16958_s13 + $0x40] sm:$0xff] }
 0xb4f   : > { %13794 = vmatpush3.msra.mxu1 %v15644_v63  ;;  %13789 = vmatmul.mubr.msk.f32.vlgmr.msra.gmra.mxu0 %vm4478_vm7, %v7833_v32  ;;  %v12603_v63 = vld [vmem:[%s16958_s13 + $0x60] sm:$0xff] }
 0xb50   : > { %13795 = vmatprep.subr.mxu1 %v15632_v11  ;;  %13800 = vmatprep.subr.mxu0 %v15668_v38 }
 0xb51   : > { %13796 = vmatpush3.msra.mxu1 %v15632_v11  ;;  %13797 = vmatprep.mubr.msk.f32.mxu1 %vm4478_vm7, %v12591_v10  ;;  %v12598_v11 = vld [vmem:[%s16958_s13 + $0x48] sm:$0xf] }
 0xb52   : > { %13801 = vmatpush3.msra.mxu0 %v15668_v38  ;;  %13798 = vmatmul.mubr.msk.f32.vlgmr.msra.gmra.mxu1 %vm4478_vm7, %v12592_v61  ;;  %v12621_v38 = vld [vmem:[%s16958_s13 + $0xc0] sm:$0xff] }
 0xb53   : > { %13802 = vmatprep.subr.mxu0 %v15642_v34  ;;  %13809 = vmatprep.subr.mxu1 %v15676_v39 }
 0xb54   : > { %13803 = vmatpush3.msra.mxu0 %v15642_v34  ;;  %13810 = vmatpush3.msra.mxu1 %v15676_v39  ;;  %v12604_v34 = vld [vmem:[%s16958_s13 + $0x68] sm:$0xf]  ;;  %v12627_v39 = vld [vmem:[%s16958_s13 + $0xe0] sm:$0xff] }
 0xb55   : > { %13804 = vmatprep.subr.mxu0 %v15628_v46  ;;  %13811 = vmatprep.subr.mxu1 %v15655_v23 }
 0xb56   : > { %13805 = vmatpush3.msra.mxu0 %v15628_v46  ;;  %13806 = vmatprep.mubr.msk.f32.mxu0 %vm4478_vm7, %v12597_v37  ;;  %v12609_v46 = vld [vmem:[%s16958_s13 + $0x80] sm:$0xff] }
 0xb57   : > { %13812 = vmatpush3.msra.mxu1 %v15655_v23  ;;  %13807 = vmatmul.mubr.msk.f32.vlgmr.msra.gmra.mxu0 %vm4478_vm7, %v12598_v11  ;;  %v12615_v23 = vld [vmem:[%s16958_s13 + $0xa0] sm:$0xff] }
 0xb58   : > { %13813 = vmatprep.subr.mxu1 %v15634_v49  ;;  %13818 = vmatprep.subr.mxu0 %v15702_v21 }
 0xb59   : > { %13814 = vmatpush3.msra.mxu1 %v15634_v49  ;;  %13815 = vmatprep.mubr.msk.f32.mxu1 %vm4478_vm7, %v12603_v63  ;;  %v12610_v49 = vld [vmem:[%s16958_s13 + $0x88] sm:$0xf] }
 0xb5a   : > { %13819 = vmatpush3.msra.mxu0 %v15702_v21  ;;  %13816 = vmatmul.mubr.msk.f32.vlgmr.msra.gmra.mxu1 %vm4478_vm7, %v12604_v34  ;;  %v9496_v21 = vld [vmem:[%s16963_s18 + $0x618] sm:$0xff] }
 0xb5b   : > { %13820 = vmatprep.subr.mxu0 %v15686_v16  ;;  %13827 = vmatprep.subr.mxu1 %v15710_v26 }
 0xb5c   : > { %13821 = vmatpush3.msra.mxu0 %v15686_v16  ;;  %13828 = vmatpush3.msra.mxu1 %v15710_v26  ;;  %v9528_v16 = vld [vmem:[%s16963_s18 + $0x718] sm:$0xff]  ;;  %v9495_v26 = vld [vmem:[%s16963_s18 + $0x610] sm:$0xff] }
 0xb5d   : > { %13822 = vmatprep.subr.mxu0 %v15670_v40  ;;  %13829 = vmatprep.subr.mxu1 %v15694_v18 }
 0xb5e   : > { %13823 = vmatpush3.msra.mxu0 %v15670_v40  ;;  %13824 = vmatprep.mubr.msk.f32.mxu0 %vm4478_vm7, %v12609_v46  ;;  %v12622_v40 = vld [vmem:[%s16958_s13 + $0xc8] sm:$0xf] }
 0xb5f   : > { %13830 = vmatpush3.msra.mxu1 %v15694_v18  ;;  %13825 = vmatmul.mubr.msk.f32.vlgmr.msra.gmra.mxu0 %vm4478_vm7, %v12610_v49  ;;  %v9527_v18 = vld [vmem:[%s16963_s18 + $0x710] sm:$0xff] }
 0xb60   : > { %13831 = vmatprep.subr.mxu1 %v15678_v50  ;;  %13836 = vmatprep.subr.mxu0 %v15716_v45 }
 0xb61   : > { %13832 = vmatpush3.msra.mxu1 %v15678_v50  ;;  %13833 = vmatprep.mubr.msk.f32.mxu1 %vm4478_vm7, %v12615_v23  ;;  %v12628_v50 = vld [vmem:[%s16958_s13 + $0xe8] sm:$0xf] }
 0xb62   : > { %13837 = vmatpush3.msra.mxu0 %v15716_v45  ;;  %13834 = vmatmul.mubr.msk.f32.vlgmr.msra.gmra.mxu1 %vm4478_vm7, %v12616_v12  ;;  %v9462_v45 = vld [vmem:[%s16963_s18 + $0x508] sm:$0xff] }
 0xb63   : > { %13838 = vmatprep.subr.mxu0 %v15700_v20  ;;  %13845 = vmatprep.subr.mxu1 %v15722_v59 }
 0xb64   : > { %13839 = vmatpush3.msra.mxu0 %v15700_v20  ;;  %13846 = vmatpush3.msra.mxu1 %v15722_v59  ;;  %v9494_v20 = vld [vmem:[%s16963_s18 + $0x608] sm:$0xff]  ;;  %v9464_v59 = vld [vmem:[%s16963_s18 + $0x518] sm:$0xff] }
 0xb65   : > { %13840 = vmatprep.subr.mxu0 %v15684_v14  ;;  %13847 = vmatprep.subr.mxu1 %v15708_v22 }
 0xb66   : > { %13841 = vmatpush3.msra.mxu0 %v15684_v14  ;;  %13842 = vmatprep.mubr.msk.f32.mxu0 %vm4478_vm7, %v12621_v38  ;;  %v9526_v14 = vld [vmem:[%s16963_s18 + $0x708] sm:$0xff] }
 0xb67   : > { %13848 = vmatpush3.msra.mxu1 %v15708_v22  ;;  %13843 = vmatmul.mubr.msk.f32.vlgmr.msra.gmra.mxu0 %vm4478_vm7, %v12622_v40  ;;  %v9493_v22 = vld [vmem:[%s16963_s18 + $0x600] sm:$0xff] }
 0xb68   : > { %13849 = vmatprep.subr.mxu1 %v15692_v17  ;;  %13851 = vmatprep.mubr.msk.f32.mxu1 %vm4478_vm7, %v12627_v39 }
 0xb69   : > { %13850 = vmatpush3.msra.mxu1 %v15692_v17  ;;  %9627 = vmatprep.mubr.f32.mxu0 %v13952_v54  ;;  %v9525_v17 = vld [vmem:[%s16963_s18 + $0x700] sm:$0xff] }
 0xb6a   : > { %13852 = vmatmul.mubr.msk.f32.vlgmr.msra.gmra.mxu1 %vm4478_vm7, %v12628_v50  ;;  %9579 = vmatprep.subr.mxu0 %v9526_v14 }
 0xb6b   : > { %9704 = vmatprep.mubr.f32.mxu1 %v13952_v54  ;;  %9656 = vmatprep.subr.mxu1 %v9528_v16 }
 0xb6c   : > { %9580 = vmatpush1.msra.mxu0 %v9525_v17  ;;  %9657 = vmatpush1.msra.mxu1 %v9527_v18 }
 0xb6d   : > { %9581 = vmatprep.subr.mxu0 %v9494_v20  ;;  %9658 = vmatprep.subr.mxu1 %v9496_v21 }
 0xb6e   : > { %9582 = vmatpush1.msra.mxu0 %v9493_v22  ;;  %9659 = vmatpush1.msra.mxu1 %v9495_v26 }
 0xb6f   : > { %9583 = vmatprep.subr.mxu0 %v9462_v45  ;;  %9660 = vmatprep.subr.mxu1 %v9464_v59 }
 0xb70   : > { %9584 = vmatpush1.msra.mxu0 %v9461_v41  ;;  %9661 = vmatpush1.msra.mxu1 %v9463_v35 }
 0xb71   : > { %9585 = vmatprep.subr.mxu0 %v9430_v55  ;;  %9662 = vmatprep.subr.mxu1 %v9432_v42 }
 0xb72   : > { %9586 = vmatpush1.msra.mxu0 %v9429_v56  ;;  %9663 = vmatpush1.msra.mxu1 %v9431_v4 }
 0xb73   : > { %9587 = vmatprep.subr.mxu0 %v9398_v33  ;;  %9664 = vmatprep.subr.mxu1 %v9400_v0 }
 0xb74   : > { %9588 = vmatpush1.msra.mxu0 %v9397_v36  ;;  %9665 = vmatpush1.msra.mxu1 %v9399_v43 }
 0xb75   : > { %9589 = vmatprep.subr.mxu0 %v9366_v44  ;;  %9666 = vmatprep.subr.mxu1 %v9368_v24 }
 0xb76   : > { %9590 = vmatpush1.msra.mxu0 %v9365_v2  ;;  %9667 = vmatpush1.msra.mxu1 %v9367_v51 }
 0xb77   : > { %9591 = vmatprep.subr.mxu0 %v9334_v58  ;;  %9668 = vmatprep.subr.mxu1 %v9336_v52 }
 0xb78   : > { %9592 = vmatpush1.msra.mxu0 %v9333_v57  ;;  %9669 = vmatpush1.msra.mxu1 %v9335_v27 }
 0xb79   : > { %9593 = vmatprep.subr.mxu0 %v9302_v28  ;;  %9670 = vmatprep.subr.mxu1 %v9304_v62 }
 0xb7a   : > { %9594 = vmatpush1.msra.mxu0 %v9301_v53  ;;  %9671 = vmatpush1.msra.mxu1 %v9303_v3 }
 0xb7b   : > { %9733 = vmatprep.subr.mxu0 %v9530_v25  ;;  %9810 = vmatprep.subr.mxu1 %v9532_v60  ;;  %v9290_v25 = vpop.permute.xlu1 %9289 }
 0xbf1   : > { %v13718_v19 = vpop.f32.mrf.mxu0 }
 0xbf3   : > { %v7921_v6 = vpop.f32.mrf.mxu0  ;;  %v13727_v15 = vpop.f32.mrf.mxu1 }
 0xbf5   : > { %v8020_v30 = vpop.f32.mrf.mxu1 }
 0xbf8   : > { %v13736_v8 = vpop.f32.mrf.mxu0 }
 0xbfa   : > { %v8119_v31 = vpop.f32.mrf.mxu0  ;;  %v13745_v1 = vpop.f32.mrf.mxu1 }
 0xbfc   : > { %v8218_v5 = vpop.f32.mrf.mxu1 }
 0xc00   : > { %v13754_v7 = vpop.f32.mrf.mxu0 }
 0xc02   : > { %v8317_v9 = vpop.f32.mrf.mxu0  ;;  %v13763_v13 = vpop.f32.mrf.mxu1 }
 0xc04   : > { %v8416_v47 = vpop.f32.mrf.mxu1 }
 0xc09   : > { %v13772_v29 = vpop.f32.mrf.mxu0 }
 0xc0b   : > { %v8515_v48 = vpop.f32.mrf.mxu0  ;;  %v13781_v32 = vpop.f32.mrf.mxu1 }
 0xc0d   : > { %v8614_v61 = vpop.f32.mrf.mxu1 }
 0xc0f   : > { %v13790_v10 = vpop.f32.mrf.mxu0 }
 0xc10   : > { %v8701_v44 = vadd.f32 %v13790_v10, %v13718_v19  ;;  %v9529_v19 = vld [vmem:[%s16963_s18 + $0x720] sm:$0xff]  ;;  %v9434_v10 = vld [vmem:[%s16963_s18 + $0x428] sm:$0xff] }
 0xc11   : > { %v8695_v11 = vpop.f32.mrf.mxu0 }
 0xc12   : > { %v13799_v37 = vpop.f32.mrf.mxu1  ;;  %v8696_v16 = vadd.f32 %v8695_v11, %v7921_v6  ;;  %v9435_v11 = vld [vmem:[%s16963_s18 + $0x430] sm:$0xff] }
 0xc13   : > { %v8782_v35 = vadd.f32 %v13799_v37, %v13727_v15  ;;  %v9433_v37 = vld [vmem:[%s16963_s18 + $0x420] sm:$0xff] }
 0xc14   : > { %v8776_v34 = vpop.f32.mrf.mxu1 }
 0xc15   : > { %v8777_v17 = vadd.f32 %v8776_v34, %v8020_v30  ;;  %v9272_v57 = vadd.f32 %v8782_v35, %v8701_v44  ;;  %v9295_v30 = vpop.permute.xlu0 %9294  ;;  %v9404_v34 = vld [vmem:[%s16963_s18 + $0x338] sm:$0xff]  ;;  %v9437_v44 = vld [vmem:[%s16963_s18 + $0x440] sm:$0xff] }
 0xc16   : > { %v9504_v35 = vld [vmem:[%s16963_s18 + $0x658] sm:$0xff] }
 0xc17   : > { %v13808_v63 = vpop.f32.mrf.mxu0  ;;  %v9271_v24 = vadd.f32 %v8777_v17, %v8696_v16  ;;  %v9339_v16 = vld [vmem:[%s16963_s18 + $0x130] sm:$0xff]  ;;  %v9306_v17 = vld [vmem:[%s16963_s18 + $0x28] sm:$0xff] }
 0xc18   : > { %v8863_v55 = vadd.f32 %v13808_v63, %v13736_v8  ;;  %v9531_v8 = vld [vmem:[%s16963_s18 + $0x730] sm:$0xff]  ;;  %v9402_v63 = vld [vmem:[%s16963_s18 + $0x328] sm:$0xff] }
 0xc19   : > { %v8857_v49 = vpop.f32.mrf.mxu0 }
 0xc1a   : > { %v13817_v46 = vpop.f32.mrf.mxu1  ;;  %v8858_v18 = vadd.f32 %v8857_v49, %v8119_v31  ;;  %v9498_v31 = vld [vmem:[%s16963_s18 + $0x628] sm:$0xff]  ;;  %v9403_v49 = vld [vmem:[%s16963_s18 + $0x330] sm:$0xff] }
 0xc1b   : > { %v8944_v20 = vadd.f32 %v13817_v46, %v13745_v1  ;;  %v9500_v1 = vld [vmem:[%s16963_s18 + $0x638] sm:$0xff]  ;;  %v9401_v46 = vld [vmem:[%s16963_s18 + $0x320] sm:$0xff] }
 0xc1c   : > { %v8938_v12 = vpop.f32.mrf.mxu1 }
 0xc1d   : > { %v8939_v50 = vadd.f32 %v8938_v12, %v8218_v5  ;;  %v9274_v2 = vadd.f32 %v8944_v20, %v8863_v55  ;;  %v9497_v5 = vld [vmem:[%s16963_s18 + $0x620] sm:$0xff]  ;;  %v9372_v12 = vld [vmem:[%s16963_s18 + $0x238] sm:$0xff] }
 0xc1e   : > { %v9305_v20 = vld [vmem:[%s16963_s18 + $0x20] sm:$0xff] }
 0xc1f   : > { %v13826_v23 = vpop.f32.mrf.mxu0  ;;  %v9273_v42 = vadd.f32 %v8939_v50, %v8858_v18  ;;  %v9280_v53 = vadd.f32 %v9274_v2, %v9272_v57  ;;  %v9340_v50 = vld [vmem:[%s16963_s18 + $0x138] sm:$0xff]  ;;  %v9501_v55 = vld [vmem:[%s16963_s18 + $0x640] sm:$0xff]  ;;  %v9406_v2 = vld [vmem:[%s16963_s18 + $0x348] sm:$0xff] }
 0xc20   : > { %v9025_v56 = vadd.f32 %v13826_v23, %v13754_v7  ;;  %v9370_v23 = vld [vmem:[%s16963_s18 + $0x228] sm:$0xff]  ;;  %v9308_v18 = vld [vmem:[%s16963_s18 + $0x38] sm:$0xff] }
 0xc21   : > { %v9019_v40 = vpop.f32.mrf.mxu0  ;;  %v9279_v27 = vadd.f32 %v9273_v42, %v9271_v24  ;;  %v9503_v42 = vld [vmem:[%s16963_s18 + $0x650] sm:$0xff]  ;;  %v9374_v57 = vld [vmem:[%s16963_s18 + $0x248] sm:$0xff] }
 0xc22   : > { %v13835_v38 = vpop.f32.mrf.mxu1  ;;  %v9020_v33 = vadd.f32 %v9019_v40, %v8317_v9  ;;  %v9499_v9 = vld [vmem:[%s16963_s18 + $0x630] sm:$0xff] }
 0xc23   : > { %v9106_v26 = vadd.f32 %v13835_v38, %v13763_v13  ;;  %v9466_v13 = vld [vmem:[%s16963_s18 + $0x528] sm:$0xff]  ;;  %v9369_v38 = vld [vmem:[%s16963_s18 + $0x220] sm:$0xff]  ;;  %v9371_v40 = vld [vmem:[%s16963_s18 + $0x230] sm:$0xff] }
 0xc24   : > { %v9100_v14 = vpop.f32.mrf.mxu1  ;;  %v9439_v24 = vld [vmem:[%s16963_s18 + $0x450] sm:$0xff] }
 0xc25   : > { %v9101_v45 = vadd.f32 %v9100_v14, %v8416_v47  ;;  %v9276_v51 = vadd.f32 %v9106_v26, %v9025_v56  ;;  %v9337_v14 = vld [vmem:[%s16963_s18 + $0x120] sm:$0xff]  ;;  %v9536_v26 = vld [vmem:[%s16963_s18 + $0x758] sm:$0xff]  ;;  %v9470_v56 = vld [vmem:[%s16963_s18 + $0x548] sm:$0xff] }
 0xc27   : > { %v13844_v39 = vpop.f32.mrf.mxu0  ;;  %v9275_v58 = vadd.f32 %v9101_v45, %v9020_v33  ;;  %v9533_v45 = vld [vmem:[%s16963_s18 + $0x740] sm:$0xff] }
 0xc28   : > { %v9187_v59 = vadd.f32 %v13844_v39, %v13772_v29  ;;  %v9468_v29 = vld [vmem:[%s16963_s18 + $0x538] sm:$0xff]  ;;  %v9338_v39 = vld [vmem:[%s16963_s18 + $0x128] sm:$0xff]  ;;  %v9469_v33 = vld [vmem:[%s16963_s18 + $0x540] sm:$0xff] }
 0xc29   : > { %v9181_v21 = vpop.f32.mrf.mxu0 }
 0xc2a   : > { %v13853_v22 = vpop.f32.mrf.mxu1  ;;  %v9182_v0 = vadd.f32 %v9181_v21, %v8515_v48  ;;  %v9465_v48 = vld [vmem:[%s16963_s18 + $0x520] sm:$0xff]  ;;  %v9307_v21 = vld [vmem:[%s16963_s18 + $0x30] sm:$0xff] }
 0xc2b   : > { %v9268_v41 = vadd.f32 %v13853_v22, %v13781_v32  ;;  %v9467_v32 = vld [vmem:[%s16963_s18 + $0x530] sm:$0xff]  ;;  %v9534_v22 = vld [vmem:[%s16963_s18 + $0x748] sm:$0xff] }
 0xc2c   : > { %v9262_v4 = vpop.f32.mrf.mxu1 }
 0xc2d   : > { %v9278_v36 = vadd.f32 %v9268_v41, %v9187_v59  ;;  %v9263_v43 = vadd.f32 %v9262_v4, %v8614_v61  ;;  %v9436_v61 = vld [vmem:[%s16963_s18 + $0x438] sm:$0xff]  ;;  %v9535_v59 = vld [vmem:[%s16963_s18 + $0x750] sm:$0xff]  ;;  %v9502_v41 = vld [vmem:[%s16963_s18 + $0x648] sm:$0xff] }
 0xc2e   : > { %v9472_v4 = vld [vmem:[%s16963_s18 + $0x558] sm:$0xff] }
 0xc2f   : > { %v9277_v52 = vadd.f32 %v9263_v43, %v9182_v0  ;;  %v9282_v28 = vadd.f32 %v9278_v36, %v9276_v51  ;;  %v9471_v0 = vld [vmem:[%s16963_s18 + $0x550] sm:$0xff]  ;;  %v9438_v36 = vld [vmem:[%s16963_s18 + $0x448] sm:$0xff]  ;;  %v9440_v43 = vld [vmem:[%s16963_s18 + $0x458] sm:$0xff] }
 0xc30   : > { %v9408_v51 = vld [vmem:[%s16963_s18 + $0x358] sm:$0xff] }
 0xc31   : > { %v9281_v62 = vadd.f32 %v9277_v52, %v9275_v58  ;;  %v9284_v60 = vadd.f32 %v9282_v28, %v9280_v53  ;;  %v9405_v58 = vld [vmem:[%s16963_s18 + $0x340] sm:$0xff]  ;;  %v9407_v52 = vld [vmem:[%s16963_s18 + $0x350] sm:$0xff]  ;;  %v9342_v53 = vld [vmem:[%s16963_s18 + $0x148] sm:$0xff] }
 0xc32   : > { %v9373_v28 = vld [vmem:[%s16963_s18 + $0x240] sm:$0xff] }
 0xc33   : > { %v9283_v3 = vadd.f32 %v9281_v62, %v9279_v27  ;;  %v9298_v7 = vadd.f32 %v9295_v30, %v9284_v60  ;;  %v9376_v27 = vld [vmem:[%s16963_s18 + $0x258] sm:$0xff]  ;;  %v9375_v62 = vld [vmem:[%s16963_s18 + $0x250] sm:$0xff] }
 0xc34   : > { %v9343_v60 = vld [vmem:[%s16963_s18 + $0x150] sm:$0xff] }
 0xc35   : > { %v9297_v6 = vadd.f32 %v9290_v25, %v9283_v3  ;;  %v16041_v47 = vmax.f32 %v9298_v7, 0.0  ;;  %v9344_v3 = vld [vmem:[%s16963_s18 + $0x158] sm:$0xff]  ;;  %v9341_v25 = vld [vmem:[%s16963_s18 + $0x140] sm:$0xff]  ;;  %v9311_v30 = vld [vmem:[%s16963_s18 + $0x50] sm:$0xff] }
 0xc36   : > { %v9537_v7 = vld [vmem:[%s16963_s18 + $0x760] sm:$0xff] }
 0xc37   : > { %v16011_v15 = vmax.f32 %v9297_v6, 0.0  ;;  %v9310_v6 = vld [vmem:[%s16963_s18 + $0x48] sm:$0xff] }
 0xc39   : > { %12649 = vmatmul.mubr.msk.f32.vlgmr.msra.gmra.mxu0 %vm2647_vm2, %v16011_v15  ;;  %12651 = vmatmul.mubr.msk.f32.vlgmr.msra.gmra.mxu1 %vm2647_vm2, %v16011_v15 }
 0xc3a   : > { %9734 = vmatpush1.msra.mxu0 %v9529_v19  ;;  %9811 = vmatpush1.msra.mxu1 %v9531_v8  ;;  %v9312_v19 = vld [vmem:[%s16963_s18 + $0x58] sm:$0xff]  ;;  %v9309_v8 = vld [vmem:[%s16963_s18 + $0x40] sm:$0xff] }
 0xc3b   : > { %9735 = vmatprep.subr.mxu0 %v9498_v31  ;;  %9812 = vmatprep.subr.mxu1 %v9500_v1  ;;  %v9538_v31 = vld [vmem:[%s16963_s18 + $0x768] sm:$0xff]  ;;  %v9540_v1 = vld [vmem:[%s16963_s18 + $0x778] sm:$0xff] }
 0xc3c   : > { %9736 = vmatpush1.msra.mxu0 %v9497_v5  ;;  %9813 = vmatpush1.msra.mxu1 %v9499_v9  ;;  %v9539_v5 = vld [vmem:[%s16963_s18 + $0x770] sm:$0xff]  ;;  %v9506_v9 = vld [vmem:[%s16963_s18 + $0x668] sm:$0xff] }
 0xc3d   : > { %9633 = vmatprep.mubr.f32.mxu0 %v13952_v54  ;;  %9710 = vmatprep.mubr.f32.mxu1 %v13952_v54 }
 0xc3e   : > { %9737 = vmatprep.subr.mxu0 %v9466_v13  ;;  %9814 = vmatprep.subr.mxu1 %v9468_v29  ;;  %v9508_v13 = vld [vmem:[%s16963_s18 + $0x678] sm:$0xff]  ;;  %v9505_v29 = vld [vmem:[%s16963_s18 + $0x660] sm:$0xff] }
 0xc3f   : > { %12650 = vmatmul.mubr.msk.f32.gmra.mxu0 %vm2647_vm2, %v16041_v47  ;;  %12652 = vmatmul.mubr.msk.f32.gmra.mxu1 %vm2647_vm2, %v16041_v47 }
 0xc40   : > { %9738 = vmatpush1.msra.mxu0 %v9465_v48  ;;  %9815 = vmatpush1.msra.mxu1 %v9467_v32  ;;  %v9507_v48 = vld [vmem:[%s16963_s18 + $0x670] sm:$0xff]  ;;  %v9474_v32 = vld [vmem:[%s16963_s18 + $0x568] sm:$0xff] }
 0xc41   : > { %9739 = vmatprep.subr.mxu0 %v9434_v10  ;;  %9816 = vmatprep.subr.mxu1 %v9436_v61  ;;  %v9476_v10 = vld [vmem:[%s16963_s18 + $0x578] sm:$0xff]  ;;  %v9473_v61 = vld [vmem:[%s16963_s18 + $0x560] sm:$0xff] }
 0xc42   : > { %9740 = vmatpush1.msra.mxu0 %v9433_v37  ;;  %9817 = vmatpush1.msra.mxu1 %v9435_v11  ;;  %v9475_v37 = vld [vmem:[%s16963_s18 + $0x570] sm:$0xff]  ;;  %v9442_v11 = vld [vmem:[%s16963_s18 + $0x468] sm:$0xff] }
 0xc43   : > { %9741 = vmatprep.subr.mxu0 %v9402_v63  ;;  %9818 = vmatprep.subr.mxu1 %v9404_v34  ;;  %v9444_v63 = vld [vmem:[%s16963_s18 + $0x478] sm:$0xff]  ;;  %v9441_v34 = vld [vmem:[%s16963_s18 + $0x460] sm:$0xff] }
 0xc44   : > { %9742 = vmatpush1.msra.mxu0 %v9401_v46  ;;  %9819 = vmatpush1.msra.mxu1 %v9403_v49  ;;  %v9443_v46 = vld [vmem:[%s16963_s18 + $0x470] sm:$0xff]  ;;  %v9410_v49 = vld [vmem:[%s16963_s18 + $0x368] sm:$0xff] }
 0xc45   : > { %9743 = vmatprep.subr.mxu0 %v9370_v23  ;;  %9820 = vmatprep.subr.mxu1 %v9372_v12  ;;  %v9412_v23 = vld [vmem:[%s16963_s18 + $0x378] sm:$0xff]  ;;  %v9409_v12 = vld [vmem:[%s16963_s18 + $0x360] sm:$0xff] }
 0xc46   : > { %9744 = vmatpush1.msra.mxu0 %v9369_v38  ;;  %9821 = vmatpush1.msra.mxu1 %v9371_v40  ;;  %v9411_v38 = vld [vmem:[%s16963_s18 + $0x370] sm:$0xff]  ;;  %v9378_v40 = vld [vmem:[%s16963_s18 + $0x268] sm:$0xff] }
 0xc47   : > { %9745 = vmatprep.subr.mxu0 %v9338_v39  ;;  %9822 = vmatprep.subr.mxu1 %v9340_v50  ;;  %v9380_v39 = vld [vmem:[%s16963_s18 + $0x278] sm:$0xff]  ;;  %v9377_v50 = vld [vmem:[%s16963_s18 + $0x260] sm:$0xff] }
 0xc48   : > { %9746 = vmatpush1.msra.mxu0 %v9337_v14  ;;  %9823 = vmatpush1.msra.mxu1 %v9339_v16  ;;  %v9379_v14 = vld [vmem:[%s16963_s18 + $0x270] sm:$0xff]  ;;  %v9346_v16 = vld [vmem:[%s16963_s18 + $0x168] sm:$0xff] }
 0xc49   : > { %9747 = vmatprep.subr.mxu0 %v9306_v17  ;;  %9824 = vmatprep.subr.mxu1 %v9308_v18  ;;  %v9348_v17 = vld [vmem:[%s16963_s18 + $0x178] sm:$0xff]  ;;  %v9345_v18 = vld [vmem:[%s16963_s18 + $0x160] sm:$0xff] }
 0xc4a   : > { %9748 = vmatpush1.msra.mxu0 %v9305_v20  ;;  %9781 = vmatprep.mubr.f32.mxu0 %v13952_v54  ;;  %v9347_v20 = vld [vmem:[%s16963_s18 + $0x170] sm:$0xff] }
 0xc4b   : > { %9825 = vmatpush1.msra.mxu1 %v9307_v21  ;;  %9858 = vmatprep.mubr.f32.mxu1 %v13952_v54  ;;  %v9314_v21 = vld [vmem:[%s16963_s18 + $0x68] sm:$0xff] }
 0xc4c   : > { %12653 = vmatmul.mubr.msk.f32.vlgmr.msra.gmra.mxu0 %vm2647_vm2, %v16011_v15  ;;  %12655 = vmatmul.mubr.msk.f32.vlgmr.msra.gmra.mxu1 %vm2647_vm2, %v16011_v15 }
 0xc4d   : > { %9887 = vmatprep.subr.mxu0 %v9534_v22  ;;  %9964 = vmatprep.subr.mxu1 %v9536_v26  ;;  %v9316_v22 = vld [vmem:[%s16963_s18 + $0x78] sm:$0xff]  ;;  %v9313_v26 = vld [vmem:[%s16963_s18 + $0x60] sm:$0xff] }
 0xc4e   : > { %9888 = vmatpush1.msra.mxu0 %v9533_v45  ;;  %9965 = vmatpush1.msra.mxu1 %v9535_v59  ;;  %v9315_v45 = vld [vmem:[%s16963_s18 + $0x70] sm:$0xff]  ;;  %v9542_v59 = vld [vmem:[%s16963_s18 + $0x788] sm:$0xff] }
 0xc4f   : > { %9889 = vmatprep.subr.mxu0 %v9502_v41  ;;  %9966 = vmatprep.subr.mxu1 %v9504_v35  ;;  %v9544_v41 = vld [vmem:[%s16963_s18 + $0x798] sm:$0xff]  ;;  %v9541_v35 = vld [vmem:[%s16963_s18 + $0x780] sm:$0xff] }
 0xc50   : > { %9787 = vmatprep.mubr.f32.mxu0 %v13952_v54  ;;  %9864 = vmatprep.mubr.f32.mxu1 %v13952_v54 }
 0xc51   : > { %9890 = vmatpush1.msra.mxu0 %v9501_v55  ;;  %9967 = vmatpush1.msra.mxu1 %v9503_v42  ;;  %v9543_v55 = vld [vmem:[%s16963_s18 + $0x790] sm:$0xff]  ;;  %v9510_v42 = vld [vmem:[%s16963_s18 + $0x688] sm:$0xff] }
 0xc52   : > { %12654 = vmatmul.mubr.msk.f32.gmra.mxu0 %vm2647_vm2, %v16041_v47  ;;  %12656 = vmatmul.mubr.msk.f32.gmra.mxu1 %vm2647_vm2, %v16041_v47 }
 0xc53   : > { %9891 = vmatprep.subr.mxu0 %v9470_v56  ;;  %9968 = vmatprep.subr.mxu1 %v9472_v4  ;;  %v9512_v56 = vld [vmem:[%s16963_s18 + $0x698] sm:$0xff]  ;;  %v9509_v4 = vld [vmem:[%s16963_s18 + $0x680] sm:$0xff] }
 0xc54   : > { %9892 = vmatpush1.msra.mxu0 %v9469_v33  ;;  %9969 = vmatpush1.msra.mxu1 %v9471_v0  ;;  %v9511_v33 = vld [vmem:[%s16963_s18 + $0x690] sm:$0xff]  ;;  %v9478_v0 = vld [vmem:[%s16963_s18 + $0x588] sm:$0xff] }
 0xc55   : > { %9893 = vmatprep.subr.mxu0 %v9438_v36  ;;  %9970 = vmatprep.subr.mxu1 %v9440_v43  ;;  %v9480_v36 = vld [vmem:[%s16963_s18 + $0x598] sm:$0xff]  ;;  %v9477_v43 = vld [vmem:[%s16963_s18 + $0x580] sm:$0xff] }
 0xc56   : > { %9894 = vmatpush1.msra.mxu0 %v9437_v44  ;;  %9971 = vmatpush1.msra.mxu1 %v9439_v24  ;;  %v9479_v44 = vld [vmem:[%s16963_s18 + $0x590] sm:$0xff]  ;;  %v9446_v24 = vld [vmem:[%s16963_s18 + $0x488] sm:$0xff] }
 0xc57   : > { %9895 = vmatprep.subr.mxu0 %v9406_v2  ;;  %9972 = vmatprep.subr.mxu1 %v9408_v51  ;;  %v9448_v2 = vld [vmem:[%s16963_s18 + $0x498] sm:$0xff]  ;;  %v9445_v51 = vld [vmem:[%s16963_s18 + $0x480] sm:$0xff] }
 0xc58   : > { %9896 = vmatpush1.msra.mxu0 %v9405_v58  ;;  %9973 = vmatpush1.msra.mxu1 %v9407_v52  ;;  %v9447_v58 = vld [vmem:[%s16963_s18 + $0x490] sm:$0xff]  ;;  %v9414_v52 = vld [vmem:[%s16963_s18 + $0x388] sm:$0xff] }
 0xc59   : > { %9897 = vmatprep.subr.mxu0 %v9374_v57  ;;  %9974 = vmatprep.subr.mxu1 %v9376_v27  ;;  %v9416_v57 = vld [vmem:[%s16963_s18 + $0x398] sm:$0xff]  ;;  %v9413_v27 = vld [vmem:[%s16963_s18 + $0x380] sm:$0xff] }
 0xc5a   : > { %9898 = vmatpush1.msra.mxu0 %v9373_v28  ;;  %9975 = vmatpush1.msra.mxu1 %v9375_v62  ;;  %v9415_v28 = vld [vmem:[%s16963_s18 + $0x390] sm:$0xff]  ;;  %v9382_v62 = vld [vmem:[%s16963_s18 + $0x288] sm:$0xff] }
 0xc5b   : > { %9899 = vmatprep.subr.mxu0 %v9342_v53  ;;  %9976 = vmatprep.subr.mxu1 %v9344_v3  ;;  %v9384_v53 = vld [vmem:[%s16963_s18 + $0x298] sm:$0xff]  ;;  %v9381_v3 = vld [vmem:[%s16963_s18 + $0x280] sm:$0xff] }
 0xc5c   : > { %9900 = vmatpush1.msra.mxu0 %v9341_v25  ;;  %9977 = vmatpush1.msra.mxu1 %v9343_v60  ;;  %v9383_v25 = vld [vmem:[%s16963_s18 + $0x290] sm:$0xff]  ;;  %v9350_v60 = vld [vmem:[%s16963_s18 + $0x188] sm:$0xff] }
 0xc5d   : > { %9901 = vmatprep.subr.mxu0 %v9310_v6  ;;  %9978 = vmatprep.subr.mxu1 %v9312_v19  ;;  %v9352_v6 = vld [vmem:[%s16963_s18 + $0x198] sm:$0xff]  ;;  %v9349_v19 = vld [vmem:[%s16963_s18 + $0x180] sm:$0xff] }
 0xc5e   : > { %9902 = vmatpush1.msra.mxu0 %v9309_v8  ;;  %9935 = vmatprep.mubr.f32.mxu0 %v13952_v54  ;;  %v9351_v8 = vld [vmem:[%s16963_s18 + $0x190] sm:$0xff] }
 0xc5f   : > { %9979 = vmatpush1.msra.mxu1 %v9311_v30  ;;  %10012 = vmatprep.mubr.f32.mxu1 %v13952_v54  ;;  %v9318_v30 = vld [vmem:[%s16963_s18 + $0x88] sm:$0xff] }
 0xc60   : > { %12657 = vmatmul.mubr.msk.f32.vlgmr.msra.gmra.mxu0 %vm2647_vm2, %v16011_v15  ;;  %12659 = vmatmul.mubr.msk.f32.vlgmr.msra.gmra.mxu1 %vm2647_vm2, %v16011_v15 }
 0xc61   : > { %10041 = vmatprep.subr.mxu0 %v9538_v31  ;;  %10118 = vmatprep.subr.mxu1 %v9540_v1  ;;  %v9320_v31 = vld [vmem:[%s16963_s18 + $0x98] sm:$0xff]  ;;  %v9317_v1 = vld [vmem:[%s16963_s18 + $0x80] sm:$0xff] }
 0xc62   : > { %10042 = vmatpush1.msra.mxu0 %v9537_v7  ;;  %10119 = vmatpush1.msra.mxu1 %v9539_v5  ;;  %v9319_v7 = vld [vmem:[%s16963_s18 + $0x90] sm:$0xff]  ;;  %v9546_v5 = vld [vmem:[%s16963_s18 + $0x7a8] sm:$0xff] }
 0xc63   : > { %10043 = vmatprep.subr.mxu0 %v9506_v9  ;;  %10120 = vmatprep.subr.mxu1 %v9508_v13  ;;  %v9548_v9 = vld [vmem:[%s16963_s18 + $0x7b8] sm:$0xff]  ;;  %v9545_v13 = vld [vmem:[%s16963_s18 + $0x7a0] sm:$0xff] }
 0xc64   : > { %9941 = vmatprep.mubr.f32.mxu0 %v13952_v54  ;;  %10018 = vmatprep.mubr.f32.mxu1 %v13952_v54 }
 0xc65   : > { %10044 = vmatpush1.msra.mxu0 %v9505_v29  ;;  %10121 = vmatpush1.msra.mxu1 %v9507_v48  ;;  %v9547_v29 = vld [vmem:[%s16963_s18 + $0x7b0] sm:$0xff]  ;;  %v9514_v48 = vld [vmem:[%s16963_s18 + $0x6a8] sm:$0xff] }
 0xc66   : > { %12658 = vmatmul.mubr.msk.f32.gmra.mxu0 %vm2647_vm2, %v16041_v47  ;;  %12660 = vmatmul.mubr.msk.f32.gmra.mxu1 %vm2647_vm2, %v16041_v47 }
 0xc67   : > { %10045 = vmatprep.subr.mxu0 %v9474_v32  ;;  %10122 = vmatprep.subr.mxu1 %v9476_v10  ;;  %v9516_v32 = vld [vmem:[%s16963_s18 + $0x6b8] sm:$0xff]  ;;  %v9513_v10 = vld [vmem:[%s16963_s18 + $0x6a0] sm:$0xff] }
 0xc68   : > { %10046 = vmatpush1.msra.mxu0 %v9473_v61  ;;  %10123 = vmatpush1.msra.mxu1 %v9475_v37  ;;  %v9515_v61 = vld [vmem:[%s16963_s18 + $0x6b0] sm:$0xff]  ;;  %v9482_v37 = vld [vmem:[%s16963_s18 + $0x5a8] sm:$0xff] }
 0xc69   : > { %10047 = vmatprep.subr.mxu0 %v9442_v11  ;;  %10124 = vmatprep.subr.mxu1 %v9444_v63  ;;  %v9484_v11 = vld [vmem:[%s16963_s18 + $0x5b8] sm:$0xff]  ;;  %v9481_v63 = vld [vmem:[%s16963_s18 + $0x5a0] sm:$0xff] }
 0xc6a   : > { %10048 = vmatpush1.msra.mxu0 %v9441_v34  ;;  %10125 = vmatpush1.msra.mxu1 %v9443_v46  ;;  %v9483_v34 = vld [vmem:[%s16963_s18 + $0x5b0] sm:$0xff]  ;;  %v9450_v46 = vld [vmem:[%s16963_s18 + $0x4a8] sm:$0xff] }
 0xc6b   : > { %10049 = vmatprep.subr.mxu0 %v9410_v49  ;;  %10126 = vmatprep.subr.mxu1 %v9412_v23  ;;  %v9452_v49 = vld [vmem:[%s16963_s18 + $0x4b8] sm:$0xff]  ;;  %v9449_v23 = vld [vmem:[%s16963_s18 + $0x4a0] sm:$0xff] }
 0xc6c   : > { %10050 = vmatpush1.msra.mxu0 %v9409_v12  ;;  %10127 = vmatpush1.msra.mxu1 %v9411_v38  ;;  %v9451_v12 = vld [vmem:[%s16963_s18 + $0x4b0] sm:$0xff]  ;;  %v9418_v38 = vld [vmem:[%s16963_s18 + $0x3a8] sm:$0xff] }
 0xc6d   : > { %10051 = vmatprep.subr.mxu0 %v9378_v40  ;;  %10128 = vmatprep.subr.mxu1 %v9380_v39  ;;  %v9420_v40 = vld [vmem:[%s16963_s18 + $0x3b8] sm:$0xff]  ;;  %v9417_v39 = vld [vmem:[%s16963_s18 + $0x3a0] sm:$0xff] }
 0xc6e   : > { %10052 = vmatpush1.msra.mxu0 %v9377_v50  ;;  %10129 = vmatpush1.msra.mxu1 %v9379_v14  ;;  %v9419_v50 = vld [vmem:[%s16963_s18 + $0x3b0] sm:$0xff]  ;;  %v9386_v14 = vld [vmem:[%s16963_s18 + $0x2a8] sm:$0xff] }
 0xc6f   : > { %10053 = vmatprep.subr.mxu0 %v9346_v16  ;;  %10130 = vmatprep.subr.mxu1 %v9348_v17  ;;  %v9388_v16 = vld [vmem:[%s16963_s18 + $0x2b8] sm:$0xff]  ;;  %v9385_v17 = vld [vmem:[%s16963_s18 + $0x2a0] sm:$0xff] }
 0xc70   : > { %10054 = vmatpush1.msra.mxu0 %v9345_v18  ;;  %10131 = vmatpush1.msra.mxu1 %v9347_v20  ;;  %v9387_v18 = vld [vmem:[%s16963_s18 + $0x2b0] sm:$0xff]  ;;  %v9354_v20 = vld [vmem:[%s16963_s18 + $0x1a8] sm:$0xff] }
 0xc71   : > { %10055 = vmatprep.subr.mxu0 %v9314_v21  ;;  %10132 = vmatprep.subr.mxu1 %v9316_v22  ;;  %v9356_v21 = vld [vmem:[%s16963_s18 + $0x1b8] sm:$0xff]  ;;  %v9353_v22 = vld [vmem:[%s16963_s18 + $0x1a0] sm:$0xff] }
 0xc72   : > { %10056 = vmatpush1.msra.mxu0 %v9313_v26  ;;  %10089 = vmatprep.mubr.f32.mxu0 %v13952_v54  ;;  %v9355_v26 = vld [vmem:[%s16963_s18 + $0x1b0] sm:$0xff] }
 0xc73   : > { %10133 = vmatpush1.msra.mxu1 %v9315_v45  ;;  %10166 = vmatprep.mubr.f32.mxu1 %v13952_v54  ;;  %v9322_v45 = vld [vmem:[%s16963_s18 + $0xa8] sm:$0xff] }
 0xc74   : > { %12661 = vmatmul.mubr.msk.f32.vlgmr.msra.gmra.mxu0 %vm2647_vm2, %v16011_v15  ;;  %12663 = vmatmul.mubr.msk.f32.vlgmr.msra.gmra.mxu1 %vm2647_vm2, %v16011_v15 }
 0xc75   : > { %10195 = vmatprep.subr.mxu0 %v9542_v59  ;;  %10272 = vmatprep.subr.mxu1 %v9544_v41  ;;  %v9324_v59 = vld [vmem:[%s16963_s18 + $0xb8] sm:$0xff]  ;;  %v9321_v41 = vld [vmem:[%s16963_s18 + $0xa0] sm:$0xff] }
 0xc76   : > { %10196 = vmatpush1.msra.mxu0 %v9541_v35  ;;  %10273 = vmatpush1.msra.mxu1 %v9543_v55  ;;  %v9323_v35 = vld [vmem:[%s16963_s18 + $0xb0] sm:$0xff]  ;;  %v9550_v55 = vld [vmem:[%s16963_s18 + $0x7c8] sm:$0xff] }
 0xc77   : > { %10197 = vmatprep.subr.mxu0 %v9510_v42  ;;  %10274 = vmatprep.subr.mxu1 %v9512_v56  ;;  %v9552_v42 = vld [vmem:[%s16963_s18 + $0x7d8] sm:$0xff]  ;;  %v9549_v56 = vld [vmem:[%s16963_s18 + $0x7c0] sm:$0xff] }
 0xc78   : > { %10095 = vmatprep.mubr.f32.mxu0 %v13952_v54  ;;  %10172 = vmatprep.mubr.f32.mxu1 %v13952_v54 }
 0xc79   : > { %10198 = vmatpush1.msra.mxu0 %v9509_v4  ;;  %10275 = vmatpush1.msra.mxu1 %v9511_v33  ;;  %v9551_v4 = vld [vmem:[%s16963_s18 + $0x7d0] sm:$0xff]  ;;  %v9518_v33 = vld [vmem:[%s16963_s18 + $0x6c8] sm:$0xff] }
 0xc7a   : > { %12662 = vmatmul.mubr.msk.f32.gmra.mxu0 %vm2647_vm2, %v16041_v47  ;;  %12664 = vmatmul.mubr.msk.f32.gmra.mxu1 %vm2647_vm2, %v16041_v47 }
 0xc7b   : > { %10199 = vmatprep.subr.mxu0 %v9478_v0  ;;  %10276 = vmatprep.subr.mxu1 %v9480_v36  ;;  %v9520_v0 = vld [vmem:[%s16963_s18 + $0x6d8] sm:$0xff]  ;;  %v9517_v36 = vld [vmem:[%s16963_s18 + $0x6c0] sm:$0xff] }
 0xc7c   : > { %10200 = vmatpush1.msra.mxu0 %v9477_v43  ;;  %10277 = vmatpush1.msra.mxu1 %v9479_v44  ;;  %v9519_v43 = vld [vmem:[%s16963_s18 + $0x6d0] sm:$0xff]  ;;  %v9486_v44 = vld [vmem:[%s16963_s18 + $0x5c8] sm:$0xff] }
 0xc7d   : > { %10201 = vmatprep.subr.mxu0 %v9446_v24  ;;  %10278 = vmatprep.subr.mxu1 %v9448_v2  ;;  %v9488_v24 = vld [vmem:[%s16963_s18 + $0x5d8] sm:$0xff]  ;;  %v9485_v2 = vld [vmem:[%s16963_s18 + $0x5c0] sm:$0xff] }
 0xc7e   : > { %10202 = vmatpush1.msra.mxu0 %v9445_v51  ;;  %10279 = vmatpush1.msra.mxu1 %v9447_v58  ;;  %v9487_v51 = vld [vmem:[%s16963_s18 + $0x5d0] sm:$0xff]  ;;  %v9454_v58 = vld [vmem:[%s16963_s18 + $0x4c8] sm:$0xff] }
 0xc7f   : > { %10203 = vmatprep.subr.mxu0 %v9414_v52  ;;  %10280 = vmatprep.subr.mxu1 %v9416_v57  ;;  %v9456_v52 = vld [vmem:[%s16963_s18 + $0x4d8] sm:$0xff]  ;;  %v9453_v57 = vld [vmem:[%s16963_s18 + $0x4c0] sm:$0xff] }
 0xc80   : > { %10204 = vmatpush1.msra.mxu0 %v9413_v27  ;;  %10281 = vmatpush1.msra.mxu1 %v9415_v28  ;;  %v9455_v27 = vld [vmem:[%s16963_s18 + $0x4d0] sm:$0xff]  ;;  %v9422_v28 = vld [vmem:[%s16963_s18 + $0x3c8] sm:$0xff] }
 0xc81   : > { %10205 = vmatprep.subr.mxu0 %v9382_v62  ;;  %10282 = vmatprep.subr.mxu1 %v9384_v53  ;;  %v9424_v62 = vld [vmem:[%s16963_s18 + $0x3d8] sm:$0xff]  ;;  %v9421_v53 = vld [vmem:[%s16963_s18 + $0x3c0] sm:$0xff] }
 0xc82   : > { %10206 = vmatpush1.msra.mxu0 %v9381_v3  ;;  %10283 = vmatpush1.msra.mxu1 %v9383_v25  ;;  %v9423_v3 = vld [vmem:[%s16963_s18 + $0x3d0] sm:$0xff]  ;;  %v9390_v25 = vld [vmem:[%s16963_s18 + $0x2c8] sm:$0xff] }
 0xc83   : > { %10207 = vmatprep.subr.mxu0 %v9350_v60  ;;  %10284 = vmatprep.subr.mxu1 %v9352_v6  ;;  %v9392_v60 = vld [vmem:[%s16963_s18 + $0x2d8] sm:$0xff]  ;;  %v9389_v6 = vld [vmem:[%s16963_s18 + $0x2c0] sm:$0xff] }
 0xc84   : > { %10208 = vmatpush1.msra.mxu0 %v9349_v19  ;;  %10285 = vmatpush1.msra.mxu1 %v9351_v8  ;;  %v9391_v19 = vld [vmem:[%s16963_s18 + $0x2d0] sm:$0xff]  ;;  %v9358_v8 = vld [vmem:[%s16963_s18 + $0x1c8] sm:$0xff] }
 0xc85   : > { %10209 = vmatprep.subr.mxu0 %v9318_v30  ;;  %10286 = vmatprep.subr.mxu1 %v9320_v31  ;;  %v9360_v30 = vld [vmem:[%s16963_s18 + $0x1d8] sm:$0xff]  ;;  %v9357_v31 = vld [vmem:[%s16963_s18 + $0x1c0] sm:$0xff] }
 0xc86   : > { %10210 = vmatpush1.msra.mxu0 %v9317_v1  ;;  %10243 = vmatprep.mubr.f32.mxu0 %v13952_v54  ;;  %v9359_v1 = vld [vmem:[%s16963_s18 + $0x1d0] sm:$0xff] }
 0xc87   : > { %10287 = vmatpush1.msra.mxu1 %v9319_v7  ;;  %10320 = vmatprep.mubr.f32.mxu1 %v13952_v54  ;;  %v9326_v7 = vld [vmem:[%s16963_s18 + $0xc8] sm:$0xff] }
 0xc88   : > { %12665 = vmatmul.mubr.msk.f32.vlgmr.msra.gmra.mxu0 %vm2647_vm2, %v16011_v15  ;;  %12667 = vmatmul.mubr.msk.f32.vlgmr.msra.gmra.mxu1 %vm2647_vm2, %v16011_v15 }
 0xc89   : > { %10349 = vmatprep.subr.mxu0 %v9546_v5  ;;  %10426 = vmatprep.subr.mxu1 %v9548_v9  ;;  %v9328_v5 = vld [vmem:[%s16963_s18 + $0xd8] sm:$0xff]  ;;  %v9325_v9 = vld [vmem:[%s16963_s18 + $0xc0] sm:$0xff] }
 0xc8a   : > { %10350 = vmatpush1.msra.mxu0 %v9545_v13  ;;  %10427 = vmatpush1.msra.mxu1 %v9547_v29  ;;  %v9327_v13 = vld [vmem:[%s16963_s18 + $0xd0] sm:$0xff]  ;;  %v9554_v29 = vld [vmem:[%s16963_s18 + $0x7e8] sm:$0xff] }
 0xc8b   : > { %10351 = vmatprep.subr.mxu0 %v9514_v48  ;;  %10428 = vmatprep.subr.mxu1 %v9516_v32  ;;  %v9556_v48 = vld [vmem:[%s16963_s18 + $0x7f8] sm:$0xff]  ;;  %v9553_v32 = vld [vmem:[%s16963_s18 + $0x7e0] sm:$0xff] }
 0xc8c   : > { %10249 = vmatprep.mubr.f32.mxu0 %v13952_v54  ;;  %10326 = vmatprep.mubr.f32.mxu1 %v13952_v54 }
 0xc8d   : > { %10352 = vmatpush1.msra.mxu0 %v9513_v10  ;;  %10429 = vmatpush1.msra.mxu1 %v9515_v61  ;;  %v9555_v10 = vld [vmem:[%s16963_s18 + $0x7f0] sm:$0xff]  ;;  %v9522_v61 = vld [vmem:[%s16963_s18 + $0x6e8] sm:$0xff] }
 0xc8e   : > { %12666 = vmatmul.mubr.msk.f32.gmra.mxu0 %vm2647_vm2, %v16041_v47  ;;  %12668 = vmatmul.mubr.msk.f32.gmra.mxu1 %vm2647_vm2, %v16041_v47 }
 0xc8f   : > { %10353 = vmatprep.subr.mxu0 %v9482_v37  ;;  %10430 = vmatprep.subr.mxu1 %v9484_v11  ;;  %v9524_v37 = vld [vmem:[%s16963_s18 + $0x6f8] sm:$0xff]  ;;  %v9521_v11 = vld [vmem:[%s16963_s18 + $0x6e0] sm:$0xff] }
 0xc90   : > { %10354 = vmatpush1.msra.mxu0 %v9481_v63  ;;  %10431 = vmatpush1.msra.mxu1 %v9483_v34  ;;  %v9523_v63 = vld [vmem:[%s16963_s18 + $0x6f0] sm:$0xff]  ;;  %v9490_v34 = vld [vmem:[%s16963_s18 + $0x5e8] sm:$0xff] }
 0xc91   : > { %10355 = vmatprep.subr.mxu0 %v9450_v46  ;;  %10432 = vmatprep.subr.mxu1 %v9452_v49  ;;  %v9492_v46 = vld [vmem:[%s16963_s18 + $0x5f8] sm:$0xff]  ;;  %v9489_v49 = vld [vmem:[%s16963_s18 + $0x5e0] sm:$0xff] }
 0xc92   : > { %10356 = vmatpush1.msra.mxu0 %v9449_v23  ;;  %10433 = vmatpush1.msra.mxu1 %v9451_v12  ;;  %v9491_v23 = vld [vmem:[%s16963_s18 + $0x5f0] sm:$0xff]  ;;  %v9458_v12 = vld [vmem:[%s16963_s18 + $0x4e8] sm:$0xff] }
 0xc93   : > { %10357 = vmatprep.subr.mxu0 %v9418_v38  ;;  %10434 = vmatprep.subr.mxu1 %v9420_v40  ;;  %v9460_v38 = vld [vmem:[%s16963_s18 + $0x4f8] sm:$0xff]  ;;  %v9457_v40 = vld [vmem:[%s16963_s18 + $0x4e0] sm:$0xff] }
 0xc94   : > { %10358 = vmatpush1.msra.mxu0 %v9417_v39  ;;  %10435 = vmatpush1.msra.mxu1 %v9419_v50  ;;  %v9459_v39 = vld [vmem:[%s16963_s18 + $0x4f0] sm:$0xff]  ;;  %v9426_v50 = vld [vmem:[%s16963_s18 + $0x3e8] sm:$0xff] }
 0xc95   : > { %10359 = vmatprep.subr.mxu0 %v9386_v14  ;;  %10436 = vmatprep.subr.mxu1 %v9388_v16  ;;  %v9428_v14 = vld [vmem:[%s16963_s18 + $0x3f8] sm:$0xff]  ;;  %v9425_v16 = vld [vmem:[%s16963_s18 + $0x3e0] sm:$0xff] }
 0xc96   : > { %10360 = vmatpush1.msra.mxu0 %v9385_v17  ;;  %10437 = vmatpush1.msra.mxu1 %v9387_v18  ;;  %v9427_v17 = vld [vmem:[%s16963_s18 + $0x3f0] sm:$0xff]  ;;  %v9394_v18 = vld [vmem:[%s16963_s18 + $0x2e8] sm:$0xff] }
 0xc97   : > { %10361 = vmatprep.subr.mxu0 %v9354_v20  ;;  %10438 = vmatprep.subr.mxu1 %v9356_v21  ;;  %v9396_v20 = vld [vmem:[%s16963_s18 + $0x2f8] sm:$0xff]  ;;  %v9393_v21 = vld [vmem:[%s16963_s18 + $0x2e0] sm:$0xff] }
 0xc98   : > { %10362 = vmatpush1.msra.mxu0 %v9353_v22  ;;  %10439 = vmatpush1.msra.mxu1 %v9355_v26  ;;  %v9395_v22 = vld [vmem:[%s16963_s18 + $0x2f0] sm:$0xff]  ;;  %v9362_v26 = vld [vmem:[%s16963_s18 + $0x1e8] sm:$0xff] }
 0xc99   : > { %10363 = vmatprep.subr.mxu0 %v9322_v45  ;;  %10440 = vmatprep.subr.mxu1 %v9324_v59  ;;  %v9364_v45 = vld [vmem:[%s16963_s18 + $0x1f8] sm:$0xff]  ;;  %v9361_v59 = vld [vmem:[%s16963_s18 + $0x1e0] sm:$0xff] }
 0xc9a   : > { %10364 = vmatpush1.msra.mxu0 %v9321_v41  ;;  %10397 = vmatprep.mubr.f32.mxu0 %v13952_v54  ;;  %v9363_v41 = vld [vmem:[%s16963_s18 + $0x1f0] sm:$0xff] }
 0xc9b   : > { %10441 = vmatpush1.msra.mxu1 %v9323_v35  ;;  %10474 = vmatprep.mubr.f32.mxu1 %v13952_v54  ;;  %v9330_v35 = vld [vmem:[%s16963_s18 + $0xe8] sm:$0xff] }
 0xc9c   : > { %12669 = vmatmul.mubr.msk.f32.vlgmr.msra.gmra.mxu0 %vm2647_vm2, %v16011_v15  ;;  %12671 = vmatmul.mubr.msk.f32.vlgmr.msra.gmra.mxu1 %vm2647_vm2, %v16011_v15 }
 0xc9d   : > { %10503 = vmatprep.subr.mxu0 %v9550_v55  ;;  %10580 = vmatprep.subr.mxu1 %v9552_v42  ;;  %v9332_v55 = vld [vmem:[%s16963_s18 + $0xf8] sm:$0xff]  ;;  %v9329_v42 = vld [vmem:[%s16963_s18 + $0xe0] sm:$0xff] }
 0xc9e   : > { %10504 = vmatpush1.msra.mxu0 %v9549_v56  ;;  %10581 = vmatpush1.msra.mxu1 %v9551_v4  ;;  %v9331_v56 = vld [vmem:[%s16963_s18 + $0xf0] sm:$0xff] }
 0xc9f   : > { %10505 = vmatprep.subr.mxu0 %v9518_v33  ;;  %10582 = vmatprep.subr.mxu1 %v9520_v0 }
 0xca0   : > { %10403 = vmatprep.mubr.f32.mxu0 %v13952_v54  ;;  %10480 = vmatprep.mubr.f32.mxu1 %v13952_v54 }
 0xca1   : > { %10506 = vmatpush1.msra.mxu0 %v9517_v36  ;;  %10583 = vmatpush1.msra.mxu1 %v9519_v43 }
 0xca2   : > { %12670 = vmatmul.mubr.msk.f32.gmra.mxu0 %vm2647_vm2, %v16041_v47  ;;  %12672 = vmatmul.mubr.msk.f32.gmra.mxu1 %vm2647_vm2, %v16041_v47 }
 0xca3   : > { %10507 = vmatprep.subr.mxu0 %v9486_v44  ;;  %10584 = vmatprep.subr.mxu1 %v9488_v24 }
 0xca4   : > { %10508 = vmatpush1.msra.mxu0 %v9485_v2  ;;  %10585 = vmatpush1.msra.mxu1 %v9487_v51  ;;  %v12686_v2 = vld [vmem:[%s16961_s16 + $0xc] sm:$0x7] }
 0xca5   : > { %10509 = vmatprep.subr.mxu0 %v9454_v58  ;;  %10586 = vmatprep.subr.mxu1 %v9456_v52 }
 0xca6   : > { %10510 = vmatpush1.msra.mxu0 %v9453_v57  ;;  %10587 = vmatpush1.msra.mxu1 %v9455_v27 }
 0xca7   : > { %10511 = vmatprep.subr.mxu0 %v9422_v28  ;;  %10588 = vmatprep.subr.mxu1 %v9424_v62  ;;  %v12691_v28 = vld [vmem:[%s16961_s16 + $0x14] sm:$0x7] }
 0xca8   : > { %10512 = vmatpush1.msra.mxu0 %v9421_v53  ;;  %10589 = vmatpush1.msra.mxu1 %v9423_v3 }
 0xca9   : > { %10513 = vmatprep.subr.mxu0 %v9390_v25  ;;  %10590 = vmatprep.subr.mxu1 %v9392_v60 }
 0xcaa   : > { %10514 = vmatpush1.msra.mxu0 %v9389_v6  ;;  %10591 = vmatpush1.msra.mxu1 %v9391_v19 }
 0xcab   : > { %10515 = vmatprep.subr.mxu0 %v9358_v8  ;;  %10592 = vmatprep.subr.mxu1 %v9360_v30 }
 0xcac   : > { %10516 = vmatpush1.msra.mxu0 %v9357_v31  ;;  %10593 = vmatpush1.msra.mxu1 %v9359_v1  ;;  %v12696_v1 = vld [vmem:[%s16961_s16 + $0x1c] sm:$0x7] }
 0xcad   : > { %10517 = vmatprep.subr.mxu0 %v9326_v7  ;;  %10594 = vmatprep.subr.mxu1 %v9328_v5 }
 0xcae   : > { %10518 = vmatpush1.msra.mxu0 %v9325_v9  ;;  %10551 = vmatprep.mubr.f32.mxu0 %v13952_v54 }
 0xcaf   : > { %10595 = vmatpush1.msra.mxu1 %v9327_v13  ;;  %10628 = vmatprep.mubr.f32.mxu1 %v13952_v54 }
 0xcb0   : > { %12673 = vmatmul.mubr.msk.f32.vlgmr.msra.gmra.mxu0 %vm2647_vm2, %v16011_v15  ;;  %12675 = vmatmul.mubr.msk.f32.vlgmr.msra.gmra.mxu1 %vm2647_vm2, %v16011_v15 }
 0xcb1   : > { %10657 = vmatprep.subr.mxu0 %v9554_v29  ;;  %10734 = vmatprep.subr.mxu1 %v9556_v48 }
 0xcb2   : > { %10658 = vmatpush1.msra.mxu0 %v9553_v32  ;;  %10735 = vmatpush1.msra.mxu1 %v9555_v10 }
 0xcb3   : > { %10659 = vmatprep.subr.mxu0 %v9522_v61  ;;  %10736 = vmatprep.subr.mxu1 %v9524_v37 }
 0xcb4   : > { %10557 = vmatprep.mubr.f32.mxu0 %v13952_v54  ;;  %10634 = vmatprep.mubr.f32.mxu1 %v13952_v54 }
 0xcb5   : > { %10660 = vmatpush1.msra.mxu0 %v9521_v11  ;;  %10737 = vmatpush1.msra.mxu1 %v9523_v63  ;;  %v12701_v11 = vld [vmem:[%s16961_s16 + $0x24] sm:$0x7] }
 0xcb6   : > { %12674 = vmatmul.mubr.msk.f32.gmra.mxu0 %vm2647_vm2, %v16041_v47  ;;  %12676 = vmatmul.mubr.msk.f32.gmra.mxu1 %vm2647_vm2, %v16041_v47 }
 0xcb7   : > { %10661 = vmatprep.subr.mxu0 %v9490_v34  ;;  %10738 = vmatprep.subr.mxu1 %v9492_v46 }
 0xcb8   : > { %10662 = vmatpush1.msra.mxu0 %v9489_v49  ;;  %10739 = vmatpush1.msra.mxu1 %v9491_v23 }
 0xcb9   : > { %10663 = vmatprep.subr.mxu0 %v9458_v12  ;;  %10740 = vmatprep.subr.mxu1 %v9460_v38 }
 0xcba   : > { %10664 = vmatpush1.msra.mxu0 %v9457_v40  ;;  %10741 = vmatpush1.msra.mxu1 %v9459_v39 }
 0xcbb   : > { %10665 = vmatprep.subr.mxu0 %v9426_v50  ;;  %10742 = vmatprep.subr.mxu1 %v9428_v14  ;;  %v12706_v50 = vld [vmem:[%s16961_s16 + $0x2c] sm:$0x7] }
 0xcbc   : > { %10666 = vmatpush1.msra.mxu0 %v9425_v16  ;;  %10743 = vmatpush1.msra.mxu1 %v9427_v17 }
 0xcbd   : > { %10667 = vmatprep.subr.mxu0 %v9394_v18  ;;  %10744 = vmatprep.subr.mxu1 %v9396_v20 }
 0xcbe   : > { %10668 = vmatpush1.msra.mxu0 %v9393_v21  ;;  %10745 = vmatpush1.msra.mxu1 %v9395_v22 }
 0xcbf   : > { %10669 = vmatprep.subr.mxu0 %v9362_v26  ;;  %10746 = vmatprep.subr.mxu1 %v9364_v45 }
 0xcc0   : > { %10670 = vmatpush1.msra.mxu0 %v9361_v59  ;;  %10747 = vmatpush1.msra.mxu1 %v9363_v41  ;;  %v12711_v41 = vld [vmem:[%s16961_s16 + $0x34] sm:$0x7] }
 0xcc1   : > { %10671 = vmatprep.subr.mxu0 %v9330_v35  ;;  %10748 = vmatprep.subr.mxu1 %v9332_v55  ;;  %v10795_v55 = vld [vmem:[%s16961_s16] sm:$0x7] }
 0xcc2   : > { %10672 = vmatpush1.msra.mxu0 %v9329_v42  ;;  %10705 = vmatprep.mubr.f32.mxu0 %v13952_v54 }
 0xcc3   : > { %10749 = vmatpush1.msra.mxu1 %v9331_v56  ;;  %10782 = vmatprep.mubr.f32.mxu1 %v13952_v54  ;;  %v12690_v56 = vld [vmem:[%s16961_s16 + $0x10] sm:$0x7] }
 0xcc4   : > { %12677 = vmatmul.mubr.msk.f32.vlgmr.msra.gmra.mxu0 %vm2647_vm2, %v16011_v15  ;;  %12679 = vmatmul.mubr.msk.f32.vlgmr.msra.gmra.mxu1 %vm2647_vm2, %v16011_v15  ;;  %v12681_v15 = vld [vmem:[%s16961_s16 + $0x4] sm:$0x7] }
 0xcc5   : > { %10711 = vmatprep.mubr.f32.mxu0 %v13952_v54  ;;  %10788 = vmatprep.mubr.f32.mxu1 %v13952_v54 }
 0xcc8   : > { %12678 = vmatmul.mubr.msk.f32.gmra.mxu0 %vm2647_vm2, %v16041_v47  ;;  %12680 = vmatmul.mubr.msk.f32.gmra.mxu1 %vm2647_vm2, %v16041_v47 }
 0xcc9   : > { %10871 = vmatprep.mubr.f32.mxu0 %v13952_v54  ;;  %10955 = vmatprep.mubr.f32.mxu1 %v13952_v54 }
 0xcf9   : > { %v9706_v4 = vpop.f32.mrf.mxu1  ;;  %v16791_v57 = vpop.f32.mrf.mxu0 }
 0xcfb   : > { %v9708_v33 = vpop.f32.mrf.mxu1  ;;  %v16798_v62 = vpop.f32.mrf.mxu0 }
 0xcff   : > { %v9712_v0 = vpop.f32.mrf.mxu1  ;;  %v16802_v53 = vpop.f32.mrf.mxu0 }
 0xd01   : > { %v9714_v36 = vpop.f32.mrf.mxu1  ;;  %v16804_v3 = vpop.f32.mrf.mxu0 }
 0xd02   : > { %12682 = vmatprep.subr.msk.mxu0 %vm2755_vm4, %v9714_v36  ;;  %v12700_v36 = vld [vmem:[%s16961_s16 + $0x20] sm:$0x7] }
 0xd03   : > { %12683 = vmatpush1.msk.msra.mxu0 %vm2755_vm4, %v9712_v0 }
 0xd04   : > { %10837 = vmatprep.subr.mxu0 %v9708_v33 }
 0xd05   : > { %10838 = vmatpush1.msra.mxu0 %v9706_v4 }
 0xd06   : > { %12684 = vmatmul.mubr.msk.f32.vlgmr.msra.gmra.mxu0 %vm2745_vm5, %v12681_v15 }
 0xd07   : > { %11039 = vmatprep.mubr.f32.mxu0 %v13952_v54 }
 0xd0c   : > { %v9860_v47 = vpop.f32.mrf.mxu1  ;;  %v16806_v60 = vpop.f32.mrf.mxu0 }
 0xd0e   : > { %v9862_v43 = vpop.f32.mrf.mxu1  ;;  %v16808_v19 = vpop.f32.mrf.mxu0 }
 0xd12   : > { %v9866_v44 = vpop.f32.mrf.mxu1  ;;  %v16811_v31 = vpop.f32.mrf.mxu0 }
 0xd14   : > { %v9868_v24 = vpop.f32.mrf.mxu1  ;;  %v16818_v7 = vpop.f32.mrf.mxu0 }
 0xd15   : > { %12687 = vmatprep.subr.msk.mxu1 %vm2755_vm4, %v9868_v24  ;;  %v12716_v24 = vld [vmem:[%s16961_s16 + $0x3c] sm:$0x7] }
 0xd16   : > { %12688 = vmatpush1.msk.msra.mxu1 %vm2755_vm4, %v9866_v44  ;;  %v12710_v44 = vld [vmem:[%s16961_s16 + $0x30] sm:$0x7] }
 0xd17   : > { %10921 = vmatprep.subr.mxu1 %v9862_v43 }
 0xd18   : > { %10922 = vmatpush1.msra.mxu1 %v9860_v47 }
 0xd19   : > { %12689 = vmatmul.mubr.msk.f32.vlgmr.msra.gmra.mxu1 %vm2745_vm5, %v12686_v2 }
 0xd1a   : > { %11123 = vmatprep.mubr.f32.mxu1 %v13952_v54 }
 0xd20   : > { %v10014_v51 = vpop.f32.mrf.mxu1  ;;  %v16821_v5 = vpop.f32.mrf.mxu0 }
 0xd22   : > { %v10016_v58 = vpop.f32.mrf.mxu1  ;;  %v9939_v9 = vpop.f32.mrf.mxu0 }
 0xd26   : > { %v10020_v52 = vpop.f32.mrf.mxu1  ;;  %v9943_v48 = vpop.f32.mrf.mxu0 }
 0xd28   : > { %v10022_v27 = vpop.f32.mrf.mxu1  ;;  %v9945_v10 = vpop.f32.mrf.mxu0 }
 0xd29   : > { %12692 = vmatprep.subr.msk.mxu0 %vm2755_vm4, %v10022_v27  ;;  %v12705_v27 = vld [vmem:[%s16961_s16 + $0x28] sm:$0x7] }
 0xd2a   : > { %12693 = vmatpush1.msk.msra.mxu0 %vm2755_vm4, %v10020_v52  ;;  %v12695_v52 = vld [vmem:[%s16961_s16 + $0x18] sm:$0x7] }
 0xd2b   : > { %11005 = vmatprep.subr.mxu0 %v10016_v58 }
 0xd2c   : > { %11006 = vmatpush1.msra.mxu0 %v10014_v51  ;;  %v12685_v51 = vld [vmem:[%s16961_s16 + $0x8] sm:$0x7] }
 0xd2d   : > { %12694 = vmatmul.mubr.msk.f32.vlgmr.msra.gmra.mxu0 %vm2745_vm5, %v12691_v28 }
 0xd2e   : > { %11207 = vmatprep.mubr.f32.mxu0 %v13952_v54 }
 0xd34   : > { %v10168_v25 = vpop.f32.mrf.mxu1  ;;  %v16824_v37 = vpop.f32.mrf.mxu0 }
 0xd36   : > { %v10170_v6 = vpop.f32.mrf.mxu1  ;;  %v16831_v63 = vpop.f32.mrf.mxu0 }
 0xd3a   : > { %v10174_v8 = vpop.f32.mrf.mxu1  ;;  %v16834_v34 = vpop.f32.mrf.mxu0 }
 0xd3c   : > { %v10176_v30 = vpop.f32.mrf.mxu1  ;;  %v16836_v49 = vpop.f32.mrf.mxu0 }
 0xd3d   : > { %12697 = vmatprep.subr.msk.mxu1 %vm2755_vm4, %v10176_v30 }
 0xd3e   : > { %12698 = vmatpush1.msk.msra.mxu1 %vm2755_vm4, %v10174_v8 }
 0xd3f   : > { %11089 = vmatprep.subr.mxu1 %v10170_v6 }
 0xd40   : > { %11090 = vmatpush1.msra.mxu1 %v10168_v25 }
 0xd41   : > { %12699 = vmatmul.mubr.msk.f32.vlgmr.msra.gmra.mxu1 %vm2745_vm5, %v12696_v1 }
 0xd42   : > { %11291 = vmatprep.mubr.f32.mxu1 %v13952_v54 }
 0xd48   : > { %v10322_v13 = vpop.f32.mrf.mxu1  ;;  %v10245_v12 = vpop.f32.mrf.mxu0 }
 0xd4a   : > { %v10324_v29 = vpop.f32.mrf.mxu1  ;;  %v10247_v40 = vpop.f32.mrf.mxu0 }
 0xd4e   : > { %v10328_v32 = vpop.f32.mrf.mxu1  ;;  %v10251_v14 = vpop.f32.mrf.mxu0 }
 0xd50   : > { %v10330_v61 = vpop.f32.mrf.mxu1  ;;  %v10253_v16 = vpop.f32.mrf.mxu0 }
 0xd51   : > { %12702 = vmatprep.subr.msk.mxu0 %vm2755_vm4, %v10330_v61 }
 0xd52   : > { %12703 = vmatpush1.msk.msra.mxu0 %vm2755_vm4, %v10328_v32 }
 0xd53   : > { %11173 = vmatprep.subr.mxu0 %v10324_v29 }
 0xd54   : > { %11174 = vmatpush1.msra.mxu0 %v10322_v13 }
 0xd55   : > { %12704 = vmatmul.mubr.msk.f32.vlgmr.msra.gmra.mxu0 %vm2745_vm5, %v12701_v11 }
 0xd56   : > { %11375 = vmatprep.mubr.f32.mxu0 %v13952_v54 }
 0xd5c   : > { %v10476_v46 = vpop.f32.mrf.mxu1  ;;  %v16845_v17 = vpop.f32.mrf.mxu0 }
 0xd5e   : > { %v10478_v23 = vpop.f32.mrf.mxu1  ;;  %v16847_v20 = vpop.f32.mrf.mxu0 }
 0xd62   : > { %v10482_v38 = vpop.f32.mrf.mxu1  ;;  %v16849_v22 = vpop.f32.mrf.mxu0 }
 0xd64   : > { %v10484_v39 = vpop.f32.mrf.mxu1  ;;  %v16852_v59 = vpop.f32.mrf.mxu0 }
 0xd65   : > { %12707 = vmatprep.subr.msk.mxu1 %vm2755_vm4, %v10484_v39 }
 0xd66   : > { %12708 = vmatpush1.msk.msra.mxu1 %vm2755_vm4, %v10482_v38 }
 0xd67   : > { %11257 = vmatprep.subr.mxu1 %v10478_v23 }
 0xd68   : > { %11258 = vmatpush1.msra.mxu1 %v10476_v46 }
 0xd69   : > { %12709 = vmatmul.mubr.msk.f32.vlgmr.msra.gmra.mxu1 %vm2745_vm5, %v12706_v50 }
 0xd6a   : > { %11459 = vmatprep.mubr.f32.mxu1 %v13952_v54 }
 0xd70   : > { %v10630_v18 = vpop.f32.mrf.mxu1  ;;  %v10553_v35 = vpop.f32.mrf.mxu0 }
 0xd72   : > { %v10632_v21 = vpop.f32.mrf.mxu1  ;;  %v10555_v42 = vpop.f32.mrf.mxu0 }
 0xd76   : > { %v10636_v26 = vpop.f32.mrf.mxu1  ;;  %v10559_v4 = vpop.f32.mrf.mxu0 }
 0xd78   : > { %v10638_v45 = vpop.f32.mrf.mxu1  ;;  %v10561_v15 = vpop.f32.mrf.mxu0 }
 0xd79   : > { %12712 = vmatprep.subr.msk.mxu0 %vm2755_vm4, %v10638_v45 }
 0xd7a   : > { %12713 = vmatpush1.msk.msra.mxu0 %vm2755_vm4, %v10636_v26 }
 0xd7b   : > { %11341 = vmatprep.subr.mxu0 %v10632_v21 }
 0xd7c   : > { %11342 = vmatpush1.msra.mxu0 %v10630_v18 }
 0xd7d   : > { %12720 = vmatprep.subr.msk.mxu0 %vm2755_vm4, %v16804_v3  ;;  %12714 = vmatmul.mubr.msk.f32.vlgmr.msra.gmra.mxu0 %vm2745_vm5, %v12711_v41 }
 0xd7e   : > { %12721 = vmatpush1.msk.msra.mxu0 %vm2755_vm4, %v16802_v53  ;;  %11539 = vmatprep.mubr.f32.mxu0 %v13952_v54 }
 0xd7f   : > { %11505 = vmatprep.subr.mxu0 %v16798_v62  ;;  %v12715_v62 = vld [vmem:[%s16961_s16 + $0x38] sm:$0x7] }
 0xd80   : > { %11506 = vmatpush1.msra.mxu0 %v16791_v57 }
 0xd81   : > { %12726 = vmatprep.subr.msk.mxu0 %vm2755_vm4, %v9945_v10  ;;  %12722 = vmatmul.mubr.msk.f32.vlgmr.msra.gmra.mxu0 %vm2745_vm5, %v10795_v55 }
 0xd82   : > { %12727 = vmatpush1.msk.msra.mxu0 %vm2755_vm4, %v9943_v48  ;;  %11699 = vmatprep.mubr.f32.mxu0 %v13952_v54 }
 0xd83   : > { %11665 = vmatprep.subr.mxu0 %v9939_v9 }
 0xd84   : > { %v10784_v33 = vpop.f32.mrf.mxu1  ;;  %11666 = vmatpush1.msra.mxu0 %v16821_v5  ;;  %v10707_v2 = vpop.f32.mrf.mxu0 }
 0xd85   : > { %12732 = vmatprep.subr.msk.mxu0 %vm2755_vm4, %v10253_v16  ;;  %12728 = vmatmul.mubr.msk.f32.vlgmr.msra.gmra.mxu0 %vm2745_vm5, %v12690_v56 }
 0xd86   : > { %v10786_v0 = vpop.f32.mrf.mxu1  ;;  %12733 = vmatpush1.msk.msra.mxu0 %vm2755_vm4, %v10251_v14  ;;  %11859 = vmatprep.mubr.f32.mxu0 %v13952_v54  ;;  %v10709_v58 = vpop.f32.mrf.mxu0 }
 0xd87   : > { %11825 = vmatprep.subr.mxu0 %v10247_v40 }
 0xd88   : > { %v10790_v47 = vpop.f32.mrf.mxu1  ;;  %11826 = vmatpush1.msra.mxu0 %v10245_v12  ;;  %v10713_v57 = vpop.f32.mrf.mxu0 }
 0xd89   : > { %12738 = vmatprep.subr.msk.mxu0 %vm2755_vm4, %v10561_v15  ;;  %12734 = vmatmul.mubr.msk.f32.vlgmr.msra.gmra.mxu0 %vm2745_vm5, %v12700_v36 }
 0xd8a   : > { %v10792_v43 = vpop.f32.mrf.mxu1  ;;  %12739 = vmatpush1.msk.msra.mxu0 %vm2755_vm4, %v10559_v4  ;;  %12019 = vmatprep.mubr.f32.mxu0 %v13952_v54  ;;  %v10715_v28 = vpop.f32.mrf.mxu0 }
 0xd8b   : > { %12717 = vmatprep.subr.msk.mxu1 %vm2755_vm4, %v10792_v43  ;;  %11985 = vmatprep.subr.mxu0 %v10555_v42 }
 0xd8c   : > { %12718 = vmatpush1.msk.msra.mxu1 %vm2755_vm4, %v10790_v47  ;;  %11986 = vmatpush1.msra.mxu0 %v10553_v35 }
 0xd8d   : > { %11425 = vmatprep.subr.mxu1 %v10786_v0  ;;  %12740 = vmatmul.mubr.msk.f32.vlgmr.msra.gmra.mxu0 %vm2745_vm5, %v12710_v44 }
 0xd8e   : > { %11426 = vmatpush1.msra.mxu1 %v10784_v33 }
 0xd8f   : > { %12719 = vmatmul.mubr.msk.f32.vlgmr.msra.gmra.mxu1 %vm2745_vm5, %v12716_v24  ;;  %12723 = vmatprep.subr.msk.mxu1 %vm2755_vm4, %v16818_v7 }
 0xd90   : > { %12724 = vmatpush1.msk.msra.mxu1 %vm2755_vm4, %v16811_v31  ;;  %11619 = vmatprep.mubr.f32.mxu1 %v13952_v54 }
 0xd91   : > { %11585 = vmatprep.subr.mxu1 %v16808_v19 }
 0xd92   : > { %11586 = vmatpush1.msra.mxu1 %v16806_v60 }
 0xd93   : > { %12725 = vmatmul.mubr.msk.f32.vlgmr.msra.gmra.mxu1 %vm2745_vm5, %v12685_v51  ;;  %12729 = vmatprep.subr.msk.mxu1 %vm2755_vm4, %v16836_v49 }
 0xd94   : > { %12730 = vmatpush1.msk.msra.mxu1 %vm2755_vm4, %v16834_v34  ;;  %11779 = vmatprep.mubr.f32.mxu1 %v13952_v54 }
 0xd95   : > { %11745 = vmatprep.subr.mxu1 %v16831_v63 }
 0xd96   : > { %11746 = vmatpush1.msra.mxu1 %v16824_v37 }
 0xd97   : > { %12731 = vmatmul.mubr.msk.f32.vlgmr.msra.gmra.mxu1 %vm2745_vm5, %v12695_v52  ;;  %12735 = vmatprep.subr.msk.mxu1 %vm2755_vm4, %v16852_v59 }
 0xd98   : > { %12736 = vmatpush1.msk.msra.mxu1 %vm2755_vm4, %v16849_v22  ;;  %11939 = vmatprep.mubr.f32.mxu1 %v13952_v54 }
 0xd99   : > { %11905 = vmatprep.subr.mxu1 %v16847_v20 }
 0xd9a   : > { %11906 = vmatpush1.msra.mxu1 %v16845_v17 }
 0xd9b   : > { %12737 = vmatmul.mubr.msk.f32.vlgmr.msra.gmra.mxu1 %vm2745_vm5, %v12705_v27  ;;  %12741 = vmatprep.subr.msk.mxu1 %vm2755_vm4, %v10715_v28  ;;  %v12124_v27 = vpop.permute.xlu1 %12123 }
 0xd9c   : > { %12742 = vmatpush1.msk.msra.mxu1 %vm2755_vm4, %v10713_v57  ;;  %12099 = vmatprep.mubr.f32.mxu1 %v13952_v54 }
 0xd9d   : > { %12065 = vmatprep.subr.mxu1 %v10709_v58 }
 0xd9e   : > { %12066 = vmatpush1.msra.mxu1 %v10707_v2 }
 0xd9f   : > { %12743 = vmatmul.mubr.msk.f32.vlgmr.msra.gmra.mxu1 %vm2745_vm5, %v12715_v62 }
 0xdc6   : > { %v10873_v53 = vpop.f32.mrf.mxu0 }
 0xdc8   : > { %v10875_v3 = vpop.f32.mrf.mxu0 }
 0xdd9   : > { %v10957_v8 = vpop.f32.mrf.mxu1 }
 0xddb   : > { %v10959_v31 = vpop.f32.mrf.mxu1 }
 0xded   : > { %v11041_v25 = vpop.f32.mrf.mxu0 }
 0xdef   : > { %v11043_v60 = vpop.f32.mrf.mxu0 }
 0xe01   : > { %v11125_v7 = vpop.f32.mrf.mxu1 }
 0xe03   : > { %v11127_v5 = vpop.f32.mrf.mxu1 }
 0xe15   : > { %v11209_v6 = vpop.f32.mrf.mxu0 }
 0xe17   : > { %v11211_v19 = vpop.f32.mrf.mxu0 }
 0xe29   : > { %v11293_v13 = vpop.f32.mrf.mxu1 }
 0xe2b   : > { %v11295_v48 = vpop.f32.mrf.mxu1 }
 0xe3d   : > { %v11377_v30 = vpop.f32.mrf.mxu0 }
 0xe3f   : > { %v11379_v1 = vpop.f32.mrf.mxu0 }
 0xe41   : > { %v11541_v54 = vpop.f32.mrf.mxu0 }
 0xe42   : > { %v11542_v18 = vadd.f32 %v11541_v54, %v10873_v53 }
 0xe43   : > { %v11543_v9 = vpop.f32.mrf.mxu0 }
 0xe44   : > { %v11544_v55 = vadd.f32 %v11543_v9, %v10875_v3 }
 0xe45   : > { %v11701_v29 = vpop.f32.mrf.mxu0 }
 0xe46   : > { %v11702_v50 = vadd.f32 %v11701_v29, %v11041_v25 }
 0xe47   : > { %v11703_v32 = vpop.f32.mrf.mxu0 }
 0xe48   : > { %v11704_v20 = vadd.f32 %v11703_v32, %v11043_v60 }
 0xe49   : > { %v11861_v37 = vpop.f32.mrf.mxu0 }
 0xe4a   : > { %v11862_v21 = vadd.f32 %v11861_v37, %v11209_v6 }
 0xe4b   : > { %v11863_v34 = vpop.f32.mrf.mxu0 }
 0xe4c   : > { %v11864_v42 = vadd.f32 %v11863_v34, %v11211_v19 }
 0xe4d   : > { %v12021_v23 = vpop.f32.mrf.mxu0 }
 0xe4e   : > { %v12022_v45 = vadd.f32 %v12021_v23, %v11377_v30 }
 0xe4f   : > { %v11461_v10 = vpop.f32.mrf.mxu1  ;;  %v12023_v14 = vpop.f32.mrf.mxu0 }
 0xe50   : > { %v12024_v4 = vadd.f32 %v12023_v14, %v11379_v1 }
 0xe51   : > { %v11463_v61 = vpop.f32.mrf.mxu1 }
 0xe53   : > { %v11621_v11 = vpop.f32.mrf.mxu1 }
 0xe54   : > { %v11622_v40 = vadd.f32 %v11621_v11, %v10957_v8 }
 0xe55   : > { %v11623_v63 = vpop.f32.mrf.mxu1 }
 0xe56   : > { %v11624_v22 = vadd.f32 %v11623_v63, %v10959_v31  ;;  %v12106_v56 = vadd.f32 %v11622_v40, %v11542_v18 }
 0xe57   : > { %v11781_v46 = vpop.f32.mrf.mxu1 }
 0xe58   : > { %v11782_v38 = vadd.f32 %v11781_v46, %v11125_v7  ;;  %v12107_v43 = vadd.f32 %v11624_v22, %v11544_v55 }
 0xe59   : > { %v11783_v49 = vpop.f32.mrf.mxu1 }
 0xe5a   : > { %v11784_v16 = vadd.f32 %v11783_v49, %v11127_v5  ;;  %v12108_v59 = vadd.f32 %v11782_v38, %v11702_v50 }
 0xe5b   : > { %v11941_v12 = vpop.f32.mrf.mxu1 }
 0xe5c   : > { %v11942_v17 = vadd.f32 %v11941_v12, %v11293_v13  ;;  %v12109_v0 = vadd.f32 %v11784_v16, %v11704_v20  ;;  %v12114_v44 = vadd.f32 %v12108_v59, %v12106_v56 }
 0xe5d   : > { %v11943_v39 = vpop.f32.mrf.mxu1 }
 0xe5e   : > { %v11944_v41 = vadd.f32 %v11943_v39, %v11295_v48  ;;  %v12110_v36 = vadd.f32 %v11942_v17, %v11862_v21  ;;  %v12115_v58 = vadd.f32 %v12109_v0, %v12107_v43 }
 0xe5f   : > { %v12101_v26 = vpop.f32.mrf.mxu1 }
 0xe60   : > { %v12102_v35 = vadd.f32 %v12101_v26, %v11461_v10  ;;  %v12111_v24 = vadd.f32 %v11944_v41, %v11864_v42 }
 0xe61   : > { %v12103_v33 = vpop.f32.mrf.mxu1 }
 0xe62   : > { %v12112_v15 = vadd.f32 %v12102_v35, %v12022_v45  ;;  %v12104_v47 = vadd.f32 %v12103_v33, %v11463_v61 }
 0xe64   : > { %v12116_v2 = vadd.f32 %v12112_v15, %v12110_v36  ;;  %v12113_v51 = vadd.f32 %v12104_v47, %v12024_v4 }
 0xe66   : > { %v12118_v52 = vadd.f32 %v12116_v2, %v12114_v44  ;;  %v12117_v57 = vadd.f32 %v12113_v51, %v12111_v24 }
 0xe68   : > { %v12126_v28 = vadd.f32 %v12124_v27, %v12118_v52  ;;  %v12119_v62 = vadd.f32 %v12117_v57, %v12115_v58 }
 0xe6a   : > { %v12128_v53 = vsub.f32 0.0, %v12126_v28  ;;  %v12127_v3 = vadd.f32 %v12124_v27, %v12119_v62 }
 0xe6c   : > { %v12130_v25 = vmul.f32 1.442695, %v12128_v53  ;;  %v12129_v60 = vsub.f32 0.0, %v12127_v3 }
 0xe6e   : > { %13901 = vpow2.f32 %v12130_v25  ;;  %v12132_v6 = vmul.f32 1.442695, %v12129_v60 }
 0xe70   : > { %13903 = vpow2.f32 %v12132_v6 }
 0xe7b   : > { %v13902_v19 = vpop.eup %13901 }
 0xe7c   : > { %v12134_v8 = vadd.f32 1.0, %v13902_v19 }
 0xe7d   : > { %v13904_v30 = vpop.eup %13903 }
 0xe7e   : > { %v12135_v31 = vadd.f32 1.0, %v13904_v30  ;;  %13905 = vrcp.f32 %v12134_v8 }
 0xe80   : > { %13907 = vrcp.f32 %v12135_v31 }
 0xe8b   : > { %v13906_v1 = vpop.eup %13905 }
 0xe8d   : > { %v13908_v7 = vpop.eup %13907 }
 0xe8e   : > { %v12143_v54 = vcombine.low %v13906_v1, %v13908_v7 }
 0xe90   : > { %12145 = vst [vmem:[%s655_s21] sm:$0x77] %v12143_v54 }
 0xe91 PF: > { %s32_s1 = sadd.s32 1, %s13945_s1  }
 0xe92   : > { %p29_p1 = scmp.ge.s32.totalorder %s32_s1, 4  }
 0xe94   :  { %31 = sbr.rel (!%p29_p1) target bundleno = 7 (0x7), region = 233 }
 0xe99   :  { %12181 = vsyncpa [#allocation3], 1 }
 0xe9a   :  { %12183 = vsyncpa [#allocation3 + $0x1], 1 }

</bundles_post_ra>
